<compile_context>
chip_gen: v6e
topology: v6e:2x2x1
jax: 0.10.0
libtpu: 0.0.40
codegen_flags: <defaults>
</compile_context>

<pallas_src>
import functools
import math

import jax
import jax.numpy as jnp
from jax.experimental import pallas as pl
from jax.experimental.pallas import tpu as pltpu

# ----------------------------- configuration --------------------------------
B = 2            # batch
C_IN = 3         # image channels
IMG = 16         # image H = W
PATCH = 8        # patch size -> 2x2 = 4 patches
NP = (IMG // PATCH) ** 2
NV = NP + 1      # vision tokens incl. CLS (CLIP would give 50; scaled down)
DV = 64          # vision hidden size   (stands in for 768)
DT = 64          # text / GPT2 hidden size
FF_V = 128       # vision MLP width
FF_IT = 128      # image_trans feedforward (torch default 2048; scaled down)
FF_T = 4 * DT    # GPT2 MLP width
VOCAB = 128      # GPT2 vocab (scaled down)
SEQ = 16         # text sequence length
MAX_POS = 32     # GPT2 position table
NH = 8           # heads for all three attention stacks
LN_EPS = 1e-5

# ------------------------------ kernel helpers -------------------------------


def _ln(x, g, b, eps=LN_EPS):
    """Row-wise LayerNorm in f32 (torch semantics: biased variance)."""
    mu = jnp.mean(x, axis=-1, keepdims=True)
    var = jnp.mean((x - mu) ** 2, axis=-1, keepdims=True)
    return (x - mu) * jax.lax.rsqrt(var + eps) * g + b


def _mm(x_f32, w_ref, b_ref=None):
    """bf16 MXU matmul with f32 accumulation; optional bias add."""
    y = jnp.dot(x_f32.astype(jnp.bfloat16), w_ref[...],
                preferred_element_type=jnp.float32)
    if b_ref is not None:
        y = y + b_ref[...]
    return y


# ------------------------------ Pallas kernels -------------------------------


def _vision_embed_kernel(patch_ref, w_ref, cls_ref, pos_ref, g_ref, b_ref, o_ref):
    # patch_ref: (1, NP, Kp); w: (Kp, DV) bf16; cls: (1, DV); pos: (NV, DV)
    emb = jnp.dot(patch_ref[0].astype(jnp.bfloat16), w_ref[...],
                  preferred_element_type=jnp.float32)          # (NP, DV)
    g = g_ref[...]
    b = b_ref[...]
    x_cls = cls_ref[...] + pos_ref[0:1, :]                     # (1, DV)
    x_pat = emb + pos_ref[1:, :]                               # (NP, DV)
    # LayerNorm is per-row, so the CLS row and patch rows normalize independently.
    o_ref[0, 0:1, :] = _ln(x_cls, g, b).astype(o_ref.dtype)
    o_ref[0, 1:, :] = _ln(x_pat, g, b).astype(o_ref.dtype)


def _encoder_block_kernel(nhead, scale, act, pre_ln, has_mask, *refs):
    """Fused transformer block over one batch element.

    pre_ln=True  : x = x + attn(LN1(x)); x = x + mlp(LN2(x))        (CLIP / GPT2)
    pre_ln=False : x = LN1(x + attn(x)); x = LN2(x + mlp(x))        (torch default)
    """
    if has_mask:
        (x_ref, g1_ref, b1_ref, wqkv_ref, bqkv_ref, wo_ref, bo_ref,
         g2_ref, b2_ref, wfc_ref, bfc_ref, wpr_ref, bpr_ref, m_ref, o_ref) = refs
    else:
        (x_ref, g1_ref, b1_ref, wqkv_ref, bqkv_ref, wo_ref, bo_ref,
         g2_ref, b2_ref, wfc_ref, bfc_ref, wpr_ref, bpr_ref, o_ref) = refs
        m_ref = None

    x = x_ref[0].astype(jnp.float32)                           # (S, D)
    S, D = x.shape

    h = _ln(x, g1_ref[...], b1_ref[...]) if pre_ln else x
    h_b = h.astype(jnp.bfloat16)
    mask = m_ref[0].astype(jnp.float32) if has_mask else None

    # Multi-head attention with per-head weight blocks (head split/merge stays
    # in-kernel; no HBM round trips, no XLA transposes).
    acc = jnp.zeros((S, D), jnp.float32)
    for hi in range(nhead):
        wq = wqkv_ref[0, hi]                                   # (D, dh) bf16
        wk = wqkv_ref[1, hi]
        wv = wqkv_ref[2, hi]
        qh = jnp.dot(h_b, wq, preferred_element_type=jnp.float32) + bqkv_ref[0, hi]
        kh = jnp.dot(h_b, wk, preferred_element_type=jnp.float32) + bqkv_ref[1, hi]
        vh = jnp.dot(h_b, wv, preferred_element_type=jnp.float32) + bqkv_ref[2, hi]
        # scores: q @ k^T without materializing a transpose (NT dot_general)
        s = jax.lax.dot_general(
            qh.astype(jnp.bfloat16), kh.astype(jnp.bfloat16),
            (((1,), (1,)), ((), ())),
            preferred_element_type=jnp.float32) * scale
        if has_mask:
            s = s + mask
        s = s - jnp.max(s, axis=-1, keepdims=True)
        p = jnp.exp(s)
        p = p * pl.reciprocal(jnp.sum(p, axis=-1, keepdims=True), approx=True)
        ctx_h = jnp.dot(p.astype(jnp.bfloat16), vh.astype(jnp.bfloat16),
                        preferred_element_type=jnp.float32)    # (S, dh)
        # fold the head-merge into the output projection: sum_h ctx_h @ Wo[h]
        acc = acc + jnp.dot(ctx_h.astype(jnp.bfloat16), wo_ref[hi],
                            preferred_element_type=jnp.float32)
    attn = acc + bo_ref[...]

    if pre_ln:
        x = x + attn
        h2 = _ln(x, g2_ref[...], b2_ref[...])
    else:
        x = _ln(x + attn, g1_ref[...], b1_ref[...])
        h2 = x

    f = _mm(h2, wfc_ref, bfc_ref)
    if act == "relu":
        f = jnp.maximum(f, 0.0)
    else:
        # TODO(synk): real CLIP uses quick_gelu and torch nn.GELU is exact erf;
        # the tanh approximation is used here (matches GPT2's gelu_new).
        f = jax.nn.gelu(f, approximate=True)
    f = _mm(f, wpr_ref, bpr_ref)

    if pre_ln:
        x = x + f
    else:
        x = _ln(x + f, g2_ref[...], b2_ref[...])
    o_ref[0] = x.astype(o_ref.dtype)


def _proj_ln_kernel(x_ref, w_ref, b_ref, g_ref, bb_ref, o_ref):
    # vision_projection (Linear) + norm_layer (LayerNorm), fused, per-row.
    y = _mm(x_ref[...].astype(jnp.float32), w_ref, b_ref)
    o_ref[...] = _ln(y, g_ref[...], bb_ref[...]).astype(o_ref.dtype)


def _lmhead_kernel(x_ref, g_ref, b_ref, w_ref, o_ref):
    # final LN + tied lm_head (bias-less); lane-dense VOCAB=128 output.
    h = _ln(x_ref[0].astype(jnp.float32), g_ref[...], b_ref[...])
    o_ref[0] = jnp.dot(h.astype(jnp.bfloat16), w_ref[...],
                       preferred_element_type=jnp.float32).astype(o_ref.dtype)


# ------------------------------ kernel wrappers -------------------------------


def vision_embed(p, patches):
    Kp = patches.shape[-1]
    return pl.pallas_call(
        _vision_embed_kernel,
        out_shape=jax.ShapeDtypeStruct((B, NV, DV), jnp.float32),
        grid=(B,),
        in_specs=[
            pl.BlockSpec((1, NP, Kp), lambda i: (i, 0, 0)),
            pl.BlockSpec((Kp, DV), lambda i: (0, 0)),
            pl.BlockSpec((1, DV), lambda i: (0, 0)),
            pl.BlockSpec((NV, DV), lambda i: (0, 0)),
            pl.BlockSpec((1, DV), lambda i: (0, 0)),
            pl.BlockSpec((1, DV), lambda i: (0, 0)),
        ],
        out_specs=pl.BlockSpec((1, NV, DV), lambda i: (i, 0, 0)),
        compiler_params=pltpu.CompilerParams(dimension_semantics=("parallel",)),
    )(patches, p["patch_w"], p["cls_emb"], p["pos_emb"], p["pre_ln_g"], p["pre_ln_b"])


def encoder_block(x, prm, *, nhead, act, pre_ln, mask=None):
    Bq, S, D = x.shape
    dh = D // nhead
    F = prm["wfc"].shape[1]
    scale = 1.0 / math.sqrt(dh)
    has_mask = mask is not None
    kernel = functools.partial(_encoder_block_kernel, nhead, scale, act, pre_ln, has_mask)

    in_specs = [
        pl.BlockSpec((1, S, D), lambda i: (i, 0, 0)),
        pl.BlockSpec((1, D), lambda i: (0, 0)),
        pl.BlockSpec((1, D), lambda i: (0, 0)),
        pl.BlockSpec((3, nhead, D, dh), lambda i: (0, 0, 0, 0)),
        pl.BlockSpec((3, nhead, 1, dh), lambda i: (0, 0, 0, 0)),
        pl.BlockSpec((nhead, dh, D), lambda i: (0, 0, 0)),
        pl.BlockSpec((1, D), lambda i: (0, 0)),
        pl.BlockSpec((1, D), lambda i: (0, 0)),
        pl.BlockSpec((1, D), lambda i: (0, 0)),
        pl.BlockSpec((D, F), lambda i: (0, 0)),
        pl.BlockSpec((1, F), lambda i: (0, 0)),
        pl.BlockSpec((F, D), lambda i: (0, 0)),
        pl.BlockSpec((1, D), lambda i: (0, 0)),
    ]
    args = [x, prm["ln1_g"], prm["ln1_b"], prm["wqkv"], prm["bqkv"], prm["wo"],
            prm["bo"], prm["ln2_g"], prm["ln2_b"], prm["wfc"], prm["bfc"],
            prm["wpr"], prm["bpr"]]
    if has_mask:
        in_specs.append(pl.BlockSpec((1, S, S), lambda i: (i, 0, 0)))
        args.append(mask)

    return pl.pallas_call(
        kernel,
        out_shape=jax.ShapeDtypeStruct((Bq, S, D), jnp.float32),
        grid=(Bq,),
        in_specs=in_specs,
        out_specs=pl.BlockSpec((1, S, D), lambda i: (i, 0, 0)),
        compiler_params=pltpu.CompilerParams(dimension_semantics=("parallel",)),
    )(*args)


def proj_ln(x, w, b, g, bb):
    lead = x.shape[:-1]
    K = x.shape[-1]
    N = w.shape[1]
    x2 = x.reshape(-1, K)
    M = x2.shape[0]
    out = pl.pallas_call(
        _proj_ln_kernel,
        out_shape=jax.ShapeDtypeStruct((M, N), jnp.float32),
        grid=(1,),
        in_specs=[
            pl.BlockSpec((M, K), lambda i: (0, 0)),
            pl.BlockSpec((K, N), lambda i: (0, 0)),
            pl.BlockSpec((1, N), lambda i: (0, 0)),
            pl.BlockSpec((1, N), lambda i: (0, 0)),
            pl.BlockSpec((1, N), lambda i: (0, 0)),
        ],
        out_specs=pl.BlockSpec((M, N), lambda i: (0, 0)),
        compiler_params=pltpu.CompilerParams(dimension_semantics=("arbitrary",)),
    )(x2, w, b, g, bb)
    return out.reshape(*lead, N)


def lm_head(h, g, b, w_t):
    Bt, S, D = h.shape
    V = w_t.shape[1]
    return pl.pallas_call(
        _lmhead_kernel,
        out_shape=jax.ShapeDtypeStruct((Bt, S, V), jnp.float32),
        grid=(Bt,),
        in_specs=[
            pl.BlockSpec((1, S, D), lambda i: (i, 0, 0)),
            pl.BlockSpec((1, D), lambda i: (0, 0)),
            pl.BlockSpec((1, D), lambda i: (0, 0)),
            pl.BlockSpec((D, V), lambda i: (0, 0)),
        ],
        out_specs=pl.BlockSpec((1, S, V), lambda i: (i, 0, 0)),
        compiler_params=pltpu.CompilerParams(dimension_semantics=("parallel",)),
    )(h, g, b, w_t)


# --------------------------------- forward -----------------------------------


def multimodal_forward(p, input_ids, attention_mask, pixel_values):
    """Mirrors MultimodalGPTViT.forward with processed_image provided."""
    input_ids = input_ids[:, 0, :]                  # .squeeze(1)
    attention_mask = attention_mask[:, 0, :]        # .squeeze(1)
    pixel_values = pixel_values[:, 0]               # pixel_values.squeeze(1)

    # token embedding gather (wte.weight[input_ids, :]) — JAX glue.
    token_embeddings = jnp.take(p["wte"], input_ids, axis=0)       # [B, SEQ, DT]

    # ---- vision model (CLIP-style: patch conv + CLS + pos + pre-LN + 1 block)
    # TODO(synk): real CLIP-ViT has 12 encoder layers; scaled to 1 block.
    Bv, C, H, W = pixel_values.shape
    gh, gw = H // PATCH, W // PATCH
    patches = pixel_values.reshape(Bv, C, gh, PATCH, gw, PATCH)
    patches = patches.transpose(0, 2, 4, 1, 3, 5).reshape(Bv, gh * gw, C * PATCH * PATCH)
    x = vision_embed(p, patches)                                   # [B, NV, DV]
    x = encoder_block(x, p["vblk"], nhead=NH, act="gelu", pre_ln=True)

    # ---- vision_projection + norm_layer (fused) ----
    pv = proj_ln(x, p["proj_w"], p["proj_b"], p["nl_g"], p["nl_b"])  # [B, NV, DT]

    # ---- image_trans: nn.TransformerEncoderLayer defaults (post-LN, relu,
    # batch_first=False) -> dim0 of the [B, NV, DT] input is treated as the
    # sequence axis, so attention mixes over the *batch* axis (reproduced).
    s = jnp.transpose(pv, (1, 0, 2))                               # [NV, B, DT]
    s = encoder_block(s, p["itblk"], nhead=NH, act="relu", pre_ln=False)
    pv = jnp.transpose(s, (1, 0, 2))                               # [B, NV, DT]

    # original hardcodes [:, 1:51, :] for CLIP's 50 tokens; here 1:1+NV.
    token_embeddings = token_embeddings.at[:, 1:1 + NV, :].add(pv)

    # ---- GPT2 text model (1 pre-LN block, tied lm_head) ----
    # TODO(synk): real GPT2-small has 12 layers; scaled to 1 block.
    S = token_embeddings.shape[1]
    h = token_embeddings + p["wpe"][None, :S, :]
    causal = jnp.tril(jnp.ones((S, S), jnp.float32))
    bias = (1.0 - causal)[None, :, :] * -1e9
    bias = bias + (1.0 - attention_mask.astype(jnp.float32))[:, None, :] * -1e9
    h = encoder_block(h, p["gblk"], nhead=NH, act="gelu", pre_ln=True, mask=bias)
    return lm_head(h, p["g_lnf_g"], p["g_lnf_b"], p["wte_T"])       # [B, SEQ, VOCAB]


# ---------------------------------- params ------------------------------------


def init_params(key):
    ks = iter(jax.random.split(key, 64))

    def nrm(shape, scale=0.02):
        return scale * jax.random.normal(next(ks), shape, jnp.float32)

    def wmat(k_dim, n_dim):          # pre-transposed [K, N], pre-cast bf16
        return nrm((k_dim, n_dim)).astype(jnp.bfloat16)

    bvec = lambda n: jnp.zeros((1, n), jnp.float32)
    gvec = lambda n: jnp.ones((1, n), jnp.float32)

    def block(d, ff):
        dh = d // NH
        return dict(
            ln1_g=gvec(d), ln1_b=bvec(d),
            # QKV / output-projection weights pre-split per head so the fused
            # kernel only does leading-axis indexing.
            wqkv=nrm((3, NH, d, dh)).astype(jnp.bfloat16),
            bqkv=jnp.zeros((3, NH, 1, dh), jnp.float32),
            wo=nrm((NH, dh, d)).astype(jnp.bfloat16),
            bo=bvec(d),
            ln2_g=gvec(d), ln2_b=bvec(d),
            wfc=wmat(d, ff), bfc=bvec(ff),
            wpr=wmat(ff, d), bpr=bvec(d),
        )

    p = {}
    # vision embeddings
    p["patch_w"] = wmat(C_IN * PATCH * PATCH, DV)
    p["cls_emb"] = nrm((1, DV))
    p["pos_emb"] = nrm((NV, DV))
    p["pre_ln_g"], p["pre_ln_b"] = gvec(DV), bvec(DV)
    p["vblk"] = block(DV, FF_V)
    # vision_projection + norm_layer
    p["proj_w"], p["proj_b"] = wmat(DV, DT), bvec(DT)
    p["nl_g"], p["nl_b"] = gvec(DT), bvec(DT)
    # image_trans (nn.TransformerEncoderLayer)
    p["itblk"] = block(DT, FF_IT)
    # GPT2 block + head
    p["gblk"] = block(DT, FF_T)
    wte = nrm((VOCAB, DT))
    p["wte"] = wte                                  # f32 for embedding gather
    p["wte_T"] = wte.T.astype(jnp.bfloat16)         # tied lm_head, pre-transposed
    p["wpe"] = nrm((MAX_POS, DT))
    p["g_lnf_g"], p["g_lnf_b"] = gvec(DT), bvec(DT)
    return p


# ----------------------------------- main --------------------------------------

if __name__ == "__main__":
    root = jax.random.PRNGKey(0)
    k_params, k_ids, k_img = jax.random.split(root, 3)

    params = init_params(k_params)
    # inputs mimic the Dataset output: extra dim that forward() squeezes.
    input_ids = jax.random.randint(k_ids, (B, 1, SEQ), 0, VOCAB, dtype=jnp.int32)
    attention_mask = jnp.ones((B, 1, SEQ), jnp.int32)
    pixel_values = jax.random.normal(k_img, (B, 1, C_IN, IMG, IMG), jnp.float32)

    fwd = jax.jit(multimodal_forward)
    logits = fwd(params, input_ids, attention_mask, pixel_values)
    jax.block_until_ready(logits)
    assert logits.shape == (B, SEQ, VOCAB), logits.shape
    print("KERNEL_OK")
</pallas_src>

<mosaic_0001>
module attributes {stable_mosaic.version = 11 : i64} {
  func.func @_proj_ln_kernel(%arg0: i32, %arg1: memref<10x64xf32, #tpu.memory_space<vmem>>, %arg2: memref<64x64xbf16, #tpu.memory_space<vmem>>, %arg3: memref<1x64xf32, #tpu.memory_space<vmem>>, %arg4: memref<1x64xf32, #tpu.memory_space<vmem>>, %arg5: memref<1x64xf32, #tpu.memory_space<vmem>>, %arg6: memref<10x64xf32, #tpu.memory_space<vmem>>) attributes {dimension_semantics = [#tpu.dimension_semantics<arbitrary>], iteration_bounds = array<i64: 1>, scalar_prefetch = 0 : i64, scratch_operands = 0 : i64, tpu.core_type = #tpu.core_type<tc>, window_params = [{pipeline_mode = #tpu.pipeline_mode<synchronous>, transform_indices = @transform_0, window_bounds = array<i64: 10, 64>}, {pipeline_mode = #tpu.pipeline_mode<synchronous>, transform_indices = @transform_1, window_bounds = array<i64: 64, 64>}, {pipeline_mode = #tpu.pipeline_mode<synchronous>, transform_indices = @transform_2, window_bounds = array<i64: 1, 64>}, {pipeline_mode = #tpu.pipeline_mode<synchronous>, transform_indices = @transform_3, window_bounds = array<i64: 1, 64>}, {pipeline_mode = #tpu.pipeline_mode<synchronous>, transform_indices = @transform_4, window_bounds = array<i64: 1, 64>}, {pipeline_mode = #tpu.pipeline_mode<synchronous>, transform_indices = @transform_5, window_bounds = array<i64: 10, 64>}]} {
    %c0 = arith.constant 0 : index
    %c0_0 = arith.constant 0 : index
    %0 = vector.load %arg1[%c0, %c0_0] : memref<10x64xf32, #tpu.memory_space<vmem>>, vector<10x64xf32>
    %1 = arith.truncf %0 : vector<10x64xf32> to vector<10x64xbf16>
    %c0_1 = arith.constant 0 : index
    %c0_2 = arith.constant 0 : index
    %2 = vector.load %arg2[%c0_1, %c0_2] : memref<64x64xbf16, #tpu.memory_space<vmem>>, vector<64x64xbf16>
    %cst = arith.constant dense<0.000000e+00> : vector<10x64xf32>
    %3 = tpu.matmul %1, %2, %cst {dimension_numbers = #tpu.dot_dimension_numbers<[1], [0], [0], [1], [0, 0, 1, 1], [], []>} : vector<10x64xbf16>, vector<64x64xbf16>, vector<10x64xf32> -> vector<10x64xf32>
    %c0_3 = arith.constant 0 : index
    %c0_4 = arith.constant 0 : index
    %4 = vector.load %arg3[%c0_3, %c0_4] : memref<1x64xf32, #tpu.memory_space<vmem>>, vector<1x64xf32>
    %5 = vector.broadcast %4 : vector<1x64xf32> to vector<10x64xf32>
    %6 = arith.addf %3, %5 : vector<10x64xf32>
    %c0_5 = arith.constant 0 : index
    %c0_6 = arith.constant 0 : index
    %7 = vector.load %arg4[%c0_5, %c0_6] : memref<1x64xf32, #tpu.memory_space<vmem>>, vector<1x64xf32>
    %c0_7 = arith.constant 0 : index
    %c0_8 = arith.constant 0 : index
    %8 = vector.load %arg5[%c0_7, %c0_8] : memref<1x64xf32, #tpu.memory_space<vmem>>, vector<1x64xf32>
    %cst_9 = arith.constant dense<0.000000e+00> : vector<10xf32>
    %9 = vector.multi_reduction <add>, %6, %cst_9 [1] : vector<10x64xf32> to vector<10xf32>
    %10 = vector.shape_cast %9 : vector<10xf32> to vector<10x1xf32>
    %cst_10 = arith.constant 6.400000e+01 : f32
    %11 = vector.broadcast %cst_10 : f32 to vector<10x1xf32>
    %12 = arith.divf %10, %11 : vector<10x1xf32>
    %13 = vector.broadcast %12 : vector<10x1xf32> to vector<10x64xf32>
    %14 = arith.subf %6, %13 : vector<10x64xf32>
    %15 = arith.mulf %14, %14 : vector<10x64xf32>
    %cst_11 = arith.constant dense<0.000000e+00> : vector<10xf32>
    %16 = vector.multi_reduction <add>, %15, %cst_11 [1] : vector<10x64xf32> to vector<10xf32>
    %17 = vector.shape_cast %16 : vector<10xf32> to vector<10x1xf32>
    %cst_12 = arith.constant 6.400000e+01 : f32
    %18 = vector.broadcast %cst_12 : f32 to vector<10x1xf32>
    %19 = arith.divf %17, %18 : vector<10x1xf32>
    %20 = vector.broadcast %12 : vector<10x1xf32> to vector<10x64xf32>
    %21 = arith.subf %6, %20 : vector<10x64xf32>
    %cst_13 = arith.constant 9.99999974E-6 : f32
    %22 = vector.broadcast %cst_13 : f32 to vector<10x1xf32>
    %23 = arith.addf %19, %22 : vector<10x1xf32>
    %24 = math.rsqrt %23 : vector<10x1xf32>
    %25 = vector.broadcast %24 : vector<10x1xf32> to vector<10x64xf32>
    %26 = arith.mulf %21, %25 : vector<10x64xf32>
    %27 = vector.broadcast %7 : vector<1x64xf32> to vector<10x64xf32>
    %28 = arith.mulf %26, %27 : vector<10x64xf32>
    %29 = vector.broadcast %8 : vector<1x64xf32> to vector<10x64xf32>
    %30 = arith.addf %28, %29 : vector<10x64xf32>
    %c0_14 = arith.constant 0 : index
    %c0_15 = arith.constant 0 : index
    %31 = vector.load %arg6[%c0_14, %c0_15] : memref<10x64xf32, #tpu.memory_space<vmem>>, vector<10x64xf32>
    tpu.vector_store %arg6[%c0_14, %c0_15], %30 {strides = array<i32>} : memref<10x64xf32, #tpu.memory_space<vmem>>, vector<10x64xf32>,
    return
  }
  func.func @transform_0(%arg0: i32) -> (i32, i32) {
    %c0_i32 = arith.constant 0 : i32
    %c0_i32_0 = arith.constant 0 : i32
    %c0_i32_1 = arith.constant 0 : i32
    return %c0_i32, %c0_i32_0 : i32, i32
  }
  func.func @transform_1(%arg0: i32) -> (i32, i32) {
    %c0_i32 = arith.constant 0 : i32
    %c0_i32_0 = arith.constant 0 : i32
    %c0_i32_1 = arith.constant 0 : i32
    return %c0_i32, %c0_i32_0 : i32, i32
  }
  func.func @transform_2(%arg0: i32) -> (i32, i32) {
    %c0_i32 = arith.constant 0 : i32
    %c0_i32_0 = arith.constant 0 : i32
    %c0_i32_1 = arith.constant 0 : i32
    return %c0_i32, %c0_i32_0 : i32, i32
  }
  func.func @transform_3(%arg0: i32) -> (i32, i32) {
    %c0_i32 = arith.constant 0 : i32
    %c0_i32_0 = arith.constant 0 : i32
    %c0_i32_1 = arith.constant 0 : i32
    return %c0_i32, %c0_i32_0 : i32, i32
  }
  func.func @transform_4(%arg0: i32) -> (i32, i32) {
    %c0_i32 = arith.constant 0 : i32
    %c0_i32_0 = arith.constant 0 : i32
    %c0_i32_1 = arith.constant 0 : i32
    return %c0_i32, %c0_i32_0 : i32, i32
  }
  func.func @transform_5(%arg0: i32) -> (i32, i32) {
    %c0_i32 = arith.constant 0 : i32
    %c0_i32_0 = arith.constant 0 : i32
    %c0_i32_1 = arith.constant 0 : i32
    return %c0_i32, %c0_i32_0 : i32, i32
  }
}

module attributes {stable_mosaic.version = 11 : i64} {
  func.func @_vision_embed_kernel(%arg0: i32, %arg1: memref<1x4x192xf32, #tpu.memory_space<vmem>>, %arg2: memref<192x64xbf16, #tpu.memory_space<vmem>>, %arg3: memref<1x64xf32, #tpu.memory_space<vmem>>, %arg4: memref<5x64xf32, #tpu.memory_space<vmem>>, %arg5: memref<1x64xf32, #tpu.memory_space<vmem>>, %arg6: memref<1x64xf32, #tpu.memory_space<vmem>>, %arg7: memref<1x5x64xf32, #tpu.memory_space<vmem>>) attributes {dimension_semantics = [#tpu.dimension_semantics<parallel>], iteration_bounds = array<i64: 2>, scalar_prefetch = 0 : i64, scratch_operands = 0 : i64, tpu.core_type = #tpu.core_type<tc>, window_params = [{transform_indices = @transform_0, window_bounds = array<i64: 1, 4, 192>}, {pipeline_mode = #tpu.pipeline_mode<synchronous>, transform_indices = @transform_1, window_bounds = array<i64: 192, 64>}, {pipeline_mode = #tpu.pipeline_mode<synchronous>, transform_indices = @transform_2, window_bounds = array<i64: 1, 64>}, {pipeline_mode = #tpu.pipeline_mode<synchronous>, transform_indices = @transform_3, window_bounds = array<i64: 5, 64>}, {pipeline_mode = #tpu.pipeline_mode<synchronous>, transform_indices = @transform_4, window_bounds = array<i64: 1, 64>}, {pipeline_mode = #tpu.pipeline_mode<synchronous>, transform_indices = @transform_5, window_bounds = array<i64: 1, 64>}, {transform_indices = @transform_6, window_bounds = array<i64: 1, 5, 64>}]} {
    %c0 = arith.constant 0 : index
    %c0_0 = arith.constant 0 : index
    %c0_1 = arith.constant 0 : index
    %0 = vector.load %arg1[%c0, %c0_0, %c0_1] : memref<1x4x192xf32, #tpu.memory_space<vmem>>, vector<1x4x192xf32>
    %1 = vector.shape_cast %0 : vector<1x4x192xf32> to vector<4x192xf32>
    %2 = arith.truncf %1 : vector<4x192xf32> to vector<4x192xbf16>
    %c0_2 = arith.constant 0 : index
    %c0_3 = arith.constant 0 : index
    %3 = vector.load %arg2[%c0_2, %c0_3] : memref<192x64xbf16, #tpu.memory_space<vmem>>, vector<192x64xbf16>
    %cst = arith.constant dense<0.000000e+00> : vector<4x64xf32>
    %4 = tpu.matmul %2, %3, %cst {dimension_numbers = #tpu.dot_dimension_numbers<[1], [0], [0], [1], [0, 0, 1, 1], [], []>} : vector<4x192xbf16>, vector<192x64xbf16>, vector<4x64xf32> -> vector<4x64xf32>
    %c0_4 = arith.constant 0 : index
    %c0_5 = arith.constant 0 : index
    %5 = vector.load %arg5[%c0_4, %c0_5] : memref<1x64xf32, #tpu.memory_space<vmem>>, vector<1x64xf32>
    %c0_6 = arith.constant 0 : index
    %c0_7 = arith.constant 0 : index
    %6 = vector.load %arg6[%c0_6, %c0_7] : memref<1x64xf32, #tpu.memory_space<vmem>>, vector<1x64xf32>
    %c0_8 = arith.constant 0 : index
    %c0_9 = arith.constant 0 : index
    %7 = vector.load %arg3[%c0_8, %c0_9] : memref<1x64xf32, #tpu.memory_space<vmem>>, vector<1x64xf32>
    %c0_10 = arith.constant 0 : index
    %c0_11 = arith.constant 0 : index
    %8 = vector.load %arg4[%c0_10, %c0_11] : memref<5x64xf32, #tpu.memory_space<vmem>>, vector<1x64xf32>
    %9 = arith.addf %7, %8 : vector<1x64xf32>
    %c1 = arith.constant 1 : index
    %c0_12 = arith.constant 0 : index
    %10 = vector.load %arg4[%c1, %c0_12] : memref<5x64xf32, #tpu.memory_space<vmem>>, vector<4x64xf32>
    %11 = arith.addf %4, %10 : vector<4x64xf32>
    %cst_13 = arith.constant dense<0.000000e+00> : vector<1xf32>
    %12 = vector.multi_reduction <add>, %9, %cst_13 [1] : vector<1x64xf32> to vector<1xf32>
    %13 = vector.shape_cast %12 : vector<1xf32> to vector<1x1xf32>
    %cst_14 = arith.constant 6.400000e+01 : f32
    %14 = vector.broadcast %cst_14 : f32 to vector<1x1xf32>
    %15 = arith.divf %13, %14 : vector<1x1xf32>
    %16 = vector.broadcast %15 : vector<1x1xf32> to vector<1x64xf32>
    %17 = arith.subf %9, %16 : vector<1x64xf32>
    %18 = arith.mulf %17, %17 : vector<1x64xf32>
    %cst_15 = arith.constant dense<0.000000e+00> : vector<1xf32>
    %19 = vector.multi_reduction <add>, %18, %cst_15 [1] : vector<1x64xf32> to vector<1xf32>
    %20 = vector.shape_cast %19 : vector<1xf32> to vector<1x1xf32>
    %cst_16 = arith.constant 6.400000e+01 : f32
    %21 = vector.broadcast %cst_16 : f32 to vector<1x1xf32>
    %22 = arith.divf %20, %21 : vector<1x1xf32>
    %23 = vector.broadcast %15 : vector<1x1xf32> to vector<1x64xf32>
    %24 = arith.subf %9, %23 : vector<1x64xf32>
    %cst_17 = arith.constant 9.99999974E-6 : f32
    %25 = vector.broadcast %cst_17 : f32 to vector<1x1xf32>
    %26 = arith.addf %22, %25 : vector<1x1xf32>
    %27 = math.rsqrt %26 : vector<1x1xf32>
    %28 = vector.broadcast %27 : vector<1x1xf32> to vector<1x64xf32>
    %29 = arith.mulf %24, %28 : vector<1x64xf32>
    %30 = arith.mulf %29, %5 : vector<1x64xf32>
    %31 = arith.addf %30, %6 : vector<1x64xf32>
    %c0_18 = arith.constant 0 : index
    %c0_19 = arith.constant 0 : index
    %c0_20 = arith.constant 0 : index
    %32 = vector.load %arg7[%c0_18, %c0_19, %c0_20] : memref<1x5x64xf32, #tpu.memory_space<vmem>>, vector<1x1x64xf32>
    %33 = vector.shape_cast %32 : vector<1x1x64xf32> to vector<1x64xf32>
    %34 = vector.shape_cast %31 : vector<1x64xf32> to vector<1x1x64xf32>
    tpu.vector_store %arg7[%c0_18, %c0_19, %c0_20], %34 {strides = array<i32>} : memref<1x5x64xf32, #tpu.memory_space<vmem>>, vector<1x1x64xf32>,
    %cst_21 = arith.constant dense<0.000000e+00> : vector<4xf32>
    %35 = vector.multi_reduction <add>, %11, %cst_21 [1] : vector<4x64xf32> to vector<4xf32>
    %36 = vector.shape_cast %35 : vector<4xf32> to vector<4x1xf32>
    %cst_22 = arith.constant 6.400000e+01 : f32
    %37 = vector.broadcast %cst_22 : f32 to vector<4x1xf32>
    %38 = arith.divf %36, %37 : vector<4x1xf32>
    %39 = vector.broadcast %38 : vector<4x1xf32> to vector<4x64xf32>
    %40 = arith.subf %11, %39 : vector<4x64xf32>
    %41 = arith.mulf %40, %40 : vector<4x64xf32>
    %cst_23 = arith.constant dense<0.000000e+00> : vector<4xf32>
    %42 = vector.multi_reduction <add>, %41, %cst_23 [1] : vector<4x64xf32> to vector<4xf32>
    %43 = vector.shape_cast %42 : vector<4xf32> to vector<4x1xf32>
    %cst_24 = arith.constant 6.400000e+01 : f32
    %44 = vector.broadcast %cst_24 : f32 to vector<4x1xf32>
    %45 = arith.divf %43, %44 : vector<4x1xf32>
    %46 = vector.broadcast %38 : vector<4x1xf32> to vector<4x64xf32>
    %47 = arith.subf %11, %46 : vector<4x64xf32>
    %cst_25 = arith.constant 9.99999974E-6 : f32
    %48 = vector.broadcast %cst_25 : f32 to vector<4x1xf32>
    %49 = arith.addf %45, %48 : vector<4x1xf32>
    %50 = math.rsqrt %49 : vector<4x1xf32>
    %51 = vector.broadcast %50 : vector<4x1xf32> to vector<4x64xf32>
    %52 = arith.mulf %47, %51 : vector<4x64xf32>
    %53 = vector.broadcast %5 : vector<1x64xf32> to vector<4x64xf32>
    %54 = arith.mulf %52, %53 : vector<4x64xf32>
    %55 = vector.broadcast %6 : vector<1x64xf32> to vector<4x64xf32>
    %56 = arith.addf %54, %55 : vector<4x64xf32>
    %c0_26 = arith.constant 0 : index
    %c1_27 = arith.constant 1 : index
    %c0_28 = arith.constant 0 : index
    %57 = vector.load %arg7[%c0_26, %c1_27, %c0_28] : memref<1x5x64xf32, #tpu.memory_space<vmem>>, vector<1x4x64xf32>
    %58 = vector.shape_cast %57 : vector<1x4x64xf32> to vector<4x64xf32>
    %59 = vector.shape_cast %56 : vector<4x64xf32> to vector<1x4x64xf32>
    tpu.vector_store %arg7[%c0_26, %c1_27, %c0_28], %59 {strides = array<i32>} : memref<1x5x64xf32, #tpu.memory_space<vmem>>, vector<1x4x64xf32>,
    return
  }
  func.func @transform_0(%arg0: i32) -> (i32, i32, i32) {
    %c0_i32 = arith.constant 0 : i32
    %c0_i32_0 = arith.constant 0 : i32
    %c0_i32_1 = arith.constant 0 : i32
    return %arg0, %c0_i32, %c0_i32_0 : i32, i32, i32
  }
  func.func @transform_1(%arg0: i32) -> (i32, i32) {
    %c0_i32 = arith.constant 0 : i32
    %c0_i32_0 = arith.constant 0 : i32
    %c0_i32_1 = arith.constant 0 : i32
    return %c0_i32, %c0_i32_0 : i32, i32
  }
  func.func @transform_2(%arg0: i32) -> (i32, i32) {
    %c0_i32 = arith.constant 0 : i32
    %c0_i32_0 = arith.constant 0 : i32
    %c0_i32_1 = arith.constant 0 : i32
    return %c0_i32, %c0_i32_0 : i32, i32
  }
  func.func @transform_3(%arg0: i32) -> (i32, i32) {
    %c0_i32 = arith.constant 0 : i32
    %c0_i32_0 = arith.constant 0 : i32
    %c0_i32_1 = arith.constant 0 : i32
    return %c0_i32, %c0_i32_0 : i32, i32
  }
  func.func @transform_4(%arg0: i32) -> (i32, i32) {
    %c0_i32 = arith.constant 0 : i32
    %c0_i32_0 = arith.constant 0 : i32
    %c0_i32_1 = arith.constant 0 : i32
    return %c0_i32, %c0_i32_0 : i32, i32
  }
  func.func @transform_5(%arg0: i32) -> (i32, i32) {
    %c0_i32 = arith.constant 0 : i32
    %c0_i32_0 = arith.constant 0 : i32
    %c0_i32_1 = arith.constant 0 : i32
    return %c0_i32, %c0_i32_0 : i32, i32
  }
  func.func @transform_6(%arg0: i32) -> (i32, i32, i32) {
    %c0_i32 = arith.constant 0 : i32
    %c0_i32_0 = arith.constant 0 : i32
    %c0_i32_1 = arith.constant 0 : i32
    return %arg0, %c0_i32, %c0_i32_0 : i32, i32, i32
  }
}

module attributes {stable_mosaic.version = 11 : i64} {
  func.func @_encoder_block_kernel(%arg0: i32, %arg1: memref<1x5x64xf32, #tpu.memory_space<vmem>>, %arg2: memref<1x64xf32, #tpu.memory_space<vmem>>, %arg3: memref<1x64xf32, #tpu.memory_space<vmem>>, %arg4: memref<3x8x64x8xbf16, #tpu.memory_space<vmem>>, %arg5: memref<3x8x1x8xf32, #tpu.memory_space<vmem>>, %arg6: memref<8x8x64xbf16, #tpu.memory_space<vmem>>, %arg7: memref<1x64xf32, #tpu.memory_space<vmem>>, %arg8: memref<1x64xf32, #tpu.memory_space<vmem>>, %arg9: memref<1x64xf32, #tpu.memory_space<vmem>>, %arg10: memref<64x128xbf16, #tpu.memory_space<vmem>>, %arg11: memref<1x128xf32, #tpu.memory_space<vmem>>, %arg12: memref<128x64xbf16, #tpu.memory_space<vmem>>, %arg13: memref<1x64xf32, #tpu.memory_space<vmem>>, %arg14: memref<1x5x64xf32, #tpu.memory_space<vmem>>) attributes {dimension_semantics = [#tpu.dimension_semantics<parallel>], iteration_bounds = array<i64: 2>, scalar_prefetch = 0 : i64, scratch_operands = 0 : i64, tpu.core_type = #tpu.core_type<tc>, window_params = [{transform_indices = @transform_0, window_bounds = array<i64: 1, 5, 64>}, {pipeline_mode = #tpu.pipeline_mode<synchronous>, transform_indices = @transform_1, window_bounds = array<i64: 1, 64>}, {pipeline_mode = #tpu.pipeline_mode<synchronous>, transform_indices = @transform_2, window_bounds = array<i64: 1, 64>}, {pipeline_mode = #tpu.pipeline_mode<synchronous>, transform_indices = @transform_3, window_bounds = array<i64: 3, 8, 64, 8>}, {pipeline_mode = #tpu.pipeline_mode<synchronous>, transform_indices = @transform_4, window_bounds = array<i64: 3, 8, 1, 8>}, {pipeline_mode = #tpu.pipeline_mode<synchronous>, transform_indices = @transform_5, window_bounds = array<i64: 8, 8, 64>}, {pipeline_mode = #tpu.pipeline_mode<synchronous>, transform_indices = @transform_6, window_bounds = array<i64: 1, 64>}, {pipeline_mode = #tpu.pipeline_mode<synchronous>, transform_indices = @transform_7, window_bounds = array<i64: 1, 64>}, {pipeline_mode = #tpu.pipeline_mode<synchronous>, transform_indices = @transform_8, window_bounds = array<i64: 1, 64>}, {pipeline_mode = #tpu.pipeline_mode<synchronous>, transform_indices = @transform_9, window_bounds = array<i64: 64, 128>}, {pipeline_mode = #tpu.pipeline_mode<synchronous>, transform_indices = @transform_10, window_bounds = array<i64: 1, 128>}, {pipeline_mode = #tpu.pipeline_mode<synchronous>, transform_indices = @transform_11, window_bounds = array<i64: 128, 64>}, {pipeline_mode = #tpu.pipeline_mode<synchronous>, transform_indices = @transform_12, window_bounds = array<i64: 1, 64>}, {transform_indices = @transform_13, window_bounds = array<i64: 1, 5, 64>}]} {
    %c0 = arith.constant 0 : index
    %c0_0 = arith.constant 0 : index
    %c0_1 = arith.constant 0 : index
    %0 = vector.load %arg1[%c0, %c0_0, %c0_1] : memref<1x5x64xf32, #tpu.memory_space<vmem>>, vector<1x5x64xf32>
    %1 = vector.shape_cast %0 : vector<1x5x64xf32> to vector<5x64xf32>
    %c0_2 = arith.constant 0 : index
    %c0_3 = arith.constant 0 : index
    %2 = vector.load %arg2[%c0_2, %c0_3] : memref<1x64xf32, #tpu.memory_space<vmem>>, vector<1x64xf32>
    %c0_4 = arith.constant 0 : index
    %c0_5 = arith.constant 0 : index
    %3 = vector.load %arg3[%c0_4, %c0_5] : memref<1x64xf32, #tpu.memory_space<vmem>>, vector<1x64xf32>
    %cst = arith.constant dense<0.000000e+00> : vector<5xf32>
    %4 = vector.multi_reduction <add>, %1, %cst [1] : vector<5x64xf32> to vector<5xf32>
    %5 = vector.shape_cast %4 : vector<5xf32> to vector<5x1xf32>
    %cst_6 = arith.constant 6.400000e+01 : f32
    %6 = vector.broadcast %cst_6 : f32 to vector<5x1xf32>
    %7 = arith.divf %5, %6 : vector<5x1xf32>
    %8 = vector.broadcast %7 : vector<5x1xf32> to vector<5x64xf32>
    %9 = arith.subf %1, %8 : vector<5x64xf32>
    %10 = arith.mulf %9, %9 : vector<5x64xf32>
    %cst_7 = arith.constant dense<0.000000e+00> : vector<5xf32>
    %11 = vector.multi_reduction <add>, %10, %cst_7 [1] : vector<5x64xf32> to vector<5xf32>
    %12 = vector.shape_cast %11 : vector<5xf32> to vector<5x1xf32>
    %cst_8 = arith.constant 6.400000e+01 : f32
    %13 = vector.broadcast %cst_8 : f32 to vector<5x1xf32>
    %14 = arith.divf %12, %13 : vector<5x1xf32>
    %15 = vector.broadcast %7 : vector<5x1xf32> to vector<5x64xf32>
    %16 = arith.subf %1, %15 : vector<5x64xf32>
    %cst_9 = arith.constant 9.99999974E-6 : f32
    %17 = vector.broadcast %cst_9 : f32 to vector<5x1xf32>
    %18 = arith.addf %14, %17 : vector<5x1xf32>
    %19 = math.rsqrt %18 : vector<5x1xf32>
    %20 = vector.broadcast %19 : vector<5x1xf32> to vector<5x64xf32>
    %21 = arith.mulf %16, %20 : vector<5x64xf32>
    %22 = vector.broadcast %2 : vector<1x64xf32> to vector<5x64xf32>
    %23 = arith.mulf %21, %22 : vector<5x64xf32>
    %24 = vector.broadcast %3 : vector<1x64xf32> to vector<5x64xf32>
    %25 = arith.addf %23, %24 : vector<5x64xf32>
    %26 = arith.truncf %25 : vector<5x64xf32> to vector<5x64xbf16>
    %cst_10 = arith.constant 0.000000e+00 : f32
    %27 = vector.broadcast %cst_10 : f32 to vector<5x64xf32>
    %c0_11 = arith.constant 0 : index
    %c0_12 = arith.constant 0 : index
    %c0_13 = arith.constant 0 : index
    %c0_14 = arith.constant 0 : index
    %28 = vector.load %arg4[%c0_11, %c0_12, %c0_13, %c0_14] : memref<3x8x64x8xbf16, #tpu.memory_space<vmem>>, vector<1x1x64x8xbf16>
    %29 = vector.shape_cast %28 : vector<1x1x64x8xbf16> to vector<64x8xbf16>
    %c1 = arith.constant 1 : index
    %c0_15 = arith.constant 0 : index
    %c0_16 = arith.constant 0 : index
    %c0_17 = arith.constant 0 : index
    %30 = vector.load %arg4[%c1, %c0_15, %c0_16, %c0_17] : memref<3x8x64x8xbf16, #tpu.memory_space<vmem>>, vector<1x1x64x8xbf16>
    %31 = vector.shape_cast %30 : vector<1x1x64x8xbf16> to vector<64x8xbf16>
    %c2 = arith.constant 2 : index
    %c0_18 = arith.constant 0 : index
    %c0_19 = arith.constant 0 : index
    %c0_20 = arith.constant 0 : index
    %32 = vector.load %arg4[%c2, %c0_18, %c0_19, %c0_20] : memref<3x8x64x8xbf16, #tpu.memory_space<vmem>>, vector<1x1x64x8xbf16>
    %33 = vector.shape_cast %32 : vector<1x1x64x8xbf16> to vector<64x8xbf16>
    %cst_21 = arith.constant dense<0.000000e+00> : vector<5x8xf32>
    %34 = tpu.matmul %26, %29, %cst_21 {dimension_numbers = #tpu.dot_dimension_numbers<[1], [0], [0], [1], [0, 0, 1, 1], [], []>} : vector<5x64xbf16>, vector<64x8xbf16>, vector<5x8xf32> -> vector<5x8xf32>
    %c0_22 = arith.constant 0 : index
    %c0_23 = arith.constant 0 : index
    %c0_24 = arith.constant 0 : index
    %c0_25 = arith.constant 0 : index
    %35 = vector.load %arg5[%c0_22, %c0_23, %c0_24, %c0_25] : memref<3x8x1x8xf32, #tpu.memory_space<vmem>>, vector<1x1x1x8xf32>
    %36 = vector.shape_cast %35 : vector<1x1x1x8xf32> to vector<1x8xf32>
    %37 = vector.broadcast %36 : vector<1x8xf32> to vector<5x8xf32>
    %38 = arith.addf %34, %37 : vector<5x8xf32>
    %cst_26 = arith.constant dense<0.000000e+00> : vector<5x8xf32>
    %39 = tpu.matmul %26, %31, %cst_26 {dimension_numbers = #tpu.dot_dimension_numbers<[1], [0], [0], [1], [0, 0, 1, 1], [], []>} : vector<5x64xbf16>, vector<64x8xbf16>, vector<5x8xf32> -> vector<5x8xf32>
    %c1_27 = arith.constant 1 : index
    %c0_28 = arith.constant 0 : index
    %c0_29 = arith.constant 0 : index
    %c0_30 = arith.constant 0 : index
    %40 = vector.load %arg5[%c1_27, %c0_28, %c0_29, %c0_30] : memref<3x8x1x8xf32, #tpu.memory_space<vmem>>, vector<1x1x1x8xf32>
    %41 = vector.shape_cast %40 : vector<1x1x1x8xf32> to vector<1x8xf32>
    %42 = vector.broadcast %41 : vector<1x8xf32> to vector<5x8xf32>
    %43 = arith.addf %39, %42 : vector<5x8xf32>
    %cst_31 = arith.constant dense<0.000000e+00> : vector<5x8xf32>
    %44 = tpu.matmul %26, %33, %cst_31 {dimension_numbers = #tpu.dot_dimension_numbers<[1], [0], [0], [1], [0, 0, 1, 1], [], []>} : vector<5x64xbf16>, vector<64x8xbf16>, vector<5x8xf32> -> vector<5x8xf32>
    %c2_32 = arith.constant 2 : index
    %c0_33 = arith.constant 0 : index
    %c0_34 = arith.constant 0 : index
    %c0_35 = arith.constant 0 : index
    %45 = vector.load %arg5[%c2_32, %c0_33, %c0_34, %c0_35] : memref<3x8x1x8xf32, #tpu.memory_space<vmem>>, vector<1x1x1x8xf32>
    %46 = vector.shape_cast %45 : vector<1x1x1x8xf32> to vector<1x8xf32>
    %47 = vector.broadcast %46 : vector<1x8xf32> to vector<5x8xf32>
    %48 = arith.addf %44, %47 : vector<5x8xf32>
    %49 = arith.truncf %38 : vector<5x8xf32> to vector<5x8xbf16>
    %50 = arith.truncf %43 : vector<5x8xf32> to vector<5x8xbf16>
    %cst_36 = arith.constant dense<0.000000e+00> : vector<5x5xf32>
    %51 = tpu.matmul %49, %50, %cst_36 {dimension_numbers = #tpu.dot_dimension_numbers<[1], [1], [0], [0], [0, 0, 1, 0], [], []>} : vector<5x8xbf16>, vector<5x8xbf16>, vector<5x5xf32> -> vector<5x5xf32>
    %cst_37 = arith.constant 0.353553385 : f32
    %52 = vector.broadcast %cst_37 : f32 to vector<5x5xf32>
    %53 = arith.mulf %51, %52 : vector<5x5xf32>
    %cst_38 = arith.constant dense<0xFF800000> : vector<5xf32>
    %54 = vector.multi_reduction <maximumf>, %53, %cst_38 [1] : vector<5x5xf32> to vector<5xf32>
    %55 = vector.shape_cast %54 : vector<5xf32> to vector<5x1xf32>
    %56 = vector.broadcast %55 : vector<5x1xf32> to vector<5x5xf32>
    %57 = arith.subf %53, %56 : vector<5x5xf32>
    %58 = math.exp %57 : vector<5x5xf32>
    %cst_39 = arith.constant dense<0.000000e+00> : vector<5xf32>
    %59 = vector.multi_reduction <add>, %58, %cst_39 [1] : vector<5x5xf32> to vector<5xf32>
    %60 = vector.shape_cast %59 : vector<5xf32> to vector<5x1xf32>
    %61 = tpu.reciprocal %60 {approx = true} : vector<5x1xf32> -> vector<5x1xf32>
    %62 = vector.broadcast %61 : vector<5x1xf32> to vector<5x5xf32>
    %63 = arith.mulf %58, %62 : vector<5x5xf32>
    %64 = arith.truncf %63 : vector<5x5xf32> to vector<5x5xbf16>
    %65 = arith.truncf %48 : vector<5x8xf32> to vector<5x8xbf16>
    %cst_40 = arith.constant dense<0.000000e+00> : vector<5x8xf32>
    %66 = tpu.matmul %64, %65, %cst_40 {dimension_numbers = #tpu.dot_dimension_numbers<[1], [0], [0], [1], [0, 0, 1, 1], [], []>} : vector<5x5xbf16>, vector<5x8xbf16>, vector<5x8xf32> -> vector<5x8xf32>
    %67 = arith.truncf %66 : vector<5x8xf32> to vector<5x8xbf16>
    %c0_41 = arith.constant 0 : index
    %c0_42 = arith.constant 0 : index
    %c0_43 = arith.constant 0 : index
    %68 = vector.load %arg6[%c0_41, %c0_42, %c0_43] : memref<8x8x64xbf16, #tpu.memory_space<vmem>>, vector<1x8x64xbf16>
    %69 = vector.shape_cast %68 : vector<1x8x64xbf16> to vector<8x64xbf16>
    %cst_44 = arith.constant dense<0.000000e+00> : vector<5x64xf32>
    %70 = tpu.matmul %67, %69, %cst_44 {dimension_numbers = #tpu.dot_dimension_numbers<[1], [0], [0], [1], [0, 0, 1, 1], [], []>} : vector<5x8xbf16>, vector<8x64xbf16>, vector<5x64xf32> -> vector<5x64xf32>
    %71 = arith.addf %27, %70 : vector<5x64xf32>
    %c0_45 = arith.constant 0 : index
    %c1_46 = arith.constant 1 : index
    %c0_47 = arith.constant 0 : index
    %c0_48 = arith.constant 0 : index
    %72 = vector.load %arg4[%c0_45, %c1_46, %c0_47, %c0_48] : memref<3x8x64x8xbf16, #tpu.memory_space<vmem>>, vector<1x1x64x8xbf16>
    %73 = vector.shape_cast %72 : vector<1x1x64x8xbf16> to vector<64x8xbf16>
    %c1_49 = arith.constant 1 : index
    %c1_50 = arith.constant 1 : index
    %c0_51 = arith.constant 0 : index
    %c0_52 = arith.constant 0 : index
    %74 = vector.load %arg4[%c1_49, %c1_50, %c0_51, %c0_52] : memref<3x8x64x8xbf16, #tpu.memory_space<vmem>>, vector<1x1x64x8xbf16>
    %75 = vector.shape_cast %74 : vector<1x1x64x8xbf16> to vector<64x8xbf16>
    %c2_53 = arith.constant 2 : index
    %c1_54 = arith.constant 1 : index
    %c0_55 = arith.constant 0 : index
    %c0_56 = arith.constant 0 : index
    %76 = vector.load %arg4[%c2_53, %c1_54, %c0_55, %c0_56] : memref<3x8x64x8xbf16, #tpu.memory_space<vmem>>, vector<1x1x64x8xbf16>
    %77 = vector.shape_cast %76 : vector<1x1x64x8xbf16> to vector<64x8xbf16>
    %cst_57 = arith.constant dense<0.000000e+00> : vector<5x8xf32>
    %78 = tpu.matmul %26, %73, %cst_57 {dimension_numbers = #tpu.dot_dimension_numbers<[1], [0], [0], [1], [0, 0, 1, 1], [], []>} : vector<5x64xbf16>, vector<64x8xbf16>, vector<5x8xf32> -> vector<5x8xf32>
    %c0_58 = arith.constant 0 : index
    %c1_59 = arith.constant 1 : index
    %c0_60 = arith.constant 0 : index
    %c0_61 = arith.constant 0 : index
    %79 = vector.load %arg5[%c0_58, %c1_59, %c0_60, %c0_61] : memref<3x8x1x8xf32, #tpu.memory_space<vmem>>, vector<1x1x1x8xf32>
    %80 = vector.shape_cast %79 : vector<1x1x1x8xf32> to vector<1x8xf32>
    %81 = vector.broadcast %80 : vector<1x8xf32> to vector<5x8xf32>
    %82 = arith.addf %78, %81 : vector<5x8xf32>
    %cst_62 = arith.constant dense<0.000000e+00> : vector<5x8xf32>
    %83 = tpu.matmul %26, %75, %cst_62 {dimension_numbers = #tpu.dot_dimension_numbers<[1], [0], [0], [1], [0, 0, 1, 1], [], []>} : vector<5x64xbf16>, vector<64x8xbf16>, vector<5x8xf32> -> vector<5x8xf32>
    %c1_63 = arith.constant 1 : index
    %c1_64 = arith.constant 1 : index
    %c0_65 = arith.constant 0 : index
    %c0_66 = arith.constant 0 : index
    %84 = vector.load %arg5[%c1_63, %c1_64, %c0_65, %c0_66] : memref<3x8x1x8xf32, #tpu.memory_space<vmem>>, vector<1x1x1x8xf32>
    %85 = vector.shape_cast %84 : vector<1x1x1x8xf32> to vector<1x8xf32>
    %86 = vector.broadcast %85 : vector<1x8xf32> to vector<5x8xf32>
    %87 = arith.addf %83, %86 : vector<5x8xf32>
    %cst_67 = arith.constant dense<0.000000e+00> : vector<5x8xf32>
    %88 = tpu.matmul %26, %77, %cst_67 {dimension_numbers = #tpu.dot_dimension_numbers<[1], [0], [0], [1], [0, 0, 1, 1], [], []>} : vector<5x64xbf16>, vector<64x8xbf16>, vector<5x8xf32> -> vector<5x8xf32>
    %c2_68 = arith.constant 2 : index
    %c1_69 = arith.constant 1 : index
    %c0_70 = arith.constant 0 : index
    %c0_71 = arith.constant 0 : index
    %89 = vector.load %arg5[%c2_68, %c1_69, %c0_70, %c0_71] : memref<3x8x1x8xf32, #tpu.memory_space<vmem>>, vector<1x1x1x8xf32>
    %90 = vector.shape_cast %89 : vector<1x1x1x8xf32> to vector<1x8xf32>
    %91 = vector.broadcast %90 : vector<1x8xf32> to vector<5x8xf32>
    %92 = arith.addf %88, %91 : vector<5x8xf32>
    %93 = arith.truncf %82 : vector<5x8xf32> to vector<5x8xbf16>
    %94 = arith.truncf %87 : vector<5x8xf32> to vector<5x8xbf16>
    %cst_72 = arith.constant dense<0.000000e+00> : vector<5x5xf32>
    %95 = tpu.matmul %93, %94, %cst_72 {dimension_numbers = #tpu.dot_dimension_numbers<[1], [1], [0], [0], [0, 0, 1, 0], [], []>} : vector<5x8xbf16>, vector<5x8xbf16>, vector<5x5xf32> -> vector<5x5xf32>
    %cst_73 = arith.constant 0.353553385 : f32
    %96 = vector.broadcast %cst_73 : f32 to vector<5x5xf32>
    %97 = arith.mulf %95, %96 : vector<5x5xf32>
    %cst_74 = arith.constant dense<0xFF800000> : vector<5xf32>
    %98 = vector.multi_reduction <maximumf>, %97, %cst_74 [1] : vector<5x5xf32> to vector<5xf32>
    %99 = vector.shape_cast %98 : vector<5xf32> to vector<5x1xf32>
    %100 = vector.broadcast %99 : vector<5x1xf32> to vector<5x5xf32>
    %101 = arith.subf %97, %100 : vector<5x5xf32>
    %102 = math.exp %101 : vector<5x5xf32>
    %cst_75 = arith.constant dense<0.000000e+00> : vector<5xf32>
    %103 = vector.multi_reduction <add>, %102, %cst_75 [1] : vector<5x5xf32> to vector<5xf32>
    %104 = vector.shape_cast %103 : vector<5xf32> to vector<5x1xf32>
    %105 = tpu.reciprocal %104 {approx = true} : vector<5x1xf32> -> vector<5x1xf32>
    %106 = vector.broadcast %105 : vector<5x1xf32> to vector<5x5xf32>
    %107 = arith.mulf %102, %106 : vector<5x5xf32>
    %108 = arith.truncf %107 : vector<5x5xf32> to vector<5x5xbf16>
    %109 = arith.truncf %92 : vector<5x8xf32> to vector<5x8xbf16>
    %cst_76 = arith.constant dense<0.000000e+00> : vector<5x8xf32>
    %110 = tpu.matmul %108, %109, %cst_76 {dimension_numbers = #tpu.dot_dimension_numbers<[1], [0], [0], [1], [0, 0, 1, 1], [], []>} : vector<5x5xbf16>, vector<5x8xbf16>, vector<5x8xf32> -> vector<5x8xf32>
    %111 = arith.truncf %110 : vector<5x8xf32> to vector<5x8xbf16>
    %c1_77 = arith.constant 1 : index
    %c0_78 = arith.constant 0 : index
    %c0_79 = arith.constant 0 : index
    %112 = vector.load %arg6[%c1_77, %c0_78, %c0_79] : memref<8x8x64xbf16, #tpu.memory_space<vmem>>, vector<1x8x64xbf16>
    %113 = vector.shape_cast %112 : vector<1x8x64xbf16> to vector<8x64xbf16>
    %cst_80 = arith.constant dense<0.000000e+00> : vector<5x64xf32>
    %114 = tpu.matmul %111, %113, %cst_80 {dimension_numbers = #tpu.dot_dimension_numbers<[1], [0], [0], [1], [0, 0, 1, 1], [], []>} : vector<5x8xbf16>, vector<8x64xbf16>, vector<5x64xf32> -> vector<5x64xf32>
    %115 = arith.addf %71, %114 : vector<5x64xf32>
    %c0_81 = arith.constant 0 : index
    %c2_82 = arith.constant 2 : index
    %c0_83 = arith.constant 0 : index
    %c0_84 = arith.constant 0 : index
    %116 = vector.load %arg4[%c0_81, %c2_82, %c0_83, %c0_84] : memref<3x8x64x8xbf16, #tpu.memory_space<vmem>>, vector<1x1x64x8xbf16>
    %117 = vector.shape_cast %116 : vector<1x1x64x8xbf16> to vector<64x8xbf16>
    %c1_85 = arith.constant 1 : index
    %c2_86 = arith.constant 2 : index
    %c0_87 = arith.constant 0 : index
    %c0_88 = arith.constant 0 : index
    %118 = vector.load %arg4[%c1_85, %c2_86, %c0_87, %c0_88] : memref<3x8x64x8xbf16, #tpu.memory_space<vmem>>, vector<1x1x64x8xbf16>
    %119 = vector.shape_cast %118 : vector<1x1x64x8xbf16> to vector<64x8xbf16>
    %c2_89 = arith.constant 2 : index
    %c2_90 = arith.constant 2 : index
    %c0_91 = arith.constant 0 : index
    %c0_92 = arith.constant 0 : index
    %120 = vector.load %arg4[%c2_89, %c2_90, %c0_91, %c0_92] : memref<3x8x64x8xbf16, #tpu.memory_space<vmem>>, vector<1x1x64x8xbf16>
    %121 = vector.shape_cast %120 : vector<1x1x64x8xbf16> to vector<64x8xbf16>
    %cst_93 = arith.constant dense<0.000000e+00> : vector<5x8xf32>
    %122 = tpu.matmul %26, %117, %cst_93 {dimension_numbers = #tpu.dot_dimension_numbers<[1], [0], [0], [1], [0, 0, 1, 1], [], []>} : vector<5x64xbf16>, vector<64x8xbf16>, vector<5x8xf32> -> vector<5x8xf32>
    %c0_94 = arith.constant 0 : index
    %c2_95 = arith.constant 2 : index
    %c0_96 = arith.constant 0 : index
    %c0_97 = arith.constant 0 : index
    %123 = vector.load %arg5[%c0_94, %c2_95, %c0_96, %c0_97] : memref<3x8x1x8xf32, #tpu.memory_space<vmem>>, vector<1x1x1x8xf32>
    %124 = vector.shape_cast %123 : vector<1x1x1x8xf32> to vector<1x8xf32>
    %125 = vector.broadcast %124 : vector<1x8xf32> to vector<5x8xf32>
    %126 = arith.addf %122, %125 : vector<5x8xf32>
    %cst_98 = arith.constant dense<0.000000e+00> : vector<5x8xf32>
    %127 = tpu.matmul %26, %119, %cst_98 {dimension_numbers = #tpu.dot_dimension_numbers<[1], [0], [0], [1], [0, 0, 1, 1], [], []>} : vector<5x64xbf16>, vector<64x8xbf16>, vector<5x8xf32> -> vector<5x8xf32>
    %c1_99 = arith.constant 1 : index
    %c2_100 = arith.constant 2 : index
    %c0_101 = arith.constant 0 : index
    %c0_102 = arith.constant 0 : index
    %128 = vector.load %arg5[%c1_99, %c2_100, %c0_101, %c0_102] : memref<3x8x1x8xf32, #tpu.memory_space<vmem>>, vector<1x1x1x8xf32>
    %129 = vector.shape_cast %128 : vector<1x1x1x8xf32> to vector<1x8xf32>
    %130 = vector.broadcast %129 : vector<1x8xf32> to vector<5x8xf32>
    %131 = arith.addf %127, %130 : vector<5x8xf32>
    %cst_103 = arith.constant dense<0.000000e+00> : vector<5x8xf32>
    %132 = tpu.matmul %26, %121, %cst_103 {dimension_numbers = #tpu.dot_dimension_numbers<[1], [0], [0], [1], [0, 0, 1, 1], [], []>} : vector<5x64xbf16>, vector<64x8xbf16>, vector<5x8xf32> -> vector<5x8xf32>
    %c2_104 = arith.constant 2 : index
    %c2_105 = arith.constant 2 : index
    %c0_106 = arith.constant 0 : index
    %c0_107 = arith.constant 0 : index
    %133 = vector.load %arg5[%c2_104, %c2_105, %c0_106, %c0_107] : memref<3x8x1x8xf32, #tpu.memory_space<vmem>>, vector<1x1x1x8xf32>
    %134 = vector.shape_cast %133 : vector<1x1x1x8xf32> to vector<1x8xf32>
    %135 = vector.broadcast %134 : vector<1x8xf32> to vector<5x8xf32>
    %136 = arith.addf %132, %135 : vector<5x8xf32>
    %137 = arith.truncf %126 : vector<5x8xf32> to vector<5x8xbf16>
    %138 = arith.truncf %131 : vector<5x8xf32> to vector<5x8xbf16>
    %cst_108 = arith.constant dense<0.000000e+00> : vector<5x5xf32>
    %139 = tpu.matmul %137, %138, %cst_108 {dimension_numbers = #tpu.dot_dimension_numbers<[1], [1], [0], [0], [0, 0, 1, 0], [], []>} : vector<5x8xbf16>, vector<5x8xbf16>, vector<5x5xf32> -> vector<5x5xf32>
    %cst_109 = arith.constant 0.353553385 : f32
    %140 = vector.broadcast %cst_109 : f32 to vector<5x5xf32>
    %141 = arith.mulf %139, %140 : vector<5x5xf32>
    %cst_110 = arith.constant dense<0xFF800000> : vector<5xf32>
    %142 = vector.multi_reduction <maximumf>, %141, %cst_110 [1] : vector<5x5xf32> to vector<5xf32>
    %143 = vector.shape_cast %142 : vector<5xf32> to vector<5x1xf32>
    %144 = vector.broadcast %143 : vector<5x1xf32> to vector<5x5xf32>
    %145 = arith.subf %141, %144 : vector<5x5xf32>
    %146 = math.exp %145 : vector<5x5xf32>
    %cst_111 = arith.constant dense<0.000000e+00> : vector<5xf32>
    %147 = vector.multi_reduction <add>, %146, %cst_111 [1] : vector<5x5xf32> to vector<5xf32>
    %148 = vector.shape_cast %147 : vector<5xf32> to vector<5x1xf32>
    %149 = tpu.reciprocal %148 {approx = true} : vector<5x1xf32> -> vector<5x1xf32>
    %150 = vector.broadcast %149 : vector<5x1xf32> to vector<5x5xf32>
    %151 = arith.mulf %146, %150 : vector<5x5xf32>
    %152 = arith.truncf %151 : vector<5x5xf32> to vector<5x5xbf16>
    %153 = arith.truncf %136 : vector<5x8xf32> to vector<5x8xbf16>
    %cst_112 = arith.constant dense<0.000000e+00> : vector<5x8xf32>
    %154 = tpu.matmul %152, %153, %cst_112 {dimension_numbers = #tpu.dot_dimension_numbers<[1], [0], [0], [1], [0, 0, 1, 1], [], []>} : vector<5x5xbf16>, vector<5x8xbf16>, vector<5x8xf32> -> vector<5x8xf32>
    %155 = arith.truncf %154 : vector<5x8xf32> to vector<5x8xbf16>
    %c2_113 = arith.constant 2 : index
    %c0_114 = arith.constant 0 : index
    %c0_115 = arith.constant 0 : index
    %156 = vector.load %arg6[%c2_113, %c0_114, %c0_115] : memref<8x8x64xbf16, #tpu.memory_space<vmem>>, vector<1x8x64xbf16>
    %157 = vector.shape_cast %156 : vector<1x8x64xbf16> to vector<8x64xbf16>
    %cst_116 = arith.constant dense<0.000000e+00> : vector<5x64xf32>
    %158 = tpu.matmul %155, %157, %cst_116 {dimension_numbers = #tpu.dot_dimension_numbers<[1], [0], [0], [1], [0, 0, 1, 1], [], []>} : vector<5x8xbf16>, vector<8x64xbf16>, vector<5x64xf32> -> vector<5x64xf32>
    %159 = arith.addf %115, %158 : vector<5x64xf32>
    %c0_117 = arith.constant 0 : index
    %c3 = arith.constant 3 : index
    %c0_118 = arith.constant 0 : index
    %c0_119 = arith.constant 0 : index
    %160 = vector.load %arg4[%c0_117, %c3, %c0_118, %c0_119] : memref<3x8x64x8xbf16, #tpu.memory_space<vmem>>, vector<1x1x64x8xbf16>
    %161 = vector.shape_cast %160 : vector<1x1x64x8xbf16> to vector<64x8xbf16>
    %c1_120 = arith.constant 1 : index
    %c3_121 = arith.constant 3 : index
    %c0_122 = arith.constant 0 : index
    %c0_123 = arith.constant 0 : index
    %162 = vector.load %arg4[%c1_120, %c3_121, %c0_122, %c0_123] : memref<3x8x64x8xbf16, #tpu.memory_space<vmem>>, vector<1x1x64x8xbf16>
    %163 = vector.shape_cast %162 : vector<1x1x64x8xbf16> to vector<64x8xbf16>
    %c2_124 = arith.constant 2 : index
    %c3_125 = arith.constant 3 : index
    %c0_126 = arith.constant 0 : index
    %c0_127 = arith.constant 0 : index
    %164 = vector.load %arg4[%c2_124, %c3_125, %c0_126, %c0_127] : memref<3x8x64x8xbf16, #tpu.memory_space<vmem>>, vector<1x1x64x8xbf16>
    %165 = vector.shape_cast %164 : vector<1x1x64x8xbf16> to vector<64x8xbf16>
    %cst_128 = arith.constant dense<0.000000e+00> : vector<5x8xf32>
    %166 = tpu.matmul %26, %161, %cst_128 {dimension_numbers = #tpu.dot_dimension_numbers<[1], [0], [0], [1], [0, 0, 1, 1], [], []>} : vector<5x64xbf16>, vector<64x8xbf16>, vector<5x8xf32> -> vector<5x8xf32>
    %c0_129 = arith.constant 0 : index
    %c3_130 = arith.constant 3 : index
    %c0_131 = arith.constant 0 : index
    %c0_132 = arith.constant 0 : index
    %167 = vector.load %arg5[%c0_129, %c3_130, %c0_131, %c0_132] : memref<3x8x1x8xf32, #tpu.memory_space<vmem>>, vector<1x1x1x8xf32>
    %168 = vector.shape_cast %167 : vector<1x1x1x8xf32> to vector<1x8xf32>
    %169 = vector.broadcast %168 : vector<1x8xf32> to vector<5x8xf32>
    %170 = arith.addf %166, %169 : vector<5x8xf32>
    %cst_133 = arith.constant dense<0.000000e+00> : vector<5x8xf32>
    %171 = tpu.matmul %26, %163, %cst_133 {dimension_numbers = #tpu.dot_dimension_numbers<[1], [0], [0], [1], [0, 0, 1, 1], [], []>} : vector<5x64xbf16>, vector<64x8xbf16>, vector<5x8xf32> -> vector<5x8xf32>
    %c1_134 = arith.constant 1 : index
    %c3_135 = arith.constant 3 : index
    %c0_136 = arith.constant 0 : index
    %c0_137 = arith.constant 0 : index
    %172 = vector.load %arg5[%c1_134, %c3_135, %c0_136, %c0_137] : memref<3x8x1x8xf32, #tpu.memory_space<vmem>>, vector<1x1x1x8xf32>
    %173 = vector.shape_cast %172 : vector<1x1x1x8xf32> to vector<1x8xf32>
    %174 = vector.broadcast %173 : vector<1x8xf32> to vector<5x8xf32>
    %175 = arith.addf %171, %174 : vector<5x8xf32>
    %cst_138 = arith.constant dense<0.000000e+00> : vector<5x8xf32>
    %176 = tpu.matmul %26, %165, %cst_138 {dimension_numbers = #tpu.dot_dimension_numbers<[1], [0], [0], [1], [0, 0, 1, 1], [], []>} : vector<5x64xbf16>, vector<64x8xbf16>, vector<5x8xf32> -> vector<5x8xf32>
    %c2_139 = arith.constant 2 : index
    %c3_140 = arith.constant 3 : index
    %c0_141 = arith.constant 0 : index
    %c0_142 = arith.constant 0 : index
    %177 = vector.load %arg5[%c2_139, %c3_140, %c0_141, %c0_142] : memref<3x8x1x8xf32, #tpu.memory_space<vmem>>, vector<1x1x1x8xf32>
    %178 = vector.shape_cast %177 : vector<1x1x1x8xf32> to vector<1x8xf32>
    %179 = vector.broadcast %178 : vector<1x8xf32> to vector<5x8xf32>
    %180 = arith.addf %176, %179 : vector<5x8xf32>
    %181 = arith.truncf %170 : vector<5x8xf32> to vector<5x8xbf16>
    %182 = arith.truncf %175 : vector<5x8xf32> to vector<5x8xbf16>
    %cst_143 = arith.constant dense<0.000000e+00> : vector<5x5xf32>
    %183 = tpu.matmul %181, %182, %cst_143 {dimension_numbers = #tpu.dot_dimension_numbers<[1], [1], [0], [0], [0, 0, 1, 0], [], []>} : vector<5x8xbf16>, vector<5x8xbf16>, vector<5x5xf32> -> vector<5x5xf32>
    %cst_144 = arith.constant 0.353553385 : f32
    %184 = vector.broadcast %cst_144 : f32 to vector<5x5xf32>
    %185 = arith.mulf %183, %184 : vector<5x5xf32>
    %cst_145 = arith.constant dense<0xFF800000> : vector<5xf32>
    %186 = vector.multi_reduction <maximumf>, %185, %cst_145 [1] : vector<5x5xf32> to vector<5xf32>
    %187 = vector.shape_cast %186 : vector<5xf32> to vector<5x1xf32>
    %188 = vector.broadcast %187 : vector<5x1xf32> to vector<5x5xf32>
    %189 = arith.subf %185, %188 : vector<5x5xf32>
    %190 = math.exp %189 : vector<5x5xf32>
    %cst_146 = arith.constant dense<0.000000e+00> : vector<5xf32>
    %191 = vector.multi_reduction <add>, %190, %cst_146 [1] : vector<5x5xf32> to vector<5xf32>
    %192 = vector.shape_cast %191 : vector<5xf32> to vector<5x1xf32>
    %193 = tpu.reciprocal %192 {approx = true} : vector<5x1xf32> -> vector<5x1xf32>
    %194 = vector.broadcast %193 : vector<5x1xf32> to vector<5x5xf32>
    %195 = arith.mulf %190, %194 : vector<5x5xf32>
    %196 = arith.truncf %195 : vector<5x5xf32> to vector<5x5xbf16>
    %197 = arith.truncf %180 : vector<5x8xf32> to vector<5x8xbf16>
    %cst_147 = arith.constant dense<0.000000e+00> : vector<5x8xf32>
    %198 = tpu.matmul %196, %197, %cst_147 {dimension_numbers = #tpu.dot_dimension_numbers<[1], [0], [0], [1], [0, 0, 1, 1], [], []>} : vector<5x5xbf16>, vector<5x8xbf16>, vector<5x8xf32> -> vector<5x8xf32>
    %199 = arith.truncf %198 : vector<5x8xf32> to vector<5x8xbf16>
    %c3_148 = arith.constant 3 : index
    %c0_149 = arith.constant 0 : index
    %c0_150 = arith.constant 0 : index
    %200 = vector.load %arg6[%c3_148, %c0_149, %c0_150] : memref<8x8x64xbf16, #tpu.memory_space<vmem>>, vector<1x8x64xbf16>
    %201 = vector.shape_cast %200 : vector<1x8x64xbf16> to vector<8x64xbf16>
    %cst_151 = arith.constant dense<0.000000e+00> : vector<5x64xf32>
    %202 = tpu.matmul %199, %201, %cst_151 {dimension_numbers = #tpu.dot_dimension_numbers<[1], [0], [0], [1], [0, 0, 1, 1], [], []>} : vector<5x8xbf16>, vector<8x64xbf16>, vector<5x64xf32> -> vector<5x64xf32>
    %203 = arith.addf %159, %202 : vector<5x64xf32>
    %c0_152 = arith.constant 0 : index
    %c4 = arith.constant 4 : index
    %c0_153 = arith.constant 0 : index
    %c0_154 = arith.constant 0 : index
    %204 = vector.load %arg4[%c0_152, %c4, %c0_153, %c0_154] : memref<3x8x64x8xbf16, #tpu.memory_space<vmem>>, vector<1x1x64x8xbf16>
    %205 = vector.shape_cast %204 : vector<1x1x64x8xbf16> to vector<64x8xbf16>
    %c1_155 = arith.constant 1 : index
    %c4_156 = arith.constant 4 : index
    %c0_157 = arith.constant 0 : index
    %c0_158 = arith.constant 0 : index
    %206 = vector.load %arg4[%c1_155, %c4_156, %c0_157, %c0_158] : memref<3x8x64x8xbf16, #tpu.memory_space<vmem>>, vector<1x1x64x8xbf16>
    %207 = vector.shape_cast %206 : vector<1x1x64x8xbf16> to vector<64x8xbf16>
    %c2_159 = arith.constant 2 : index
    %c4_160 = arith.constant 4 : index
    %c0_161 = arith.constant 0 : index
    %c0_162 = arith.constant 0 : index
    %208 = vector.load %arg4[%c2_159, %c4_160, %c0_161, %c0_162] : memref<3x8x64x8xbf16, #tpu.memory_space<vmem>>, vector<1x1x64x8xbf16>
    %209 = vector.shape_cast %208 : vector<1x1x64x8xbf16> to vector<64x8xbf16>
    %cst_163 = arith.constant dense<0.000000e+00> : vector<5x8xf32>
    %210 = tpu.matmul %26, %205, %cst_163 {dimension_numbers = #tpu.dot_dimension_numbers<[1], [0], [0], [1], [0, 0, 1, 1], [], []>} : vector<5x64xbf16>, vector<64x8xbf16>, vector<5x8xf32> -> vector<5x8xf32>
    %c0_164 = arith.constant 0 : index
    %c4_165 = arith.constant 4 : index
    %c0_166 = arith.constant 0 : index
    %c0_167 = arith.constant 0 : index
    %211 = vector.load %arg5[%c0_164, %c4_165, %c0_166, %c0_167] : memref<3x8x1x8xf32, #tpu.memory_space<vmem>>, vector<1x1x1x8xf32>
    %212 = vector.shape_cast %211 : vector<1x1x1x8xf32> to vector<1x8xf32>
    %213 = vector.broadcast %212 : vector<1x8xf32> to vector<5x8xf32>
    %214 = arith.addf %210, %213 : vector<5x8xf32>
    %cst_168 = arith.constant dense<0.000000e+00> : vector<5x8xf32>
    %215 = tpu.matmul %26, %207, %cst_168 {dimension_numbers = #tpu.dot_dimension_numbers<[1], [0], [0], [1], [0, 0, 1, 1], [], []>} : vector<5x64xbf16>, vector<64x8xbf16>, vector<5x8xf32> -> vector<5x8xf32>
    %c1_169 = arith.constant 1 : index
    %c4_170 = arith.constant 4 : index
    %c0_171 = arith.constant 0 : index
    %c0_172 = arith.constant 0 : index
    %216 = vector.load %arg5[%c1_169, %c4_170, %c0_171, %c0_172] : memref<3x8x1x8xf32, #tpu.memory_space<vmem>>, vector<1x1x1x8xf32>
    %217 = vector.shape_cast %216 : vector<1x1x1x8xf32> to vector<1x8xf32>
    %218 = vector.broadcast %217 : vector<1x8xf32> to vector<5x8xf32>
    %219 = arith.addf %215, %218 : vector<5x8xf32>
    %cst_173 = arith.constant dense<0.000000e+00> : vector<5x8xf32>
    %220 = tpu.matmul %26, %209, %cst_173 {dimension_numbers = #tpu.dot_dimension_numbers<[1], [0], [0], [1], [0, 0, 1, 1], [], []>} : vector<5x64xbf16>, vector<64x8xbf16>, vector<5x8xf32> -> vector<5x8xf32>
    %c2_174 = arith.constant 2 : index
    %c4_175 = arith.constant 4 : index
    %c0_176 = arith.constant 0 : index
    %c0_177 = arith.constant 0 : index
    %221 = vector.load %arg5[%c2_174, %c4_175, %c0_176, %c0_177] : memref<3x8x1x8xf32, #tpu.memory_space<vmem>>, vector<1x1x1x8xf32>
    %222 = vector.shape_cast %221 : vector<1x1x1x8xf32> to vector<1x8xf32>
    %223 = vector.broadcast %222 : vector<1x8xf32> to vector<5x8xf32>
    %224 = arith.addf %220, %223 : vector<5x8xf32>
    %225 = arith.truncf %214 : vector<5x8xf32> to vector<5x8xbf16>
    %226 = arith.truncf %219 : vector<5x8xf32> to vector<5x8xbf16>
    %cst_178 = arith.constant dense<0.000000e+00> : vector<5x5xf32>
    %227 = tpu.matmul %225, %226, %cst_178 {dimension_numbers = #tpu.dot_dimension_numbers<[1], [1], [0], [0], [0, 0, 1, 0], [], []>} : vector<5x8xbf16>, vector<5x8xbf16>, vector<5x5xf32> -> vector<5x5xf32>
    %cst_179 = arith.constant 0.353553385 : f32
    %228 = vector.broadcast %cst_179 : f32 to vector<5x5xf32>
    %229 = arith.mulf %227, %228 : vector<5x5xf32>
    %cst_180 = arith.constant dense<0xFF800000> : vector<5xf32>
    %230 = vector.multi_reduction <maximumf>, %229, %cst_180 [1] : vector<5x5xf32> to vector<5xf32>
    %231 = vector.shape_cast %230 : vector<5xf32> to vector<5x1xf32>
    %232 = vector.broadcast %231 : vector<5x1xf32> to vector<5x5xf32>
    %233 = arith.subf %229, %232 : vector<5x5xf32>
    %234 = math.exp %233 : vector<5x5xf32>
    %cst_181 = arith.constant dense<0.000000e+00> : vector<5xf32>
    %235 = vector.multi_reduction <add>, %234, %cst_181 [1] : vector<5x5xf32> to vector<5xf32>
    %236 = vector.shape_cast %235 : vector<5xf32> to vector<5x1xf32>
    %237 = tpu.reciprocal %236 {approx = true} : vector<5x1xf32> -> vector<5x1xf32>
    %238 = vector.broadcast %237 : vector<5x1xf32> to vector<5x5xf32>
    %239 = arith.mulf %234, %238 : vector<5x5xf32>
    %240 = arith.truncf %239 : vector<5x5xf32> to vector<5x5xbf16>
    %241 = arith.truncf %224 : vector<5x8xf32> to vector<5x8xbf16>
    %cst_182 = arith.constant dense<0.000000e+00> : vector<5x8xf32>
    %242 = tpu.matmul %240, %241, %cst_182 {dimension_numbers = #tpu.dot_dimension_numbers<[1], [0], [0], [1], [0, 0, 1, 1], [], []>} : vector<5x5xbf16>, vector<5x8xbf16>, vector<5x8xf32> -> vector<5x8xf32>
    %243 = arith.truncf %242 : vector<5x8xf32> to vector<5x8xbf16>
    %c4_183 = arith.constant 4 : index
    %c0_184 = arith.constant 0 : index
    %c0_185 = arith.constant 0 : index
    %244 = vector.load %arg6[%c4_183, %c0_184, %c0_185] : memref<8x8x64xbf16, #tpu.memory_space<vmem>>, vector<1x8x64xbf16>
    %245 = vector.shape_cast %244 : vector<1x8x64xbf16> to vector<8x64xbf16>
    %cst_186 = arith.constant dense<0.000000e+00> : vector<5x64xf32>
    %246 = tpu.matmul %243, %245, %cst_186 {dimension_numbers = #tpu.dot_dimension_numbers<[1], [0], [0], [1], [0, 0, 1, 1], [], []>} : vector<5x8xbf16>, vector<8x64xbf16>, vector<5x64xf32> -> vector<5x64xf32>
    %247 = arith.addf %203, %246 : vector<5x64xf32>
    %c0_187 = arith.constant 0 : index
    %c5 = arith.constant 5 : index
    %c0_188 = arith.constant 0 : index
    %c0_189 = arith.constant 0 : index
    %248 = vector.load %arg4[%c0_187, %c5, %c0_188, %c0_189] : memref<3x8x64x8xbf16, #tpu.memory_space<vmem>>, vector<1x1x64x8xbf16>
    %249 = vector.shape_cast %248 : vector<1x1x64x8xbf16> to vector<64x8xbf16>
    %c1_190 = arith.constant 1 : index
    %c5_191 = arith.constant 5 : index
    %c0_192 = arith.constant 0 : index
    %c0_193 = arith.constant 0 : index
    %250 = vector.load %arg4[%c1_190, %c5_191, %c0_192, %c0_193] : memref<3x8x64x8xbf16, #tpu.memory_space<vmem>>, vector<1x1x64x8xbf16>
    %251 = vector.shape_cast %250 : vector<1x1x64x8xbf16> to vector<64x8xbf16>
    %c2_194 = arith.constant 2 : index
    %c5_195 = arith.constant 5 : index
    %c0_196 = arith.constant 0 : index
    %c0_197 = arith.constant 0 : index
    %252 = vector.load %arg4[%c2_194, %c5_195, %c0_196, %c0_197] : memref<3x8x64x8xbf16, #tpu.memory_space<vmem>>, vector<1x1x64x8xbf16>
    %253 = vector.shape_cast %252 : vector<1x1x64x8xbf16> to vector<64x8xbf16>
    %cst_198 = arith.constant dense<0.000000e+00> : vector<5x8xf32>
    %254 = tpu.matmul %26, %249, %cst_198 {dimension_numbers = #tpu.dot_dimension_numbers<[1], [0], [0], [1], [0, 0, 1, 1], [], []>} : vector<5x64xbf16>, vector<64x8xbf16>, vector<5x8xf32> -> vector<5x8xf32>
    %c0_199 = arith.constant 0 : index
    %c5_200 = arith.constant 5 : index
    %c0_201 = arith.constant 0 : index
    %c0_202 = arith.constant 0 : index
    %255 = vector.load %arg5[%c0_199, %c5_200, %c0_201, %c0_202] : memref<3x8x1x8xf32, #tpu.memory_space<vmem>>, vector<1x1x1x8xf32>
    %256 = vector.shape_cast %255 : vector<1x1x1x8xf32> to vector<1x8xf32>
    %257 = vector.broadcast %256 : vector<1x8xf32> to vector<5x8xf32>
    %258 = arith.addf %254, %257 : vector<5x8xf32>
    %cst_203 = arith.constant dense<0.000000e+00> : vector<5x8xf32>
    %259 = tpu.matmul %26, %251, %cst_203 {dimension_numbers = #tpu.dot_dimension_numbers<[1], [0], [0], [1], [0, 0, 1, 1], [], []>} : vector<5x64xbf16>, vector<64x8xbf16>, vector<5x8xf32> -> vector<5x8xf32>
    %c1_204 = arith.constant 1 : index
    %c5_205 = arith.constant 5 : index
    %c0_206 = arith.constant 0 : index
    %c0_207 = arith.constant 0 : index
    %260 = vector.load %arg5[%c1_204, %c5_205, %c0_206, %c0_207] : memref<3x8x1x8xf32, #tpu.memory_space<vmem>>, vector<1x1x1x8xf32>
    %261 = vector.shape_cast %260 : vector<1x1x1x8xf32> to vector<1x8xf32>
    %262 = vector.broadcast %261 : vector<1x8xf32> to vector<5x8xf32>
    %263 = arith.addf %259, %262 : vector<5x8xf32>
    %cst_208 = arith.constant dense<0.000000e+00> : vector<5x8xf32>
    %264 = tpu.matmul %26, %253, %cst_208 {dimension_numbers = #tpu.dot_dimension_numbers<[1], [0], [0], [1], [0, 0, 1, 1], [], []>} : vector<5x64xbf16>, vector<64x8xbf16>, vector<5x8xf32> -> vector<5x8xf32>
    %c2_209 = arith.constant 2 : index
    %c5_210 = arith.constant 5 : index
    %c0_211 = arith.constant 0 : index
    %c0_212 = arith.constant 0 : index
    %265 = vector.load %arg5[%c2_209, %c5_210, %c0_211, %c0_212] : memref<3x8x1x8xf32, #tpu.memory_space<vmem>>, vector<1x1x1x8xf32>
    %266 = vector.shape_cast %265 : vector<1x1x1x8xf32> to vector<1x8xf32>
    %267 = vector.broadcast %266 : vector<1x8xf32> to vector<5x8xf32>
    %268 = arith.addf %264, %267 : vector<5x8xf32>
    %269 = arith.truncf %258 : vector<5x8xf32> to vector<5x8xbf16>
    %270 = arith.truncf %263 : vector<5x8xf32> to vector<5x8xbf16>
    %cst_213 = arith.constant dense<0.000000e+00> : vector<5x5xf32>
    %271 = tpu.matmul %269, %270, %cst_213 {dimension_numbers = #tpu.dot_dimension_numbers<[1], [1], [0], [0], [0, 0, 1, 0], [], []>} : vector<5x8xbf16>, vector<5x8xbf16>, vector<5x5xf32> -> vector<5x5xf32>
    %cst_214 = arith.constant 0.353553385 : f32
    %272 = vector.broadcast %cst_214 : f32 to vector<5x5xf32>
    %273 = arith.mulf %271, %272 : vector<5x5xf32>
    %cst_215 = arith.constant dense<0xFF800000> : vector<5xf32>
    %274 = vector.multi_reduction <maximumf>, %273, %cst_215 [1] : vector<5x5xf32> to vector<5xf32>
    %275 = vector.shape_cast %274 : vector<5xf32> to vector<5x1xf32>
    %276 = vector.broadcast %275 : vector<5x1xf32> to vector<5x5xf32>
    %277 = arith.subf %273, %276 : vector<5x5xf32>
    %278 = math.exp %277 : vector<5x5xf32>
    %cst_216 = arith.constant dense<0.000000e+00> : vector<5xf32>
    %279 = vector.multi_reduction <add>, %278, %cst_216 [1] : vector<5x5xf32> to vector<5xf32>
    %280 = vector.shape_cast %279 : vector<5xf32> to vector<5x1xf32>
    %281 = tpu.reciprocal %280 {approx = true} : vector<5x1xf32> -> vector<5x1xf32>
    %282 = vector.broadcast %281 : vector<5x1xf32> to vector<5x5xf32>
    %283 = arith.mulf %278, %282 : vector<5x5xf32>
    %284 = arith.truncf %283 : vector<5x5xf32> to vector<5x5xbf16>
    %285 = arith.truncf %268 : vector<5x8xf32> to vector<5x8xbf16>
    %cst_217 = arith.constant dense<0.000000e+00> : vector<5x8xf32>
    %286 = tpu.matmul %284, %285, %cst_217 {dimension_numbers = #tpu.dot_dimension_numbers<[1], [0], [0], [1], [0, 0, 1, 1], [], []>} : vector<5x5xbf16>, vector<5x8xbf16>, vector<5x8xf32> -> vector<5x8xf32>
    %287 = arith.truncf %286 : vector<5x8xf32> to vector<5x8xbf16>
    %c5_218 = arith.constant 5 : index
    %c0_219 = arith.constant 0 : index
    %c0_220 = arith.constant 0 : index
    %288 = vector.load %arg6[%c5_218, %c0_219, %c0_220] : memref<8x8x64xbf16, #tpu.memory_space<vmem>>, vector<1x8x64xbf16>
    %289 = vector.shape_cast %288 : vector<1x8x64xbf16> to vector<8x64xbf16>
    %cst_221 = arith.constant dense<0.000000e+00> : vector<5x64xf32>
    %290 = tpu.matmul %287, %289, %cst_221 {dimension_numbers = #tpu.dot_dimension_numbers<[1], [0], [0], [1], [0, 0, 1, 1], [], []>} : vector<5x8xbf16>, vector<8x64xbf16>, vector<5x64xf32> -> vector<5x64xf32>
    %291 = arith.addf %247, %290 : vector<5x64xf32>
    %c0_222 = arith.constant 0 : index
    %c6 = arith.constant 6 : index
    %c0_223 = arith.constant 0 : index
    %c0_224 = arith.constant 0 : index
    %292 = vector.load %arg4[%c0_222, %c6, %c0_223, %c0_224] : memref<3x8x64x8xbf16, #tpu.memory_space<vmem>>, vector<1x1x64x8xbf16>
    %293 = vector.shape_cast %292 : vector<1x1x64x8xbf16> to vector<64x8xbf16>
    %c1_225 = arith.constant 1 : index
    %c6_226 = arith.constant 6 : index
    %c0_227 = arith.constant 0 : index
    %c0_228 = arith.constant 0 : index
    %294 = vector.load %arg4[%c1_225, %c6_226, %c0_227, %c0_228] : memref<3x8x64x8xbf16, #tpu.memory_space<vmem>>, vector<1x1x64x8xbf16>
    %295 = vector.shape_cast %294 : vector<1x1x64x8xbf16> to vector<64x8xbf16>
    %c2_229 = arith.constant 2 : index
    %c6_230 = arith.constant 6 : index
    %c0_231 = arith.constant 0 : index
    %c0_232 = arith.constant 0 : index
    %296 = vector.load %arg4[%c2_229, %c6_230, %c0_231, %c0_232] : memref<3x8x64x8xbf16, #tpu.memory_space<vmem>>, vector<1x1x64x8xbf16>
    %297 = vector.shape_cast %296 : vector<1x1x64x8xbf16> to vector<64x8xbf16>
    %cst_233 = arith.constant dense<0.000000e+00> : vector<5x8xf32>
    %298 = tpu.matmul %26, %293, %cst_233 {dimension_numbers = #tpu.dot_dimension_numbers<[1], [0], [0], [1], [0, 0, 1, 1], [], []>} : vector<5x64xbf16>, vector<64x8xbf16>, vector<5x8xf32> -> vector<5x8xf32>
    %c0_234 = arith.constant 0 : index
    %c6_235 = arith.constant 6 : index
    %c0_236 = arith.constant 0 : index
    %c0_237 = arith.constant 0 : index
    %299 = vector.load %arg5[%c0_234, %c6_235, %c0_236, %c0_237] : memref<3x8x1x8xf32, #tpu.memory_space<vmem>>, vector<1x1x1x8xf32>
    %300 = vector.shape_cast %299 : vector<1x1x1x8xf32> to vector<1x8xf32>
    %301 = vector.broadcast %300 : vector<1x8xf32> to vector<5x8xf32>
    %302 = arith.addf %298, %301 : vector<5x8xf32>
    %cst_238 = arith.constant dense<0.000000e+00> : vector<5x8xf32>
    %303 = tpu.matmul %26, %295, %cst_238 {dimension_numbers = #tpu.dot_dimension_numbers<[1], [0], [0], [1], [0, 0, 1, 1], [], []>} : vector<5x64xbf16>, vector<64x8xbf16>, vector<5x8xf32> -> vector<5x8xf32>
    %c1_239 = arith.constant 1 : index
    %c6_240 = arith.constant 6 : index
    %c0_241 = arith.constant 0 : index
    %c0_242 = arith.constant 0 : index
    %304 = vector.load %arg5[%c1_239, %c6_240, %c0_241, %c0_242] : memref<3x8x1x8xf32, #tpu.memory_space<vmem>>, vector<1x1x1x8xf32>
    %305 = vector.shape_cast %304 : vector<1x1x1x8xf32> to vector<1x8xf32>
    %306 = vector.broadcast %305 : vector<1x8xf32> to vector<5x8xf32>
    %307 = arith.addf %303, %306 : vector<5x8xf32>
    %cst_243 = arith.constant dense<0.000000e+00> : vector<5x8xf32>
    %308 = tpu.matmul %26, %297, %cst_243 {dimension_numbers = #tpu.dot_dimension_numbers<[1], [0], [0], [1], [0, 0, 1, 1], [], []>} : vector<5x64xbf16>, vector<64x8xbf16>, vector<5x8xf32> -> vector<5x8xf32>
    %c2_244 = arith.constant 2 : index
    %c6_245 = arith.constant 6 : index
    %c0_246 = arith.constant 0 : index
    %c0_247 = arith.constant 0 : index
    %309 = vector.load %arg5[%c2_244, %c6_245, %c0_246, %c0_247] : memref<3x8x1x8xf32, #tpu.memory_space<vmem>>, vector<1x1x1x8xf32>
    %310 = vector.shape_cast %309 : vector<1x1x1x8xf32> to vector<1x8xf32>
    %311 = vector.broadcast %310 : vector<1x8xf32> to vector<5x8xf32>
    %312 = arith.addf %308, %311 : vector<5x8xf32>
    %313 = arith.truncf %302 : vector<5x8xf32> to vector<5x8xbf16>
    %314 = arith.truncf %307 : vector<5x8xf32> to vector<5x8xbf16>
    %cst_248 = arith.constant dense<0.000000e+00> : vector<5x5xf32>
    %315 = tpu.matmul %313, %314, %cst_248 {dimension_numbers = #tpu.dot_dimension_numbers<[1], [1], [0], [0], [0, 0, 1, 0], [], []>} : vector<5x8xbf16>, vector<5x8xbf16>, vector<5x5xf32> -> vector<5x5xf32>
    %cst_249 = arith.constant 0.353553385 : f32
    %316 = vector.broadcast %cst_249 : f32 to vector<5x5xf32>
    %317 = arith.mulf %315, %316 : vector<5x5xf32>
    %cst_250 = arith.constant dense<0xFF800000> : vector<5xf32>
    %318 = vector.multi_reduction <maximumf>, %317, %cst_250 [1] : vector<5x5xf32> to vector<5xf32>
    %319 = vector.shape_cast %318 : vector<5xf32> to vector<5x1xf32>
    %320 = vector.broadcast %319 : vector<5x1xf32> to vector<5x5xf32>
    %321 = arith.subf %317, %320 : vector<5x5xf32>
    %322 = math.exp %321 : vector<5x5xf32>
    %cst_251 = arith.constant dense<0.000000e+00> : vector<5xf32>
    %323 = vector.multi_reduction <add>, %322, %cst_251 [1] : vector<5x5xf32> to vector<5xf32>
    %324 = vector.shape_cast %323 : vector<5xf32> to vector<5x1xf32>
    %325 = tpu.reciprocal %324 {approx = true} : vector<5x1xf32> -> vector<5x1xf32>
    %326 = vector.broadcast %325 : vector<5x1xf32> to vector<5x5xf32>
    %327 = arith.mulf %322, %326 : vector<5x5xf32>
    %328 = arith.truncf %327 : vector<5x5xf32> to vector<5x5xbf16>
    %329 = arith.truncf %312 : vector<5x8xf32> to vector<5x8xbf16>
    %cst_252 = arith.constant dense<0.000000e+00> : vector<5x8xf32>
    %330 = tpu.matmul %328, %329, %cst_252 {dimension_numbers = #tpu.dot_dimension_numbers<[1], [0], [0], [1], [0, 0, 1, 1], [], []>} : vector<5x5xbf16>, vector<5x8xbf16>, vector<5x8xf32> -> vector<5x8xf32>
    %331 = arith.truncf %330 : vector<5x8xf32> to vector<5x8xbf16>
    %c6_253 = arith.constant 6 : index
    %c0_254 = arith.constant 0 : index
    %c0_255 = arith.constant 0 : index
    %332 = vector.load %arg6[%c6_253, %c0_254, %c0_255] : memref<8x8x64xbf16, #tpu.memory_space<vmem>>, vector<1x8x64xbf16>
    %333 = vector.shape_cast %332 : vector<1x8x64xbf16> to vector<8x64xbf16>
    %cst_256 = arith.constant dense<0.000000e+00> : vector<5x64xf32>
    %334 = tpu.matmul %331, %333, %cst_256 {dimension_numbers = #tpu.dot_dimension_numbers<[1], [0], [0], [1], [0, 0, 1, 1], [], []>} : vector<5x8xbf16>, vector<8x64xbf16>, vector<5x64xf32> -> vector<5x64xf32>
    %335 = arith.addf %291, %334 : vector<5x64xf32>
    %c0_257 = arith.constant 0 : index
    %c7 = arith.constant 7 : index
    %c0_258 = arith.constant 0 : index
    %c0_259 = arith.constant 0 : index
    %336 = vector.load %arg4[%c0_257, %c7, %c0_258, %c0_259] : memref<3x8x64x8xbf16, #tpu.memory_space<vmem>>, vector<1x1x64x8xbf16>
    %337 = vector.shape_cast %336 : vector<1x1x64x8xbf16> to vector<64x8xbf16>
    %c1_260 = arith.constant 1 : index
    %c7_261 = arith.constant 7 : index
    %c0_262 = arith.constant 0 : index
    %c0_263 = arith.constant 0 : index
    %338 = vector.load %arg4[%c1_260, %c7_261, %c0_262, %c0_263] : memref<3x8x64x8xbf16, #tpu.memory_space<vmem>>, vector<1x1x64x8xbf16>
    %339 = vector.shape_cast %338 : vector<1x1x64x8xbf16> to vector<64x8xbf16>
    %c2_264 = arith.constant 2 : index
    %c7_265 = arith.constant 7 : index
    %c0_266 = arith.constant 0 : index
    %c0_267 = arith.constant 0 : index
    %340 = vector.load %arg4[%c2_264, %c7_265, %c0_266, %c0_267] : memref<3x8x64x8xbf16, #tpu.memory_space<vmem>>, vector<1x1x64x8xbf16>
    %341 = vector.shape_cast %340 : vector<1x1x64x8xbf16> to vector<64x8xbf16>
    %cst_268 = arith.constant dense<0.000000e+00> : vector<5x8xf32>
    %342 = tpu.matmul %26, %337, %cst_268 {dimension_numbers = #tpu.dot_dimension_numbers<[1], [0], [0], [1], [0, 0, 1, 1], [], []>} : vector<5x64xbf16>, vector<64x8xbf16>, vector<5x8xf32> -> vector<5x8xf32>
    %c0_269 = arith.constant 0 : index
    %c7_270 = arith.constant 7 : index
    %c0_271 = arith.constant 0 : index
    %c0_272 = arith.constant 0 : index
    %343 = vector.load %arg5[%c0_269, %c7_270, %c0_271, %c0_272] : memref<3x8x1x8xf32, #tpu.memory_space<vmem>>, vector<1x1x1x8xf32>
    %344 = vector.shape_cast %343 : vector<1x1x1x8xf32> to vector<1x8xf32>
    %345 = vector.broadcast %344 : vector<1x8xf32> to vector<5x8xf32>
    %346 = arith.addf %342, %345 : vector<5x8xf32>
    %cst_273 = arith.constant dense<0.000000e+00> : vector<5x8xf32>
    %347 = tpu.matmul %26, %339, %cst_273 {dimension_numbers = #tpu.dot_dimension_numbers<[1], [0], [0], [1], [0, 0, 1, 1], [], []>} : vector<5x64xbf16>, vector<64x8xbf16>, vector<5x8xf32> -> vector<5x8xf32>
    %c1_274 = arith.constant 1 : index
    %c7_275 = arith.constant 7 : index
    %c0_276 = arith.constant 0 : index
    %c0_277 = arith.constant 0 : index
    %348 = vector.load %arg5[%c1_274, %c7_275, %c0_276, %c0_277] : memref<3x8x1x8xf32, #tpu.memory_space<vmem>>, vector<1x1x1x8xf32>
    %349 = vector.shape_cast %348 : vector<1x1x1x8xf32> to vector<1x8xf32>
    %350 = vector.broadcast %349 : vector<1x8xf32> to vector<5x8xf32>
    %351 = arith.addf %347, %350 : vector<5x8xf32>
    %cst_278 = arith.constant dense<0.000000e+00> : vector<5x8xf32>
    %352 = tpu.matmul %26, %341, %cst_278 {dimension_numbers = #tpu.dot_dimension_numbers<[1], [0], [0], [1], [0, 0, 1, 1], [], []>} : vector<5x64xbf16>, vector<64x8xbf16>, vector<5x8xf32> -> vector<5x8xf32>
    %c2_279 = arith.constant 2 : index
    %c7_280 = arith.constant 7 : index
    %c0_281 = arith.constant 0 : index
    %c0_282 = arith.constant 0 : index
    %353 = vector.load %arg5[%c2_279, %c7_280, %c0_281, %c0_282] : memref<3x8x1x8xf32, #tpu.memory_space<vmem>>, vector<1x1x1x8xf32>
    %354 = vector.shape_cast %353 : vector<1x1x1x8xf32> to vector<1x8xf32>
    %355 = vector.broadcast %354 : vector<1x8xf32> to vector<5x8xf32>
    %356 = arith.addf %352, %355 : vector<5x8xf32>
    %357 = arith.truncf %346 : vector<5x8xf32> to vector<5x8xbf16>
    %358 = arith.truncf %351 : vector<5x8xf32> to vector<5x8xbf16>
    %cst_283 = arith.constant dense<0.000000e+00> : vector<5x5xf32>
    %359 = tpu.matmul %357, %358, %cst_283 {dimension_numbers = #tpu.dot_dimension_numbers<[1], [1], [0], [0], [0, 0, 1, 0], [], []>} : vector<5x8xbf16>, vector<5x8xbf16>, vector<5x5xf32> -> vector<5x5xf32>
    %cst_284 = arith.constant 0.353553385 : f32
    %360 = vector.broadcast %cst_284 : f32 to vector<5x5xf32>
    %361 = arith.mulf %359, %360 : vector<5x5xf32>
    %cst_285 = arith.constant dense<0xFF800000> : vector<5xf32>
    %362 = vector.multi_reduction <maximumf>, %361, %cst_285 [1] : vector<5x5xf32> to vector<5xf32>
    %363 = vector.shape_cast %362 : vector<5xf32> to vector<5x1xf32>
    %364 = vector.broadcast %363 : vector<5x1xf32> to vector<5x5xf32>
    %365 = arith.subf %361, %364 : vector<5x5xf32>
    %366 = math.exp %365 : vector<5x5xf32>
    %cst_286 = arith.constant dense<0.000000e+00> : vector<5xf32>
    %367 = vector.multi_reduction <add>, %366, %cst_286 [1] : vector<5x5xf32> to vector<5xf32>
    %368 = vector.shape_cast %367 : vector<5xf32> to vector<5x1xf32>
    %369 = tpu.reciprocal %368 {approx = true} : vector<5x1xf32> -> vector<5x1xf32>
    %370 = vector.broadcast %369 : vector<5x1xf32> to vector<5x5xf32>
    %371 = arith.mulf %366, %370 : vector<5x5xf32>
    %372 = arith.truncf %371 : vector<5x5xf32> to vector<5x5xbf16>
    %373 = arith.truncf %356 : vector<5x8xf32> to vector<5x8xbf16>
    %cst_287 = arith.constant dense<0.000000e+00> : vector<5x8xf32>
    %374 = tpu.matmul %372, %373, %cst_287 {dimension_numbers = #tpu.dot_dimension_numbers<[1], [0], [0], [1], [0, 0, 1, 1], [], []>} : vector<5x5xbf16>, vector<5x8xbf16>, vector<5x8xf32> -> vector<5x8xf32>
    %375 = arith.truncf %374 : vector<5x8xf32> to vector<5x8xbf16>
    %c7_288 = arith.constant 7 : index
    %c0_289 = arith.constant 0 : index
    %c0_290 = arith.constant 0 : index
    %376 = vector.load %arg6[%c7_288, %c0_289, %c0_290] : memref<8x8x64xbf16, #tpu.memory_space<vmem>>, vector<1x8x64xbf16>
    %377 = vector.shape_cast %376 : vector<1x8x64xbf16> to vector<8x64xbf16>
    %cst_291 = arith.constant dense<0.000000e+00> : vector<5x64xf32>
    %378 = tpu.matmul %375, %377, %cst_291 {dimension_numbers = #tpu.dot_dimension_numbers<[1], [0], [0], [1], [0, 0, 1, 1], [], []>} : vector<5x8xbf16>, vector<8x64xbf16>, vector<5x64xf32> -> vector<5x64xf32>
    %379 = arith.addf %335, %378 : vector<5x64xf32>
    %c0_292 = arith.constant 0 : index
    %c0_293 = arith.constant 0 : index
    %380 = vector.load %arg7[%c0_292, %c0_293] : memref<1x64xf32, #tpu.memory_space<vmem>>, vector<1x64xf32>
    %381 = vector.broadcast %380 : vector<1x64xf32> to vector<5x64xf32>
    %382 = arith.addf %379, %381 : vector<5x64xf32>
    %383 = arith.addf %1, %382 : vector<5x64xf32>
    %c0_294 = arith.constant 0 : index
    %c0_295 = arith.constant 0 : index
    %384 = vector.load %arg8[%c0_294, %c0_295] : memref<1x64xf32, #tpu.memory_space<vmem>>, vector<1x64xf32>
    %c0_296 = arith.constant 0 : index
    %c0_297 = arith.constant 0 : index
    %385 = vector.load %arg9[%c0_296, %c0_297] : memref<1x64xf32, #tpu.memory_space<vmem>>, vector<1x64xf32>
    %cst_298 = arith.constant dense<0.000000e+00> : vector<5xf32>
    %386 = vector.multi_reduction <add>, %383, %cst_298 [1] : vector<5x64xf32> to vector<5xf32>
    %387 = vector.shape_cast %386 : vector<5xf32> to vector<5x1xf32>
    %cst_299 = arith.constant 6.400000e+01 : f32
    %388 = vector.broadcast %cst_299 : f32 to vector<5x1xf32>
    %389 = arith.divf %387, %388 : vector<5x1xf32>
    %390 = vector.broadcast %389 : vector<5x1xf32> to vector<5x64xf32>
    %391 = arith.subf %383, %390 : vector<5x64xf32>
    %392 = arith.mulf %391, %391 : vector<5x64xf32>
    %cst_300 = arith.constant dense<0.000000e+00> : vector<5xf32>
    %393 = vector.multi_reduction <add>, %392, %cst_300 [1] : vector<5x64xf32> to vector<5xf32>
    %394 = vector.shape_cast %393 : vector<5xf32> to vector<5x1xf32>
    %cst_301 = arith.constant 6.400000e+01 : f32
    %395 = vector.broadcast %cst_301 : f32 to vector<5x1xf32>
    %396 = arith.divf %394, %395 : vector<5x1xf32>
    %397 = vector.broadcast %389 : vector<5x1xf32> to vector<5x64xf32>
    %398 = arith.subf %383, %397 : vector<5x64xf32>
    %cst_302 = arith.constant 9.99999974E-6 : f32
    %399 = vector.broadcast %cst_302 : f32 to vector<5x1xf32>
    %400 = arith.addf %396, %399 : vector<5x1xf32>
    %401 = math.rsqrt %400 : vector<5x1xf32>
    %402 = vector.broadcast %401 : vector<5x1xf32> to vector<5x64xf32>
    %403 = arith.mulf %398, %402 : vector<5x64xf32>
    %404 = vector.broadcast %384 : vector<1x64xf32> to vector<5x64xf32>
    %405 = arith.mulf %403, %404 : vector<5x64xf32>
    %406 = vector.broadcast %385 : vector<1x64xf32> to vector<5x64xf32>
    %407 = arith.addf %405, %406 : vector<5x64xf32>
    %408 = arith.truncf %407 : vector<5x64xf32> to vector<5x64xbf16>
    %c0_303 = arith.constant 0 : index
    %c0_304 = arith.constant 0 : index
    %409 = vector.load %arg10[%c0_303, %c0_304] : memref<64x128xbf16, #tpu.memory_space<vmem>>, vector<64x128xbf16>
    %cst_305 = arith.constant dense<0.000000e+00> : vector<5x128xf32>
    %410 = tpu.matmul %408, %409, %cst_305 {dimension_numbers = #tpu.dot_dimension_numbers<[1], [0], [0], [1], [0, 0, 1, 1], [], []>} : vector<5x64xbf16>, vector<64x128xbf16>, vector<5x128xf32> -> vector<5x128xf32>
    %c0_306 = arith.constant 0 : index
    %c0_307 = arith.constant 0 : index
    %411 = vector.load %arg11[%c0_306, %c0_307] : memref<1x128xf32, #tpu.memory_space<vmem>>, vector<1x128xf32>
    %412 = vector.broadcast %411 : vector<1x128xf32> to vector<5x128xf32>
    %413 = arith.addf %410, %412 : vector<5x128xf32>
    %414 = arith.mulf %413, %413 : vector<5x128xf32>
    %415 = arith.mulf %413, %414 : vector<5x128xf32>
    %cst_308 = arith.constant 4.471500e-02 : f32
    %416 = vector.broadcast %cst_308 : f32 to vector<5x128xf32>
    %417 = arith.mulf %416, %415 : vector<5x128xf32>
    %418 = arith.addf %413, %417 : vector<5x128xf32>
    %cst_309 = arith.constant 0.797884583 : f32
    %419 = vector.broadcast %cst_309 : f32 to vector<5x128xf32>
    %420 = arith.mulf %419, %418 : vector<5x128xf32>
    %421 = math.tanh %420 : vector<5x128xf32>
    %cst_310 = arith.constant 1.000000e+00 : f32
    %422 = vector.broadcast %cst_310 : f32 to vector<5x128xf32>
    %423 = arith.addf %422, %421 : vector<5x128xf32>
    %cst_311 = arith.constant 5.000000e-01 : f32
    %424 = vector.broadcast %cst_311 : f32 to vector<5x128xf32>
    %425 = arith.mulf %424, %423 : vector<5x128xf32>
    %426 = arith.mulf %413, %425 : vector<5x128xf32>
    %427 = arith.truncf %426 : vector<5x128xf32> to vector<5x128xbf16>
    %c0_312 = arith.constant 0 : index
    %c0_313 = arith.constant 0 : index
    %428 = vector.load %arg12[%c0_312, %c0_313] : memref<128x64xbf16, #tpu.memory_space<vmem>>, vector<128x64xbf16>
    %cst_314 = arith.constant dense<0.000000e+00> : vector<5x64xf32>
    %429 = tpu.matmul %427, %428, %cst_314 {dimension_numbers = #tpu.dot_dimension_numbers<[1], [0], [0], [1], [0, 0, 1, 1], [], []>} : vector<5x128xbf16>, vector<128x64xbf16>, vector<5x64xf32> -> vector<5x64xf32>
    %c0_315 = arith.constant 0 : index
    %c0_316 = arith.constant 0 : index
    %430 = vector.load %arg13[%c0_315, %c0_316] : memref<1x64xf32, #tpu.memory_space<vmem>>, vector<1x64xf32>
    %431 = vector.broadcast %430 : vector<1x64xf32> to vector<5x64xf32>
    %432 = arith.addf %429, %431 : vector<5x64xf32>
    %433 = arith.addf %383, %432 : vector<5x64xf32>
    %c0_317 = arith.constant 0 : index
    %c0_318 = arith.constant 0 : index
    %c0_319 = arith.constant 0 : index
    %434 = vector.load %arg14[%c0_317, %c0_318, %c0_319] : memref<1x5x64xf32, #tpu.memory_space<vmem>>, vector<1x5x64xf32>
    %435 = vector.shape_cast %434 : vector<1x5x64xf32> to vector<5x64xf32>
    %436 = vector.shape_cast %433 : vector<5x64xf32> to vector<1x5x64xf32>
    tpu.vector_store %arg14[%c0_317, %c0_318, %c0_319], %436 {strides = array<i32>} : memref<1x5x64xf32, #tpu.memory_space<vmem>>, vector<1x5x64xf32>,
    return
  }
  func.func @transform_0(%arg0: i32) -> (i32, i32, i32) {
    %c0_i32 = arith.constant 0 : i32
    %c0_i32_0 = arith.constant 0 : i32
    %c0_i32_1 = arith.constant 0 : i32
    return %arg0, %c0_i32, %c0_i32_0 : i32, i32, i32
  }
  func.func @transform_1(%arg0: i32) -> (i32, i32) {
    %c0_i32 = arith.constant 0 : i32
    %c0_i32_0 = arith.constant 0 : i32
    %c0_i32_1 = arith.constant 0 : i32
    return %c0_i32, %c0_i32_0 : i32, i32
  }
  func.func @transform_2(%arg0: i32) -> (i32, i32) {
    %c0_i32 = arith.constant 0 : i32
    %c0_i32_0 = arith.constant 0 : i32
    %c0_i32_1 = arith.constant 0 : i32
    return %c0_i32, %c0_i32_0 : i32, i32
  }
  func.func @transform_3(%arg0: i32) -> (i32, i32, i32, i32) {
    %c0_i32 = arith.constant 0 : i32
    %c0_i32_0 = arith.constant 0 : i32
    %c0_i32_1 = arith.constant 0 : i32
    %c0_i32_2 = arith.constant 0 : i32
    %c0_i32_3 = arith.constant 0 : i32
    return %c0_i32, %c0_i32_0, %c0_i32_1, %c0_i32_2 : i32, i32, i32, i32
  }
  func.func @transform_4(%arg0: i32) -> (i32, i32, i32, i32) {
    %c0_i32 = arith.constant 0 : i32
    %c0_i32_0 = arith.constant 0 : i32
    %c0_i32_1 = arith.constant 0 : i32
    %c0_i32_2 = arith.constant 0 : i32
    %c0_i32_3 = arith.constant 0 : i32
    return %c0_i32, %c0_i32_0, %c0_i32_1, %c0_i32_2 : i32, i32, i32, i32
  }
  func.func @transform_5(%arg0: i32) -> (i32, i32, i32) {
    %c0_i32 = arith.constant 0 : i32
    %c0_i32_0 = arith.constant 0 : i32
    %c0_i32_1 = arith.constant 0 : i32
    %c0_i32_2 = arith.constant 0 : i32
    return %c0_i32, %c0_i32_0, %c0_i32_1 : i32, i32, i32
  }
  func.func @transform_6(%arg0: i32) -> (i32, i32) {
    %c0_i32 = arith.constant 0 : i32
    %c0_i32_0 = arith.constant 0 : i32
    %c0_i32_1 = arith.constant 0 : i32
    return %c0_i32, %c0_i32_0 : i32, i32
  }
  func.func @transform_7(%arg0: i32) -> (i32, i32) {
    %c0_i32 = arith.constant 0 : i32
    %c0_i32_0 = arith.constant 0 : i32
    %c0_i32_1 = arith.constant 0 : i32
    return %c0_i32, %c0_i32_0 : i32, i32
  }
  func.func @transform_8(%arg0: i32) -> (i32, i32) {
    %c0_i32 = arith.constant 0 : i32
    %c0_i32_0 = arith.constant 0 : i32
    %c0_i32_1 = arith.constant 0 : i32
    return %c0_i32, %c0_i32_0 : i32, i32
  }
  func.func @transform_9(%arg0: i32) -> (i32, i32) {
    %c0_i32 = arith.constant 0 : i32
    %c0_i32_0 = arith.constant 0 : i32
    %c0_i32_1 = arith.constant 0 : i32
    return %c0_i32, %c0_i32_0 : i32, i32
  }
  func.func @transform_10(%arg0: i32) -> (i32, i32) {
    %c0_i32 = arith.constant 0 : i32
    %c0_i32_0 = arith.constant 0 : i32
    %c0_i32_1 = arith.constant 0 : i32
    return %c0_i32, %c0_i32_0 : i32, i32
  }
  func.func @transform_11(%arg0: i32) -> (i32, i32) {
    %c0_i32 = arith.constant 0 : i32
    %c0_i32_0 = arith.constant 0 : i32
    %c0_i32_1 = arith.constant 0 : i32
    return %c0_i32, %c0_i32_0 : i32, i32
  }
  func.func @transform_12(%arg0: i32) -> (i32, i32) {
    %c0_i32 = arith.constant 0 : i32
    %c0_i32_0 = arith.constant 0 : i32
    %c0_i32_1 = arith.constant 0 : i32
    return %c0_i32, %c0_i32_0 : i32, i32
  }
  func.func @transform_13(%arg0: i32) -> (i32, i32, i32) {
    %c0_i32 = arith.constant 0 : i32
    %c0_i32_0 = arith.constant 0 : i32
    %c0_i32_1 = arith.constant 0 : i32
    return %arg0, %c0_i32, %c0_i32_0 : i32, i32, i32
  }
}

module attributes {stable_mosaic.version = 11 : i64} {
  func.func @_encoder_block_kernel(%arg0: i32, %arg1: memref<1x2x64xf32, #tpu.memory_space<vmem>>, %arg2: memref<1x64xf32, #tpu.memory_space<vmem>>, %arg3: memref<1x64xf32, #tpu.memory_space<vmem>>, %arg4: memref<3x8x64x8xbf16, #tpu.memory_space<vmem>>, %arg5: memref<3x8x1x8xf32, #tpu.memory_space<vmem>>, %arg6: memref<8x8x64xbf16, #tpu.memory_space<vmem>>, %arg7: memref<1x64xf32, #tpu.memory_space<vmem>>, %arg8: memref<1x64xf32, #tpu.memory_space<vmem>>, %arg9: memref<1x64xf32, #tpu.memory_space<vmem>>, %arg10: memref<64x128xbf16, #tpu.memory_space<vmem>>, %arg11: memref<1x128xf32, #tpu.memory_space<vmem>>, %arg12: memref<128x64xbf16, #tpu.memory_space<vmem>>, %arg13: memref<1x64xf32, #tpu.memory_space<vmem>>, %arg14: memref<1x2x64xf32, #tpu.memory_space<vmem>>) attributes {dimension_semantics = [#tpu.dimension_semantics<parallel>], iteration_bounds = array<i64: 5>, scalar_prefetch = 0 : i64, scratch_operands = 0 : i64, tpu.core_type = #tpu.core_type<tc>, window_params = [{transform_indices = @transform_0, window_bounds = array<i64: 1, 2, 64>}, {pipeline_mode = #tpu.pipeline_mode<synchronous>, transform_indices = @transform_1, window_bounds = array<i64: 1, 64>}, {pipeline_mode = #tpu.pipeline_mode<synchronous>, transform_indices = @transform_2, window_bounds = array<i64: 1, 64>}, {pipeline_mode = #tpu.pipeline_mode<synchronous>, transform_indices = @transform_3, window_bounds = array<i64: 3, 8, 64, 8>}, {pipeline_mode = #tpu.pipeline_mode<synchronous>, transform_indices = @transform_4, window_bounds = array<i64: 3, 8, 1, 8>}, {pipeline_mode = #tpu.pipeline_mode<synchronous>, transform_indices = @transform_5, window_bounds = array<i64: 8, 8, 64>}, {pipeline_mode = #tpu.pipeline_mode<synchronous>, transform_indices = @transform_6, window_bounds = array<i64: 1, 64>}, {pipeline_mode = #tpu.pipeline_mode<synchronous>, transform_indices = @transform_7, window_bounds = array<i64: 1, 64>}, {pipeline_mode = #tpu.pipeline_mode<synchronous>, transform_indices = @transform_8, window_bounds = array<i64: 1, 64>}, {pipeline_mode = #tpu.pipeline_mode<synchronous>, transform_indices = @transform_9, window_bounds = array<i64: 64, 128>}, {pipeline_mode = #tpu.pipeline_mode<synchronous>, transform_indices = @transform_10, window_bounds = array<i64: 1, 128>}, {pipeline_mode = #tpu.pipeline_mode<synchronous>, transform_indices = @transform_11, window_bounds = array<i64: 128, 64>}, {pipeline_mode = #tpu.pipeline_mode<synchronous>, transform_indices = @transform_12, window_bounds = array<i64: 1, 64>}, {transform_indices = @transform_13, window_bounds = array<i64: 1, 2, 64>}]} {
    %c0 = arith.constant 0 : index
    %c0_0 = arith.constant 0 : index
    %c0_1 = arith.constant 0 : index
    %0 = vector.load %arg1[%c0, %c0_0, %c0_1] : memref<1x2x64xf32, #tpu.memory_space<vmem>>, vector<1x2x64xf32>
    %1 = vector.shape_cast %0 : vector<1x2x64xf32> to vector<2x64xf32>
    %2 = arith.truncf %1 : vector<2x64xf32> to vector<2x64xbf16>
    %cst = arith.constant 0.000000e+00 : f32
    %3 = vector.broadcast %cst : f32 to vector<2x64xf32>
    %c0_2 = arith.constant 0 : index
    %c0_3 = arith.constant 0 : index
    %c0_4 = arith.constant 0 : index
    %c0_5 = arith.constant 0 : index
    %4 = vector.load %arg4[%c0_2, %c0_3, %c0_4, %c0_5] : memref<3x8x64x8xbf16, #tpu.memory_space<vmem>>, vector<1x1x64x8xbf16>
    %5 = vector.shape_cast %4 : vector<1x1x64x8xbf16> to vector<64x8xbf16>
    %c1 = arith.constant 1 : index
    %c0_6 = arith.constant 0 : index
    %c0_7 = arith.constant 0 : index
    %c0_8 = arith.constant 0 : index
    %6 = vector.load %arg4[%c1, %c0_6, %c0_7, %c0_8] : memref<3x8x64x8xbf16, #tpu.memory_space<vmem>>, vector<1x1x64x8xbf16>
    %7 = vector.shape_cast %6 : vector<1x1x64x8xbf16> to vector<64x8xbf16>
    %c2 = arith.constant 2 : index
    %c0_9 = arith.constant 0 : index
    %c0_10 = arith.constant 0 : index
    %c0_11 = arith.constant 0 : index
    %8 = vector.load %arg4[%c2, %c0_9, %c0_10, %c0_11] : memref<3x8x64x8xbf16, #tpu.memory_space<vmem>>, vector<1x1x64x8xbf16>
    %9 = vector.shape_cast %8 : vector<1x1x64x8xbf16> to vector<64x8xbf16>
    %cst_12 = arith.constant dense<0.000000e+00> : vector<2x8xf32>
    %10 = tpu.matmul %2, %5, %cst_12 {dimension_numbers = #tpu.dot_dimension_numbers<[1], [0], [0], [1], [0, 0, 1, 1], [], []>} : vector<2x64xbf16>, vector<64x8xbf16>, vector<2x8xf32> -> vector<2x8xf32>
    %c0_13 = arith.constant 0 : index
    %c0_14 = arith.constant 0 : index
    %c0_15 = arith.constant 0 : index
    %c0_16 = arith.constant 0 : index
    %11 = vector.load %arg5[%c0_13, %c0_14, %c0_15, %c0_16] : memref<3x8x1x8xf32, #tpu.memory_space<vmem>>, vector<1x1x1x8xf32>
    %12 = vector.shape_cast %11 : vector<1x1x1x8xf32> to vector<1x8xf32>
    %13 = vector.broadcast %12 : vector<1x8xf32> to vector<2x8xf32>
    %14 = arith.addf %10, %13 : vector<2x8xf32>
    %cst_17 = arith.constant dense<0.000000e+00> : vector<2x8xf32>
    %15 = tpu.matmul %2, %7, %cst_17 {dimension_numbers = #tpu.dot_dimension_numbers<[1], [0], [0], [1], [0, 0, 1, 1], [], []>} : vector<2x64xbf16>, vector<64x8xbf16>, vector<2x8xf32> -> vector<2x8xf32>
    %c1_18 = arith.constant 1 : index
    %c0_19 = arith.constant 0 : index
    %c0_20 = arith.constant 0 : index
    %c0_21 = arith.constant 0 : index
    %16 = vector.load %arg5[%c1_18, %c0_19, %c0_20, %c0_21] : memref<3x8x1x8xf32, #tpu.memory_space<vmem>>, vector<1x1x1x8xf32>
    %17 = vector.shape_cast %16 : vector<1x1x1x8xf32> to vector<1x8xf32>
    %18 = vector.broadcast %17 : vector<1x8xf32> to vector<2x8xf32>
    %19 = arith.addf %15, %18 : vector<2x8xf32>
    %cst_22 = arith.constant dense<0.000000e+00> : vector<2x8xf32>
    %20 = tpu.matmul %2, %9, %cst_22 {dimension_numbers = #tpu.dot_dimension_numbers<[1], [0], [0], [1], [0, 0, 1, 1], [], []>} : vector<2x64xbf16>, vector<64x8xbf16>, vector<2x8xf32> -> vector<2x8xf32>
    %c2_23 = arith.constant 2 : index
    %c0_24 = arith.constant 0 : index
    %c0_25 = arith.constant 0 : index
    %c0_26 = arith.constant 0 : index
    %21 = vector.load %arg5[%c2_23, %c0_24, %c0_25, %c0_26] : memref<3x8x1x8xf32, #tpu.memory_space<vmem>>, vector<1x1x1x8xf32>
    %22 = vector.shape_cast %21 : vector<1x1x1x8xf32> to vector<1x8xf32>
    %23 = vector.broadcast %22 : vector<1x8xf32> to vector<2x8xf32>
    %24 = arith.addf %20, %23 : vector<2x8xf32>
    %25 = arith.truncf %14 : vector<2x8xf32> to vector<2x8xbf16>
    %26 = arith.truncf %19 : vector<2x8xf32> to vector<2x8xbf16>
    %cst_27 = arith.constant dense<0.000000e+00> : vector<2x2xf32>
    %27 = tpu.matmul %25, %26, %cst_27 {dimension_numbers = #tpu.dot_dimension_numbers<[1], [1], [0], [0], [0, 0, 1, 0], [], []>} : vector<2x8xbf16>, vector<2x8xbf16>, vector<2x2xf32> -> vector<2x2xf32>
    %cst_28 = arith.constant 0.353553385 : f32
    %28 = vector.broadcast %cst_28 : f32 to vector<2x2xf32>
    %29 = arith.mulf %27, %28 : vector<2x2xf32>
    %cst_29 = arith.constant dense<0xFF800000> : vector<2xf32>
    %30 = vector.multi_reduction <maximumf>, %29, %cst_29 [1] : vector<2x2xf32> to vector<2xf32>
    %31 = vector.shape_cast %30 : vector<2xf32> to vector<2x1xf32>
    %32 = vector.broadcast %31 : vector<2x1xf32> to vector<2x2xf32>
    %33 = arith.subf %29, %32 : vector<2x2xf32>
    %34 = math.exp %33 : vector<2x2xf32>
    %cst_30 = arith.constant dense<0.000000e+00> : vector<2xf32>
    %35 = vector.multi_reduction <add>, %34, %cst_30 [1] : vector<2x2xf32> to vector<2xf32>
    %36 = vector.shape_cast %35 : vector<2xf32> to vector<2x1xf32>
    %37 = tpu.reciprocal %36 {approx = true} : vector<2x1xf32> -> vector<2x1xf32>
    %38 = vector.broadcast %37 : vector<2x1xf32> to vector<2x2xf32>
    %39 = arith.mulf %34, %38 : vector<2x2xf32>
    %40 = arith.truncf %39 : vector<2x2xf32> to vector<2x2xbf16>
    %41 = arith.truncf %24 : vector<2x8xf32> to vector<2x8xbf16>
    %cst_31 = arith.constant dense<0.000000e+00> : vector<2x8xf32>
    %42 = tpu.matmul %40, %41, %cst_31 {dimension_numbers = #tpu.dot_dimension_numbers<[1], [0], [0], [1], [0, 0, 1, 1], [], []>} : vector<2x2xbf16>, vector<2x8xbf16>, vector<2x8xf32> -> vector<2x8xf32>
    %43 = arith.truncf %42 : vector<2x8xf32> to vector<2x8xbf16>
    %c0_32 = arith.constant 0 : index
    %c0_33 = arith.constant 0 : index
    %c0_34 = arith.constant 0 : index
    %44 = vector.load %arg6[%c0_32, %c0_33, %c0_34] : memref<8x8x64xbf16, #tpu.memory_space<vmem>>, vector<1x8x64xbf16>
    %45 = vector.shape_cast %44 : vector<1x8x64xbf16> to vector<8x64xbf16>
    %cst_35 = arith.constant dense<0.000000e+00> : vector<2x64xf32>
    %46 = tpu.matmul %43, %45, %cst_35 {dimension_numbers = #tpu.dot_dimension_numbers<[1], [0], [0], [1], [0, 0, 1, 1], [], []>} : vector<2x8xbf16>, vector<8x64xbf16>, vector<2x64xf32> -> vector<2x64xf32>
    %47 = arith.addf %3, %46 : vector<2x64xf32>
    %c0_36 = arith.constant 0 : index
    %c1_37 = arith.constant 1 : index
    %c0_38 = arith.constant 0 : index
    %c0_39 = arith.constant 0 : index
    %48 = vector.load %arg4[%c0_36, %c1_37, %c0_38, %c0_39] : memref<3x8x64x8xbf16, #tpu.memory_space<vmem>>, vector<1x1x64x8xbf16>
    %49 = vector.shape_cast %48 : vector<1x1x64x8xbf16> to vector<64x8xbf16>
    %c1_40 = arith.constant 1 : index
    %c1_41 = arith.constant 1 : index
    %c0_42 = arith.constant 0 : index
    %c0_43 = arith.constant 0 : index
    %50 = vector.load %arg4[%c1_40, %c1_41, %c0_42, %c0_43] : memref<3x8x64x8xbf16, #tpu.memory_space<vmem>>, vector<1x1x64x8xbf16>
    %51 = vector.shape_cast %50 : vector<1x1x64x8xbf16> to vector<64x8xbf16>
    %c2_44 = arith.constant 2 : index
    %c1_45 = arith.constant 1 : index
    %c0_46 = arith.constant 0 : index
    %c0_47 = arith.constant 0 : index
    %52 = vector.load %arg4[%c2_44, %c1_45, %c0_46, %c0_47] : memref<3x8x64x8xbf16, #tpu.memory_space<vmem>>, vector<1x1x64x8xbf16>
    %53 = vector.shape_cast %52 : vector<1x1x64x8xbf16> to vector<64x8xbf16>
    %cst_48 = arith.constant dense<0.000000e+00> : vector<2x8xf32>
    %54 = tpu.matmul %2, %49, %cst_48 {dimension_numbers = #tpu.dot_dimension_numbers<[1], [0], [0], [1], [0, 0, 1, 1], [], []>} : vector<2x64xbf16>, vector<64x8xbf16>, vector<2x8xf32> -> vector<2x8xf32>
    %c0_49 = arith.constant 0 : index
    %c1_50 = arith.constant 1 : index
    %c0_51 = arith.constant 0 : index
    %c0_52 = arith.constant 0 : index
    %55 = vector.load %arg5[%c0_49, %c1_50, %c0_51, %c0_52] : memref<3x8x1x8xf32, #tpu.memory_space<vmem>>, vector<1x1x1x8xf32>
    %56 = vector.shape_cast %55 : vector<1x1x1x8xf32> to vector<1x8xf32>
    %57 = vector.broadcast %56 : vector<1x8xf32> to vector<2x8xf32>
    %58 = arith.addf %54, %57 : vector<2x8xf32>
    %cst_53 = arith.constant dense<0.000000e+00> : vector<2x8xf32>
    %59 = tpu.matmul %2, %51, %cst_53 {dimension_numbers = #tpu.dot_dimension_numbers<[1], [0], [0], [1], [0, 0, 1, 1], [], []>} : vector<2x64xbf16>, vector<64x8xbf16>, vector<2x8xf32> -> vector<2x8xf32>
    %c1_54 = arith.constant 1 : index
    %c1_55 = arith.constant 1 : index
    %c0_56 = arith.constant 0 : index
    %c0_57 = arith.constant 0 : index
    %60 = vector.load %arg5[%c1_54, %c1_55, %c0_56, %c0_57] : memref<3x8x1x8xf32, #tpu.memory_space<vmem>>, vector<1x1x1x8xf32>
    %61 = vector.shape_cast %60 : vector<1x1x1x8xf32> to vector<1x8xf32>
    %62 = vector.broadcast %61 : vector<1x8xf32> to vector<2x8xf32>
    %63 = arith.addf %59, %62 : vector<2x8xf32>
    %cst_58 = arith.constant dense<0.000000e+00> : vector<2x8xf32>
    %64 = tpu.matmul %2, %53, %cst_58 {dimension_numbers = #tpu.dot_dimension_numbers<[1], [0], [0], [1], [0, 0, 1, 1], [], []>} : vector<2x64xbf16>, vector<64x8xbf16>, vector<2x8xf32> -> vector<2x8xf32>
    %c2_59 = arith.constant 2 : index
    %c1_60 = arith.constant 1 : index
    %c0_61 = arith.constant 0 : index
    %c0_62 = arith.constant 0 : index
    %65 = vector.load %arg5[%c2_59, %c1_60, %c0_61, %c0_62] : memref<3x8x1x8xf32, #tpu.memory_space<vmem>>, vector<1x1x1x8xf32>
    %66 = vector.shape_cast %65 : vector<1x1x1x8xf32> to vector<1x8xf32>
    %67 = vector.broadcast %66 : vector<1x8xf32> to vector<2x8xf32>
    %68 = arith.addf %64, %67 : vector<2x8xf32>
    %69 = arith.truncf %58 : vector<2x8xf32> to vector<2x8xbf16>
    %70 = arith.truncf %63 : vector<2x8xf32> to vector<2x8xbf16>
    %cst_63 = arith.constant dense<0.000000e+00> : vector<2x2xf32>
    %71 = tpu.matmul %69, %70, %cst_63 {dimension_numbers = #tpu.dot_dimension_numbers<[1], [1], [0], [0], [0, 0, 1, 0], [], []>} : vector<2x8xbf16>, vector<2x8xbf16>, vector<2x2xf32> -> vector<2x2xf32>
    %cst_64 = arith.constant 0.353553385 : f32
    %72 = vector.broadcast %cst_64 : f32 to vector<2x2xf32>
    %73 = arith.mulf %71, %72 : vector<2x2xf32>
    %cst_65 = arith.constant dense<0xFF800000> : vector<2xf32>
    %74 = vector.multi_reduction <maximumf>, %73, %cst_65 [1] : vector<2x2xf32> to vector<2xf32>
    %75 = vector.shape_cast %74 : vector<2xf32> to vector<2x1xf32>
    %76 = vector.broadcast %75 : vector<2x1xf32> to vector<2x2xf32>
    %77 = arith.subf %73, %76 : vector<2x2xf32>
    %78 = math.exp %77 : vector<2x2xf32>
    %cst_66 = arith.constant dense<0.000000e+00> : vector<2xf32>
    %79 = vector.multi_reduction <add>, %78, %cst_66 [1] : vector<2x2xf32> to vector<2xf32>
    %80 = vector.shape_cast %79 : vector<2xf32> to vector<2x1xf32>
    %81 = tpu.reciprocal %80 {approx = true} : vector<2x1xf32> -> vector<2x1xf32>
    %82 = vector.broadcast %81 : vector<2x1xf32> to vector<2x2xf32>
    %83 = arith.mulf %78, %82 : vector<2x2xf32>
    %84 = arith.truncf %83 : vector<2x2xf32> to vector<2x2xbf16>
    %85 = arith.truncf %68 : vector<2x8xf32> to vector<2x8xbf16>
    %cst_67 = arith.constant dense<0.000000e+00> : vector<2x8xf32>
    %86 = tpu.matmul %84, %85, %cst_67 {dimension_numbers = #tpu.dot_dimension_numbers<[1], [0], [0], [1], [0, 0, 1, 1], [], []>} : vector<2x2xbf16>, vector<2x8xbf16>, vector<2x8xf32> -> vector<2x8xf32>
    %87 = arith.truncf %86 : vector<2x8xf32> to vector<2x8xbf16>
    %c1_68 = arith.constant 1 : index
    %c0_69 = arith.constant 0 : index
    %c0_70 = arith.constant 0 : index
    %88 = vector.load %arg6[%c1_68, %c0_69, %c0_70] : memref<8x8x64xbf16, #tpu.memory_space<vmem>>, vector<1x8x64xbf16>
    %89 = vector.shape_cast %88 : vector<1x8x64xbf16> to vector<8x64xbf16>
    %cst_71 = arith.constant dense<0.000000e+00> : vector<2x64xf32>
    %90 = tpu.matmul %87, %89, %cst_71 {dimension_numbers = #tpu.dot_dimension_numbers<[1], [0], [0], [1], [0, 0, 1, 1], [], []>} : vector<2x8xbf16>, vector<8x64xbf16>, vector<2x64xf32> -> vector<2x64xf32>
    %91 = arith.addf %47, %90 : vector<2x64xf32>
    %c0_72 = arith.constant 0 : index
    %c2_73 = arith.constant 2 : index
    %c0_74 = arith.constant 0 : index
    %c0_75 = arith.constant 0 : index
    %92 = vector.load %arg4[%c0_72, %c2_73, %c0_74, %c0_75] : memref<3x8x64x8xbf16, #tpu.memory_space<vmem>>, vector<1x1x64x8xbf16>
    %93 = vector.shape_cast %92 : vector<1x1x64x8xbf16> to vector<64x8xbf16>
    %c1_76 = arith.constant 1 : index
    %c2_77 = arith.constant 2 : index
    %c0_78 = arith.constant 0 : index
    %c0_79 = arith.constant 0 : index
    %94 = vector.load %arg4[%c1_76, %c2_77, %c0_78, %c0_79] : memref<3x8x64x8xbf16, #tpu.memory_space<vmem>>, vector<1x1x64x8xbf16>
    %95 = vector.shape_cast %94 : vector<1x1x64x8xbf16> to vector<64x8xbf16>
    %c2_80 = arith.constant 2 : index
    %c2_81 = arith.constant 2 : index
    %c0_82 = arith.constant 0 : index
    %c0_83 = arith.constant 0 : index
    %96 = vector.load %arg4[%c2_80, %c2_81, %c0_82, %c0_83] : memref<3x8x64x8xbf16, #tpu.memory_space<vmem>>, vector<1x1x64x8xbf16>
    %97 = vector.shape_cast %96 : vector<1x1x64x8xbf16> to vector<64x8xbf16>
    %cst_84 = arith.constant dense<0.000000e+00> : vector<2x8xf32>
    %98 = tpu.matmul %2, %93, %cst_84 {dimension_numbers = #tpu.dot_dimension_numbers<[1], [0], [0], [1], [0, 0, 1, 1], [], []>} : vector<2x64xbf16>, vector<64x8xbf16>, vector<2x8xf32> -> vector<2x8xf32>
    %c0_85 = arith.constant 0 : index
    %c2_86 = arith.constant 2 : index
    %c0_87 = arith.constant 0 : index
    %c0_88 = arith.constant 0 : index
    %99 = vector.load %arg5[%c0_85, %c2_86, %c0_87, %c0_88] : memref<3x8x1x8xf32, #tpu.memory_space<vmem>>, vector<1x1x1x8xf32>
    %100 = vector.shape_cast %99 : vector<1x1x1x8xf32> to vector<1x8xf32>
    %101 = vector.broadcast %100 : vector<1x8xf32> to vector<2x8xf32>
    %102 = arith.addf %98, %101 : vector<2x8xf32>
    %cst_89 = arith.constant dense<0.000000e+00> : vector<2x8xf32>
    %103 = tpu.matmul %2, %95, %cst_89 {dimension_numbers = #tpu.dot_dimension_numbers<[1], [0], [0], [1], [0, 0, 1, 1], [], []>} : vector<2x64xbf16>, vector<64x8xbf16>, vector<2x8xf32> -> vector<2x8xf32>
    %c1_90 = arith.constant 1 : index
    %c2_91 = arith.constant 2 : index
    %c0_92 = arith.constant 0 : index
    %c0_93 = arith.constant 0 : index
    %104 = vector.load %arg5[%c1_90, %c2_91, %c0_92, %c0_93] : memref<3x8x1x8xf32, #tpu.memory_space<vmem>>, vector<1x1x1x8xf32>
    %105 = vector.shape_cast %104 : vector<1x1x1x8xf32> to vector<1x8xf32>
    %106 = vector.broadcast %105 : vector<1x8xf32> to vector<2x8xf32>
    %107 = arith.addf %103, %106 : vector<2x8xf32>
    %cst_94 = arith.constant dense<0.000000e+00> : vector<2x8xf32>
    %108 = tpu.matmul %2, %97, %cst_94 {dimension_numbers = #tpu.dot_dimension_numbers<[1], [0], [0], [1], [0, 0, 1, 1], [], []>} : vector<2x64xbf16>, vector<64x8xbf16>, vector<2x8xf32> -> vector<2x8xf32>
    %c2_95 = arith.constant 2 : index
    %c2_96 = arith.constant 2 : index
    %c0_97 = arith.constant 0 : index
    %c0_98 = arith.constant 0 : index
    %109 = vector.load %arg5[%c2_95, %c2_96, %c0_97, %c0_98] : memref<3x8x1x8xf32, #tpu.memory_space<vmem>>, vector<1x1x1x8xf32>
    %110 = vector.shape_cast %109 : vector<1x1x1x8xf32> to vector<1x8xf32>
    %111 = vector.broadcast %110 : vector<1x8xf32> to vector<2x8xf32>
    %112 = arith.addf %108, %111 : vector<2x8xf32>
    %113 = arith.truncf %102 : vector<2x8xf32> to vector<2x8xbf16>
    %114 = arith.truncf %107 : vector<2x8xf32> to vector<2x8xbf16>
    %cst_99 = arith.constant dense<0.000000e+00> : vector<2x2xf32>
    %115 = tpu.matmul %113, %114, %cst_99 {dimension_numbers = #tpu.dot_dimension_numbers<[1], [1], [0], [0], [0, 0, 1, 0], [], []>} : vector<2x8xbf16>, vector<2x8xbf16>, vector<2x2xf32> -> vector<2x2xf32>
    %cst_100 = arith.constant 0.353553385 : f32
    %116 = vector.broadcast %cst_100 : f32 to vector<2x2xf32>
    %117 = arith.mulf %115, %116 : vector<2x2xf32>
    %cst_101 = arith.constant dense<0xFF800000> : vector<2xf32>
    %118 = vector.multi_reduction <maximumf>, %117, %cst_101 [1] : vector<2x2xf32> to vector<2xf32>
    %119 = vector.shape_cast %118 : vector<2xf32> to vector<2x1xf32>
    %120 = vector.broadcast %119 : vector<2x1xf32> to vector<2x2xf32>
    %121 = arith.subf %117, %120 : vector<2x2xf32>
    %122 = math.exp %121 : vector<2x2xf32>
    %cst_102 = arith.constant dense<0.000000e+00> : vector<2xf32>
    %123 = vector.multi_reduction <add>, %122, %cst_102 [1] : vector<2x2xf32> to vector<2xf32>
    %124 = vector.shape_cast %123 : vector<2xf32> to vector<2x1xf32>
    %125 = tpu.reciprocal %124 {approx = true} : vector<2x1xf32> -> vector<2x1xf32>
    %126 = vector.broadcast %125 : vector<2x1xf32> to vector<2x2xf32>
    %127 = arith.mulf %122, %126 : vector<2x2xf32>
    %128 = arith.truncf %127 : vector<2x2xf32> to vector<2x2xbf16>
    %129 = arith.truncf %112 : vector<2x8xf32> to vector<2x8xbf16>
    %cst_103 = arith.constant dense<0.000000e+00> : vector<2x8xf32>
    %130 = tpu.matmul %128, %129, %cst_103 {dimension_numbers = #tpu.dot_dimension_numbers<[1], [0], [0], [1], [0, 0, 1, 1], [], []>} : vector<2x2xbf16>, vector<2x8xbf16>, vector<2x8xf32> -> vector<2x8xf32>
    %131 = arith.truncf %130 : vector<2x8xf32> to vector<2x8xbf16>
    %c2_104 = arith.constant 2 : index
    %c0_105 = arith.constant 0 : index
    %c0_106 = arith.constant 0 : index
    %132 = vector.load %arg6[%c2_104, %c0_105, %c0_106] : memref<8x8x64xbf16, #tpu.memory_space<vmem>>, vector<1x8x64xbf16>
    %133 = vector.shape_cast %132 : vector<1x8x64xbf16> to vector<8x64xbf16>
    %cst_107 = arith.constant dense<0.000000e+00> : vector<2x64xf32>
    %134 = tpu.matmul %131, %133, %cst_107 {dimension_numbers = #tpu.dot_dimension_numbers<[1], [0], [0], [1], [0, 0, 1, 1], [], []>} : vector<2x8xbf16>, vector<8x64xbf16>, vector<2x64xf32> -> vector<2x64xf32>
    %135 = arith.addf %91, %134 : vector<2x64xf32>
    %c0_108 = arith.constant 0 : index
    %c3 = arith.constant 3 : index
    %c0_109 = arith.constant 0 : index
    %c0_110 = arith.constant 0 : index
    %136 = vector.load %arg4[%c0_108, %c3, %c0_109, %c0_110] : memref<3x8x64x8xbf16, #tpu.memory_space<vmem>>, vector<1x1x64x8xbf16>
    %137 = vector.shape_cast %136 : vector<1x1x64x8xbf16> to vector<64x8xbf16>
    %c1_111 = arith.constant 1 : index
    %c3_112 = arith.constant 3 : index
    %c0_113 = arith.constant 0 : index
    %c0_114 = arith.constant 0 : index
    %138 = vector.load %arg4[%c1_111, %c3_112, %c0_113, %c0_114] : memref<3x8x64x8xbf16, #tpu.memory_space<vmem>>, vector<1x1x64x8xbf16>
    %139 = vector.shape_cast %138 : vector<1x1x64x8xbf16> to vector<64x8xbf16>
    %c2_115 = arith.constant 2 : index
    %c3_116 = arith.constant 3 : index
    %c0_117 = arith.constant 0 : index
    %c0_118 = arith.constant 0 : index
    %140 = vector.load %arg4[%c2_115, %c3_116, %c0_117, %c0_118] : memref<3x8x64x8xbf16, #tpu.memory_space<vmem>>, vector<1x1x64x8xbf16>
    %141 = vector.shape_cast %140 : vector<1x1x64x8xbf16> to vector<64x8xbf16>
    %cst_119 = arith.constant dense<0.000000e+00> : vector<2x8xf32>
    %142 = tpu.matmul %2, %137, %cst_119 {dimension_numbers = #tpu.dot_dimension_numbers<[1], [0], [0], [1], [0, 0, 1, 1], [], []>} : vector<2x64xbf16>, vector<64x8xbf16>, vector<2x8xf32> -> vector<2x8xf32>
    %c0_120 = arith.constant 0 : index
    %c3_121 = arith.constant 3 : index
    %c0_122 = arith.constant 0 : index
    %c0_123 = arith.constant 0 : index
    %143 = vector.load %arg5[%c0_120, %c3_121, %c0_122, %c0_123] : memref<3x8x1x8xf32, #tpu.memory_space<vmem>>, vector<1x1x1x8xf32>
    %144 = vector.shape_cast %143 : vector<1x1x1x8xf32> to vector<1x8xf32>
    %145 = vector.broadcast %144 : vector<1x8xf32> to vector<2x8xf32>
    %146 = arith.addf %142, %145 : vector<2x8xf32>
    %cst_124 = arith.constant dense<0.000000e+00> : vector<2x8xf32>
    %147 = tpu.matmul %2, %139, %cst_124 {dimension_numbers = #tpu.dot_dimension_numbers<[1], [0], [0], [1], [0, 0, 1, 1], [], []>} : vector<2x64xbf16>, vector<64x8xbf16>, vector<2x8xf32> -> vector<2x8xf32>
    %c1_125 = arith.constant 1 : index
    %c3_126 = arith.constant 3 : index
    %c0_127 = arith.constant 0 : index
    %c0_128 = arith.constant 0 : index
    %148 = vector.load %arg5[%c1_125, %c3_126, %c0_127, %c0_128] : memref<3x8x1x8xf32, #tpu.memory_space<vmem>>, vector<1x1x1x8xf32>
    %149 = vector.shape_cast %148 : vector<1x1x1x8xf32> to vector<1x8xf32>
    %150 = vector.broadcast %149 : vector<1x8xf32> to vector<2x8xf32>
    %151 = arith.addf %147, %150 : vector<2x8xf32>
    %cst_129 = arith.constant dense<0.000000e+00> : vector<2x8xf32>
    %152 = tpu.matmul %2, %141, %cst_129 {dimension_numbers = #tpu.dot_dimension_numbers<[1], [0], [0], [1], [0, 0, 1, 1], [], []>} : vector<2x64xbf16>, vector<64x8xbf16>, vector<2x8xf32> -> vector<2x8xf32>
    %c2_130 = arith.constant 2 : index
    %c3_131 = arith.constant 3 : index
    %c0_132 = arith.constant 0 : index
    %c0_133 = arith.constant 0 : index
    %153 = vector.load %arg5[%c2_130, %c3_131, %c0_132, %c0_133] : memref<3x8x1x8xf32, #tpu.memory_space<vmem>>, vector<1x1x1x8xf32>
    %154 = vector.shape_cast %153 : vector<1x1x1x8xf32> to vector<1x8xf32>
    %155 = vector.broadcast %154 : vector<1x8xf32> to vector<2x8xf32>
    %156 = arith.addf %152, %155 : vector<2x8xf32>
    %157 = arith.truncf %146 : vector<2x8xf32> to vector<2x8xbf16>
    %158 = arith.truncf %151 : vector<2x8xf32> to vector<2x8xbf16>
    %cst_134 = arith.constant dense<0.000000e+00> : vector<2x2xf32>
    %159 = tpu.matmul %157, %158, %cst_134 {dimension_numbers = #tpu.dot_dimension_numbers<[1], [1], [0], [0], [0, 0, 1, 0], [], []>} : vector<2x8xbf16>, vector<2x8xbf16>, vector<2x2xf32> -> vector<2x2xf32>
    %cst_135 = arith.constant 0.353553385 : f32
    %160 = vector.broadcast %cst_135 : f32 to vector<2x2xf32>
    %161 = arith.mulf %159, %160 : vector<2x2xf32>
    %cst_136 = arith.constant dense<0xFF800000> : vector<2xf32>
    %162 = vector.multi_reduction <maximumf>, %161, %cst_136 [1] : vector<2x2xf32> to vector<2xf32>
    %163 = vector.shape_cast %162 : vector<2xf32> to vector<2x1xf32>
    %164 = vector.broadcast %163 : vector<2x1xf32> to vector<2x2xf32>
    %165 = arith.subf %161, %164 : vector<2x2xf32>
    %166 = math.exp %165 : vector<2x2xf32>
    %cst_137 = arith.constant dense<0.000000e+00> : vector<2xf32>
    %167 = vector.multi_reduction <add>, %166, %cst_137 [1] : vector<2x2xf32> to vector<2xf32>
    %168 = vector.shape_cast %167 : vector<2xf32> to vector<2x1xf32>
    %169 = tpu.reciprocal %168 {approx = true} : vector<2x1xf32> -> vector<2x1xf32>
    %170 = vector.broadcast %169 : vector<2x1xf32> to vector<2x2xf32>
    %171 = arith.mulf %166, %170 : vector<2x2xf32>
    %172 = arith.truncf %171 : vector<2x2xf32> to vector<2x2xbf16>
    %173 = arith.truncf %156 : vector<2x8xf32> to vector<2x8xbf16>
    %cst_138 = arith.constant dense<0.000000e+00> : vector<2x8xf32>
    %174 = tpu.matmul %172, %173, %cst_138 {dimension_numbers = #tpu.dot_dimension_numbers<[1], [0], [0], [1], [0, 0, 1, 1], [], []>} : vector<2x2xbf16>, vector<2x8xbf16>, vector<2x8xf32> -> vector<2x8xf32>
    %175 = arith.truncf %174 : vector<2x8xf32> to vector<2x8xbf16>
    %c3_139 = arith.constant 3 : index
    %c0_140 = arith.constant 0 : index
    %c0_141 = arith.constant 0 : index
    %176 = vector.load %arg6[%c3_139, %c0_140, %c0_141] : memref<8x8x64xbf16, #tpu.memory_space<vmem>>, vector<1x8x64xbf16>
    %177 = vector.shape_cast %176 : vector<1x8x64xbf16> to vector<8x64xbf16>
    %cst_142 = arith.constant dense<0.000000e+00> : vector<2x64xf32>
    %178 = tpu.matmul %175, %177, %cst_142 {dimension_numbers = #tpu.dot_dimension_numbers<[1], [0], [0], [1], [0, 0, 1, 1], [], []>} : vector<2x8xbf16>, vector<8x64xbf16>, vector<2x64xf32> -> vector<2x64xf32>
    %179 = arith.addf %135, %178 : vector<2x64xf32>
    %c0_143 = arith.constant 0 : index
    %c4 = arith.constant 4 : index
    %c0_144 = arith.constant 0 : index
    %c0_145 = arith.constant 0 : index
    %180 = vector.load %arg4[%c0_143, %c4, %c0_144, %c0_145] : memref<3x8x64x8xbf16, #tpu.memory_space<vmem>>, vector<1x1x64x8xbf16>
    %181 = vector.shape_cast %180 : vector<1x1x64x8xbf16> to vector<64x8xbf16>
    %c1_146 = arith.constant 1 : index
    %c4_147 = arith.constant 4 : index
    %c0_148 = arith.constant 0 : index
    %c0_149 = arith.constant 0 : index
    %182 = vector.load %arg4[%c1_146, %c4_147, %c0_148, %c0_149] : memref<3x8x64x8xbf16, #tpu.memory_space<vmem>>, vector<1x1x64x8xbf16>
    %183 = vector.shape_cast %182 : vector<1x1x64x8xbf16> to vector<64x8xbf16>
    %c2_150 = arith.constant 2 : index
    %c4_151 = arith.constant 4 : index
    %c0_152 = arith.constant 0 : index
    %c0_153 = arith.constant 0 : index
    %184 = vector.load %arg4[%c2_150, %c4_151, %c0_152, %c0_153] : memref<3x8x64x8xbf16, #tpu.memory_space<vmem>>, vector<1x1x64x8xbf16>
    %185 = vector.shape_cast %184 : vector<1x1x64x8xbf16> to vector<64x8xbf16>
    %cst_154 = arith.constant dense<0.000000e+00> : vector<2x8xf32>
    %186 = tpu.matmul %2, %181, %cst_154 {dimension_numbers = #tpu.dot_dimension_numbers<[1], [0], [0], [1], [0, 0, 1, 1], [], []>} : vector<2x64xbf16>, vector<64x8xbf16>, vector<2x8xf32> -> vector<2x8xf32>
    %c0_155 = arith.constant 0 : index
    %c4_156 = arith.constant 4 : index
    %c0_157 = arith.constant 0 : index
    %c0_158 = arith.constant 0 : index
    %187 = vector.load %arg5[%c0_155, %c4_156, %c0_157, %c0_158] : memref<3x8x1x8xf32, #tpu.memory_space<vmem>>, vector<1x1x1x8xf32>
    %188 = vector.shape_cast %187 : vector<1x1x1x8xf32> to vector<1x8xf32>
    %189 = vector.broadcast %188 : vector<1x8xf32> to vector<2x8xf32>
    %190 = arith.addf %186, %189 : vector<2x8xf32>
    %cst_159 = arith.constant dense<0.000000e+00> : vector<2x8xf32>
    %191 = tpu.matmul %2, %183, %cst_159 {dimension_numbers = #tpu.dot_dimension_numbers<[1], [0], [0], [1], [0, 0, 1, 1], [], []>} : vector<2x64xbf16>, vector<64x8xbf16>, vector<2x8xf32> -> vector<2x8xf32>
    %c1_160 = arith.constant 1 : index
    %c4_161 = arith.constant 4 : index
    %c0_162 = arith.constant 0 : index
    %c0_163 = arith.constant 0 : index
    %192 = vector.load %arg5[%c1_160, %c4_161, %c0_162, %c0_163] : memref<3x8x1x8xf32, #tpu.memory_space<vmem>>, vector<1x1x1x8xf32>
    %193 = vector.shape_cast %192 : vector<1x1x1x8xf32> to vector<1x8xf32>
    %194 = vector.broadcast %193 : vector<1x8xf32> to vector<2x8xf32>
    %195 = arith.addf %191, %194 : vector<2x8xf32>
    %cst_164 = arith.constant dense<0.000000e+00> : vector<2x8xf32>
    %196 = tpu.matmul %2, %185, %cst_164 {dimension_numbers = #tpu.dot_dimension_numbers<[1], [0], [0], [1], [0, 0, 1, 1], [], []>} : vector<2x64xbf16>, vector<64x8xbf16>, vector<2x8xf32> -> vector<2x8xf32>
    %c2_165 = arith.constant 2 : index
    %c4_166 = arith.constant 4 : index
    %c0_167 = arith.constant 0 : index
    %c0_168 = arith.constant 0 : index
    %197 = vector.load %arg5[%c2_165, %c4_166, %c0_167, %c0_168] : memref<3x8x1x8xf32, #tpu.memory_space<vmem>>, vector<1x1x1x8xf32>
    %198 = vector.shape_cast %197 : vector<1x1x1x8xf32> to vector<1x8xf32>
    %199 = vector.broadcast %198 : vector<1x8xf32> to vector<2x8xf32>
    %200 = arith.addf %196, %199 : vector<2x8xf32>
    %201 = arith.truncf %190 : vector<2x8xf32> to vector<2x8xbf16>
    %202 = arith.truncf %195 : vector<2x8xf32> to vector<2x8xbf16>
    %cst_169 = arith.constant dense<0.000000e+00> : vector<2x2xf32>
    %203 = tpu.matmul %201, %202, %cst_169 {dimension_numbers = #tpu.dot_dimension_numbers<[1], [1], [0], [0], [0, 0, 1, 0], [], []>} : vector<2x8xbf16>, vector<2x8xbf16>, vector<2x2xf32> -> vector<2x2xf32>
    %cst_170 = arith.constant 0.353553385 : f32
    %204 = vector.broadcast %cst_170 : f32 to vector<2x2xf32>
    %205 = arith.mulf %203, %204 : vector<2x2xf32>
    %cst_171 = arith.constant dense<0xFF800000> : vector<2xf32>
    %206 = vector.multi_reduction <maximumf>, %205, %cst_171 [1] : vector<2x2xf32> to vector<2xf32>
    %207 = vector.shape_cast %206 : vector<2xf32> to vector<2x1xf32>
    %208 = vector.broadcast %207 : vector<2x1xf32> to vector<2x2xf32>
    %209 = arith.subf %205, %208 : vector<2x2xf32>
    %210 = math.exp %209 : vector<2x2xf32>
    %cst_172 = arith.constant dense<0.000000e+00> : vector<2xf32>
    %211 = vector.multi_reduction <add>, %210, %cst_172 [1] : vector<2x2xf32> to vector<2xf32>
    %212 = vector.shape_cast %211 : vector<2xf32> to vector<2x1xf32>
    %213 = tpu.reciprocal %212 {approx = true} : vector<2x1xf32> -> vector<2x1xf32>
    %214 = vector.broadcast %213 : vector<2x1xf32> to vector<2x2xf32>
    %215 = arith.mulf %210, %214 : vector<2x2xf32>
    %216 = arith.truncf %215 : vector<2x2xf32> to vector<2x2xbf16>
    %217 = arith.truncf %200 : vector<2x8xf32> to vector<2x8xbf16>
    %cst_173 = arith.constant dense<0.000000e+00> : vector<2x8xf32>
    %218 = tpu.matmul %216, %217, %cst_173 {dimension_numbers = #tpu.dot_dimension_numbers<[1], [0], [0], [1], [0, 0, 1, 1], [], []>} : vector<2x2xbf16>, vector<2x8xbf16>, vector<2x8xf32> -> vector<2x8xf32>
    %219 = arith.truncf %218 : vector<2x8xf32> to vector<2x8xbf16>
    %c4_174 = arith.constant 4 : index
    %c0_175 = arith.constant 0 : index
    %c0_176 = arith.constant 0 : index
    %220 = vector.load %arg6[%c4_174, %c0_175, %c0_176] : memref<8x8x64xbf16, #tpu.memory_space<vmem>>, vector<1x8x64xbf16>
    %221 = vector.shape_cast %220 : vector<1x8x64xbf16> to vector<8x64xbf16>
    %cst_177 = arith.constant dense<0.000000e+00> : vector<2x64xf32>
    %222 = tpu.matmul %219, %221, %cst_177 {dimension_numbers = #tpu.dot_dimension_numbers<[1], [0], [0], [1], [0, 0, 1, 1], [], []>} : vector<2x8xbf16>, vector<8x64xbf16>, vector<2x64xf32> -> vector<2x64xf32>
    %223 = arith.addf %179, %222 : vector<2x64xf32>
    %c0_178 = arith.constant 0 : index
    %c5 = arith.constant 5 : index
    %c0_179 = arith.constant 0 : index
    %c0_180 = arith.constant 0 : index
    %224 = vector.load %arg4[%c0_178, %c5, %c0_179, %c0_180] : memref<3x8x64x8xbf16, #tpu.memory_space<vmem>>, vector<1x1x64x8xbf16>
    %225 = vector.shape_cast %224 : vector<1x1x64x8xbf16> to vector<64x8xbf16>
    %c1_181 = arith.constant 1 : index
    %c5_182 = arith.constant 5 : index
    %c0_183 = arith.constant 0 : index
    %c0_184 = arith.constant 0 : index
    %226 = vector.load %arg4[%c1_181, %c5_182, %c0_183, %c0_184] : memref<3x8x64x8xbf16, #tpu.memory_space<vmem>>, vector<1x1x64x8xbf16>
    %227 = vector.shape_cast %226 : vector<1x1x64x8xbf16> to vector<64x8xbf16>
    %c2_185 = arith.constant 2 : index
    %c5_186 = arith.constant 5 : index
    %c0_187 = arith.constant 0 : index
    %c0_188 = arith.constant 0 : index
    %228 = vector.load %arg4[%c2_185, %c5_186, %c0_187, %c0_188] : memref<3x8x64x8xbf16, #tpu.memory_space<vmem>>, vector<1x1x64x8xbf16>
    %229 = vector.shape_cast %228 : vector<1x1x64x8xbf16> to vector<64x8xbf16>
    %cst_189 = arith.constant dense<0.000000e+00> : vector<2x8xf32>
    %230 = tpu.matmul %2, %225, %cst_189 {dimension_numbers = #tpu.dot_dimension_numbers<[1], [0], [0], [1], [0, 0, 1, 1], [], []>} : vector<2x64xbf16>, vector<64x8xbf16>, vector<2x8xf32> -> vector<2x8xf32>
    %c0_190 = arith.constant 0 : index
    %c5_191 = arith.constant 5 : index
    %c0_192 = arith.constant 0 : index
    %c0_193 = arith.constant 0 : index
    %231 = vector.load %arg5[%c0_190, %c5_191, %c0_192, %c0_193] : memref<3x8x1x8xf32, #tpu.memory_space<vmem>>, vector<1x1x1x8xf32>
    %232 = vector.shape_cast %231 : vector<1x1x1x8xf32> to vector<1x8xf32>
    %233 = vector.broadcast %232 : vector<1x8xf32> to vector<2x8xf32>
    %234 = arith.addf %230, %233 : vector<2x8xf32>
    %cst_194 = arith.constant dense<0.000000e+00> : vector<2x8xf32>
    %235 = tpu.matmul %2, %227, %cst_194 {dimension_numbers = #tpu.dot_dimension_numbers<[1], [0], [0], [1], [0, 0, 1, 1], [], []>} : vector<2x64xbf16>, vector<64x8xbf16>, vector<2x8xf32> -> vector<2x8xf32>
    %c1_195 = arith.constant 1 : index
    %c5_196 = arith.constant 5 : index
    %c0_197 = arith.constant 0 : index
    %c0_198 = arith.constant 0 : index
    %236 = vector.load %arg5[%c1_195, %c5_196, %c0_197, %c0_198] : memref<3x8x1x8xf32, #tpu.memory_space<vmem>>, vector<1x1x1x8xf32>
    %237 = vector.shape_cast %236 : vector<1x1x1x8xf32> to vector<1x8xf32>
    %238 = vector.broadcast %237 : vector<1x8xf32> to vector<2x8xf32>
    %239 = arith.addf %235, %238 : vector<2x8xf32>
    %cst_199 = arith.constant dense<0.000000e+00> : vector<2x8xf32>
    %240 = tpu.matmul %2, %229, %cst_199 {dimension_numbers = #tpu.dot_dimension_numbers<[1], [0], [0], [1], [0, 0, 1, 1], [], []>} : vector<2x64xbf16>, vector<64x8xbf16>, vector<2x8xf32> -> vector<2x8xf32>
    %c2_200 = arith.constant 2 : index
    %c5_201 = arith.constant 5 : index
    %c0_202 = arith.constant 0 : index
    %c0_203 = arith.constant 0 : index
    %241 = vector.load %arg5[%c2_200, %c5_201, %c0_202, %c0_203] : memref<3x8x1x8xf32, #tpu.memory_space<vmem>>, vector<1x1x1x8xf32>
    %242 = vector.shape_cast %241 : vector<1x1x1x8xf32> to vector<1x8xf32>
    %243 = vector.broadcast %242 : vector<1x8xf32> to vector<2x8xf32>
    %244 = arith.addf %240, %243 : vector<2x8xf32>
    %245 = arith.truncf %234 : vector<2x8xf32> to vector<2x8xbf16>
    %246 = arith.truncf %239 : vector<2x8xf32> to vector<2x8xbf16>
    %cst_204 = arith.constant dense<0.000000e+00> : vector<2x2xf32>
    %247 = tpu.matmul %245, %246, %cst_204 {dimension_numbers = #tpu.dot_dimension_numbers<[1], [1], [0], [0], [0, 0, 1, 0], [], []>} : vector<2x8xbf16>, vector<2x8xbf16>, vector<2x2xf32> -> vector<2x2xf32>
    %cst_205 = arith.constant 0.353553385 : f32
    %248 = vector.broadcast %cst_205 : f32 to vector<2x2xf32>
    %249 = arith.mulf %247, %248 : vector<2x2xf32>
    %cst_206 = arith.constant dense<0xFF800000> : vector<2xf32>
    %250 = vector.multi_reduction <maximumf>, %249, %cst_206 [1] : vector<2x2xf32> to vector<2xf32>
    %251 = vector.shape_cast %250 : vector<2xf32> to vector<2x1xf32>
    %252 = vector.broadcast %251 : vector<2x1xf32> to vector<2x2xf32>
    %253 = arith.subf %249, %252 : vector<2x2xf32>
    %254 = math.exp %253 : vector<2x2xf32>
    %cst_207 = arith.constant dense<0.000000e+00> : vector<2xf32>
    %255 = vector.multi_reduction <add>, %254, %cst_207 [1] : vector<2x2xf32> to vector<2xf32>
    %256 = vector.shape_cast %255 : vector<2xf32> to vector<2x1xf32>
    %257 = tpu.reciprocal %256 {approx = true} : vector<2x1xf32> -> vector<2x1xf32>
    %258 = vector.broadcast %257 : vector<2x1xf32> to vector<2x2xf32>
    %259 = arith.mulf %254, %258 : vector<2x2xf32>
    %260 = arith.truncf %259 : vector<2x2xf32> to vector<2x2xbf16>
    %261 = arith.truncf %244 : vector<2x8xf32> to vector<2x8xbf16>
    %cst_208 = arith.constant dense<0.000000e+00> : vector<2x8xf32>
    %262 = tpu.matmul %260, %261, %cst_208 {dimension_numbers = #tpu.dot_dimension_numbers<[1], [0], [0], [1], [0, 0, 1, 1], [], []>} : vector<2x2xbf16>, vector<2x8xbf16>, vector<2x8xf32> -> vector<2x8xf32>
    %263 = arith.truncf %262 : vector<2x8xf32> to vector<2x8xbf16>
    %c5_209 = arith.constant 5 : index
    %c0_210 = arith.constant 0 : index
    %c0_211 = arith.constant 0 : index
    %264 = vector.load %arg6[%c5_209, %c0_210, %c0_211] : memref<8x8x64xbf16, #tpu.memory_space<vmem>>, vector<1x8x64xbf16>
    %265 = vector.shape_cast %264 : vector<1x8x64xbf16> to vector<8x64xbf16>
    %cst_212 = arith.constant dense<0.000000e+00> : vector<2x64xf32>
    %266 = tpu.matmul %263, %265, %cst_212 {dimension_numbers = #tpu.dot_dimension_numbers<[1], [0], [0], [1], [0, 0, 1, 1], [], []>} : vector<2x8xbf16>, vector<8x64xbf16>, vector<2x64xf32> -> vector<2x64xf32>
    %267 = arith.addf %223, %266 : vector<2x64xf32>
    %c0_213 = arith.constant 0 : index
    %c6 = arith.constant 6 : index
    %c0_214 = arith.constant 0 : index
    %c0_215 = arith.constant 0 : index
    %268 = vector.load %arg4[%c0_213, %c6, %c0_214, %c0_215] : memref<3x8x64x8xbf16, #tpu.memory_space<vmem>>, vector<1x1x64x8xbf16>
    %269 = vector.shape_cast %268 : vector<1x1x64x8xbf16> to vector<64x8xbf16>
    %c1_216 = arith.constant 1 : index
    %c6_217 = arith.constant 6 : index
    %c0_218 = arith.constant 0 : index
    %c0_219 = arith.constant 0 : index
    %270 = vector.load %arg4[%c1_216, %c6_217, %c0_218, %c0_219] : memref<3x8x64x8xbf16, #tpu.memory_space<vmem>>, vector<1x1x64x8xbf16>
    %271 = vector.shape_cast %270 : vector<1x1x64x8xbf16> to vector<64x8xbf16>
    %c2_220 = arith.constant 2 : index
    %c6_221 = arith.constant 6 : index
    %c0_222 = arith.constant 0 : index
    %c0_223 = arith.constant 0 : index
    %272 = vector.load %arg4[%c2_220, %c6_221, %c0_222, %c0_223] : memref<3x8x64x8xbf16, #tpu.memory_space<vmem>>, vector<1x1x64x8xbf16>
    %273 = vector.shape_cast %272 : vector<1x1x64x8xbf16> to vector<64x8xbf16>
    %cst_224 = arith.constant dense<0.000000e+00> : vector<2x8xf32>
    %274 = tpu.matmul %2, %269, %cst_224 {dimension_numbers = #tpu.dot_dimension_numbers<[1], [0], [0], [1], [0, 0, 1, 1], [], []>} : vector<2x64xbf16>, vector<64x8xbf16>, vector<2x8xf32> -> vector<2x8xf32>
    %c0_225 = arith.constant 0 : index
    %c6_226 = arith.constant 6 : index
    %c0_227 = arith.constant 0 : index
    %c0_228 = arith.constant 0 : index
    %275 = vector.load %arg5[%c0_225, %c6_226, %c0_227, %c0_228] : memref<3x8x1x8xf32, #tpu.memory_space<vmem>>, vector<1x1x1x8xf32>
    %276 = vector.shape_cast %275 : vector<1x1x1x8xf32> to vector<1x8xf32>
    %277 = vector.broadcast %276 : vector<1x8xf32> to vector<2x8xf32>
    %278 = arith.addf %274, %277 : vector<2x8xf32>
    %cst_229 = arith.constant dense<0.000000e+00> : vector<2x8xf32>
    %279 = tpu.matmul %2, %271, %cst_229 {dimension_numbers = #tpu.dot_dimension_numbers<[1], [0], [0], [1], [0, 0, 1, 1], [], []>} : vector<2x64xbf16>, vector<64x8xbf16>, vector<2x8xf32> -> vector<2x8xf32>
    %c1_230 = arith.constant 1 : index
    %c6_231 = arith.constant 6 : index
    %c0_232 = arith.constant 0 : index
    %c0_233 = arith.constant 0 : index
    %280 = vector.load %arg5[%c1_230, %c6_231, %c0_232, %c0_233] : memref<3x8x1x8xf32, #tpu.memory_space<vmem>>, vector<1x1x1x8xf32>
    %281 = vector.shape_cast %280 : vector<1x1x1x8xf32> to vector<1x8xf32>
    %282 = vector.broadcast %281 : vector<1x8xf32> to vector<2x8xf32>
    %283 = arith.addf %279, %282 : vector<2x8xf32>
    %cst_234 = arith.constant dense<0.000000e+00> : vector<2x8xf32>
    %284 = tpu.matmul %2, %273, %cst_234 {dimension_numbers = #tpu.dot_dimension_numbers<[1], [0], [0], [1], [0, 0, 1, 1], [], []>} : vector<2x64xbf16>, vector<64x8xbf16>, vector<2x8xf32> -> vector<2x8xf32>
    %c2_235 = arith.constant 2 : index
    %c6_236 = arith.constant 6 : index
    %c0_237 = arith.constant 0 : index
    %c0_238 = arith.constant 0 : index
    %285 = vector.load %arg5[%c2_235, %c6_236, %c0_237, %c0_238] : memref<3x8x1x8xf32, #tpu.memory_space<vmem>>, vector<1x1x1x8xf32>
    %286 = vector.shape_cast %285 : vector<1x1x1x8xf32> to vector<1x8xf32>
    %287 = vector.broadcast %286 : vector<1x8xf32> to vector<2x8xf32>
    %288 = arith.addf %284, %287 : vector<2x8xf32>
    %289 = arith.truncf %278 : vector<2x8xf32> to vector<2x8xbf16>
    %290 = arith.truncf %283 : vector<2x8xf32> to vector<2x8xbf16>
    %cst_239 = arith.constant dense<0.000000e+00> : vector<2x2xf32>
    %291 = tpu.matmul %289, %290, %cst_239 {dimension_numbers = #tpu.dot_dimension_numbers<[1], [1], [0], [0], [0, 0, 1, 0], [], []>} : vector<2x8xbf16>, vector<2x8xbf16>, vector<2x2xf32> -> vector<2x2xf32>
    %cst_240 = arith.constant 0.353553385 : f32
    %292 = vector.broadcast %cst_240 : f32 to vector<2x2xf32>
    %293 = arith.mulf %291, %292 : vector<2x2xf32>
    %cst_241 = arith.constant dense<0xFF800000> : vector<2xf32>
    %294 = vector.multi_reduction <maximumf>, %293, %cst_241 [1] : vector<2x2xf32> to vector<2xf32>
    %295 = vector.shape_cast %294 : vector<2xf32> to vector<2x1xf32>
    %296 = vector.broadcast %295 : vector<2x1xf32> to vector<2x2xf32>
    %297 = arith.subf %293, %296 : vector<2x2xf32>
    %298 = math.exp %297 : vector<2x2xf32>
    %cst_242 = arith.constant dense<0.000000e+00> : vector<2xf32>
    %299 = vector.multi_reduction <add>, %298, %cst_242 [1] : vector<2x2xf32> to vector<2xf32>
    %300 = vector.shape_cast %299 : vector<2xf32> to vector<2x1xf32>
    %301 = tpu.reciprocal %300 {approx = true} : vector<2x1xf32> -> vector<2x1xf32>
    %302 = vector.broadcast %301 : vector<2x1xf32> to vector<2x2xf32>
    %303 = arith.mulf %298, %302 : vector<2x2xf32>
    %304 = arith.truncf %303 : vector<2x2xf32> to vector<2x2xbf16>
    %305 = arith.truncf %288 : vector<2x8xf32> to vector<2x8xbf16>
    %cst_243 = arith.constant dense<0.000000e+00> : vector<2x8xf32>
    %306 = tpu.matmul %304, %305, %cst_243 {dimension_numbers = #tpu.dot_dimension_numbers<[1], [0], [0], [1], [0, 0, 1, 1], [], []>} : vector<2x2xbf16>, vector<2x8xbf16>, vector<2x8xf32> -> vector<2x8xf32>
    %307 = arith.truncf %306 : vector<2x8xf32> to vector<2x8xbf16>
    %c6_244 = arith.constant 6 : index
    %c0_245 = arith.constant 0 : index
    %c0_246 = arith.constant 0 : index
    %308 = vector.load %arg6[%c6_244, %c0_245, %c0_246] : memref<8x8x64xbf16, #tpu.memory_space<vmem>>, vector<1x8x64xbf16>
    %309 = vector.shape_cast %308 : vector<1x8x64xbf16> to vector<8x64xbf16>
    %cst_247 = arith.constant dense<0.000000e+00> : vector<2x64xf32>
    %310 = tpu.matmul %307, %309, %cst_247 {dimension_numbers = #tpu.dot_dimension_numbers<[1], [0], [0], [1], [0, 0, 1, 1], [], []>} : vector<2x8xbf16>, vector<8x64xbf16>, vector<2x64xf32> -> vector<2x64xf32>
    %311 = arith.addf %267, %310 : vector<2x64xf32>
    %c0_248 = arith.constant 0 : index
    %c7 = arith.constant 7 : index
    %c0_249 = arith.constant 0 : index
    %c0_250 = arith.constant 0 : index
    %312 = vector.load %arg4[%c0_248, %c7, %c0_249, %c0_250] : memref<3x8x64x8xbf16, #tpu.memory_space<vmem>>, vector<1x1x64x8xbf16>
    %313 = vector.shape_cast %312 : vector<1x1x64x8xbf16> to vector<64x8xbf16>
    %c1_251 = arith.constant 1 : index
    %c7_252 = arith.constant 7 : index
    %c0_253 = arith.constant 0 : index
    %c0_254 = arith.constant 0 : index
    %314 = vector.load %arg4[%c1_251, %c7_252, %c0_253, %c0_254] : memref<3x8x64x8xbf16, #tpu.memory_space<vmem>>, vector<1x1x64x8xbf16>
    %315 = vector.shape_cast %314 : vector<1x1x64x8xbf16> to vector<64x8xbf16>
    %c2_255 = arith.constant 2 : index
    %c7_256 = arith.constant 7 : index
    %c0_257 = arith.constant 0 : index
    %c0_258 = arith.constant 0 : index
    %316 = vector.load %arg4[%c2_255, %c7_256, %c0_257, %c0_258] : memref<3x8x64x8xbf16, #tpu.memory_space<vmem>>, vector<1x1x64x8xbf16>
    %317 = vector.shape_cast %316 : vector<1x1x64x8xbf16> to vector<64x8xbf16>
    %cst_259 = arith.constant dense<0.000000e+00> : vector<2x8xf32>
    %318 = tpu.matmul %2, %313, %cst_259 {dimension_numbers = #tpu.dot_dimension_numbers<[1], [0], [0], [1], [0, 0, 1, 1], [], []>} : vector<2x64xbf16>, vector<64x8xbf16>, vector<2x8xf32> -> vector<2x8xf32>
    %c0_260 = arith.constant 0 : index
    %c7_261 = arith.constant 7 : index
    %c0_262 = arith.constant 0 : index
    %c0_263 = arith.constant 0 : index
    %319 = vector.load %arg5[%c0_260, %c7_261, %c0_262, %c0_263] : memref<3x8x1x8xf32, #tpu.memory_space<vmem>>, vector<1x1x1x8xf32>
    %320 = vector.shape_cast %319 : vector<1x1x1x8xf32> to vector<1x8xf32>
    %321 = vector.broadcast %320 : vector<1x8xf32> to vector<2x8xf32>
    %322 = arith.addf %318, %321 : vector<2x8xf32>
    %cst_264 = arith.constant dense<0.000000e+00> : vector<2x8xf32>
    %323 = tpu.matmul %2, %315, %cst_264 {dimension_numbers = #tpu.dot_dimension_numbers<[1], [0], [0], [1], [0, 0, 1, 1], [], []>} : vector<2x64xbf16>, vector<64x8xbf16>, vector<2x8xf32> -> vector<2x8xf32>
    %c1_265 = arith.constant 1 : index
    %c7_266 = arith.constant 7 : index
    %c0_267 = arith.constant 0 : index
    %c0_268 = arith.constant 0 : index
    %324 = vector.load %arg5[%c1_265, %c7_266, %c0_267, %c0_268] : memref<3x8x1x8xf32, #tpu.memory_space<vmem>>, vector<1x1x1x8xf32>
    %325 = vector.shape_cast %324 : vector<1x1x1x8xf32> to vector<1x8xf32>
    %326 = vector.broadcast %325 : vector<1x8xf32> to vector<2x8xf32>
    %327 = arith.addf %323, %326 : vector<2x8xf32>
    %cst_269 = arith.constant dense<0.000000e+00> : vector<2x8xf32>
    %328 = tpu.matmul %2, %317, %cst_269 {dimension_numbers = #tpu.dot_dimension_numbers<[1], [0], [0], [1], [0, 0, 1, 1], [], []>} : vector<2x64xbf16>, vector<64x8xbf16>, vector<2x8xf32> -> vector<2x8xf32>
    %c2_270 = arith.constant 2 : index
    %c7_271 = arith.constant 7 : index
    %c0_272 = arith.constant 0 : index
    %c0_273 = arith.constant 0 : index
    %329 = vector.load %arg5[%c2_270, %c7_271, %c0_272, %c0_273] : memref<3x8x1x8xf32, #tpu.memory_space<vmem>>, vector<1x1x1x8xf32>
    %330 = vector.shape_cast %329 : vector<1x1x1x8xf32> to vector<1x8xf32>
    %331 = vector.broadcast %330 : vector<1x8xf32> to vector<2x8xf32>
    %332 = arith.addf %328, %331 : vector<2x8xf32>
    %333 = arith.truncf %322 : vector<2x8xf32> to vector<2x8xbf16>
    %334 = arith.truncf %327 : vector<2x8xf32> to vector<2x8xbf16>
    %cst_274 = arith.constant dense<0.000000e+00> : vector<2x2xf32>
    %335 = tpu.matmul %333, %334, %cst_274 {dimension_numbers = #tpu.dot_dimension_numbers<[1], [1], [0], [0], [0, 0, 1, 0], [], []>} : vector<2x8xbf16>, vector<2x8xbf16>, vector<2x2xf32> -> vector<2x2xf32>
    %cst_275 = arith.constant 0.353553385 : f32
    %336 = vector.broadcast %cst_275 : f32 to vector<2x2xf32>
    %337 = arith.mulf %335, %336 : vector<2x2xf32>
    %cst_276 = arith.constant dense<0xFF800000> : vector<2xf32>
    %338 = vector.multi_reduction <maximumf>, %337, %cst_276 [1] : vector<2x2xf32> to vector<2xf32>
    %339 = vector.shape_cast %338 : vector<2xf32> to vector<2x1xf32>
    %340 = vector.broadcast %339 : vector<2x1xf32> to vector<2x2xf32>
    %341 = arith.subf %337, %340 : vector<2x2xf32>
    %342 = math.exp %341 : vector<2x2xf32>
    %cst_277 = arith.constant dense<0.000000e+00> : vector<2xf32>
    %343 = vector.multi_reduction <add>, %342, %cst_277 [1] : vector<2x2xf32> to vector<2xf32>
    %344 = vector.shape_cast %343 : vector<2xf32> to vector<2x1xf32>
    %345 = tpu.reciprocal %344 {approx = true} : vector<2x1xf32> -> vector<2x1xf32>
    %346 = vector.broadcast %345 : vector<2x1xf32> to vector<2x2xf32>
    %347 = arith.mulf %342, %346 : vector<2x2xf32>
    %348 = arith.truncf %347 : vector<2x2xf32> to vector<2x2xbf16>
    %349 = arith.truncf %332 : vector<2x8xf32> to vector<2x8xbf16>
    %cst_278 = arith.constant dense<0.000000e+00> : vector<2x8xf32>
    %350 = tpu.matmul %348, %349, %cst_278 {dimension_numbers = #tpu.dot_dimension_numbers<[1], [0], [0], [1], [0, 0, 1, 1], [], []>} : vector<2x2xbf16>, vector<2x8xbf16>, vector<2x8xf32> -> vector<2x8xf32>
    %351 = arith.truncf %350 : vector<2x8xf32> to vector<2x8xbf16>
    %c7_279 = arith.constant 7 : index
    %c0_280 = arith.constant 0 : index
    %c0_281 = arith.constant 0 : index
    %352 = vector.load %arg6[%c7_279, %c0_280, %c0_281] : memref<8x8x64xbf16, #tpu.memory_space<vmem>>, vector<1x8x64xbf16>
    %353 = vector.shape_cast %352 : vector<1x8x64xbf16> to vector<8x64xbf16>
    %cst_282 = arith.constant dense<0.000000e+00> : vector<2x64xf32>
    %354 = tpu.matmul %351, %353, %cst_282 {dimension_numbers = #tpu.dot_dimension_numbers<[1], [0], [0], [1], [0, 0, 1, 1], [], []>} : vector<2x8xbf16>, vector<8x64xbf16>, vector<2x64xf32> -> vector<2x64xf32>
    %355 = arith.addf %311, %354 : vector<2x64xf32>
    %c0_283 = arith.constant 0 : index
    %c0_284 = arith.constant 0 : index
    %356 = vector.load %arg7[%c0_283, %c0_284] : memref<1x64xf32, #tpu.memory_space<vmem>>, vector<1x64xf32>
    %357 = vector.broadcast %356 : vector<1x64xf32> to vector<2x64xf32>
    %358 = arith.addf %355, %357 : vector<2x64xf32>
    %359 = arith.addf %1, %358 : vector<2x64xf32>
    %c0_285 = arith.constant 0 : index
    %c0_286 = arith.constant 0 : index
    %360 = vector.load %arg2[%c0_285, %c0_286] : memref<1x64xf32, #tpu.memory_space<vmem>>, vector<1x64xf32>
    %c0_287 = arith.constant 0 : index
    %c0_288 = arith.constant 0 : index
    %361 = vector.load %arg3[%c0_287, %c0_288] : memref<1x64xf32, #tpu.memory_space<vmem>>, vector<1x64xf32>
    %cst_289 = arith.constant dense<0.000000e+00> : vector<2xf32>
    %362 = vector.multi_reduction <add>, %359, %cst_289 [1] : vector<2x64xf32> to vector<2xf32>
    %363 = vector.shape_cast %362 : vector<2xf32> to vector<2x1xf32>
    %cst_290 = arith.constant 6.400000e+01 : f32
    %364 = vector.broadcast %cst_290 : f32 to vector<2x1xf32>
    %365 = arith.divf %363, %364 : vector<2x1xf32>
    %366 = vector.broadcast %365 : vector<2x1xf32> to vector<2x64xf32>
    %367 = arith.subf %359, %366 : vector<2x64xf32>
    %368 = arith.mulf %367, %367 : vector<2x64xf32>
    %cst_291 = arith.constant dense<0.000000e+00> : vector<2xf32>
    %369 = vector.multi_reduction <add>, %368, %cst_291 [1] : vector<2x64xf32> to vector<2xf32>
    %370 = vector.shape_cast %369 : vector<2xf32> to vector<2x1xf32>
    %cst_292 = arith.constant 6.400000e+01 : f32
    %371 = vector.broadcast %cst_292 : f32 to vector<2x1xf32>
    %372 = arith.divf %370, %371 : vector<2x1xf32>
    %373 = vector.broadcast %365 : vector<2x1xf32> to vector<2x64xf32>
    %374 = arith.subf %359, %373 : vector<2x64xf32>
    %cst_293 = arith.constant 9.99999974E-6 : f32
    %375 = vector.broadcast %cst_293 : f32 to vector<2x1xf32>
    %376 = arith.addf %372, %375 : vector<2x1xf32>
    %377 = math.rsqrt %376 : vector<2x1xf32>
    %378 = vector.broadcast %377 : vector<2x1xf32> to vector<2x64xf32>
    %379 = arith.mulf %374, %378 : vector<2x64xf32>
    %380 = vector.broadcast %360 : vector<1x64xf32> to vector<2x64xf32>
    %381 = arith.mulf %379, %380 : vector<2x64xf32>
    %382 = vector.broadcast %361 : vector<1x64xf32> to vector<2x64xf32>
    %383 = arith.addf %381, %382 : vector<2x64xf32>
    %384 = arith.truncf %383 : vector<2x64xf32> to vector<2x64xbf16>
    %c0_294 = arith.constant 0 : index
    %c0_295 = arith.constant 0 : index
    %385 = vector.load %arg10[%c0_294, %c0_295] : memref<64x128xbf16, #tpu.memory_space<vmem>>, vector<64x128xbf16>
    %cst_296 = arith.constant dense<0.000000e+00> : vector<2x128xf32>
    %386 = tpu.matmul %384, %385, %cst_296 {dimension_numbers = #tpu.dot_dimension_numbers<[1], [0], [0], [1], [0, 0, 1, 1], [], []>} : vector<2x64xbf16>, vector<64x128xbf16>, vector<2x128xf32> -> vector<2x128xf32>
    %c0_297 = arith.constant 0 : index
    %c0_298 = arith.constant 0 : index
    %387 = vector.load %arg11[%c0_297, %c0_298] : memref<1x128xf32, #tpu.memory_space<vmem>>, vector<1x128xf32>
    %388 = vector.broadcast %387 : vector<1x128xf32> to vector<2x128xf32>
    %389 = arith.addf %386, %388 : vector<2x128xf32>
    %cst_299 = arith.constant 0.000000e+00 : f32
    %390 = vector.broadcast %cst_299 : f32 to vector<2x128xf32>
    %391 = arith.maximumf %389, %390 : vector<2x128xf32>
    %392 = arith.truncf %391 : vector<2x128xf32> to vector<2x128xbf16>
    %c0_300 = arith.constant 0 : index
    %c0_301 = arith.constant 0 : index
    %393 = vector.load %arg12[%c0_300, %c0_301] : memref<128x64xbf16, #tpu.memory_space<vmem>>, vector<128x64xbf16>
    %cst_302 = arith.constant dense<0.000000e+00> : vector<2x64xf32>
    %394 = tpu.matmul %392, %393, %cst_302 {dimension_numbers = #tpu.dot_dimension_numbers<[1], [0], [0], [1], [0, 0, 1, 1], [], []>} : vector<2x128xbf16>, vector<128x64xbf16>, vector<2x64xf32> -> vector<2x64xf32>
    %c0_303 = arith.constant 0 : index
    %c0_304 = arith.constant 0 : index
    %395 = vector.load %arg13[%c0_303, %c0_304] : memref<1x64xf32, #tpu.memory_space<vmem>>, vector<1x64xf32>
    %396 = vector.broadcast %395 : vector<1x64xf32> to vector<2x64xf32>
    %397 = arith.addf %394, %396 : vector<2x64xf32>
    %398 = arith.addf %383, %397 : vector<2x64xf32>
    %c0_305 = arith.constant 0 : index
    %c0_306 = arith.constant 0 : index
    %399 = vector.load %arg8[%c0_305, %c0_306] : memref<1x64xf32, #tpu.memory_space<vmem>>, vector<1x64xf32>
    %c0_307 = arith.constant 0 : index
    %c0_308 = arith.constant 0 : index
    %400 = vector.load %arg9[%c0_307, %c0_308] : memref<1x64xf32, #tpu.memory_space<vmem>>, vector<1x64xf32>
    %cst_309 = arith.constant dense<0.000000e+00> : vector<2xf32>
    %401 = vector.multi_reduction <add>, %398, %cst_309 [1] : vector<2x64xf32> to vector<2xf32>
    %402 = vector.shape_cast %401 : vector<2xf32> to vector<2x1xf32>
    %cst_310 = arith.constant 6.400000e+01 : f32
    %403 = vector.broadcast %cst_310 : f32 to vector<2x1xf32>
    %404 = arith.divf %402, %403 : vector<2x1xf32>
    %405 = vector.broadcast %404 : vector<2x1xf32> to vector<2x64xf32>
    %406 = arith.subf %398, %405 : vector<2x64xf32>
    %407 = arith.mulf %406, %406 : vector<2x64xf32>
    %cst_311 = arith.constant dense<0.000000e+00> : vector<2xf32>
    %408 = vector.multi_reduction <add>, %407, %cst_311 [1] : vector<2x64xf32> to vector<2xf32>
    %409 = vector.shape_cast %408 : vector<2xf32> to vector<2x1xf32>
    %cst_312 = arith.constant 6.400000e+01 : f32
    %410 = vector.broadcast %cst_312 : f32 to vector<2x1xf32>
    %411 = arith.divf %409, %410 : vector<2x1xf32>
    %412 = vector.broadcast %404 : vector<2x1xf32> to vector<2x64xf32>
    %413 = arith.subf %398, %412 : vector<2x64xf32>
    %cst_313 = arith.constant 9.99999974E-6 : f32
    %414 = vector.broadcast %cst_313 : f32 to vector<2x1xf32>
    %415 = arith.addf %411, %414 : vector<2x1xf32>
    %416 = math.rsqrt %415 : vector<2x1xf32>
    %417 = vector.broadcast %416 : vector<2x1xf32> to vector<2x64xf32>
    %418 = arith.mulf %413, %417 : vector<2x64xf32>
    %419 = vector.broadcast %399 : vector<1x64xf32> to vector<2x64xf32>
    %420 = arith.mulf %418, %419 : vector<2x64xf32>
    %421 = vector.broadcast %400 : vector<1x64xf32> to vector<2x64xf32>
    %422 = arith.addf %420, %421 : vector<2x64xf32>
    %c0_314 = arith.constant 0 : index
    %c0_315 = arith.constant 0 : index
    %c0_316 = arith.constant 0 : index
    %423 = vector.load %arg14[%c0_314, %c0_315, %c0_316] : memref<1x2x64xf32, #tpu.memory_space<vmem>>, vector<1x2x64xf32>
    %424 = vector.shape_cast %423 : vector<1x2x64xf32> to vector<2x64xf32>
    %425 = vector.shape_cast %422 : vector<2x64xf32> to vector<1x2x64xf32>
    tpu.vector_store %arg14[%c0_314, %c0_315, %c0_316], %425 {strides = array<i32>} : memref<1x2x64xf32, #tpu.memory_space<vmem>>, vector<1x2x64xf32>,
    return
  }
  func.func @transform_0(%arg0: i32) -> (i32, i32, i32) {
    %c0_i32 = arith.constant 0 : i32
    %c0_i32_0 = arith.constant 0 : i32
    %c0_i32_1 = arith.constant 0 : i32
    return %arg0, %c0_i32, %c0_i32_0 : i32, i32, i32
  }
  func.func @transform_1(%arg0: i32) -> (i32, i32) {
    %c0_i32 = arith.constant 0 : i32
    %c0_i32_0 = arith.constant 0 : i32
    %c0_i32_1 = arith.constant 0 : i32
    return %c0_i32, %c0_i32_0 : i32, i32
  }
  func.func @transform_2(%arg0: i32) -> (i32, i32) {
    %c0_i32 = arith.constant 0 : i32
    %c0_i32_0 = arith.constant 0 : i32
    %c0_i32_1 = arith.constant 0 : i32
    return %c0_i32, %c0_i32_0 : i32, i32
  }
  func.func @transform_3(%arg0: i32) -> (i32, i32, i32, i32) {
    %c0_i32 = arith.constant 0 : i32
    %c0_i32_0 = arith.constant 0 : i32
    %c0_i32_1 = arith.constant 0 : i32
    %c0_i32_2 = arith.constant 0 : i32
    %c0_i32_3 = arith.constant 0 : i32
    return %c0_i32, %c0_i32_0, %c0_i32_1, %c0_i32_2 : i32, i32, i32, i32
  }
  func.func @transform_4(%arg0: i32) -> (i32, i32, i32, i32) {
    %c0_i32 = arith.constant 0 : i32
    %c0_i32_0 = arith.constant 0 : i32
    %c0_i32_1 = arith.constant 0 : i32
    %c0_i32_2 = arith.constant 0 : i32
    %c0_i32_3 = arith.constant 0 : i32
    return %c0_i32, %c0_i32_0, %c0_i32_1, %c0_i32_2 : i32, i32, i32, i32
  }
  func.func @transform_5(%arg0: i32) -> (i32, i32, i32) {
    %c0_i32 = arith.constant 0 : i32
    %c0_i32_0 = arith.constant 0 : i32
    %c0_i32_1 = arith.constant 0 : i32
    %c0_i32_2 = arith.constant 0 : i32
    return %c0_i32, %c0_i32_0, %c0_i32_1 : i32, i32, i32
  }
  func.func @transform_6(%arg0: i32) -> (i32, i32) {
    %c0_i32 = arith.constant 0 : i32
    %c0_i32_0 = arith.constant 0 : i32
    %c0_i32_1 = arith.constant 0 : i32
    return %c0_i32, %c0_i32_0 : i32, i32
  }
  func.func @transform_7(%arg0: i32) -> (i32, i32) {
    %c0_i32 = arith.constant 0 : i32
    %c0_i32_0 = arith.constant 0 : i32
    %c0_i32_1 = arith.constant 0 : i32
    return %c0_i32, %c0_i32_0 : i32, i32
  }
  func.func @transform_8(%arg0: i32) -> (i32, i32) {
    %c0_i32 = arith.constant 0 : i32
    %c0_i32_0 = arith.constant 0 : i32
    %c0_i32_1 = arith.constant 0 : i32
    return %c0_i32, %c0_i32_0 : i32, i32
  }
  func.func @transform_9(%arg0: i32) -> (i32, i32) {
    %c0_i32 = arith.constant 0 : i32
    %c0_i32_0 = arith.constant 0 : i32
    %c0_i32_1 = arith.constant 0 : i32
    return %c0_i32, %c0_i32_0 : i32, i32
  }
  func.func @transform_10(%arg0: i32) -> (i32, i32) {
    %c0_i32 = arith.constant 0 : i32
    %c0_i32_0 = arith.constant 0 : i32
    %c0_i32_1 = arith.constant 0 : i32
    return %c0_i32, %c0_i32_0 : i32, i32
  }
  func.func @transform_11(%arg0: i32) -> (i32, i32) {
    %c0_i32 = arith.constant 0 : i32
    %c0_i32_0 = arith.constant 0 : i32
    %c0_i32_1 = arith.constant 0 : i32
    return %c0_i32, %c0_i32_0 : i32, i32
  }
  func.func @transform_12(%arg0: i32) -> (i32, i32) {
    %c0_i32 = arith.constant 0 : i32
    %c0_i32_0 = arith.constant 0 : i32
    %c0_i32_1 = arith.constant 0 : i32
    return %c0_i32, %c0_i32_0 : i32, i32
  }
  func.func @transform_13(%arg0: i32) -> (i32, i32, i32) {
    %c0_i32 = arith.constant 0 : i32
    %c0_i32_0 = arith.constant 0 : i32
    %c0_i32_1 = arith.constant 0 : i32
    return %arg0, %c0_i32, %c0_i32_0 : i32, i32, i32
  }
}

module attributes {stable_mosaic.version = 11 : i64} {
  func.func @_encoder_block_kernel(%arg0: i32, %arg1: memref<1x16x64xf32, #tpu.memory_space<vmem>>, %arg2: memref<1x64xf32, #tpu.memory_space<vmem>>, %arg3: memref<1x64xf32, #tpu.memory_space<vmem>>, %arg4: memref<3x8x64x8xbf16, #tpu.memory_space<vmem>>, %arg5: memref<3x8x1x8xf32, #tpu.memory_space<vmem>>, %arg6: memref<8x8x64xbf16, #tpu.memory_space<vmem>>, %arg7: memref<1x64xf32, #tpu.memory_space<vmem>>, %arg8: memref<1x64xf32, #tpu.memory_space<vmem>>, %arg9: memref<1x64xf32, #tpu.memory_space<vmem>>, %arg10: memref<64x256xbf16, #tpu.memory_space<vmem>>, %arg11: memref<1x256xf32, #tpu.memory_space<vmem>>, %arg12: memref<256x64xbf16, #tpu.memory_space<vmem>>, %arg13: memref<1x64xf32, #tpu.memory_space<vmem>>, %arg14: memref<1x16x16xf32, #tpu.memory_space<vmem>>, %arg15: memref<1x16x64xf32, #tpu.memory_space<vmem>>) attributes {dimension_semantics = [#tpu.dimension_semantics<parallel>], iteration_bounds = array<i64: 2>, scalar_prefetch = 0 : i64, scratch_operands = 0 : i64, tpu.core_type = #tpu.core_type<tc>, window_params = [{transform_indices = @transform_0, window_bounds = array<i64: 1, 16, 64>}, {pipeline_mode = #tpu.pipeline_mode<synchronous>, transform_indices = @transform_1, window_bounds = array<i64: 1, 64>}, {pipeline_mode = #tpu.pipeline_mode<synchronous>, transform_indices = @transform_2, window_bounds = array<i64: 1, 64>}, {pipeline_mode = #tpu.pipeline_mode<synchronous>, transform_indices = @transform_3, window_bounds = array<i64: 3, 8, 64, 8>}, {pipeline_mode = #tpu.pipeline_mode<synchronous>, transform_indices = @transform_4, window_bounds = array<i64: 3, 8, 1, 8>}, {pipeline_mode = #tpu.pipeline_mode<synchronous>, transform_indices = @transform_5, window_bounds = array<i64: 8, 8, 64>}, {pipeline_mode = #tpu.pipeline_mode<synchronous>, transform_indices = @transform_6, window_bounds = array<i64: 1, 64>}, {pipeline_mode = #tpu.pipeline_mode<synchronous>, transform_indices = @transform_7, window_bounds = array<i64: 1, 64>}, {pipeline_mode = #tpu.pipeline_mode<synchronous>, transform_indices = @transform_8, window_bounds = array<i64: 1, 64>}, {pipeline_mode = #tpu.pipeline_mode<synchronous>, transform_indices = @transform_9, window_bounds = array<i64: 64, 256>}, {pipeline_mode = #tpu.pipeline_mode<synchronous>, transform_indices = @transform_10, window_bounds = array<i64: 1, 256>}, {pipeline_mode = #tpu.pipeline_mode<synchronous>, transform_indices = @transform_11, window_bounds = array<i64: 256, 64>}, {pipeline_mode = #tpu.pipeline_mode<synchronous>, transform_indices = @transform_12, window_bounds = array<i64: 1, 64>}, {transform_indices = @transform_13, window_bounds = array<i64: 1, 16, 16>}, {transform_indices = @transform_14, window_bounds = array<i64: 1, 16, 64>}]} {
    %c0 = arith.constant 0 : index
    %c0_0 = arith.constant 0 : index
    %c0_1 = arith.constant 0 : index
    %0 = vector.load %arg1[%c0, %c0_0, %c0_1] : memref<1x16x64xf32, #tpu.memory_space<vmem>>, vector<1x16x64xf32>
    %1 = vector.shape_cast %0 : vector<1x16x64xf32> to vector<16x64xf32>
    %c0_2 = arith.constant 0 : index
    %c0_3 = arith.constant 0 : index
    %2 = vector.load %arg2[%c0_2, %c0_3] : memref<1x64xf32, #tpu.memory_space<vmem>>, vector<1x64xf32>
    %c0_4 = arith.constant 0 : index
    %c0_5 = arith.constant 0 : index
    %3 = vector.load %arg3[%c0_4, %c0_5] : memref<1x64xf32, #tpu.memory_space<vmem>>, vector<1x64xf32>
    %cst = arith.constant dense<0.000000e+00> : vector<16xf32>
    %4 = vector.multi_reduction <add>, %1, %cst [1] : vector<16x64xf32> to vector<16xf32>
    %5 = vector.shape_cast %4 : vector<16xf32> to vector<16x1xf32>
    %cst_6 = arith.constant 6.400000e+01 : f32
    %6 = vector.broadcast %cst_6 : f32 to vector<16x1xf32>
    %7 = arith.divf %5, %6 : vector<16x1xf32>
    %8 = vector.broadcast %7 : vector<16x1xf32> to vector<16x64xf32>
    %9 = arith.subf %1, %8 : vector<16x64xf32>
    %10 = arith.mulf %9, %9 : vector<16x64xf32>
    %cst_7 = arith.constant dense<0.000000e+00> : vector<16xf32>
    %11 = vector.multi_reduction <add>, %10, %cst_7 [1] : vector<16x64xf32> to vector<16xf32>
    %12 = vector.shape_cast %11 : vector<16xf32> to vector<16x1xf32>
    %cst_8 = arith.constant 6.400000e+01 : f32
    %13 = vector.broadcast %cst_8 : f32 to vector<16x1xf32>
    %14 = arith.divf %12, %13 : vector<16x1xf32>
    %15 = vector.broadcast %7 : vector<16x1xf32> to vector<16x64xf32>
    %16 = arith.subf %1, %15 : vector<16x64xf32>
    %cst_9 = arith.constant 9.99999974E-6 : f32
    %17 = vector.broadcast %cst_9 : f32 to vector<16x1xf32>
    %18 = arith.addf %14, %17 : vector<16x1xf32>
    %19 = math.rsqrt %18 : vector<16x1xf32>
    %20 = vector.broadcast %19 : vector<16x1xf32> to vector<16x64xf32>
    %21 = arith.mulf %16, %20 : vector<16x64xf32>
    %22 = vector.broadcast %2 : vector<1x64xf32> to vector<16x64xf32>
    %23 = arith.mulf %21, %22 : vector<16x64xf32>
    %24 = vector.broadcast %3 : vector<1x64xf32> to vector<16x64xf32>
    %25 = arith.addf %23, %24 : vector<16x64xf32>
    %26 = arith.truncf %25 : vector<16x64xf32> to vector<16x64xbf16>
    %c0_10 = arith.constant 0 : index
    %c0_11 = arith.constant 0 : index
    %c0_12 = arith.constant 0 : index
    %27 = vector.load %arg14[%c0_10, %c0_11, %c0_12] : memref<1x16x16xf32, #tpu.memory_space<vmem>>, vector<1x16x16xf32>
    %28 = vector.shape_cast %27 : vector<1x16x16xf32> to vector<16x16xf32>
    %cst_13 = arith.constant 0.000000e+00 : f32
    %29 = vector.broadcast %cst_13 : f32 to vector<16x64xf32>
    %c0_14 = arith.constant 0 : index
    %c0_15 = arith.constant 0 : index
    %c0_16 = arith.constant 0 : index
    %c0_17 = arith.constant 0 : index
    %30 = vector.load %arg4[%c0_14, %c0_15, %c0_16, %c0_17] : memref<3x8x64x8xbf16, #tpu.memory_space<vmem>>, vector<1x1x64x8xbf16>
    %31 = vector.shape_cast %30 : vector<1x1x64x8xbf16> to vector<64x8xbf16>
    %c1 = arith.constant 1 : index
    %c0_18 = arith.constant 0 : index
    %c0_19 = arith.constant 0 : index
    %c0_20 = arith.constant 0 : index
    %32 = vector.load %arg4[%c1, %c0_18, %c0_19, %c0_20] : memref<3x8x64x8xbf16, #tpu.memory_space<vmem>>, vector<1x1x64x8xbf16>
    %33 = vector.shape_cast %32 : vector<1x1x64x8xbf16> to vector<64x8xbf16>
    %c2 = arith.constant 2 : index
    %c0_21 = arith.constant 0 : index
    %c0_22 = arith.constant 0 : index
    %c0_23 = arith.constant 0 : index
    %34 = vector.load %arg4[%c2, %c0_21, %c0_22, %c0_23] : memref<3x8x64x8xbf16, #tpu.memory_space<vmem>>, vector<1x1x64x8xbf16>
    %35 = vector.shape_cast %34 : vector<1x1x64x8xbf16> to vector<64x8xbf16>
    %cst_24 = arith.constant dense<0.000000e+00> : vector<16x8xf32>
    %36 = tpu.matmul %26, %31, %cst_24 {dimension_numbers = #tpu.dot_dimension_numbers<[1], [0], [0], [1], [0, 0, 1, 1], [], []>} : vector<16x64xbf16>, vector<64x8xbf16>, vector<16x8xf32> -> vector<16x8xf32>
    %c0_25 = arith.constant 0 : index
    %c0_26 = arith.constant 0 : index
    %c0_27 = arith.constant 0 : index
    %c0_28 = arith.constant 0 : index
    %37 = vector.load %arg5[%c0_25, %c0_26, %c0_27, %c0_28] : memref<3x8x1x8xf32, #tpu.memory_space<vmem>>, vector<1x1x1x8xf32>
    %38 = vector.shape_cast %37 : vector<1x1x1x8xf32> to vector<1x8xf32>
    %39 = vector.broadcast %38 : vector<1x8xf32> to vector<16x8xf32>
    %40 = arith.addf %36, %39 : vector<16x8xf32>
    %cst_29 = arith.constant dense<0.000000e+00> : vector<16x8xf32>
    %41 = tpu.matmul %26, %33, %cst_29 {dimension_numbers = #tpu.dot_dimension_numbers<[1], [0], [0], [1], [0, 0, 1, 1], [], []>} : vector<16x64xbf16>, vector<64x8xbf16>, vector<16x8xf32> -> vector<16x8xf32>
    %c1_30 = arith.constant 1 : index
    %c0_31 = arith.constant 0 : index
    %c0_32 = arith.constant 0 : index
    %c0_33 = arith.constant 0 : index
    %42 = vector.load %arg5[%c1_30, %c0_31, %c0_32, %c0_33] : memref<3x8x1x8xf32, #tpu.memory_space<vmem>>, vector<1x1x1x8xf32>
    %43 = vector.shape_cast %42 : vector<1x1x1x8xf32> to vector<1x8xf32>
    %44 = vector.broadcast %43 : vector<1x8xf32> to vector<16x8xf32>
    %45 = arith.addf %41, %44 : vector<16x8xf32>
    %cst_34 = arith.constant dense<0.000000e+00> : vector<16x8xf32>
    %46 = tpu.matmul %26, %35, %cst_34 {dimension_numbers = #tpu.dot_dimension_numbers<[1], [0], [0], [1], [0, 0, 1, 1], [], []>} : vector<16x64xbf16>, vector<64x8xbf16>, vector<16x8xf32> -> vector<16x8xf32>
    %c2_35 = arith.constant 2 : index
    %c0_36 = arith.constant 0 : index
    %c0_37 = arith.constant 0 : index
    %c0_38 = arith.constant 0 : index
    %47 = vector.load %arg5[%c2_35, %c0_36, %c0_37, %c0_38] : memref<3x8x1x8xf32, #tpu.memory_space<vmem>>, vector<1x1x1x8xf32>
    %48 = vector.shape_cast %47 : vector<1x1x1x8xf32> to vector<1x8xf32>
    %49 = vector.broadcast %48 : vector<1x8xf32> to vector<16x8xf32>
    %50 = arith.addf %46, %49 : vector<16x8xf32>
    %51 = arith.truncf %40 : vector<16x8xf32> to vector<16x8xbf16>
    %52 = arith.truncf %45 : vector<16x8xf32> to vector<16x8xbf16>
    %cst_39 = arith.constant dense<0.000000e+00> : vector<16x16xf32>
    %53 = tpu.matmul %51, %52, %cst_39 {dimension_numbers = #tpu.dot_dimension_numbers<[1], [1], [0], [0], [0, 0, 1, 0], [], []>} : vector<16x8xbf16>, vector<16x8xbf16>, vector<16x16xf32> -> vector<16x16xf32>
    %cst_40 = arith.constant 0.353553385 : f32
    %54 = vector.broadcast %cst_40 : f32 to vector<16x16xf32>
    %55 = arith.mulf %53, %54 : vector<16x16xf32>
    %56 = arith.addf %55, %28 : vector<16x16xf32>
    %cst_41 = arith.constant dense<0xFF800000> : vector<16xf32>
    %57 = vector.multi_reduction <maximumf>, %56, %cst_41 [1] : vector<16x16xf32> to vector<16xf32>
    %58 = vector.shape_cast %57 : vector<16xf32> to vector<16x1xf32>
    %59 = vector.broadcast %58 : vector<16x1xf32> to vector<16x16xf32>
    %60 = arith.subf %56, %59 : vector<16x16xf32>
    %61 = math.exp %60 : vector<16x16xf32>
    %cst_42 = arith.constant dense<0.000000e+00> : vector<16xf32>
    %62 = vector.multi_reduction <add>, %61, %cst_42 [1] : vector<16x16xf32> to vector<16xf32>
    %63 = vector.shape_cast %62 : vector<16xf32> to vector<16x1xf32>
    %64 = tpu.reciprocal %63 {approx = true} : vector<16x1xf32> -> vector<16x1xf32>
    %65 = vector.broadcast %64 : vector<16x1xf32> to vector<16x16xf32>
    %66 = arith.mulf %61, %65 : vector<16x16xf32>
    %67 = arith.truncf %66 : vector<16x16xf32> to vector<16x16xbf16>
    %68 = arith.truncf %50 : vector<16x8xf32> to vector<16x8xbf16>
    %cst_43 = arith.constant dense<0.000000e+00> : vector<16x8xf32>
    %69 = tpu.matmul %67, %68, %cst_43 {dimension_numbers = #tpu.dot_dimension_numbers<[1], [0], [0], [1], [0, 0, 1, 1], [], []>} : vector<16x16xbf16>, vector<16x8xbf16>, vector<16x8xf32> -> vector<16x8xf32>
    %70 = arith.truncf %69 : vector<16x8xf32> to vector<16x8xbf16>
    %c0_44 = arith.constant 0 : index
    %c0_45 = arith.constant 0 : index
    %c0_46 = arith.constant 0 : index
    %71 = vector.load %arg6[%c0_44, %c0_45, %c0_46] : memref<8x8x64xbf16, #tpu.memory_space<vmem>>, vector<1x8x64xbf16>
    %72 = vector.shape_cast %71 : vector<1x8x64xbf16> to vector<8x64xbf16>
    %cst_47 = arith.constant dense<0.000000e+00> : vector<16x64xf32>
    %73 = tpu.matmul %70, %72, %cst_47 {dimension_numbers = #tpu.dot_dimension_numbers<[1], [0], [0], [1], [0, 0, 1, 1], [], []>} : vector<16x8xbf16>, vector<8x64xbf16>, vector<16x64xf32> -> vector<16x64xf32>
    %74 = arith.addf %29, %73 : vector<16x64xf32>
    %c0_48 = arith.constant 0 : index
    %c1_49 = arith.constant 1 : index
    %c0_50 = arith.constant 0 : index
    %c0_51 = arith.constant 0 : index
    %75 = vector.load %arg4[%c0_48, %c1_49, %c0_50, %c0_51] : memref<3x8x64x8xbf16, #tpu.memory_space<vmem>>, vector<1x1x64x8xbf16>
    %76 = vector.shape_cast %75 : vector<1x1x64x8xbf16> to vector<64x8xbf16>
    %c1_52 = arith.constant 1 : index
    %c1_53 = arith.constant 1 : index
    %c0_54 = arith.constant 0 : index
    %c0_55 = arith.constant 0 : index
    %77 = vector.load %arg4[%c1_52, %c1_53, %c0_54, %c0_55] : memref<3x8x64x8xbf16, #tpu.memory_space<vmem>>, vector<1x1x64x8xbf16>
    %78 = vector.shape_cast %77 : vector<1x1x64x8xbf16> to vector<64x8xbf16>
    %c2_56 = arith.constant 2 : index
    %c1_57 = arith.constant 1 : index
    %c0_58 = arith.constant 0 : index
    %c0_59 = arith.constant 0 : index
    %79 = vector.load %arg4[%c2_56, %c1_57, %c0_58, %c0_59] : memref<3x8x64x8xbf16, #tpu.memory_space<vmem>>, vector<1x1x64x8xbf16>
    %80 = vector.shape_cast %79 : vector<1x1x64x8xbf16> to vector<64x8xbf16>
    %cst_60 = arith.constant dense<0.000000e+00> : vector<16x8xf32>
    %81 = tpu.matmul %26, %76, %cst_60 {dimension_numbers = #tpu.dot_dimension_numbers<[1], [0], [0], [1], [0, 0, 1, 1], [], []>} : vector<16x64xbf16>, vector<64x8xbf16>, vector<16x8xf32> -> vector<16x8xf32>
    %c0_61 = arith.constant 0 : index
    %c1_62 = arith.constant 1 : index
    %c0_63 = arith.constant 0 : index
    %c0_64 = arith.constant 0 : index
    %82 = vector.load %arg5[%c0_61, %c1_62, %c0_63, %c0_64] : memref<3x8x1x8xf32, #tpu.memory_space<vmem>>, vector<1x1x1x8xf32>
    %83 = vector.shape_cast %82 : vector<1x1x1x8xf32> to vector<1x8xf32>
    %84 = vector.broadcast %83 : vector<1x8xf32> to vector<16x8xf32>
    %85 = arith.addf %81, %84 : vector<16x8xf32>
    %cst_65 = arith.constant dense<0.000000e+00> : vector<16x8xf32>
    %86 = tpu.matmul %26, %78, %cst_65 {dimension_numbers = #tpu.dot_dimension_numbers<[1], [0], [0], [1], [0, 0, 1, 1], [], []>} : vector<16x64xbf16>, vector<64x8xbf16>, vector<16x8xf32> -> vector<16x8xf32>
    %c1_66 = arith.constant 1 : index
    %c1_67 = arith.constant 1 : index
    %c0_68 = arith.constant 0 : index
    %c0_69 = arith.constant 0 : index
    %87 = vector.load %arg5[%c1_66, %c1_67, %c0_68, %c0_69] : memref<3x8x1x8xf32, #tpu.memory_space<vmem>>, vector<1x1x1x8xf32>
    %88 = vector.shape_cast %87 : vector<1x1x1x8xf32> to vector<1x8xf32>
    %89 = vector.broadcast %88 : vector<1x8xf32> to vector<16x8xf32>
    %90 = arith.addf %86, %89 : vector<16x8xf32>
    %cst_70 = arith.constant dense<0.000000e+00> : vector<16x8xf32>
    %91 = tpu.matmul %26, %80, %cst_70 {dimension_numbers = #tpu.dot_dimension_numbers<[1], [0], [0], [1], [0, 0, 1, 1], [], []>} : vector<16x64xbf16>, vector<64x8xbf16>, vector<16x8xf32> -> vector<16x8xf32>
    %c2_71 = arith.constant 2 : index
    %c1_72 = arith.constant 1 : index
    %c0_73 = arith.constant 0 : index
    %c0_74 = arith.constant 0 : index
    %92 = vector.load %arg5[%c2_71, %c1_72, %c0_73, %c0_74] : memref<3x8x1x8xf32, #tpu.memory_space<vmem>>, vector<1x1x1x8xf32>
    %93 = vector.shape_cast %92 : vector<1x1x1x8xf32> to vector<1x8xf32>
    %94 = vector.broadcast %93 : vector<1x8xf32> to vector<16x8xf32>
    %95 = arith.addf %91, %94 : vector<16x8xf32>
    %96 = arith.truncf %85 : vector<16x8xf32> to vector<16x8xbf16>
    %97 = arith.truncf %90 : vector<16x8xf32> to vector<16x8xbf16>
    %cst_75 = arith.constant dense<0.000000e+00> : vector<16x16xf32>
    %98 = tpu.matmul %96, %97, %cst_75 {dimension_numbers = #tpu.dot_dimension_numbers<[1], [1], [0], [0], [0, 0, 1, 0], [], []>} : vector<16x8xbf16>, vector<16x8xbf16>, vector<16x16xf32> -> vector<16x16xf32>
    %cst_76 = arith.constant 0.353553385 : f32
    %99 = vector.broadcast %cst_76 : f32 to vector<16x16xf32>
    %100 = arith.mulf %98, %99 : vector<16x16xf32>
    %101 = arith.addf %100, %28 : vector<16x16xf32>
    %cst_77 = arith.constant dense<0xFF800000> : vector<16xf32>
    %102 = vector.multi_reduction <maximumf>, %101, %cst_77 [1] : vector<16x16xf32> to vector<16xf32>
    %103 = vector.shape_cast %102 : vector<16xf32> to vector<16x1xf32>
    %104 = vector.broadcast %103 : vector<16x1xf32> to vector<16x16xf32>
    %105 = arith.subf %101, %104 : vector<16x16xf32>
    %106 = math.exp %105 : vector<16x16xf32>
    %cst_78 = arith.constant dense<0.000000e+00> : vector<16xf32>
    %107 = vector.multi_reduction <add>, %106, %cst_78 [1] : vector<16x16xf32> to vector<16xf32>
    %108 = vector.shape_cast %107 : vector<16xf32> to vector<16x1xf32>
    %109 = tpu.reciprocal %108 {approx = true} : vector<16x1xf32> -> vector<16x1xf32>
    %110 = vector.broadcast %109 : vector<16x1xf32> to vector<16x16xf32>
    %111 = arith.mulf %106, %110 : vector<16x16xf32>
    %112 = arith.truncf %111 : vector<16x16xf32> to vector<16x16xbf16>
    %113 = arith.truncf %95 : vector<16x8xf32> to vector<16x8xbf16>
    %cst_79 = arith.constant dense<0.000000e+00> : vector<16x8xf32>
    %114 = tpu.matmul %112, %113, %cst_79 {dimension_numbers = #tpu.dot_dimension_numbers<[1], [0], [0], [1], [0, 0, 1, 1], [], []>} : vector<16x16xbf16>, vector<16x8xbf16>, vector<16x8xf32> -> vector<16x8xf32>
    %115 = arith.truncf %114 : vector<16x8xf32> to vector<16x8xbf16>
    %c1_80 = arith.constant 1 : index
    %c0_81 = arith.constant 0 : index
    %c0_82 = arith.constant 0 : index
    %116 = vector.load %arg6[%c1_80, %c0_81, %c0_82] : memref<8x8x64xbf16, #tpu.memory_space<vmem>>, vector<1x8x64xbf16>
    %117 = vector.shape_cast %116 : vector<1x8x64xbf16> to vector<8x64xbf16>
    %cst_83 = arith.constant dense<0.000000e+00> : vector<16x64xf32>
    %118 = tpu.matmul %115, %117, %cst_83 {dimension_numbers = #tpu.dot_dimension_numbers<[1], [0], [0], [1], [0, 0, 1, 1], [], []>} : vector<16x8xbf16>, vector<8x64xbf16>, vector<16x64xf32> -> vector<16x64xf32>
    %119 = arith.addf %74, %118 : vector<16x64xf32>
    %c0_84 = arith.constant 0 : index
    %c2_85 = arith.constant 2 : index
    %c0_86 = arith.constant 0 : index
    %c0_87 = arith.constant 0 : index
    %120 = vector.load %arg4[%c0_84, %c2_85, %c0_86, %c0_87] : memref<3x8x64x8xbf16, #tpu.memory_space<vmem>>, vector<1x1x64x8xbf16>
    %121 = vector.shape_cast %120 : vector<1x1x64x8xbf16> to vector<64x8xbf16>
    %c1_88 = arith.constant 1 : index
    %c2_89 = arith.constant 2 : index
    %c0_90 = arith.constant 0 : index
    %c0_91 = arith.constant 0 : index
    %122 = vector.load %arg4[%c1_88, %c2_89, %c0_90, %c0_91] : memref<3x8x64x8xbf16, #tpu.memory_space<vmem>>, vector<1x1x64x8xbf16>
    %123 = vector.shape_cast %122 : vector<1x1x64x8xbf16> to vector<64x8xbf16>
    %c2_92 = arith.constant 2 : index
    %c2_93 = arith.constant 2 : index
    %c0_94 = arith.constant 0 : index
    %c0_95 = arith.constant 0 : index
    %124 = vector.load %arg4[%c2_92, %c2_93, %c0_94, %c0_95] : memref<3x8x64x8xbf16, #tpu.memory_space<vmem>>, vector<1x1x64x8xbf16>
    %125 = vector.shape_cast %124 : vector<1x1x64x8xbf16> to vector<64x8xbf16>
    %cst_96 = arith.constant dense<0.000000e+00> : vector<16x8xf32>
    %126 = tpu.matmul %26, %121, %cst_96 {dimension_numbers = #tpu.dot_dimension_numbers<[1], [0], [0], [1], [0, 0, 1, 1], [], []>} : vector<16x64xbf16>, vector<64x8xbf16>, vector<16x8xf32> -> vector<16x8xf32>
    %c0_97 = arith.constant 0 : index
    %c2_98 = arith.constant 2 : index
    %c0_99 = arith.constant 0 : index
    %c0_100 = arith.constant 0 : index
    %127 = vector.load %arg5[%c0_97, %c2_98, %c0_99, %c0_100] : memref<3x8x1x8xf32, #tpu.memory_space<vmem>>, vector<1x1x1x8xf32>
    %128 = vector.shape_cast %127 : vector<1x1x1x8xf32> to vector<1x8xf32>
    %129 = vector.broadcast %128 : vector<1x8xf32> to vector<16x8xf32>
    %130 = arith.addf %126, %129 : vector<16x8xf32>
    %cst_101 = arith.constant dense<0.000000e+00> : vector<16x8xf32>
    %131 = tpu.matmul %26, %123, %cst_101 {dimension_numbers = #tpu.dot_dimension_numbers<[1], [0], [0], [1], [0, 0, 1, 1], [], []>} : vector<16x64xbf16>, vector<64x8xbf16>, vector<16x8xf32> -> vector<16x8xf32>
    %c1_102 = arith.constant 1 : index
    %c2_103 = arith.constant 2 : index
    %c0_104 = arith.constant 0 : index
    %c0_105 = arith.constant 0 : index
    %132 = vector.load %arg5[%c1_102, %c2_103, %c0_104, %c0_105] : memref<3x8x1x8xf32, #tpu.memory_space<vmem>>, vector<1x1x1x8xf32>
    %133 = vector.shape_cast %132 : vector<1x1x1x8xf32> to vector<1x8xf32>
    %134 = vector.broadcast %133 : vector<1x8xf32> to vector<16x8xf32>
    %135 = arith.addf %131, %134 : vector<16x8xf32>
    %cst_106 = arith.constant dense<0.000000e+00> : vector<16x8xf32>
    %136 = tpu.matmul %26, %125, %cst_106 {dimension_numbers = #tpu.dot_dimension_numbers<[1], [0], [0], [1], [0, 0, 1, 1], [], []>} : vector<16x64xbf16>, vector<64x8xbf16>, vector<16x8xf32> -> vector<16x8xf32>
    %c2_107 = arith.constant 2 : index
    %c2_108 = arith.constant 2 : index
    %c0_109 = arith.constant 0 : index
    %c0_110 = arith.constant 0 : index
    %137 = vector.load %arg5[%c2_107, %c2_108, %c0_109, %c0_110] : memref<3x8x1x8xf32, #tpu.memory_space<vmem>>, vector<1x1x1x8xf32>
    %138 = vector.shape_cast %137 : vector<1x1x1x8xf32> to vector<1x8xf32>
    %139 = vector.broadcast %138 : vector<1x8xf32> to vector<16x8xf32>
    %140 = arith.addf %136, %139 : vector<16x8xf32>
    %141 = arith.truncf %130 : vector<16x8xf32> to vector<16x8xbf16>
    %142 = arith.truncf %135 : vector<16x8xf32> to vector<16x8xbf16>
    %cst_111 = arith.constant dense<0.000000e+00> : vector<16x16xf32>
    %143 = tpu.matmul %141, %142, %cst_111 {dimension_numbers = #tpu.dot_dimension_numbers<[1], [1], [0], [0], [0, 0, 1, 0], [], []>} : vector<16x8xbf16>, vector<16x8xbf16>, vector<16x16xf32> -> vector<16x16xf32>
    %cst_112 = arith.constant 0.353553385 : f32
    %144 = vector.broadcast %cst_112 : f32 to vector<16x16xf32>
    %145 = arith.mulf %143, %144 : vector<16x16xf32>
    %146 = arith.addf %145, %28 : vector<16x16xf32>
    %cst_113 = arith.constant dense<0xFF800000> : vector<16xf32>
    %147 = vector.multi_reduction <maximumf>, %146, %cst_113 [1] : vector<16x16xf32> to vector<16xf32>
    %148 = vector.shape_cast %147 : vector<16xf32> to vector<16x1xf32>
    %149 = vector.broadcast %148 : vector<16x1xf32> to vector<16x16xf32>
    %150 = arith.subf %146, %149 : vector<16x16xf32>
    %151 = math.exp %150 : vector<16x16xf32>
    %cst_114 = arith.constant dense<0.000000e+00> : vector<16xf32>
    %152 = vector.multi_reduction <add>, %151, %cst_114 [1] : vector<16x16xf32> to vector<16xf32>
    %153 = vector.shape_cast %152 : vector<16xf32> to vector<16x1xf32>
    %154 = tpu.reciprocal %153 {approx = true} : vector<16x1xf32> -> vector<16x1xf32>
    %155 = vector.broadcast %154 : vector<16x1xf32> to vector<16x16xf32>
    %156 = arith.mulf %151, %155 : vector<16x16xf32>
    %157 = arith.truncf %156 : vector<16x16xf32> to vector<16x16xbf16>
    %158 = arith.truncf %140 : vector<16x8xf32> to vector<16x8xbf16>
    %cst_115 = arith.constant dense<0.000000e+00> : vector<16x8xf32>
    %159 = tpu.matmul %157, %158, %cst_115 {dimension_numbers = #tpu.dot_dimension_numbers<[1], [0], [0], [1], [0, 0, 1, 1], [], []>} : vector<16x16xbf16>, vector<16x8xbf16>, vector<16x8xf32> -> vector<16x8xf32>
    %160 = arith.truncf %159 : vector<16x8xf32> to vector<16x8xbf16>
    %c2_116 = arith.constant 2 : index
    %c0_117 = arith.constant 0 : index
    %c0_118 = arith.constant 0 : index
    %161 = vector.load %arg6[%c2_116, %c0_117, %c0_118] : memref<8x8x64xbf16, #tpu.memory_space<vmem>>, vector<1x8x64xbf16>
    %162 = vector.shape_cast %161 : vector<1x8x64xbf16> to vector<8x64xbf16>
    %cst_119 = arith.constant dense<0.000000e+00> : vector<16x64xf32>
    %163 = tpu.matmul %160, %162, %cst_119 {dimension_numbers = #tpu.dot_dimension_numbers<[1], [0], [0], [1], [0, 0, 1, 1], [], []>} : vector<16x8xbf16>, vector<8x64xbf16>, vector<16x64xf32> -> vector<16x64xf32>
    %164 = arith.addf %119, %163 : vector<16x64xf32>
    %c0_120 = arith.constant 0 : index
    %c3 = arith.constant 3 : index
    %c0_121 = arith.constant 0 : index
    %c0_122 = arith.constant 0 : index
    %165 = vector.load %arg4[%c0_120, %c3, %c0_121, %c0_122] : memref<3x8x64x8xbf16, #tpu.memory_space<vmem>>, vector<1x1x64x8xbf16>
    %166 = vector.shape_cast %165 : vector<1x1x64x8xbf16> to vector<64x8xbf16>
    %c1_123 = arith.constant 1 : index
    %c3_124 = arith.constant 3 : index
    %c0_125 = arith.constant 0 : index
    %c0_126 = arith.constant 0 : index
    %167 = vector.load %arg4[%c1_123, %c3_124, %c0_125, %c0_126] : memref<3x8x64x8xbf16, #tpu.memory_space<vmem>>, vector<1x1x64x8xbf16>
    %168 = vector.shape_cast %167 : vector<1x1x64x8xbf16> to vector<64x8xbf16>
    %c2_127 = arith.constant 2 : index
    %c3_128 = arith.constant 3 : index
    %c0_129 = arith.constant 0 : index
    %c0_130 = arith.constant 0 : index
    %169 = vector.load %arg4[%c2_127, %c3_128, %c0_129, %c0_130] : memref<3x8x64x8xbf16, #tpu.memory_space<vmem>>, vector<1x1x64x8xbf16>
    %170 = vector.shape_cast %169 : vector<1x1x64x8xbf16> to vector<64x8xbf16>
    %cst_131 = arith.constant dense<0.000000e+00> : vector<16x8xf32>
    %171 = tpu.matmul %26, %166, %cst_131 {dimension_numbers = #tpu.dot_dimension_numbers<[1], [0], [0], [1], [0, 0, 1, 1], [], []>} : vector<16x64xbf16>, vector<64x8xbf16>, vector<16x8xf32> -> vector<16x8xf32>
    %c0_132 = arith.constant 0 : index
    %c3_133 = arith.constant 3 : index
    %c0_134 = arith.constant 0 : index
    %c0_135 = arith.constant 0 : index
    %172 = vector.load %arg5[%c0_132, %c3_133, %c0_134, %c0_135] : memref<3x8x1x8xf32, #tpu.memory_space<vmem>>, vector<1x1x1x8xf32>
    %173 = vector.shape_cast %172 : vector<1x1x1x8xf32> to vector<1x8xf32>
    %174 = vector.broadcast %173 : vector<1x8xf32> to vector<16x8xf32>
    %175 = arith.addf %171, %174 : vector<16x8xf32>
    %cst_136 = arith.constant dense<0.000000e+00> : vector<16x8xf32>
    %176 = tpu.matmul %26, %168, %cst_136 {dimension_numbers = #tpu.dot_dimension_numbers<[1], [0], [0], [1], [0, 0, 1, 1], [], []>} : vector<16x64xbf16>, vector<64x8xbf16>, vector<16x8xf32> -> vector<16x8xf32>
    %c1_137 = arith.constant 1 : index
    %c3_138 = arith.constant 3 : index
    %c0_139 = arith.constant 0 : index
    %c0_140 = arith.constant 0 : index
    %177 = vector.load %arg5[%c1_137, %c3_138, %c0_139, %c0_140] : memref<3x8x1x8xf32, #tpu.memory_space<vmem>>, vector<1x1x1x8xf32>
    %178 = vector.shape_cast %177 : vector<1x1x1x8xf32> to vector<1x8xf32>
    %179 = vector.broadcast %178 : vector<1x8xf32> to vector<16x8xf32>
    %180 = arith.addf %176, %179 : vector<16x8xf32>
    %cst_141 = arith.constant dense<0.000000e+00> : vector<16x8xf32>
    %181 = tpu.matmul %26, %170, %cst_141 {dimension_numbers = #tpu.dot_dimension_numbers<[1], [0], [0], [1], [0, 0, 1, 1], [], []>} : vector<16x64xbf16>, vector<64x8xbf16>, vector<16x8xf32> -> vector<16x8xf32>
    %c2_142 = arith.constant 2 : index
    %c3_143 = arith.constant 3 : index
    %c0_144 = arith.constant 0 : index
    %c0_145 = arith.constant 0 : index
    %182 = vector.load %arg5[%c2_142, %c3_143, %c0_144, %c0_145] : memref<3x8x1x8xf32, #tpu.memory_space<vmem>>, vector<1x1x1x8xf32>
    %183 = vector.shape_cast %182 : vector<1x1x1x8xf32> to vector<1x8xf32>
    %184 = vector.broadcast %183 : vector<1x8xf32> to vector<16x8xf32>
    %185 = arith.addf %181, %184 : vector<16x8xf32>
    %186 = arith.truncf %175 : vector<16x8xf32> to vector<16x8xbf16>
    %187 = arith.truncf %180 : vector<16x8xf32> to vector<16x8xbf16>
    %cst_146 = arith.constant dense<0.000000e+00> : vector<16x16xf32>
    %188 = tpu.matmul %186, %187, %cst_146 {dimension_numbers = #tpu.dot_dimension_numbers<[1], [1], [0], [0], [0, 0, 1, 0], [], []>} : vector<16x8xbf16>, vector<16x8xbf16>, vector<16x16xf32> -> vector<16x16xf32>
    %cst_147 = arith.constant 0.353553385 : f32
    %189 = vector.broadcast %cst_147 : f32 to vector<16x16xf32>
    %190 = arith.mulf %188, %189 : vector<16x16xf32>
    %191 = arith.addf %190, %28 : vector<16x16xf32>
    %cst_148 = arith.constant dense<0xFF800000> : vector<16xf32>
    %192 = vector.multi_reduction <maximumf>, %191, %cst_148 [1] : vector<16x16xf32> to vector<16xf32>
    %193 = vector.shape_cast %192 : vector<16xf32> to vector<16x1xf32>
    %194 = vector.broadcast %193 : vector<16x1xf32> to vector<16x16xf32>
    %195 = arith.subf %191, %194 : vector<16x16xf32>
    %196 = math.exp %195 : vector<16x16xf32>
    %cst_149 = arith.constant dense<0.000000e+00> : vector<16xf32>
    %197 = vector.multi_reduction <add>, %196, %cst_149 [1] : vector<16x16xf32> to vector<16xf32>
    %198 = vector.shape_cast %197 : vector<16xf32> to vector<16x1xf32>
    %199 = tpu.reciprocal %198 {approx = true} : vector<16x1xf32> -> vector<16x1xf32>
    %200 = vector.broadcast %199 : vector<16x1xf32> to vector<16x16xf32>
    %201 = arith.mulf %196, %200 : vector<16x16xf32>
    %202 = arith.truncf %201 : vector<16x16xf32> to vector<16x16xbf16>
    %203 = arith.truncf %185 : vector<16x8xf32> to vector<16x8xbf16>
    %cst_150 = arith.constant dense<0.000000e+00> : vector<16x8xf32>
    %204 = tpu.matmul %202, %203, %cst_150 {dimension_numbers = #tpu.dot_dimension_numbers<[1], [0], [0], [1], [0, 0, 1, 1], [], []>} : vector<16x16xbf16>, vector<16x8xbf16>, vector<16x8xf32> -> vector<16x8xf32>
    %205 = arith.truncf %204 : vector<16x8xf32> to vector<16x8xbf16>
    %c3_151 = arith.constant 3 : index
    %c0_152 = arith.constant 0 : index
    %c0_153 = arith.constant 0 : index
    %206 = vector.load %arg6[%c3_151, %c0_152, %c0_153] : memref<8x8x64xbf16, #tpu.memory_space<vmem>>, vector<1x8x64xbf16>
    %207 = vector.shape_cast %206 : vector<1x8x64xbf16> to vector<8x64xbf16>
    %cst_154 = arith.constant dense<0.000000e+00> : vector<16x64xf32>
    %208 = tpu.matmul %205, %207, %cst_154 {dimension_numbers = #tpu.dot_dimension_numbers<[1], [0], [0], [1], [0, 0, 1, 1], [], []>} : vector<16x8xbf16>, vector<8x64xbf16>, vector<16x64xf32> -> vector<16x64xf32>
    %209 = arith.addf %164, %208 : vector<16x64xf32>
    %c0_155 = arith.constant 0 : index
    %c4 = arith.constant 4 : index
    %c0_156 = arith.constant 0 : index
    %c0_157 = arith.constant 0 : index
    %210 = vector.load %arg4[%c0_155, %c4, %c0_156, %c0_157] : memref<3x8x64x8xbf16, #tpu.memory_space<vmem>>, vector<1x1x64x8xbf16>
    %211 = vector.shape_cast %210 : vector<1x1x64x8xbf16> to vector<64x8xbf16>
    %c1_158 = arith.constant 1 : index
    %c4_159 = arith.constant 4 : index
    %c0_160 = arith.constant 0 : index
    %c0_161 = arith.constant 0 : index
    %212 = vector.load %arg4[%c1_158, %c4_159, %c0_160, %c0_161] : memref<3x8x64x8xbf16, #tpu.memory_space<vmem>>, vector<1x1x64x8xbf16>
    %213 = vector.shape_cast %212 : vector<1x1x64x8xbf16> to vector<64x8xbf16>
    %c2_162 = arith.constant 2 : index
    %c4_163 = arith.constant 4 : index
    %c0_164 = arith.constant 0 : index
    %c0_165 = arith.constant 0 : index
    %214 = vector.load %arg4[%c2_162, %c4_163, %c0_164, %c0_165] : memref<3x8x64x8xbf16, #tpu.memory_space<vmem>>, vector<1x1x64x8xbf16>
    %215 = vector.shape_cast %214 : vector<1x1x64x8xbf16> to vector<64x8xbf16>
    %cst_166 = arith.constant dense<0.000000e+00> : vector<16x8xf32>
    %216 = tpu.matmul %26, %211, %cst_166 {dimension_numbers = #tpu.dot_dimension_numbers<[1], [0], [0], [1], [0, 0, 1, 1], [], []>} : vector<16x64xbf16>, vector<64x8xbf16>, vector<16x8xf32> -> vector<16x8xf32>
    %c0_167 = arith.constant 0 : index
    %c4_168 = arith.constant 4 : index
    %c0_169 = arith.constant 0 : index
    %c0_170 = arith.constant 0 : index
    %217 = vector.load %arg5[%c0_167, %c4_168, %c0_169, %c0_170] : memref<3x8x1x8xf32, #tpu.memory_space<vmem>>, vector<1x1x1x8xf32>
    %218 = vector.shape_cast %217 : vector<1x1x1x8xf32> to vector<1x8xf32>
    %219 = vector.broadcast %218 : vector<1x8xf32> to vector<16x8xf32>
    %220 = arith.addf %216, %219 : vector<16x8xf32>
    %cst_171 = arith.constant dense<0.000000e+00> : vector<16x8xf32>
    %221 = tpu.matmul %26, %213, %cst_171 {dimension_numbers = #tpu.dot_dimension_numbers<[1], [0], [0], [1], [0, 0, 1, 1], [], []>} : vector<16x64xbf16>, vector<64x8xbf16>, vector<16x8xf32> -> vector<16x8xf32>
    %c1_172 = arith.constant 1 : index
    %c4_173 = arith.constant 4 : index
    %c0_174 = arith.constant 0 : index
    %c0_175 = arith.constant 0 : index
    %222 = vector.load %arg5[%c1_172, %c4_173, %c0_174, %c0_175] : memref<3x8x1x8xf32, #tpu.memory_space<vmem>>, vector<1x1x1x8xf32>
    %223 = vector.shape_cast %222 : vector<1x1x1x8xf32> to vector<1x8xf32>
    %224 = vector.broadcast %223 : vector<1x8xf32> to vector<16x8xf32>
    %225 = arith.addf %221, %224 : vector<16x8xf32>
    %cst_176 = arith.constant dense<0.000000e+00> : vector<16x8xf32>
    %226 = tpu.matmul %26, %215, %cst_176 {dimension_numbers = #tpu.dot_dimension_numbers<[1], [0], [0], [1], [0, 0, 1, 1], [], []>} : vector<16x64xbf16>, vector<64x8xbf16>, vector<16x8xf32> -> vector<16x8xf32>
    %c2_177 = arith.constant 2 : index
    %c4_178 = arith.constant 4 : index
    %c0_179 = arith.constant 0 : index
    %c0_180 = arith.constant 0 : index
    %227 = vector.load %arg5[%c2_177, %c4_178, %c0_179, %c0_180] : memref<3x8x1x8xf32, #tpu.memory_space<vmem>>, vector<1x1x1x8xf32>
    %228 = vector.shape_cast %227 : vector<1x1x1x8xf32> to vector<1x8xf32>
    %229 = vector.broadcast %228 : vector<1x8xf32> to vector<16x8xf32>
    %230 = arith.addf %226, %229 : vector<16x8xf32>
    %231 = arith.truncf %220 : vector<16x8xf32> to vector<16x8xbf16>
    %232 = arith.truncf %225 : vector<16x8xf32> to vector<16x8xbf16>
    %cst_181 = arith.constant dense<0.000000e+00> : vector<16x16xf32>
    %233 = tpu.matmul %231, %232, %cst_181 {dimension_numbers = #tpu.dot_dimension_numbers<[1], [1], [0], [0], [0, 0, 1, 0], [], []>} : vector<16x8xbf16>, vector<16x8xbf16>, vector<16x16xf32> -> vector<16x16xf32>
    %cst_182 = arith.constant 0.353553385 : f32
    %234 = vector.broadcast %cst_182 : f32 to vector<16x16xf32>
    %235 = arith.mulf %233, %234 : vector<16x16xf32>
    %236 = arith.addf %235, %28 : vector<16x16xf32>
    %cst_183 = arith.constant dense<0xFF800000> : vector<16xf32>
    %237 = vector.multi_reduction <maximumf>, %236, %cst_183 [1] : vector<16x16xf32> to vector<16xf32>
    %238 = vector.shape_cast %237 : vector<16xf32> to vector<16x1xf32>
    %239 = vector.broadcast %238 : vector<16x1xf32> to vector<16x16xf32>
    %240 = arith.subf %236, %239 : vector<16x16xf32>
    %241 = math.exp %240 : vector<16x16xf32>
    %cst_184 = arith.constant dense<0.000000e+00> : vector<16xf32>
    %242 = vector.multi_reduction <add>, %241, %cst_184 [1] : vector<16x16xf32> to vector<16xf32>
    %243 = vector.shape_cast %242 : vector<16xf32> to vector<16x1xf32>
    %244 = tpu.reciprocal %243 {approx = true} : vector<16x1xf32> -> vector<16x1xf32>
    %245 = vector.broadcast %244 : vector<16x1xf32> to vector<16x16xf32>
    %246 = arith.mulf %241, %245 : vector<16x16xf32>
    %247 = arith.truncf %246 : vector<16x16xf32> to vector<16x16xbf16>
    %248 = arith.truncf %230 : vector<16x8xf32> to vector<16x8xbf16>
    %cst_185 = arith.constant dense<0.000000e+00> : vector<16x8xf32>
    %249 = tpu.matmul %247, %248, %cst_185 {dimension_numbers = #tpu.dot_dimension_numbers<[1], [0], [0], [1], [0, 0, 1, 1], [], []>} : vector<16x16xbf16>, vector<16x8xbf16>, vector<16x8xf32> -> vector<16x8xf32>
    %250 = arith.truncf %249 : vector<16x8xf32> to vector<16x8xbf16>
    %c4_186 = arith.constant 4 : index
    %c0_187 = arith.constant 0 : index
    %c0_188 = arith.constant 0 : index
    %251 = vector.load %arg6[%c4_186, %c0_187, %c0_188] : memref<8x8x64xbf16, #tpu.memory_space<vmem>>, vector<1x8x64xbf16>
    %252 = vector.shape_cast %251 : vector<1x8x64xbf16> to vector<8x64xbf16>
    %cst_189 = arith.constant dense<0.000000e+00> : vector<16x64xf32>
    %253 = tpu.matmul %250, %252, %cst_189 {dimension_numbers = #tpu.dot_dimension_numbers<[1], [0], [0], [1], [0, 0, 1, 1], [], []>} : vector<16x8xbf16>, vector<8x64xbf16>, vector<16x64xf32> -> vector<16x64xf32>
    %254 = arith.addf %209, %253 : vector<16x64xf32>
    %c0_190 = arith.constant 0 : index
    %c5 = arith.constant 5 : index
    %c0_191 = arith.constant 0 : index
    %c0_192 = arith.constant 0 : index
    %255 = vector.load %arg4[%c0_190, %c5, %c0_191, %c0_192] : memref<3x8x64x8xbf16, #tpu.memory_space<vmem>>, vector<1x1x64x8xbf16>
    %256 = vector.shape_cast %255 : vector<1x1x64x8xbf16> to vector<64x8xbf16>
    %c1_193 = arith.constant 1 : index
    %c5_194 = arith.constant 5 : index
    %c0_195 = arith.constant 0 : index
    %c0_196 = arith.constant 0 : index
    %257 = vector.load %arg4[%c1_193, %c5_194, %c0_195, %c0_196] : memref<3x8x64x8xbf16, #tpu.memory_space<vmem>>, vector<1x1x64x8xbf16>
    %258 = vector.shape_cast %257 : vector<1x1x64x8xbf16> to vector<64x8xbf16>
    %c2_197 = arith.constant 2 : index
    %c5_198 = arith.constant 5 : index
    %c0_199 = arith.constant 0 : index
    %c0_200 = arith.constant 0 : index
    %259 = vector.load %arg4[%c2_197, %c5_198, %c0_199, %c0_200] : memref<3x8x64x8xbf16, #tpu.memory_space<vmem>>, vector<1x1x64x8xbf16>
    %260 = vector.shape_cast %259 : vector<1x1x64x8xbf16> to vector<64x8xbf16>
    %cst_201 = arith.constant dense<0.000000e+00> : vector<16x8xf32>
    %261 = tpu.matmul %26, %256, %cst_201 {dimension_numbers = #tpu.dot_dimension_numbers<[1], [0], [0], [1], [0, 0, 1, 1], [], []>} : vector<16x64xbf16>, vector<64x8xbf16>, vector<16x8xf32> -> vector<16x8xf32>
    %c0_202 = arith.constant 0 : index
    %c5_203 = arith.constant 5 : index
    %c0_204 = arith.constant 0 : index
    %c0_205 = arith.constant 0 : index
    %262 = vector.load %arg5[%c0_202, %c5_203, %c0_204, %c0_205] : memref<3x8x1x8xf32, #tpu.memory_space<vmem>>, vector<1x1x1x8xf32>
    %263 = vector.shape_cast %262 : vector<1x1x1x8xf32> to vector<1x8xf32>
    %264 = vector.broadcast %263 : vector<1x8xf32> to vector<16x8xf32>
    %265 = arith.addf %261, %264 : vector<16x8xf32>
    %cst_206 = arith.constant dense<0.000000e+00> : vector<16x8xf32>
    %266 = tpu.matmul %26, %258, %cst_206 {dimension_numbers = #tpu.dot_dimension_numbers<[1], [0], [0], [1], [0, 0, 1, 1], [], []>} : vector<16x64xbf16>, vector<64x8xbf16>, vector<16x8xf32> -> vector<16x8xf32>
    %c1_207 = arith.constant 1 : index
    %c5_208 = arith.constant 5 : index
    %c0_209 = arith.constant 0 : index
    %c0_210 = arith.constant 0 : index
    %267 = vector.load %arg5[%c1_207, %c5_208, %c0_209, %c0_210] : memref<3x8x1x8xf32, #tpu.memory_space<vmem>>, vector<1x1x1x8xf32>
    %268 = vector.shape_cast %267 : vector<1x1x1x8xf32> to vector<1x8xf32>
    %269 = vector.broadcast %268 : vector<1x8xf32> to vector<16x8xf32>
    %270 = arith.addf %266, %269 : vector<16x8xf32>
    %cst_211 = arith.constant dense<0.000000e+00> : vector<16x8xf32>
    %271 = tpu.matmul %26, %260, %cst_211 {dimension_numbers = #tpu.dot_dimension_numbers<[1], [0], [0], [1], [0, 0, 1, 1], [], []>} : vector<16x64xbf16>, vector<64x8xbf16>, vector<16x8xf32> -> vector<16x8xf32>
    %c2_212 = arith.constant 2 : index
    %c5_213 = arith.constant 5 : index
    %c0_214 = arith.constant 0 : index
    %c0_215 = arith.constant 0 : index
    %272 = vector.load %arg5[%c2_212, %c5_213, %c0_214, %c0_215] : memref<3x8x1x8xf32, #tpu.memory_space<vmem>>, vector<1x1x1x8xf32>
    %273 = vector.shape_cast %272 : vector<1x1x1x8xf32> to vector<1x8xf32>
    %274 = vector.broadcast %273 : vector<1x8xf32> to vector<16x8xf32>
    %275 = arith.addf %271, %274 : vector<16x8xf32>
    %276 = arith.truncf %265 : vector<16x8xf32> to vector<16x8xbf16>
    %277 = arith.truncf %270 : vector<16x8xf32> to vector<16x8xbf16>
    %cst_216 = arith.constant dense<0.000000e+00> : vector<16x16xf32>
    %278 = tpu.matmul %276, %277, %cst_216 {dimension_numbers = #tpu.dot_dimension_numbers<[1], [1], [0], [0], [0, 0, 1, 0], [], []>} : vector<16x8xbf16>, vector<16x8xbf16>, vector<16x16xf32> -> vector<16x16xf32>
    %cst_217 = arith.constant 0.353553385 : f32
    %279 = vector.broadcast %cst_217 : f32 to vector<16x16xf32>
    %280 = arith.mulf %278, %279 : vector<16x16xf32>
    %281 = arith.addf %280, %28 : vector<16x16xf32>
    %cst_218 = arith.constant dense<0xFF800000> : vector<16xf32>
    %282 = vector.multi_reduction <maximumf>, %281, %cst_218 [1] : vector<16x16xf32> to vector<16xf32>
    %283 = vector.shape_cast %282 : vector<16xf32> to vector<16x1xf32>
    %284 = vector.broadcast %283 : vector<16x1xf32> to vector<16x16xf32>
    %285 = arith.subf %281, %284 : vector<16x16xf32>
    %286 = math.exp %285 : vector<16x16xf32>
    %cst_219 = arith.constant dense<0.000000e+00> : vector<16xf32>
    %287 = vector.multi_reduction <add>, %286, %cst_219 [1] : vector<16x16xf32> to vector<16xf32>
    %288 = vector.shape_cast %287 : vector<16xf32> to vector<16x1xf32>
    %289 = tpu.reciprocal %288 {approx = true} : vector<16x1xf32> -> vector<16x1xf32>
    %290 = vector.broadcast %289 : vector<16x1xf32> to vector<16x16xf32>
    %291 = arith.mulf %286, %290 : vector<16x16xf32>
    %292 = arith.truncf %291 : vector<16x16xf32> to vector<16x16xbf16>
    %293 = arith.truncf %275 : vector<16x8xf32> to vector<16x8xbf16>
    %cst_220 = arith.constant dense<0.000000e+00> : vector<16x8xf32>
    %294 = tpu.matmul %292, %293, %cst_220 {dimension_numbers = #tpu.dot_dimension_numbers<[1], [0], [0], [1], [0, 0, 1, 1], [], []>} : vector<16x16xbf16>, vector<16x8xbf16>, vector<16x8xf32> -> vector<16x8xf32>
    %295 = arith.truncf %294 : vector<16x8xf32> to vector<16x8xbf16>
    %c5_221 = arith.constant 5 : index
    %c0_222 = arith.constant 0 : index
    %c0_223 = arith.constant 0 : index
    %296 = vector.load %arg6[%c5_221, %c0_222, %c0_223] : memref<8x8x64xbf16, #tpu.memory_space<vmem>>, vector<1x8x64xbf16>
    %297 = vector.shape_cast %296 : vector<1x8x64xbf16> to vector<8x64xbf16>
    %cst_224 = arith.constant dense<0.000000e+00> : vector<16x64xf32>
    %298 = tpu.matmul %295, %297, %cst_224 {dimension_numbers = #tpu.dot_dimension_numbers<[1], [0], [0], [1], [0, 0, 1, 1], [], []>} : vector<16x8xbf16>, vector<8x64xbf16>, vector<16x64xf32> -> vector<16x64xf32>
    %299 = arith.addf %254, %298 : vector<16x64xf32>
    %c0_225 = arith.constant 0 : index
    %c6 = arith.constant 6 : index
    %c0_226 = arith.constant 0 : index
    %c0_227 = arith.constant 0 : index
    %300 = vector.load %arg4[%c0_225, %c6, %c0_226, %c0_227] : memref<3x8x64x8xbf16, #tpu.memory_space<vmem>>, vector<1x1x64x8xbf16>
    %301 = vector.shape_cast %300 : vector<1x1x64x8xbf16> to vector<64x8xbf16>
    %c1_228 = arith.constant 1 : index
    %c6_229 = arith.constant 6 : index
    %c0_230 = arith.constant 0 : index
    %c0_231 = arith.constant 0 : index
    %302 = vector.load %arg4[%c1_228, %c6_229, %c0_230, %c0_231] : memref<3x8x64x8xbf16, #tpu.memory_space<vmem>>, vector<1x1x64x8xbf16>
    %303 = vector.shape_cast %302 : vector<1x1x64x8xbf16> to vector<64x8xbf16>
    %c2_232 = arith.constant 2 : index
    %c6_233 = arith.constant 6 : index
    %c0_234 = arith.constant 0 : index
    %c0_235 = arith.constant 0 : index
    %304 = vector.load %arg4[%c2_232, %c6_233, %c0_234, %c0_235] : memref<3x8x64x8xbf16, #tpu.memory_space<vmem>>, vector<1x1x64x8xbf16>
    %305 = vector.shape_cast %304 : vector<1x1x64x8xbf16> to vector<64x8xbf16>
    %cst_236 = arith.constant dense<0.000000e+00> : vector<16x8xf32>
    %306 = tpu.matmul %26, %301, %cst_236 {dimension_numbers = #tpu.dot_dimension_numbers<[1], [0], [0], [1], [0, 0, 1, 1], [], []>} : vector<16x64xbf16>, vector<64x8xbf16>, vector<16x8xf32> -> vector<16x8xf32>
    %c0_237 = arith.constant 0 : index
    %c6_238 = arith.constant 6 : index
    %c0_239 = arith.constant 0 : index
    %c0_240 = arith.constant 0 : index
    %307 = vector.load %arg5[%c0_237, %c6_238, %c0_239, %c0_240] : memref<3x8x1x8xf32, #tpu.memory_space<vmem>>, vector<1x1x1x8xf32>
    %308 = vector.shape_cast %307 : vector<1x1x1x8xf32> to vector<1x8xf32>
    %309 = vector.broadcast %308 : vector<1x8xf32> to vector<16x8xf32>
    %310 = arith.addf %306, %309 : vector<16x8xf32>
    %cst_241 = arith.constant dense<0.000000e+00> : vector<16x8xf32>
    %311 = tpu.matmul %26, %303, %cst_241 {dimension_numbers = #tpu.dot_dimension_numbers<[1], [0], [0], [1], [0, 0, 1, 1], [], []>} : vector<16x64xbf16>, vector<64x8xbf16>, vector<16x8xf32> -> vector<16x8xf32>
    %c1_242 = arith.constant 1 : index
    %c6_243 = arith.constant 6 : index
    %c0_244 = arith.constant 0 : index
    %c0_245 = arith.constant 0 : index
    %312 = vector.load %arg5[%c1_242, %c6_243, %c0_244, %c0_245] : memref<3x8x1x8xf32, #tpu.memory_space<vmem>>, vector<1x1x1x8xf32>
    %313 = vector.shape_cast %312 : vector<1x1x1x8xf32> to vector<1x8xf32>
    %314 = vector.broadcast %313 : vector<1x8xf32> to vector<16x8xf32>
    %315 = arith.addf %311, %314 : vector<16x8xf32>
    %cst_246 = arith.constant dense<0.000000e+00> : vector<16x8xf32>
    %316 = tpu.matmul %26, %305, %cst_246 {dimension_numbers = #tpu.dot_dimension_numbers<[1], [0], [0], [1], [0, 0, 1, 1], [], []>} : vector<16x64xbf16>, vector<64x8xbf16>, vector<16x8xf32> -> vector<16x8xf32>
    %c2_247 = arith.constant 2 : index
    %c6_248 = arith.constant 6 : index
    %c0_249 = arith.constant 0 : index
    %c0_250 = arith.constant 0 : index
    %317 = vector.load %arg5[%c2_247, %c6_248, %c0_249, %c0_250] : memref<3x8x1x8xf32, #tpu.memory_space<vmem>>, vector<1x1x1x8xf32>
    %318 = vector.shape_cast %317 : vector<1x1x1x8xf32> to vector<1x8xf32>
    %319 = vector.broadcast %318 : vector<1x8xf32> to vector<16x8xf32>
    %320 = arith.addf %316, %319 : vector<16x8xf32>
    %321 = arith.truncf %310 : vector<16x8xf32> to vector<16x8xbf16>
    %322 = arith.truncf %315 : vector<16x8xf32> to vector<16x8xbf16>
    %cst_251 = arith.constant dense<0.000000e+00> : vector<16x16xf32>
    %323 = tpu.matmul %321, %322, %cst_251 {dimension_numbers = #tpu.dot_dimension_numbers<[1], [1], [0], [0], [0, 0, 1, 0], [], []>} : vector<16x8xbf16>, vector<16x8xbf16>, vector<16x16xf32> -> vector<16x16xf32>
    %cst_252 = arith.constant 0.353553385 : f32
    %324 = vector.broadcast %cst_252 : f32 to vector<16x16xf32>
    %325 = arith.mulf %323, %324 : vector<16x16xf32>
    %326 = arith.addf %325, %28 : vector<16x16xf32>
    %cst_253 = arith.constant dense<0xFF800000> : vector<16xf32>
    %327 = vector.multi_reduction <maximumf>, %326, %cst_253 [1] : vector<16x16xf32> to vector<16xf32>
    %328 = vector.shape_cast %327 : vector<16xf32> to vector<16x1xf32>
    %329 = vector.broadcast %328 : vector<16x1xf32> to vector<16x16xf32>
    %330 = arith.subf %326, %329 : vector<16x16xf32>
    %331 = math.exp %330 : vector<16x16xf32>
    %cst_254 = arith.constant dense<0.000000e+00> : vector<16xf32>
    %332 = vector.multi_reduction <add>, %331, %cst_254 [1] : vector<16x16xf32> to vector<16xf32>
    %333 = vector.shape_cast %332 : vector<16xf32> to vector<16x1xf32>
    %334 = tpu.reciprocal %333 {approx = true} : vector<16x1xf32> -> vector<16x1xf32>
    %335 = vector.broadcast %334 : vector<16x1xf32> to vector<16x16xf32>
    %336 = arith.mulf %331, %335 : vector<16x16xf32>
    %337 = arith.truncf %336 : vector<16x16xf32> to vector<16x16xbf16>
    %338 = arith.truncf %320 : vector<16x8xf32> to vector<16x8xbf16>
    %cst_255 = arith.constant dense<0.000000e+00> : vector<16x8xf32>
    %339 = tpu.matmul %337, %338, %cst_255 {dimension_numbers = #tpu.dot_dimension_numbers<[1], [0], [0], [1], [0, 0, 1, 1], [], []>} : vector<16x16xbf16>, vector<16x8xbf16>, vector<16x8xf32> -> vector<16x8xf32>
    %340 = arith.truncf %339 : vector<16x8xf32> to vector<16x8xbf16>
    %c6_256 = arith.constant 6 : index
    %c0_257 = arith.constant 0 : index
    %c0_258 = arith.constant 0 : index
    %341 = vector.load %arg6[%c6_256, %c0_257, %c0_258] : memref<8x8x64xbf16, #tpu.memory_space<vmem>>, vector<1x8x64xbf16>
    %342 = vector.shape_cast %341 : vector<1x8x64xbf16> to vector<8x64xbf16>
    %cst_259 = arith.constant dense<0.000000e+00> : vector<16x64xf32>
    %343 = tpu.matmul %340, %342, %cst_259 {dimension_numbers = #tpu.dot_dimension_numbers<[1], [0], [0], [1], [0, 0, 1, 1], [], []>} : vector<16x8xbf16>, vector<8x64xbf16>, vector<16x64xf32> -> vector<16x64xf32>
    %344 = arith.addf %299, %343 : vector<16x64xf32>
    %c0_260 = arith.constant 0 : index
    %c7 = arith.constant 7 : index
    %c0_261 = arith.constant 0 : index
    %c0_262 = arith.constant 0 : index
    %345 = vector.load %arg4[%c0_260, %c7, %c0_261, %c0_262] : memref<3x8x64x8xbf16, #tpu.memory_space<vmem>>, vector<1x1x64x8xbf16>
    %346 = vector.shape_cast %345 : vector<1x1x64x8xbf16> to vector<64x8xbf16>
    %c1_263 = arith.constant 1 : index
    %c7_264 = arith.constant 7 : index
    %c0_265 = arith.constant 0 : index
    %c0_266 = arith.constant 0 : index
    %347 = vector.load %arg4[%c1_263, %c7_264, %c0_265, %c0_266] : memref<3x8x64x8xbf16, #tpu.memory_space<vmem>>, vector<1x1x64x8xbf16>
    %348 = vector.shape_cast %347 : vector<1x1x64x8xbf16> to vector<64x8xbf16>
    %c2_267 = arith.constant 2 : index
    %c7_268 = arith.constant 7 : index
    %c0_269 = arith.constant 0 : index
    %c0_270 = arith.constant 0 : index
    %349 = vector.load %arg4[%c2_267, %c7_268, %c0_269, %c0_270] : memref<3x8x64x8xbf16, #tpu.memory_space<vmem>>, vector<1x1x64x8xbf16>
    %350 = vector.shape_cast %349 : vector<1x1x64x8xbf16> to vector<64x8xbf16>
    %cst_271 = arith.constant dense<0.000000e+00> : vector<16x8xf32>
    %351 = tpu.matmul %26, %346, %cst_271 {dimension_numbers = #tpu.dot_dimension_numbers<[1], [0], [0], [1], [0, 0, 1, 1], [], []>} : vector<16x64xbf16>, vector<64x8xbf16>, vector<16x8xf32> -> vector<16x8xf32>
    %c0_272 = arith.constant 0 : index
    %c7_273 = arith.constant 7 : index
    %c0_274 = arith.constant 0 : index
    %c0_275 = arith.constant 0 : index
    %352 = vector.load %arg5[%c0_272, %c7_273, %c0_274, %c0_275] : memref<3x8x1x8xf32, #tpu.memory_space<vmem>>, vector<1x1x1x8xf32>
    %353 = vector.shape_cast %352 : vector<1x1x1x8xf32> to vector<1x8xf32>
    %354 = vector.broadcast %353 : vector<1x8xf32> to vector<16x8xf32>
    %355 = arith.addf %351, %354 : vector<16x8xf32>
    %cst_276 = arith.constant dense<0.000000e+00> : vector<16x8xf32>
    %356 = tpu.matmul %26, %348, %cst_276 {dimension_numbers = #tpu.dot_dimension_numbers<[1], [0], [0], [1], [0, 0, 1, 1], [], []>} : vector<16x64xbf16>, vector<64x8xbf16>, vector<16x8xf32> -> vector<16x8xf32>
    %c1_277 = arith.constant 1 : index
    %c7_278 = arith.constant 7 : index
    %c0_279 = arith.constant 0 : index
    %c0_280 = arith.constant 0 : index
    %357 = vector.load %arg5[%c1_277, %c7_278, %c0_279, %c0_280] : memref<3x8x1x8xf32, #tpu.memory_space<vmem>>, vector<1x1x1x8xf32>
    %358 = vector.shape_cast %357 : vector<1x1x1x8xf32> to vector<1x8xf32>
    %359 = vector.broadcast %358 : vector<1x8xf32> to vector<16x8xf32>
    %360 = arith.addf %356, %359 : vector<16x8xf32>
    %cst_281 = arith.constant dense<0.000000e+00> : vector<16x8xf32>
    %361 = tpu.matmul %26, %350, %cst_281 {dimension_numbers = #tpu.dot_dimension_numbers<[1], [0], [0], [1], [0, 0, 1, 1], [], []>} : vector<16x64xbf16>, vector<64x8xbf16>, vector<16x8xf32> -> vector<16x8xf32>
    %c2_282 = arith.constant 2 : index
    %c7_283 = arith.constant 7 : index
    %c0_284 = arith.constant 0 : index
    %c0_285 = arith.constant 0 : index
    %362 = vector.load %arg5[%c2_282, %c7_283, %c0_284, %c0_285] : memref<3x8x1x8xf32, #tpu.memory_space<vmem>>, vector<1x1x1x8xf32>
    %363 = vector.shape_cast %362 : vector<1x1x1x8xf32> to vector<1x8xf32>
    %364 = vector.broadcast %363 : vector<1x8xf32> to vector<16x8xf32>
    %365 = arith.addf %361, %364 : vector<16x8xf32>
    %366 = arith.truncf %355 : vector<16x8xf32> to vector<16x8xbf16>
    %367 = arith.truncf %360 : vector<16x8xf32> to vector<16x8xbf16>
    %cst_286 = arith.constant dense<0.000000e+00> : vector<16x16xf32>
    %368 = tpu.matmul %366, %367, %cst_286 {dimension_numbers = #tpu.dot_dimension_numbers<[1], [1], [0], [0], [0, 0, 1, 0], [], []>} : vector<16x8xbf16>, vector<16x8xbf16>, vector<16x16xf32> -> vector<16x16xf32>
    %cst_287 = arith.constant 0.353553385 : f32
    %369 = vector.broadcast %cst_287 : f32 to vector<16x16xf32>
    %370 = arith.mulf %368, %369 : vector<16x16xf32>
    %371 = arith.addf %370, %28 : vector<16x16xf32>
    %cst_288 = arith.constant dense<0xFF800000> : vector<16xf32>
    %372 = vector.multi_reduction <maximumf>, %371, %cst_288 [1] : vector<16x16xf32> to vector<16xf32>
    %373 = vector.shape_cast %372 : vector<16xf32> to vector<16x1xf32>
    %374 = vector.broadcast %373 : vector<16x1xf32> to vector<16x16xf32>
    %375 = arith.subf %371, %374 : vector<16x16xf32>
    %376 = math.exp %375 : vector<16x16xf32>
    %cst_289 = arith.constant dense<0.000000e+00> : vector<16xf32>
    %377 = vector.multi_reduction <add>, %376, %cst_289 [1] : vector<16x16xf32> to vector<16xf32>
    %378 = vector.shape_cast %377 : vector<16xf32> to vector<16x1xf32>
    %379 = tpu.reciprocal %378 {approx = true} : vector<16x1xf32> -> vector<16x1xf32>
    %380 = vector.broadcast %379 : vector<16x1xf32> to vector<16x16xf32>
    %381 = arith.mulf %376, %380 : vector<16x16xf32>
    %382 = arith.truncf %381 : vector<16x16xf32> to vector<16x16xbf16>
    %383 = arith.truncf %365 : vector<16x8xf32> to vector<16x8xbf16>
    %cst_290 = arith.constant dense<0.000000e+00> : vector<16x8xf32>
    %384 = tpu.matmul %382, %383, %cst_290 {dimension_numbers = #tpu.dot_dimension_numbers<[1], [0], [0], [1], [0, 0, 1, 1], [], []>} : vector<16x16xbf16>, vector<16x8xbf16>, vector<16x8xf32> -> vector<16x8xf32>
    %385 = arith.truncf %384 : vector<16x8xf32> to vector<16x8xbf16>
    %c7_291 = arith.constant 7 : index
    %c0_292 = arith.constant 0 : index
    %c0_293 = arith.constant 0 : index
    %386 = vector.load %arg6[%c7_291, %c0_292, %c0_293] : memref<8x8x64xbf16, #tpu.memory_space<vmem>>, vector<1x8x64xbf16>
    %387 = vector.shape_cast %386 : vector<1x8x64xbf16> to vector<8x64xbf16>
    %cst_294 = arith.constant dense<0.000000e+00> : vector<16x64xf32>
    %388 = tpu.matmul %385, %387, %cst_294 {dimension_numbers = #tpu.dot_dimension_numbers<[1], [0], [0], [1], [0, 0, 1, 1], [], []>} : vector<16x8xbf16>, vector<8x64xbf16>, vector<16x64xf32> -> vector<16x64xf32>
    %389 = arith.addf %344, %388 : vector<16x64xf32>
    %c0_295 = arith.constant 0 : index
    %c0_296 = arith.constant 0 : index
    %390 = vector.load %arg7[%c0_295, %c0_296] : memref<1x64xf32, #tpu.memory_space<vmem>>, vector<1x64xf32>
    %391 = vector.broadcast %390 : vector<1x64xf32> to vector<16x64xf32>
    %392 = arith.addf %389, %391 : vector<16x64xf32>
    %393 = arith.addf %1, %392 : vector<16x64xf32>
    %c0_297 = arith.constant 0 : index
    %c0_298 = arith.constant 0 : index
    %394 = vector.load %arg8[%c0_297, %c0_298] : memref<1x64xf32, #tpu.memory_space<vmem>>, vector<1x64xf32>
    %c0_299 = arith.constant 0 : index
    %c0_300 = arith.constant 0 : index
    %395 = vector.load %arg9[%c0_299, %c0_300] : memref<1x64xf32, #tpu.memory_space<vmem>>, vector<1x64xf32>
    %cst_301 = arith.constant dense<0.000000e+00> : vector<16xf32>
    %396 = vector.multi_reduction <add>, %393, %cst_301 [1] : vector<16x64xf32> to vector<16xf32>
    %397 = vector.shape_cast %396 : vector<16xf32> to vector<16x1xf32>
    %cst_302 = arith.constant 6.400000e+01 : f32
    %398 = vector.broadcast %cst_302 : f32 to vector<16x1xf32>
    %399 = arith.divf %397, %398 : vector<16x1xf32>
    %400 = vector.broadcast %399 : vector<16x1xf32> to vector<16x64xf32>
    %401 = arith.subf %393, %400 : vector<16x64xf32>
    %402 = arith.mulf %401, %401 : vector<16x64xf32>
    %cst_303 = arith.constant dense<0.000000e+00> : vector<16xf32>
    %403 = vector.multi_reduction <add>, %402, %cst_303 [1] : vector<16x64xf32> to vector<16xf32>
    %404 = vector.shape_cast %403 : vector<16xf32> to vector<16x1xf32>
    %cst_304 = arith.constant 6.400000e+01 : f32
    %405 = vector.broadcast %cst_304 : f32 to vector<16x1xf32>
    %406 = arith.divf %404, %405 : vector<16x1xf32>
    %407 = vector.broadcast %399 : vector<16x1xf32> to vector<16x64xf32>
    %408 = arith.subf %393, %407 : vector<16x64xf32>
    %cst_305 = arith.constant 9.99999974E-6 : f32
    %409 = vector.broadcast %cst_305 : f32 to vector<16x1xf32>
    %410 = arith.addf %406, %409 : vector<16x1xf32>
    %411 = math.rsqrt %410 : vector<16x1xf32>
    %412 = vector.broadcast %411 : vector<16x1xf32> to vector<16x64xf32>
    %413 = arith.mulf %408, %412 : vector<16x64xf32>
    %414 = vector.broadcast %394 : vector<1x64xf32> to vector<16x64xf32>
    %415 = arith.mulf %413, %414 : vector<16x64xf32>
    %416 = vector.broadcast %395 : vector<1x64xf32> to vector<16x64xf32>
    %417 = arith.addf %415, %416 : vector<16x64xf32>
    %418 = arith.truncf %417 : vector<16x64xf32> to vector<16x64xbf16>
    %c0_306 = arith.constant 0 : index
    %c0_307 = arith.constant 0 : index
    %419 = vector.load %arg10[%c0_306, %c0_307] : memref<64x256xbf16, #tpu.memory_space<vmem>>, vector<64x256xbf16>
    %cst_308 = arith.constant dense<0.000000e+00> : vector<16x256xf32>
    %420 = tpu.matmul %418, %419, %cst_308 {dimension_numbers = #tpu.dot_dimension_numbers<[1], [0], [0], [1], [0, 0, 1, 1], [], []>} : vector<16x64xbf16>, vector<64x256xbf16>, vector<16x256xf32> -> vector<16x256xf32>
    %c0_309 = arith.constant 0 : index
    %c0_310 = arith.constant 0 : index
    %421 = vector.load %arg11[%c0_309, %c0_310] : memref<1x256xf32, #tpu.memory_space<vmem>>, vector<1x256xf32>
    %422 = vector.broadcast %421 : vector<1x256xf32> to vector<16x256xf32>
    %423 = arith.addf %420, %422 : vector<16x256xf32>
    %424 = arith.mulf %423, %423 : vector<16x256xf32>
    %425 = arith.mulf %423, %424 : vector<16x256xf32>
    %cst_311 = arith.constant 4.471500e-02 : f32
    %426 = vector.broadcast %cst_311 : f32 to vector<16x256xf32>
    %427 = arith.mulf %426, %425 : vector<16x256xf32>
    %428 = arith.addf %423, %427 : vector<16x256xf32>
    %cst_312 = arith.constant 0.797884583 : f32
    %429 = vector.broadcast %cst_312 : f32 to vector<16x256xf32>
    %430 = arith.mulf %429, %428 : vector<16x256xf32>
    %431 = math.tanh %430 : vector<16x256xf32>
    %cst_313 = arith.constant 1.000000e+00 : f32
    %432 = vector.broadcast %cst_313 : f32 to vector<16x256xf32>
    %433 = arith.addf %432, %431 : vector<16x256xf32>
    %cst_314 = arith.constant 5.000000e-01 : f32
    %434 = vector.broadcast %cst_314 : f32 to vector<16x256xf32>
    %435 = arith.mulf %434, %433 : vector<16x256xf32>
    %436 = arith.mulf %423, %435 : vector<16x256xf32>
    %437 = arith.truncf %436 : vector<16x256xf32> to vector<16x256xbf16>
    %c0_315 = arith.constant 0 : index
    %c0_316 = arith.constant 0 : index
    %438 = vector.load %arg12[%c0_315, %c0_316] : memref<256x64xbf16, #tpu.memory_space<vmem>>, vector<256x64xbf16>
    %cst_317 = arith.constant dense<0.000000e+00> : vector<16x64xf32>
    %439 = tpu.matmul %437, %438, %cst_317 {dimension_numbers = #tpu.dot_dimension_numbers<[1], [0], [0], [1], [0, 0, 1, 1], [], []>} : vector<16x256xbf16>, vector<256x64xbf16>, vector<16x64xf32> -> vector<16x64xf32>
    %c0_318 = arith.constant 0 : index
    %c0_319 = arith.constant 0 : index
    %440 = vector.load %arg13[%c0_318, %c0_319] : memref<1x64xf32, #tpu.memory_space<vmem>>, vector<1x64xf32>
    %441 = vector.broadcast %440 : vector<1x64xf32> to vector<16x64xf32>
    %442 = arith.addf %439, %441 : vector<16x64xf32>
    %443 = arith.addf %393, %442 : vector<16x64xf32>
    %c0_320 = arith.constant 0 : index
    %c0_321 = arith.constant 0 : index
    %c0_322 = arith.constant 0 : index
    %444 = vector.load %arg15[%c0_320, %c0_321, %c0_322] : memref<1x16x64xf32, #tpu.memory_space<vmem>>, vector<1x16x64xf32>
    %445 = vector.shape_cast %444 : vector<1x16x64xf32> to vector<16x64xf32>
    %446 = vector.shape_cast %443 : vector<16x64xf32> to vector<1x16x64xf32>
    tpu.vector_store %arg15[%c0_320, %c0_321, %c0_322], %446 {strides = array<i32>} : memref<1x16x64xf32, #tpu.memory_space<vmem>>, vector<1x16x64xf32>,
    return
  }
  func.func @transform_0(%arg0: i32) -> (i32, i32, i32) {
    %c0_i32 = arith.constant 0 : i32
    %c0_i32_0 = arith.constant 0 : i32
    %c0_i32_1 = arith.constant 0 : i32
    return %arg0, %c0_i32, %c0_i32_0 : i32, i32, i32
  }
  func.func @transform_1(%arg0: i32) -> (i32, i32) {
    %c0_i32 = arith.constant 0 : i32
    %c0_i32_0 = arith.constant 0 : i32
    %c0_i32_1 = arith.constant 0 : i32
    return %c0_i32, %c0_i32_0 : i32, i32
  }
  func.func @transform_2(%arg0: i32) -> (i32, i32) {
    %c0_i32 = arith.constant 0 : i32
    %c0_i32_0 = arith.constant 0 : i32
    %c0_i32_1 = arith.constant 0 : i32
    return %c0_i32, %c0_i32_0 : i32, i32
  }
  func.func @transform_3(%arg0: i32) -> (i32, i32, i32, i32) {
    %c0_i32 = arith.constant 0 : i32
    %c0_i32_0 = arith.constant 0 : i32
    %c0_i32_1 = arith.constant 0 : i32
    %c0_i32_2 = arith.constant 0 : i32
    %c0_i32_3 = arith.constant 0 : i32
    return %c0_i32, %c0_i32_0, %c0_i32_1, %c0_i32_2 : i32, i32, i32, i32
  }
  func.func @transform_4(%arg0: i32) -> (i32, i32, i32, i32) {
    %c0_i32 = arith.constant 0 : i32
    %c0_i32_0 = arith.constant 0 : i32
    %c0_i32_1 = arith.constant 0 : i32
    %c0_i32_2 = arith.constant 0 : i32
    %c0_i32_3 = arith.constant 0 : i32
    return %c0_i32, %c0_i32_0, %c0_i32_1, %c0_i32_2 : i32, i32, i32, i32
  }
  func.func @transform_5(%arg0: i32) -> (i32, i32, i32) {
    %c0_i32 = arith.constant 0 : i32
    %c0_i32_0 = arith.constant 0 : i32
    %c0_i32_1 = arith.constant 0 : i32
    %c0_i32_2 = arith.constant 0 : i32
    return %c0_i32, %c0_i32_0, %c0_i32_1 : i32, i32, i32
  }
  func.func @transform_6(%arg0: i32) -> (i32, i32) {
    %c0_i32 = arith.constant 0 : i32
    %c0_i32_0 = arith.constant 0 : i32
    %c0_i32_1 = arith.constant 0 : i32
    return %c0_i32, %c0_i32_0 : i32, i32
  }
  func.func @transform_7(%arg0: i32) -> (i32, i32) {
    %c0_i32 = arith.constant 0 : i32
    %c0_i32_0 = arith.constant 0 : i32
    %c0_i32_1 = arith.constant 0 : i32
    return %c0_i32, %c0_i32_0 : i32, i32
  }
  func.func @transform_8(%arg0: i32) -> (i32, i32) {
    %c0_i32 = arith.constant 0 : i32
    %c0_i32_0 = arith.constant 0 : i32
    %c0_i32_1 = arith.constant 0 : i32
    return %c0_i32, %c0_i32_0 : i32, i32
  }
  func.func @transform_9(%arg0: i32) -> (i32, i32) {
    %c0_i32 = arith.constant 0 : i32
    %c0_i32_0 = arith.constant 0 : i32
    %c0_i32_1 = arith.constant 0 : i32
    return %c0_i32, %c0_i32_0 : i32, i32
  }
  func.func @transform_10(%arg0: i32) -> (i32, i32) {
    %c0_i32 = arith.constant 0 : i32
    %c0_i32_0 = arith.constant 0 : i32
    %c0_i32_1 = arith.constant 0 : i32
    return %c0_i32, %c0_i32_0 : i32, i32
  }
  func.func @transform_11(%arg0: i32) -> (i32, i32) {
    %c0_i32 = arith.constant 0 : i32
    %c0_i32_0 = arith.constant 0 : i32
    %c0_i32_1 = arith.constant 0 : i32
    return %c0_i32, %c0_i32_0 : i32, i32
  }
  func.func @transform_12(%arg0: i32) -> (i32, i32) {
    %c0_i32 = arith.constant 0 : i32
    %c0_i32_0 = arith.constant 0 : i32
    %c0_i32_1 = arith.constant 0 : i32
    return %c0_i32, %c0_i32_0 : i32, i32
  }
  func.func @transform_13(%arg0: i32) -> (i32, i32, i32) {
    %c0_i32 = arith.constant 0 : i32
    %c0_i32_0 = arith.constant 0 : i32
    %c0_i32_1 = arith.constant 0 : i32
    return %arg0, %c0_i32, %c0_i32_0 : i32, i32, i32
  }
  func.func @transform_14(%arg0: i32) -> (i32, i32, i32) {
    %c0_i32 = arith.constant 0 : i32
    %c0_i32_0 = arith.constant 0 : i32
    %c0_i32_1 = arith.constant 0 : i32
    return %arg0, %c0_i32, %c0_i32_0 : i32, i32, i32
  }
}

module attributes {stable_mosaic.version = 11 : i64} {
  func.func @_lmhead_kernel(%arg0: i32, %arg1: memref<1x16x64xf32, #tpu.memory_space<vmem>>, %arg2: memref<1x64xf32, #tpu.memory_space<vmem>>, %arg3: memref<1x64xf32, #tpu.memory_space<vmem>>, %arg4: memref<64x128xbf16, #tpu.memory_space<vmem>>, %arg5: memref<1x16x128xf32, #tpu.memory_space<vmem>>) attributes {dimension_semantics = [#tpu.dimension_semantics<parallel>], iteration_bounds = array<i64: 2>, scalar_prefetch = 0 : i64, scratch_operands = 0 : i64, tpu.core_type = #tpu.core_type<tc>, window_params = [{transform_indices = @transform_0, window_bounds = array<i64: 1, 16, 64>}, {pipeline_mode = #tpu.pipeline_mode<synchronous>, transform_indices = @transform_1, window_bounds = array<i64: 1, 64>}, {pipeline_mode = #tpu.pipeline_mode<synchronous>, transform_indices = @transform_2, window_bounds = array<i64: 1, 64>}, {pipeline_mode = #tpu.pipeline_mode<synchronous>, transform_indices = @transform_3, window_bounds = array<i64: 64, 128>}, {transform_indices = @transform_4, window_bounds = array<i64: 1, 16, 128>}]} {
    %c0 = arith.constant 0 : index
    %c0_0 = arith.constant 0 : index
    %c0_1 = arith.constant 0 : index
    %0 = vector.load %arg1[%c0, %c0_0, %c0_1] : memref<1x16x64xf32, #tpu.memory_space<vmem>>, vector<1x16x64xf32>
    %1 = vector.shape_cast %0 : vector<1x16x64xf32> to vector<16x64xf32>
    %c0_2 = arith.constant 0 : index
    %c0_3 = arith.constant 0 : index
    %2 = vector.load %arg2[%c0_2, %c0_3] : memref<1x64xf32, #tpu.memory_space<vmem>>, vector<1x64xf32>
    %c0_4 = arith.constant 0 : index
    %c0_5 = arith.constant 0 : index
    %3 = vector.load %arg3[%c0_4, %c0_5] : memref<1x64xf32, #tpu.memory_space<vmem>>, vector<1x64xf32>
    %cst = arith.constant dense<0.000000e+00> : vector<16xf32>
    %4 = vector.multi_reduction <add>, %1, %cst [1] : vector<16x64xf32> to vector<16xf32>
    %5 = vector.shape_cast %4 : vector<16xf32> to vector<16x1xf32>
    %cst_6 = arith.constant 6.400000e+01 : f32
    %6 = vector.broadcast %cst_6 : f32 to vector<16x1xf32>
    %7 = arith.divf %5, %6 : vector<16x1xf32>
    %8 = vector.broadcast %7 : vector<16x1xf32> to vector<16x64xf32>
    %9 = arith.subf %1, %8 : vector<16x64xf32>
    %10 = arith.mulf %9, %9 : vector<16x64xf32>
    %cst_7 = arith.constant dense<0.000000e+00> : vector<16xf32>
    %11 = vector.multi_reduction <add>, %10, %cst_7 [1] : vector<16x64xf32> to vector<16xf32>
    %12 = vector.shape_cast %11 : vector<16xf32> to vector<16x1xf32>
    %cst_8 = arith.constant 6.400000e+01 : f32
    %13 = vector.broadcast %cst_8 : f32 to vector<16x1xf32>
    %14 = arith.divf %12, %13 : vector<16x1xf32>
    %15 = vector.broadcast %7 : vector<16x1xf32> to vector<16x64xf32>
    %16 = arith.subf %1, %15 : vector<16x64xf32>
    %cst_9 = arith.constant 9.99999974E-6 : f32
    %17 = vector.broadcast %cst_9 : f32 to vector<16x1xf32>
    %18 = arith.addf %14, %17 : vector<16x1xf32>
    %19 = math.rsqrt %18 : vector<16x1xf32>
    %20 = vector.broadcast %19 : vector<16x1xf32> to vector<16x64xf32>
    %21 = arith.mulf %16, %20 : vector<16x64xf32>
    %22 = vector.broadcast %2 : vector<1x64xf32> to vector<16x64xf32>
    %23 = arith.mulf %21, %22 : vector<16x64xf32>
    %24 = vector.broadcast %3 : vector<1x64xf32> to vector<16x64xf32>
    %25 = arith.addf %23, %24 : vector<16x64xf32>
    %26 = arith.truncf %25 : vector<16x64xf32> to vector<16x64xbf16>
    %c0_10 = arith.constant 0 : index
    %c0_11 = arith.constant 0 : index
    %27 = vector.load %arg4[%c0_10, %c0_11] : memref<64x128xbf16, #tpu.memory_space<vmem>>, vector<64x128xbf16>
    %cst_12 = arith.constant dense<0.000000e+00> : vector<16x128xf32>
    %28 = tpu.matmul %26, %27, %cst_12 {dimension_numbers = #tpu.dot_dimension_numbers<[1], [0], [0], [1], [0, 0, 1, 1], [], []>} : vector<16x64xbf16>, vector<64x128xbf16>, vector<16x128xf32> -> vector<16x128xf32>
    %c0_13 = arith.constant 0 : index
    %c0_14 = arith.constant 0 : index
    %c0_15 = arith.constant 0 : index
    %29 = vector.load %arg5[%c0_13, %c0_14, %c0_15] : memref<1x16x128xf32, #tpu.memory_space<vmem>>, vector<1x16x128xf32>
    %30 = vector.shape_cast %29 : vector<1x16x128xf32> to vector<16x128xf32>
    %31 = vector.shape_cast %28 : vector<16x128xf32> to vector<1x16x128xf32>
    tpu.vector_store %arg5[%c0_13, %c0_14, %c0_15], %31 {strides = array<i32>} : memref<1x16x128xf32, #tpu.memory_space<vmem>>, vector<1x16x128xf32>,
    return
  }
  func.func @transform_0(%arg0: i32) -> (i32, i32, i32) {
    %c0_i32 = arith.constant 0 : i32
    %c0_i32_0 = arith.constant 0 : i32
    %c0_i32_1 = arith.constant 0 : i32
    return %arg0, %c0_i32, %c0_i32_0 : i32, i32, i32
  }
  func.func @transform_1(%arg0: i32) -> (i32, i32) {
    %c0_i32 = arith.constant 0 : i32
    %c0_i32_0 = arith.constant 0 : i32
    %c0_i32_1 = arith.constant 0 : i32
    return %c0_i32, %c0_i32_0 : i32, i32
  }
  func.func @transform_2(%arg0: i32) -> (i32, i32) {
    %c0_i32 = arith.constant 0 : i32
    %c0_i32_0 = arith.constant 0 : i32
    %c0_i32_1 = arith.constant 0 : i32
    return %c0_i32, %c0_i32_0 : i32, i32
  }
  func.func @transform_3(%arg0: i32) -> (i32, i32) {
    %c0_i32 = arith.constant 0 : i32
    %c0_i32_0 = arith.constant 0 : i32
    %c0_i32_1 = arith.constant 0 : i32
    return %c0_i32, %c0_i32_0 : i32, i32
  }
  func.func @transform_4(%arg0: i32) -> (i32, i32, i32) {
    %c0_i32 = arith.constant 0 : i32
    %c0_i32_0 = arith.constant 0 : i32
    %c0_i32_1 = arith.constant 0 : i32
    return %arg0, %c0_i32, %c0_i32_0 : i32, i32, i32
  }
}

</mosaic_0001>

<bundles_post_ra>
// kernel: squeeze.5
= control target key start
LH: loop header
LB: loop body
LE: loop exit
PB: predicated region body
PF: predicated region fallthrough
CT: control target
= control target key end

     0   :  { %vm3_vm0 = vcmask 64512   ;;  %s1074_s12 = smov 120   ;;  %s1469_s0 = inlined_call_operand.vmem [shape: f32[2,1,3,16,16], index: 0, kind: input, shape index: {}]   ;;  %s1470_s1 = inlined_call_operand.vmem [shape: f32[2,3,2,8,2,8], index: 1, kind: output, shape index: {}]  }
   0x1   :  { %v968_v0 = vld [vmem:[%s1469_s0 + $0x10] sm:$0xff]   ;;  %v83_v1 = vld [vmem:[%s1469_s0] sm:$0xff]   ;;  %v969_v2 = vld [vmem:[%s1469_s0 + $0x18] sm:$0xff]  }
   0x2   :  { %102 = vrot.lane.b32.xlu1 %v968_v0, %s1074_s12  ;;  %84 = vrot.lane.b32.xlu0 %v83_v1, %s1074_s12  ;;  %v967_v3 = vld [vmem:[%s1469_s0 + $0x8] sm:$0xff]   ;;  %17 = vst.msk [vmem:[#allocation0 + $0x80] ss:$8 sm:$0xf] %vm3_vm0, %v968_v0   ;;  %v970_v5 = vld [vmem:[%s1469_s0 + $0x20] sm:$0xff]  }
   0x3   :  { %v971_v4 = vld [vmem:[%s1469_s0 + $0x28] sm:$0xff]   ;;  %19 = vst.msk [vmem:[#allocation0 + $0x80] ss:$8 sm:$0xf0] %vm3_vm0, %v968_v0   ;;  %v973_v6 = vld [vmem:[%s1469_s0 + $0x38] sm:$0xff]   ;;  %v972_v7 = vld [vmem:[%s1469_s0 + $0x30] sm:$0xff]  }
   0x4   :  { %4 = vst.msk [vmem:[#allocation0] ss:$8 sm:$0xf] %vm3_vm0, %v83_v1   ;;  %5 = vst.msk [vmem:[#allocation0] ss:$8 sm:$0xf0] %vm3_vm0, %v83_v1  }
   0x5   :  { %24 = vst.msk [vmem:[#allocation0 + $0xc0] ss:$8 sm:$0xf] %vm3_vm0, %v969_v2   ;;  %26 = vst.msk [vmem:[#allocation0 + $0xc0] ss:$8 sm:$0xf0] %vm3_vm0, %v969_v2  }
   0x6   :  { %10 = vst.msk [vmem:[#allocation0 + $0x40] ss:$8 sm:$0xf] %vm3_vm0, %v967_v3   ;;  %12 = vst.msk [vmem:[#allocation0 + $0x40] ss:$8 sm:$0xf0] %vm3_vm0, %v967_v3   ;;  %111 = vrot.lane.b32.xlu1 %v969_v2, %s1074_s12  ;;  %93 = vrot.lane.b32.xlu0 %v967_v3, %s1074_s12 }
   0x7   :  { %38 = vst.msk [vmem:[#allocation0 + $0x140] ss:$8 sm:$0xf] %vm3_vm0, %v971_v4   ;;  %40 = vst.msk [vmem:[#allocation0 + $0x140] ss:$8 sm:$0xf0] %vm3_vm0, %v971_v4  }
   0x8   :  { %v975_v8 = vld [vmem:[%s1469_s0 + $0x48] sm:$0xff]   ;;  %v974_v9 = vld [vmem:[%s1469_s0 + $0x40] sm:$0xff]   ;;  %v977_v10 = vld [vmem:[%s1469_s0 + $0x58] sm:$0xff]   ;;  %31 = vst.msk [vmem:[#allocation0 + $0x100] ss:$8 sm:$0xf] %vm3_vm0, %v970_v5  }
   0x9   :  { %33 = vst.msk [vmem:[#allocation0 + $0x100] ss:$8 sm:$0xf0] %vm3_vm0, %v970_v5   ;;  %52 = vst.msk [vmem:[#allocation0 + $0x1c0] ss:$8 sm:$0xf] %vm3_vm0, %v973_v6  }
   0xa   :  { %54 = vst.msk [vmem:[#allocation0 + $0x1c0] ss:$8 sm:$0xf0] %vm3_vm0, %v973_v6   ;;  %45 = vst.msk [vmem:[#allocation0 + $0x180] ss:$8 sm:$0xf] %vm3_vm0, %v972_v7   ;;  %129 = vrot.lane.b32.xlu1 %v971_v4, %s1074_s12  ;;  %120 = vrot.lane.b32.xlu0 %v970_v5, %s1074_s12 }
   0xb   :  { %47 = vst.msk [vmem:[#allocation0 + $0x180] ss:$8 sm:$0xf0] %vm3_vm0, %v972_v7   ;;  %v976_v11 = vld [vmem:[%s1469_s0 + $0x50] sm:$0xff]  }
   0xc   :  { %66 = vst.msk [vmem:[#allocation0 + $0x240] ss:$8 sm:$0xf] %vm3_vm0, %v975_v8   ;;  %68 = vst.msk [vmem:[#allocation0 + $0x240] ss:$8 sm:$0xf0] %vm3_vm0, %v975_v8  }
   0xd   :  { %59 = vst.msk [vmem:[#allocation0 + $0x200] ss:$8 sm:$0xf] %vm3_vm0, %v974_v9   ;;  %61 = vst.msk [vmem:[#allocation0 + $0x200] ss:$8 sm:$0xf0] %vm3_vm0, %v974_v9  }
   0xe   :  { %80 = vst.msk [vmem:[#allocation0 + $0x2c0] ss:$8 sm:$0xf] %vm3_vm0, %v977_v10   ;;  %82 = vst.msk [vmem:[#allocation0 + $0x2c0] ss:$8 sm:$0xf0] %vm3_vm0, %v977_v10   ;;  %147 = vrot.lane.b32.xlu1 %v973_v6, %s1074_s12  ;;  %138 = vrot.lane.b32.xlu0 %v972_v7, %s1074_s12 }
   0xf   :  { %73 = vst.msk [vmem:[#allocation0 + $0x280] ss:$8 sm:$0xf] %vm3_vm0, %v976_v11   ;;  %75 = vst.msk [vmem:[#allocation0 + $0x280] ss:$8 sm:$0xf0] %vm3_vm0, %v976_v11  }
  0x12   :  { %165 = vrot.lane.b32.xlu1 %v975_v8, %s1074_s12  ;;  %156 = vrot.lane.b32.xlu0 %v974_v9, %s1074_s12 }
  0x16   :  { %183 = vrot.lane.b32.xlu1 %v977_v10, %s1074_s12  ;;  %174 = vrot.lane.b32.xlu0 %v976_v11, %s1074_s12 }
  0x74   :  { %v103_v12 = vpop.permute.xlu1 %102   ;;  %v85_v13 = vpop.permute.xlu0 %84  }
  0x75   :  { %106 = vst.msk [vmem:[#allocation0 + $0x81] ss:$8 sm:$0xf] %vm3_vm0, %v103_v12   ;;  %108 = vst.msk [vmem:[#allocation0 + $0x81] ss:$8 sm:$0xf0] %vm3_vm0, %v103_v12  }
  0x76   :  { %88 = vst.msk [vmem:[#allocation0 + $0x1] ss:$8 sm:$0xf] %vm3_vm0, %v85_v13   ;;  %90 = vst.msk [vmem:[#allocation0 + $0x1] ss:$8 sm:$0xf0] %vm3_vm0, %v85_v13  }
  0x78   :  { %v112_v14 = vpop.permute.xlu1 %111   ;;  %v94_v15 = vpop.permute.xlu0 %93  }
  0x79   :  { %115 = vst.msk [vmem:[#allocation0 + $0xc1] ss:$8 sm:$0xf] %vm3_vm0, %v112_v14   ;;  %117 = vst.msk [vmem:[#allocation0 + $0xc1] ss:$8 sm:$0xf0] %vm3_vm0, %v112_v14  }
  0x7a   :  { %97 = vst.msk [vmem:[#allocation0 + $0x41] ss:$8 sm:$0xf] %vm3_vm0, %v94_v15   ;;  %99 = vst.msk [vmem:[#allocation0 + $0x41] ss:$8 sm:$0xf0] %vm3_vm0, %v94_v15  }
  0x7c   :  { %v303_v16 = vld [vmem:[#allocation0 + $0x80] sm:$0x3]  ;;  %v310_v17 = vld [vmem:[#allocation0 + $0x88] sm:$0x3]  ;;  %v317_v18 = vld [vmem:[#allocation0 + $0x90] sm:$0x3]  ;;  %v130_v19 = vpop.permute.xlu1 %129   ;;  %v121_v20 = vpop.permute.xlu0 %120  }
  0x7d   :  { %993 = vst [vmem:[%s1470_s1 + $0x20] sm:$0x3] %v303_v16  ;;  %994 = vst [vmem:[%s1470_s1 + $0x22] sm:$0x3] %v310_v17  ;;  %v324_v21 = vld [vmem:[#allocation0 + $0x98] sm:$0x3] }
  0x7e   :  { %995 = vst [vmem:[%s1470_s1 + $0x24] sm:$0x3] %v317_v18  ;;  %v331_v22 = vld [vmem:[#allocation0 + $0xa0] sm:$0x3]  ;;  %v338_v23 = vld [vmem:[#allocation0 + $0xa8] sm:$0x3] }
  0x7f   :  { %133 = vst.msk [vmem:[#allocation0 + $0x141] ss:$8 sm:$0xf] %vm3_vm0, %v130_v19   ;;  %135 = vst.msk [vmem:[#allocation0 + $0x141] ss:$8 sm:$0xf0] %vm3_vm0, %v130_v19  }
  0x80   :  { %124 = vst.msk [vmem:[#allocation0 + $0x101] ss:$8 sm:$0xf] %vm3_vm0, %v121_v20   ;;  %126 = vst.msk [vmem:[#allocation0 + $0x101] ss:$8 sm:$0xf0] %vm3_vm0, %v121_v20   ;;  %v148_v33 = vpop.permute.xlu1 %147   ;;  %v139_v34 = vpop.permute.xlu0 %138  }
  0x81   :  { %996 = vst [vmem:[%s1470_s1 + $0x26] sm:$0x3] %v324_v21  ;;  %997 = vst [vmem:[%s1470_s1 + $0x28] sm:$0x3] %v331_v22  ;;  %v345_v24 = vld [vmem:[#allocation0 + $0xb0] sm:$0x3] }
  0x82   :  { %998 = vst [vmem:[%s1470_s1 + $0x2a] sm:$0x3] %v338_v23  ;;  %v352_v25 = vld [vmem:[#allocation0 + $0xb8] sm:$0x3]  ;;  %v194_v26 = vld [vmem:[#allocation0] sm:$0x3] }
  0x83   :  { %999 = vst [vmem:[%s1470_s1 + $0x2c] sm:$0x3] %v345_v24  ;;  %1000 = vst [vmem:[%s1470_s1 + $0x2e] sm:$0x3] %v352_v25  ;;  %v199_v27 = vld [vmem:[#allocation0 + $0x8] sm:$0x3] }
  0x84   :  { %197 = vst [vmem:[%s1470_s1] sm:$0x3] %v194_v26  ;;  %v205_v28 = vld [vmem:[#allocation0 + $0x10] sm:$0x3]  ;;  %v212_v29 = vld [vmem:[#allocation0 + $0x18] sm:$0x3]  ;;  %v166_v47 = vpop.permute.xlu1 %165   ;;  %v157_v48 = vpop.permute.xlu0 %156  }
  0x85   :  { %978 = vst [vmem:[%s1470_s1 + $0x2] sm:$0x3] %v199_v27  ;;  %979 = vst [vmem:[%s1470_s1 + $0x4] sm:$0x3] %v205_v28  ;;  %v219_v30 = vld [vmem:[#allocation0 + $0x20] sm:$0x3] }
  0x86   :  { %980 = vst [vmem:[%s1470_s1 + $0x6] sm:$0x3] %v212_v29  ;;  %v226_v31 = vld [vmem:[#allocation0 + $0x28] sm:$0x3]  ;;  %v233_v32 = vld [vmem:[#allocation0 + $0x30] sm:$0x3] }
  0x87   :  { %981 = vst [vmem:[%s1470_s1 + $0x8] sm:$0x3] %v219_v30  ;;  %982 = vst [vmem:[%s1470_s1 + $0xa] sm:$0x3] %v226_v31  ;;  %v240_v35 = vld [vmem:[#allocation0 + $0x38] sm:$0x3] }
  0x88   :  { %983 = vst [vmem:[%s1470_s1 + $0xc] sm:$0x3] %v233_v32  ;;  %v359_v36 = vld [vmem:[#allocation0 + $0xc0] sm:$0x3]  ;;  %v366_v37 = vld [vmem:[#allocation0 + $0xc8] sm:$0x3]  ;;  %v184_v61 = vpop.permute.xlu1 %183   ;;  %v175_v62 = vpop.permute.xlu0 %174  }
  0x89   :  { %151 = vst.msk [vmem:[#allocation0 + $0x1c1] ss:$8 sm:$0xf] %vm3_vm0, %v148_v33   ;;  %153 = vst.msk [vmem:[#allocation0 + $0x1c1] ss:$8 sm:$0xf0] %vm3_vm0, %v148_v33  }
  0x8a   :  { %142 = vst.msk [vmem:[#allocation0 + $0x181] ss:$8 sm:$0xf] %vm3_vm0, %v139_v34   ;;  %144 = vst.msk [vmem:[#allocation0 + $0x181] ss:$8 sm:$0xf0] %vm3_vm0, %v139_v34  }
  0x8b   :  { %984 = vst [vmem:[%s1470_s1 + $0xe] sm:$0x3] %v240_v35  ;;  %1001 = vst [vmem:[%s1470_s1 + $0x30] sm:$0x3] %v359_v36  ;;  %v373_v38 = vld [vmem:[#allocation0 + $0xd0] sm:$0x3] }
  0x8c   :  { %1002 = vst [vmem:[%s1470_s1 + $0x32] sm:$0x3] %v366_v37  ;;  %v380_v39 = vld [vmem:[#allocation0 + $0xd8] sm:$0x3]  ;;  %v387_v40 = vld [vmem:[#allocation0 + $0xe0] sm:$0x3] }
  0x8d   :  { %1003 = vst [vmem:[%s1470_s1 + $0x34] sm:$0x3] %v373_v38  ;;  %1004 = vst [vmem:[%s1470_s1 + $0x36] sm:$0x3] %v380_v39  ;;  %v394_v41 = vld [vmem:[#allocation0 + $0xe8] sm:$0x3] }
  0x8e   :  { %1005 = vst [vmem:[%s1470_s1 + $0x38] sm:$0x3] %v387_v40  ;;  %v401_v42 = vld [vmem:[#allocation0 + $0xf0] sm:$0x3]  ;;  %v408_v43 = vld [vmem:[#allocation0 + $0xf8] sm:$0x3] }
  0x8f   :  { %1006 = vst [vmem:[%s1470_s1 + $0x3a] sm:$0x3] %v394_v41  ;;  %1007 = vst [vmem:[%s1470_s1 + $0x3c] sm:$0x3] %v401_v42  ;;  %v247_v44 = vld [vmem:[#allocation0 + $0x40] sm:$0x3] }
  0x90   :  { %1008 = vst [vmem:[%s1470_s1 + $0x3e] sm:$0x3] %v408_v43  ;;  %v254_v45 = vld [vmem:[#allocation0 + $0x48] sm:$0x3]  ;;  %v261_v46 = vld [vmem:[#allocation0 + $0x50] sm:$0x3] }
  0x91   :  { %985 = vst [vmem:[%s1470_s1 + $0x10] sm:$0x3] %v247_v44  ;;  %986 = vst [vmem:[%s1470_s1 + $0x12] sm:$0x3] %v254_v45  ;;  %v268_v49 = vld [vmem:[#allocation0 + $0x58] sm:$0x3] }
  0x92   :  { %987 = vst [vmem:[%s1470_s1 + $0x14] sm:$0x3] %v261_v46  ;;  %v275_v50 = vld [vmem:[#allocation0 + $0x60] sm:$0x3]  ;;  %v282_v51 = vld [vmem:[#allocation0 + $0x68] sm:$0x3] }
  0x93   :  { %169 = vst.msk [vmem:[#allocation0 + $0x241] ss:$8 sm:$0xf] %vm3_vm0, %v166_v47   ;;  %171 = vst.msk [vmem:[#allocation0 + $0x241] ss:$8 sm:$0xf0] %vm3_vm0, %v166_v47  }
  0x94   :  { %160 = vst.msk [vmem:[#allocation0 + $0x201] ss:$8 sm:$0xf] %vm3_vm0, %v157_v48   ;;  %162 = vst.msk [vmem:[#allocation0 + $0x201] ss:$8 sm:$0xf0] %vm3_vm0, %v157_v48  }
  0x95   :  { %988 = vst [vmem:[%s1470_s1 + $0x16] sm:$0x3] %v268_v49  ;;  %989 = vst [vmem:[%s1470_s1 + $0x18] sm:$0x3] %v275_v50  ;;  %v289_v52 = vld [vmem:[#allocation0 + $0x70] sm:$0x3] }
  0x96   :  { %990 = vst [vmem:[%s1470_s1 + $0x1a] sm:$0x3] %v282_v51  ;;  %v296_v53 = vld [vmem:[#allocation0 + $0x78] sm:$0x3]  ;;  %v471_v54 = vld [vmem:[#allocation0 + $0x140] sm:$0x3] }
  0x97   :  { %991 = vst [vmem:[%s1470_s1 + $0x1c] sm:$0x3] %v289_v52  ;;  %992 = vst [vmem:[%s1470_s1 + $0x1e] sm:$0x3] %v296_v53  ;;  %v478_v55 = vld [vmem:[#allocation0 + $0x148] sm:$0x3] }
  0x98   :  { %1017 = vst [vmem:[%s1470_s1 + $0x50] sm:$0x3] %v471_v54  ;;  %v485_v56 = vld [vmem:[#allocation0 + $0x150] sm:$0x3]  ;;  %v492_v57 = vld [vmem:[#allocation0 + $0x158] sm:$0x3] }
  0x99   :  { %1018 = vst [vmem:[%s1470_s1 + $0x52] sm:$0x3] %v478_v55  ;;  %1019 = vst [vmem:[%s1470_s1 + $0x54] sm:$0x3] %v485_v56  ;;  %v499_v58 = vld [vmem:[#allocation0 + $0x160] sm:$0x3] }
  0x9a   :  { %1020 = vst [vmem:[%s1470_s1 + $0x56] sm:$0x3] %v492_v57  ;;  %v506_v59 = vld [vmem:[#allocation0 + $0x168] sm:$0x3]  ;;  %v513_v60 = vld [vmem:[#allocation0 + $0x170] sm:$0x3] }
  0x9b   :  { %1021 = vst [vmem:[%s1470_s1 + $0x58] sm:$0x3] %v499_v58  ;;  %1022 = vst [vmem:[%s1470_s1 + $0x5a] sm:$0x3] %v506_v59  ;;  %v520_v63 = vld [vmem:[#allocation0 + $0x178] sm:$0x3] }
  0x9c   :  { %1023 = vst [vmem:[%s1470_s1 + $0x5c] sm:$0x3] %v513_v60  ;;  %v415_v0 = vld [vmem:[#allocation0 + $0x100] sm:$0x3]  ;;  %v422_v1 = vld [vmem:[#allocation0 + $0x108] sm:$0x3] }
  0x9d   :  { %187 = vst.msk [vmem:[#allocation0 + $0x2c1] ss:$8 sm:$0xf] %vm3_vm0, %v184_v61   ;;  %189 = vst.msk [vmem:[#allocation0 + $0x2c1] ss:$8 sm:$0xf0] %vm3_vm0, %v184_v61  }
  0x9e   :  { %178 = vst.msk [vmem:[#allocation0 + $0x281] ss:$8 sm:$0xf] %vm3_vm0, %v175_v62   ;;  %180 = vst.msk [vmem:[#allocation0 + $0x281] ss:$8 sm:$0xf0] %vm3_vm0, %v175_v62  }
  0x9f   :  { %1024 = vst [vmem:[%s1470_s1 + $0x5e] sm:$0x3] %v520_v63  ;;  %1009 = vst [vmem:[%s1470_s1 + $0x40] sm:$0x3] %v415_v0  ;;  %v429_v2 = vld [vmem:[#allocation0 + $0x110] sm:$0x3] }
  0xa0   :  { %1010 = vst [vmem:[%s1470_s1 + $0x42] sm:$0x3] %v422_v1  ;;  %v436_v3 = vld [vmem:[#allocation0 + $0x118] sm:$0x3]  ;;  %v443_v4 = vld [vmem:[#allocation0 + $0x120] sm:$0x3] }
  0xa1   :  { %1011 = vst [vmem:[%s1470_s1 + $0x44] sm:$0x3] %v429_v2  ;;  %1012 = vst [vmem:[%s1470_s1 + $0x46] sm:$0x3] %v436_v3  ;;  %v450_v5 = vld [vmem:[#allocation0 + $0x128] sm:$0x3] }
  0xa2   :  { %1013 = vst [vmem:[%s1470_s1 + $0x48] sm:$0x3] %v443_v4  ;;  %v457_v6 = vld [vmem:[#allocation0 + $0x130] sm:$0x3]  ;;  %v464_v7 = vld [vmem:[#allocation0 + $0x138] sm:$0x3] }
  0xa3   :  { %1014 = vst [vmem:[%s1470_s1 + $0x4a] sm:$0x3] %v450_v5  ;;  %1015 = vst [vmem:[%s1470_s1 + $0x4c] sm:$0x3] %v457_v6  ;;  %v583_v8 = vld [vmem:[#allocation0 + $0x1c0] sm:$0x3] }
  0xa4   :  { %1016 = vst [vmem:[%s1470_s1 + $0x4e] sm:$0x3] %v464_v7  ;;  %v590_v9 = vld [vmem:[#allocation0 + $0x1c8] sm:$0x3]  ;;  %v597_v10 = vld [vmem:[#allocation0 + $0x1d0] sm:$0x3] }
  0xa5   :  { %1033 = vst [vmem:[%s1470_s1 + $0x70] sm:$0x3] %v583_v8  ;;  %1034 = vst [vmem:[%s1470_s1 + $0x72] sm:$0x3] %v590_v9  ;;  %v604_v11 = vld [vmem:[#allocation0 + $0x1d8] sm:$0x3] }
  0xa6   :  { %1035 = vst [vmem:[%s1470_s1 + $0x74] sm:$0x3] %v597_v10  ;;  %v611_v12 = vld [vmem:[#allocation0 + $0x1e0] sm:$0x3]  ;;  %v618_v13 = vld [vmem:[#allocation0 + $0x1e8] sm:$0x3] }
  0xa7   :  { %1036 = vst [vmem:[%s1470_s1 + $0x76] sm:$0x3] %v604_v11  ;;  %1037 = vst [vmem:[%s1470_s1 + $0x78] sm:$0x3] %v611_v12  ;;  %v625_v14 = vld [vmem:[#allocation0 + $0x1f0] sm:$0x3] }
  0xa8   :  { %1038 = vst [vmem:[%s1470_s1 + $0x7a] sm:$0x3] %v618_v13  ;;  %v632_v15 = vld [vmem:[#allocation0 + $0x1f8] sm:$0x3]  ;;  %v527_v16 = vld [vmem:[#allocation0 + $0x180] sm:$0x3] }
  0xa9   :  { %1039 = vst [vmem:[%s1470_s1 + $0x7c] sm:$0x3] %v625_v14  ;;  %1040 = vst [vmem:[%s1470_s1 + $0x7e] sm:$0x3] %v632_v15  ;;  %v534_v17 = vld [vmem:[#allocation0 + $0x188] sm:$0x3] }
  0xaa   :  { %1025 = vst [vmem:[%s1470_s1 + $0x60] sm:$0x3] %v527_v16  ;;  %v541_v18 = vld [vmem:[#allocation0 + $0x190] sm:$0x3]  ;;  %v548_v19 = vld [vmem:[#allocation0 + $0x198] sm:$0x3] }
  0xab   :  { %1026 = vst [vmem:[%s1470_s1 + $0x62] sm:$0x3] %v534_v17  ;;  %1027 = vst [vmem:[%s1470_s1 + $0x64] sm:$0x3] %v541_v18  ;;  %v555_v20 = vld [vmem:[#allocation0 + $0x1a0] sm:$0x3] }
  0xac   :  { %1028 = vst [vmem:[%s1470_s1 + $0x66] sm:$0x3] %v548_v19  ;;  %v562_v21 = vld [vmem:[#allocation0 + $0x1a8] sm:$0x3]  ;;  %v569_v22 = vld [vmem:[#allocation0 + $0x1b0] sm:$0x3] }
  0xad   :  { %1029 = vst [vmem:[%s1470_s1 + $0x68] sm:$0x3] %v555_v20  ;;  %1030 = vst [vmem:[%s1470_s1 + $0x6a] sm:$0x3] %v562_v21  ;;  %v576_v23 = vld [vmem:[#allocation0 + $0x1b8] sm:$0x3] }
  0xae   :  { %1031 = vst [vmem:[%s1470_s1 + $0x6c] sm:$0x3] %v569_v22  ;;  %v695_v24 = vld [vmem:[#allocation0 + $0x240] sm:$0x3]  ;;  %v702_v25 = vld [vmem:[#allocation0 + $0x248] sm:$0x3] }
  0xaf   :  { %1032 = vst [vmem:[%s1470_s1 + $0x6e] sm:$0x3] %v576_v23  ;;  %1049 = vst [vmem:[%s1470_s1 + $0x90] sm:$0x3] %v695_v24  ;;  %v709_v26 = vld [vmem:[#allocation0 + $0x250] sm:$0x3] }
  0xb0   :  { %1050 = vst [vmem:[%s1470_s1 + $0x92] sm:$0x3] %v702_v25  ;;  %v716_v27 = vld [vmem:[#allocation0 + $0x258] sm:$0x3]  ;;  %v723_v28 = vld [vmem:[#allocation0 + $0x260] sm:$0x3] }
  0xb1   :  { %1051 = vst [vmem:[%s1470_s1 + $0x94] sm:$0x3] %v709_v26  ;;  %1052 = vst [vmem:[%s1470_s1 + $0x96] sm:$0x3] %v716_v27  ;;  %v730_v29 = vld [vmem:[#allocation0 + $0x268] sm:$0x3] }
  0xb2   :  { %1053 = vst [vmem:[%s1470_s1 + $0x98] sm:$0x3] %v723_v28  ;;  %v737_v30 = vld [vmem:[#allocation0 + $0x270] sm:$0x3]  ;;  %v744_v31 = vld [vmem:[#allocation0 + $0x278] sm:$0x3] }
  0xb3   :  { %1054 = vst [vmem:[%s1470_s1 + $0x9a] sm:$0x3] %v730_v29  ;;  %1055 = vst [vmem:[%s1470_s1 + $0x9c] sm:$0x3] %v737_v30  ;;  %v639_v32 = vld [vmem:[#allocation0 + $0x200] sm:$0x3] }
  0xb4   :  { %1056 = vst [vmem:[%s1470_s1 + $0x9e] sm:$0x3] %v744_v31  ;;  %v646_v33 = vld [vmem:[#allocation0 + $0x208] sm:$0x3]  ;;  %v653_v34 = vld [vmem:[#allocation0 + $0x210] sm:$0x3] }
  0xb5   :  { %1041 = vst [vmem:[%s1470_s1 + $0x80] sm:$0x3] %v639_v32  ;;  %1042 = vst [vmem:[%s1470_s1 + $0x82] sm:$0x3] %v646_v33  ;;  %v660_v35 = vld [vmem:[#allocation0 + $0x218] sm:$0x3] }
  0xb6   :  { %1043 = vst [vmem:[%s1470_s1 + $0x84] sm:$0x3] %v653_v34  ;;  %v667_v36 = vld [vmem:[#allocation0 + $0x220] sm:$0x3]  ;;  %v674_v37 = vld [vmem:[#allocation0 + $0x228] sm:$0x3] }
  0xb7   :  { %1044 = vst [vmem:[%s1470_s1 + $0x86] sm:$0x3] %v660_v35  ;;  %1045 = vst [vmem:[%s1470_s1 + $0x88] sm:$0x3] %v667_v36  ;;  %v681_v38 = vld [vmem:[#allocation0 + $0x230] sm:$0x3] }
  0xb8   :  { %1046 = vst [vmem:[%s1470_s1 + $0x8a] sm:$0x3] %v674_v37  ;;  %v688_v39 = vld [vmem:[#allocation0 + $0x238] sm:$0x3]  ;;  %v807_v40 = vld [vmem:[#allocation0 + $0x2c0] sm:$0x3] }
  0xb9   :  { %1047 = vst [vmem:[%s1470_s1 + $0x8c] sm:$0x3] %v681_v38  ;;  %1048 = vst [vmem:[%s1470_s1 + $0x8e] sm:$0x3] %v688_v39  ;;  %v814_v41 = vld [vmem:[#allocation0 + $0x2c8] sm:$0x3] }
  0xba   :  { %1065 = vst [vmem:[%s1470_s1 + $0xb0] sm:$0x3] %v807_v40  ;;  %v821_v42 = vld [vmem:[#allocation0 + $0x2d0] sm:$0x3]  ;;  %v828_v43 = vld [vmem:[#allocation0 + $0x2d8] sm:$0x3] }
  0xbb   :  { %1066 = vst [vmem:[%s1470_s1 + $0xb2] sm:$0x3] %v814_v41  ;;  %1067 = vst [vmem:[%s1470_s1 + $0xb4] sm:$0x3] %v821_v42  ;;  %v835_v44 = vld [vmem:[#allocation0 + $0x2e0] sm:$0x3] }
  0xbc   :  { %1068 = vst [vmem:[%s1470_s1 + $0xb6] sm:$0x3] %v828_v43  ;;  %v842_v45 = vld [vmem:[#allocation0 + $0x2e8] sm:$0x3]  ;;  %v849_v46 = vld [vmem:[#allocation0 + $0x2f0] sm:$0x3] }
  0xbd   :  { %1069 = vst [vmem:[%s1470_s1 + $0xb8] sm:$0x3] %v835_v44  ;;  %1070 = vst [vmem:[%s1470_s1 + $0xba] sm:$0x3] %v842_v45  ;;  %v856_v47 = vld [vmem:[#allocation0 + $0x2f8] sm:$0x3] }
  0xbe   :  { %1071 = vst [vmem:[%s1470_s1 + $0xbc] sm:$0x3] %v849_v46  ;;  %v751_v48 = vld [vmem:[#allocation0 + $0x280] sm:$0x3]  ;;  %v758_v49 = vld [vmem:[#allocation0 + $0x288] sm:$0x3] }
  0xbf   :  { %1072 = vst [vmem:[%s1470_s1 + $0xbe] sm:$0x3] %v856_v47  ;;  %1057 = vst [vmem:[%s1470_s1 + $0xa0] sm:$0x3] %v751_v48  ;;  %v765_v50 = vld [vmem:[#allocation0 + $0x290] sm:$0x3] }
  0xc0   :  { %1058 = vst [vmem:[%s1470_s1 + $0xa2] sm:$0x3] %v758_v49  ;;  %v772_v51 = vld [vmem:[#allocation0 + $0x298] sm:$0x3]  ;;  %v779_v52 = vld [vmem:[#allocation0 + $0x2a0] sm:$0x3] }
  0xc1   :  { %1059 = vst [vmem:[%s1470_s1 + $0xa4] sm:$0x3] %v765_v50  ;;  %1060 = vst [vmem:[%s1470_s1 + $0xa6] sm:$0x3] %v772_v51  ;;  %v786_v53 = vld [vmem:[#allocation0 + $0x2a8] sm:$0x3] }
  0xc2   :  { %1061 = vst [vmem:[%s1470_s1 + $0xa8] sm:$0x3] %v779_v52  ;;  %v793_v54 = vld [vmem:[#allocation0 + $0x2b0] sm:$0x3]  ;;  %v800_v55 = vld [vmem:[#allocation0 + $0x2b8] sm:$0x3] }
  0xc3   :  { %1062 = vst [vmem:[%s1470_s1 + $0xaa] sm:$0x3] %v786_v53  ;;  %1063 = vst [vmem:[%s1470_s1 + $0xac] sm:$0x3] %v793_v54 }
  0xc4   :  { %1064 = vst [vmem:[%s1470_s1 + $0xae] sm:$0x3] %v800_v55 }

// kernel: multimodal_forward.8
= control target key start
LH: loop header
LB: loop body
LE: loop exit
PB: predicated region body
PF: predicated region fallthrough
CT: control target
= control target key end

     0   :  { %v195_v0 = vmov 0.0   ;;  %vm196_vm0 = vmmov 0   ;;  %vm63_vm1 = vcmask 523264   ;;  %vm113_vm2 = vcmask 517120   ;;  %s267_s1 = inlined_call_operand.vmem [shape: bf16[64,64], index: 1, kind: input, shape index: {}]   ;;  %s268_s0 = inlined_call_operand.vmem [shape: f32[10,64], index: 0, kind: input, shape index: {}]   ;;  %s269_s2 = inlined_call_operand.vmem [shape: f32[1,64], index: 2, kind: input, shape index: {}]   ;;  %s270_s3 = inlined_call_operand.vmem [shape: f32[1,64], index: 3, kind: input, shape index: {}]   ;;  %s271_s4 = inlined_call_operand.vmem [shape: f32[1,64], index: 4, kind: input, shape index: {}]   ;;  %s272_s5 = inlined_call_operand.vmem [shape: f32[10,64], index: 5, kind: output, shape index: {}]  }
   0x1   :  { %173 = vmatprep.subr.bf16.mxu0 %v195_v0  ;;  %v187_v1 = vld [vmem:[%s267_s1 + $0x18] sm:$0xff]   ;;  %181 = vmatprep.mubr.msk.bf16.mxu0 %vm196_vm0, %v195_v0  ;;  %v188_v2 = vld [vmem:[%s267_s1 + $0x10] sm:$0xff]   ;;  %v189_v3 = vld [vmem:[%s267_s1 + $0x8] sm:$0xff]  }
   0x2   :  { %174 = vmatpush3.bf16.msra.mxu0 %v187_v1  ;;  %v190_v4 = vld [vmem:[%s267_s1] sm:$0xff]   ;;  %v22_v6 = vld [vmem:[%s268_s0 + $0x8] sm:$0x3] }
   0x3   :  { %175 = vmatprep.subr.bf16.mxu0 %v195_v0  ;;  %v21_v5 = vld [vmem:[%s268_s0] sm:$0xff] }
   0x4   :  { %v23_v7 = vpack.c.bf16 %v22_v6, %v21_v5  ;;  %v160_v8 = vld [vmem:[%s269_s2] ss:$0 sm:$0xff] }
   0x5   :  { %v166_v34 = vld [vmem:[%s270_s3] ss:$0 sm:$0xff] }
   0x6   :  { %176 = vmatpush3.bf16.msra.mxu0 %v188_v2  ;;  %v167_v36 = vld [vmem:[%s271_s4] ss:$0 sm:$0xff] }
   0x7   :  { %177 = vmatprep.subr.bf16.mxu0 %v195_v0 }
   0xa   :  { %178 = vmatpush3.bf16.msra.mxu0 %v189_v3 }
   0xb   :  { %179 = vmatprep.subr.bf16.mxu0 %v195_v0 }
   0xe   :  { %180 = vmatpush3.bf16.msra.mxu0 %v190_v4 }
  0x11   :  { %182 = vmatmul.mubr.msk.bf16.vlgmr.msra.gmra.mxu0 %vm63_vm1, %v23_v7 }
  0xd1   :  { %v101_v9 = vpop.f32.mrf.mxu0 }
  0xd2   :  { %v102_v10 = vadd.f32 %v160_v8, %v101_v9 }
  0xd3   :  { %v183_v11 = vpop.f32.mrf.mxu0 }
  0xd4   :  { %v110_v12 = vsel %vm63_vm1, %v102_v10, 0.0 }
  0xd5   :  { %111 = vadd.xlane.f32.xlu0 %v110_v12  ;;  %v104_v13 = vpop.f32.mrf.mxu0 }
  0xd6   :  { %v105_v14 = vadd.f32 %v160_v8, %v104_v13 }
  0xd7   :  { %v184_v15 = vpop.f32.mrf.mxu0 }
  0xd8   :  { %v114_v16 = vsel %vm113_vm2, %v105_v14, 0.0 }
  0xd9   :  { %115 = vadd.xlane.f32.xlu0 %v114_v16 }
 0x15e   :  { %v112_v17 = vpop.xlane.xlu0 %111 }
 0x15f   :  { %v118_v18 = vmul.f32 0.015625, %v112_v17 }
 0x161   :  { %v120_v19 = vsub.f32 %v102_v10, %v118_v18 }
 0x162   :  { %v116_v20 = vpop.xlane.xlu0 %115 }
 0x163   :  { %v119_v21 = vmul.f32 0.015625, %v116_v20  ;;  %v122_v22 = vmul.f32 %v120_v19, %v120_v19 }
 0x165   :  { %v121_v23 = vsub.f32 %v105_v14, %v119_v21  ;;  %v124_v24 = vsel %vm63_vm1, %v122_v22, 0.0 }
 0x166   :  { %125 = vadd.xlane.f32.xlu1 %v124_v24 }
 0x167   :  { %v123_v25 = vmul.f32 %v121_v23, %v121_v23 }
 0x169   :  { %v127_v26 = vsel %vm113_vm2, %v123_v25, 0.0 }
 0x16a   :  { %128 = vadd.xlane.f32.xlu1 %v127_v26 }
 0x1ef   :  { %v126_v27 = vpop.xlane.xlu1 %125 }
 0x1f0   :  { %v130_v28 = vmul.f32 0.015625, %v126_v27 }
 0x1f2   :  { %v132_v29 = vadd.f32 1e-05, %v130_v28 }
 0x1f3   :  { %v129_v30 = vpop.xlane.xlu1 %128 }
 0x1f4   :  { %191 = vrsqrt.f32 %v132_v29  ;;  %v131_v31 = vmul.f32 0.015625, %v129_v30 }
 0x1f6   :  { %v133_v32 = vadd.f32 1e-05, %v131_v31 }
 0x1f8   :  { %193 = vrsqrt.f32 %v133_v32 }
 0x201   :  { %v192_v33 = vpop.eup %191 }
 0x202   :  { %v136_v35 = vmul.f32 %v192_v33, %v120_v19 }
 0x204   :  { %v144_v37 = vmul.f32 %v166_v34, %v136_v35 }
 0x205   :  { %v194_v38 = vpop.eup %193 }
 0x206   :  { %v152_v39 = vadd.f32 %v167_v36, %v144_v37  ;;  %v137_v40 = vmul.f32 %v194_v38, %v121_v23 }
 0x208   :  { %154 = vst.msk [vmem:[%s272_s5] sm:$0xff] %vm63_vm1, %v152_v39  ;;  %v145_v41 = vmul.f32 %v166_v34, %v137_v40 }
 0x20a   :  { %v153_v42 = vadd.f32 %v167_v36, %v145_v41 }
 0x20c   :  { %155 = vst.msk [vmem:[%s272_s5 + $0x8] sm:$0x3] %vm113_vm2, %v153_v42 }

// kernel: multimodal_forward.6
= control target key start
LH: loop header
LB: loop body
LE: loop exit
PB: predicated region body
PF: predicated region fallthrough
CT: control target
= control target key end

     0   :  { %s597_s21 = smov 0   ;;  %s678_s0 = inlined_call_operand.vmem [shape: f32[2,4,192], index: 0, kind: input, shape index: {}]   ;;  %s679_s1 = inlined_call_operand.vmem [shape: bf16[192,64], index: 1, kind: input, shape index: {}]   ;;  %s680_s2 = inlined_call_operand.vmem [shape: f32[1,64], index: 2, kind: input, shape index: {}]   ;;  %s681_s3 = inlined_call_operand.vmem [shape: f32[5,64], index: 3, kind: input, shape index: {}]   ;;  %s682_s4 = inlined_call_operand.vmem [shape: f32[1,64], index: 4, kind: input, shape index: {}]   ;;  %s683_s5 = inlined_call_operand.vmem [shape: f32[1,64], index: 5, kind: input, shape index: {}]   ;;  %s684_s6 = inlined_call_operand.vmem [shape: f32[2,5,64], index: 6, kind: output, shape index: {}]  }
   0x1 LB: > { %s503_s22 = sadd.s32 4294967295, %s559_s21   ;;  %p507_p0 = scmp.ge.s32.totalorder %s559_s21, 1  ;;  %s559_s21 = sphi %s597_s21, %s16_s21  }
   0x2   : > { %p212_p1 = scmp.lt.s32.totalorder %s559_s21, 3 }
   0x4   : > { %p213_p2 = pnand %p507_p0, %p212_p1 }
   0x5   : > { %p241_p3 = scmp.lt.s32.totalorder (!%p213_p2), %s503_s22, 1 }
   0x6   : > { %216 = sbr.rel (%p213_p2) target bundleno = 564 (0x234), region = 44 }
   0xb   : > { %v536_v0 = vld [vmem:[%s679_s1 + $0x38] sm:$0xff]   ;;  %v561_v1 = vmov 0   ;;  %v537_v2 = vld [vmem:[%s679_s1 + $0x30] sm:$0xff]   ;;  %s686_s22 = smov (!%p241_p3, %s503_s22), 1  ;;  %v538_v3 = vld [vmem:[%s679_s1 + $0x28] sm:$0xff]   ;;  %vm403_vm0 = vcmask 516096   ;;  %v436_v50 = vlaneseq }
   0xc   : > { %363 = vmatprep.subr.bf16.mxu0 %v561_v1  ;;  %s526_s29 = sshll.u32 %s686_s22, 3  ;;  %v539_v4 = vld [vmem:[%s679_s1 + $0x20] sm:$0xff]   ;;  %v540_v10 = vld [vmem:[%s679_s1 + $0x18] sm:$0xff]   ;;  %vm359_vm1 = vcmask 523264   ;;  %v541_v13 = vld [vmem:[%s679_s1 + $0x10] sm:$0xff]   ;;  %vm421_vm2 = vcmask 519168  }
   0xd   : > { %364 = vmatpush1.bf16.msra.mxu0 %v536_v0  ;;  %s245_s8 = scalar_lea.vmem %s678_s0, %s526_s29  ;;  %v283_v6 = vld [vmem:[%s680_s2] sm:$0x1]  ;;  %v542_v14 = vld [vmem:[%s679_s1 + $0x8] sm:$0xff]   ;;  %v544_v16 = vld [vmem:[%s679_s1 + $0x58] sm:$0xff]   ;;  %s249_s18 = scalar_lea.vmem %s684_s6, %s526_s29  ;;  %v437_v51 = vshrl.u32 %v436_v50, 7 }
   0xe   : > { %365 = vmatprep.subr.bf16.mxu0 %v561_v1  ;;  %v251_v5 = vld [vmem:[%s245_s8] sm:$0xff]  ;;  %v545_v17 = vld [vmem:[%s679_s1 + $0x50] sm:$0xff]   ;;  %v546_v18 = vld [vmem:[%s679_s1 + $0x48] sm:$0xff]  }
   0xf   : > { %v284_v7 = vld [vmem:[%s681_s3] sm:$0x1]  ;;  %v253_v8 = vcombine.high %v251_v5, %v251_v5  ;;  %v255_v20 = vpack.c.bf16 %v251_v5, %v251_v5  ;;  %v286_v26 = vld [vmem:[%s681_s3 + $0x1] sm:$0xf]  ;;  %v438_v52 = vsub.s32 0, %v437_v51 }
  0x10   : > { %v285_v9 = vadd.f32 %v284_v7, %v283_v6  ;;  %v543_v15 = vld [vmem:[%s679_s1] sm:$0xff]  }
  0x11   : > { %366 = vmatpush1.bf16.msra.mxu0 %v537_v2  ;;  %v256_v11 = vpack.c.bf16 %v253_v8, %v253_v8  ;;  %v547_v19 = vld [vmem:[%s679_s1 + $0x40] sm:$0xff]  }
  0x12   : > { %367 = vmatprep.subr.bf16.mxu0 %v561_v1  ;;  %v404_v12 = vsel %vm403_vm0, %v285_v9, 0.0  ;;  %v281_v37 = vld [vmem:[%s682_s4] sm:$0x1] }
  0x13   : > { %405 = vadd.xlane.f32.xlu0 %v404_v12  ;;  %523 = vmatprep.mubr.msk.bf16.mxu0 %vm359_vm1, %v256_v11  ;;  %v282_v39 = vld [vmem:[%s683_s5] sm:$0x1]  ;;  %v439_v53 = vrot.slane %v281_v37, %v438_v52 }
  0x14   : > { %v446_v55 = vrot.slane %v282_v39, %v438_v52 }
  0x15   : > { %368 = vmatpush1.bf16.msra.mxu0 %v538_v3 }
  0x16   : > { %369 = vmatprep.subr.bf16.mxu0 %v561_v1 }
  0x19   : > { %370 = vmatpush1.bf16.msra.mxu0 %v539_v4 }
  0x1a   : > { %371 = vmatprep.subr.bf16.mxu0 %v561_v1 }
  0x1d   : > { %372 = vmatpush1.bf16.msra.mxu0 %v540_v10 }
  0x1e   : > { %373 = vmatprep.subr.bf16.mxu0 %v561_v1 }
  0x21   : > { %374 = vmatpush1.bf16.msra.mxu0 %v541_v13 }
  0x22   : > { %375 = vmatprep.subr.bf16.mxu0 %v561_v1 }
  0x25   : > { %376 = vmatpush1.bf16.msra.mxu0 %v542_v14 }
  0x26   : > { %377 = vmatprep.subr.bf16.mxu0 %v561_v1 }
  0x29   : > { %378 = vmatpush1.bf16.msra.mxu0 %v543_v15 }
  0x2a   : > { %387 = vmatprep.subr.bf16.mxu0 %v561_v1 }
  0x2d   : > { %388 = vmatpush2.bf16.msra.mxu0 %v544_v16 }
  0x2e   : > { %389 = vmatprep.subr.bf16.mxu0 %v561_v1 }
  0x31   : > { %390 = vmatpush2.bf16.msra.mxu0 %v545_v17 }
  0x32   : > { %391 = vmatprep.subr.bf16.mxu0 %v561_v1 }
  0x35   : > { %392 = vmatpush2.bf16.msra.mxu0 %v546_v18 }
  0x36   : > { %393 = vmatprep.subr.bf16.mxu0 %v561_v1 }
  0x39   : > { %394 = vmatpush2.bf16.msra.mxu0 %v547_v19 }
  0x3c   : > { %396 = vmatmul.mubr.bf16.vlgmr.msra.gmra.mxu0 %v255_v20 }
  0x9c   : > { %v406_v21 = vpop.xlane.xlu0 %405 }
  0x9d   : > { %v408_v22 = vmul.f32 0.015625, %v406_v21 }
  0x9f   : > { %v409_v23 = vsub.f32 %v285_v9, %v408_v22 }
  0xa1   : > { %v410_v24 = vmul.f32 %v409_v23, %v409_v23 }
  0xa3   : > { %v411_v25 = vsel %vm403_vm0, %v410_v24, 0.0 }
  0xa4   : > { %412 = vadd.xlane.f32.xlu1 %v411_v25 }
  0xfc   : > { %v397_v27 = vpop.f32.mrf.mxu0 }
  0xfd   : > { %v398_v28 = vadd.f32 %v397_v27, %v286_v26 }
  0xfe   : > { %v399_v29 = vpop.f32.mrf.mxu0 }
  0xff   : > { %v422_v30 = vsel %vm421_vm2, %v398_v28, 0.0 }
 0x100   : > { %v400_v31 = vpop.f32.mrf.mxu0  ;;  %423 = vadd.xlane.f32.xlu0 %v422_v30 }
 0x102   : > { %v401_v32 = vpop.f32.mrf.mxu0 }
 0x12d   : > { %v413_v33 = vpop.xlane.xlu1 %412 }
 0x12e   : > { %v414_v34 = vmul.f32 0.015625, %v413_v33 }
 0x130   : > { %v415_v35 = vadd.f32 1e-05, %v414_v34 }
 0x132   : > { %549 = vrsqrt.f32 %v415_v35 }
 0x13f   : > { %v550_v36 = vpop.eup %549 }
 0x140   : > { %v417_v38 = vmul.f32 %v550_v36, %v409_v23 }
 0x142   : > { %v418_v40 = vmul.f32 %v417_v38, %v281_v37 }
 0x144   : > { %v419_v41 = vadd.f32 %v418_v40, %v282_v39 }
 0x146   : > { %420 = vst.msk [vmem:[%s249_s18] sm:$0x1] %vm403_vm0, %v419_v41 }
 0x189   : > { %v424_v42 = vpop.xlane.xlu0 %423 }
 0x18a   : > { %v425_v43 = vmul.f32 0.015625, %v424_v42 }
 0x18c   : > { %v426_v44 = vsub.f32 %v398_v28, %v425_v43 }
 0x18e   : > { %v427_v45 = vmul.f32 %v426_v44, %v426_v44 }
 0x190   : > { %v428_v46 = vsel %vm421_vm2, %v427_v45, 0.0 }
 0x191   : > { %429 = vadd.xlane.f32.xlu1 %v428_v46 }
 0x21a   : > { %v430_v47 = vpop.xlane.xlu1 %429 }
 0x21b   : > { %v431_v48 = vmul.f32 0.015625, %v430_v47 }
 0x21d   : > { %v432_v49 = vadd.f32 1e-05, %v431_v48 }
 0x21f   : > { %551 = vrsqrt.f32 %v432_v49 }
 0x22c   : > { %v552_v54 = vpop.eup %551 }
 0x22d   : > { %v434_v56 = vmul.f32 %v552_v54, %v426_v44 }
 0x22f   : > { %v441_v57 = vmul.f32 %v439_v53, %v434_v56 }
 0x231   : > { %v448_v58 = vadd.f32 %v446_v55, %v441_v57 }
 0x233   : > { %449 = vst.msk [vmem:[%s249_s18 + $0x1] sm:$0xf] %vm421_vm2, %v448_v58 }
 0x234 PF: > { %s16_s21 = sadd.s32 1, %s559_s21  }
 0x235   : > { %p13_p4 = scmp.ge.s32.totalorder %s16_s21, 4  }
 0x237   :  { %15 = sbr.rel (!%p13_p4) target bundleno = 1 (0x1), region = 74 }

// kernel: multimodal_forward.11
= control target key start
LH: loop header
LB: loop body
LE: loop exit
PB: predicated region body
PF: predicated region fallthrough
CT: control target
= control target key end

     0   :  { %9 = vsyncpa [#allocation3], 0  ;;  %s706_s0 = inlined_call_operand.vmem [shape: f32[2,16,64], index: 0, kind: input, shape index: {}]   ;;  %s707_s1 = inlined_call_operand.vmem [shape: f32[1,64], index: 1, kind: input, shape index: {}]   ;;  %s708_s2 = inlined_call_operand.vmem [shape: f32[1,64], index: 2, kind: input, shape index: {}]   ;;  %s709_s3 = inlined_call_operand.vmem [shape: bf16[64,128], index: 3, kind: input, shape index: {}]   ;;  %s710_s4 = inlined_call_operand.hbm [shape: f32[2,16,128], index: 4, kind: output, shape index: {}]  }
   0x1   :  { %11 = vsyncpa [#allocation3 + $0x1], 0  ;;  %s581_s15 = smov 0   ;;  %s583_s16 = smov 0  }
   0x2   :  { %s585_s17 = smov 0   ;;  %s587_s18 = smov 0  }
   0x3 LB: > { %s602_s19 = sadd.s32 4294967295, %s549_s18   ;;  %s400_s20 = sadd.s32 4294967294, %s549_s18   ;;  %s549_s18 = sphi %s587_s18, %s716_s18   ;;  %s545_s17 = sphi %s585_s17, %s715_s17   ;;  %s541_s16 = sphi %s583_s16, %s714_s16   ;;  %s537_s15 = sphi %s581_s15, %s713_s15  }
   0x4   : > { %s606_s21 = sadd.s32 1, %s549_s18   ;;  %s113_s22 = sadd.s32 1, %s545_s17 }
   0x5   : > { %s110_s23 = ssub.s32 %s549_s18, %s606_s21  ;;  %p123_p0 = scmp.ne.s32.totalorder %s545_s17, %s541_s16 }
   0x6   : > { %p111_p1 = scmp.eq.s32.totalorder %s110_s23, 0  ;;  %p124_p2 = scmp.eq.s32.totalorder %s602_s19, 1 }
   0x7   : > { %p129_p3 = scmp.ne.s32.totalorder %s541_s16, %s537_s15  ;;  %p130_p4 = scmp.eq.s32.totalorder %s400_s20, 1 }
   0x8   : > { %s617_s24 = scalar_select %p111_p1, %s545_s17, %s113_s22  }
   0x9   : > { %p619_p5 = por %p124_p2, %p123_p0  ;;  %p623_p6 = por %p130_p4, %p129_p3 }
   0xa   : > { %p403_p7 = scmp.ge.s32.totalorder %s549_s18, 1  ;;  %p165_p8 = scmp.lt.s32.totalorder %s549_s18, 3 }
   0xc   : > { %p166_p9 = pnand %p403_p7, %p165_p8 }
   0xd   : > { %p191_p10 = scmp.lt.s32.totalorder (!%p166_p9), %s602_s19, 1 }
   0xe   : > { %169 = sbr.rel (%p166_p9) target bundleno = 550 (0x226), region = 36 }
  0x13   : > { %s192_s27 = scalar_select %p191_p10, %s602_s19, 1  ;;  %vm201_vm0 = vcmask 523264   ;;  %v481_v14 = vld [vmem:[%s709_s3 + $0x18] sm:$0xff]   ;;  %v551_v15 = vmov 0.0   ;;  %vm552_vm1 = vmmov 0   ;;  %v482_v16 = vld [vmem:[%s709_s3 + $0x10] sm:$0xff]  }
  0x14   : > { %426 = vmatprep.subr.bf16.mxu0 %v551_v15  ;;  %434 = vmatprep.mubr.msk.bf16.mxu0 %vm552_vm1, %v551_v15  ;;  %v483_v17 = vld [vmem:[%s709_s3 + $0x8] sm:$0xff]   ;;  %v484_v18 = vld [vmem:[%s709_s3] sm:$0xff]  }
  0x15   : > { %s419_s28 = sshll.u32 %s192_s27, 4  ;;  %427 = vmatpush3.bf16.msra.mxu0 %v481_v14  ;;  %v407_v27 = vld [vmem:[%s707_s1] ss:$0 sm:$0xff]  ;;  %s188_s27 = sand.u32 1, %s541_s16  }
  0x16   : > { %s195_s5 = scalar_lea.vmem %s706_s0, %s419_s28  ;;  %428 = vmatprep.subr.bf16.mxu0 %v551_v15  ;;  %v408_v31 = vld [vmem:[%s708_s2] ss:$0 sm:$0xff]  ;;  %s404_s28 = sshll.u32 %s188_s27, 4 }
  0x17   : > { %v197_v0 = vld [vmem:[%s195_s5] sm:$0xff]  ;;  %v198_v1 = vld [vmem:[%s195_s5 + $0x8] sm:$0xff]  ;;  %s190_s29 = scalar_lea.vmem [#allocation2], %s404_s28  ;;  %s420_s5 = sshll.u32 %s602_s19, 8 }
  0x18   : > { %v202_v2 = vsel %vm201_vm0, %v197_v0, 0.0  ;;  %v205_v3 = vsel %vm201_vm0, %v198_v1, 0.0  ;;  %s338_s30 = sshll.u32 %s190_s29, 4  ;;  %s664_s8 = scalar_lea.hbm %s710_s4, %s420_s5  ;;  %s659_s30 = int_to_ptr.vmem [resolvable:$true] %s338_s30 }
  0x19   : > { %203 = vadd.xlane.f32.xlu0 %v202_v2  ;;  %429 = vmatpush3.bf16.msra.mxu0 %v482_v16  ;;  %s666_s9 = scalar_lea.sflag [#allocation3], %s188_s27  ;;  %s489_s10 = scalar_lea.vmem %s659_s30, 256 }
  0x1a   : > { %430 = vmatprep.subr.bf16.mxu0 %v551_v15  ;;  %p490_p11 = scmp.ne.s32.totalorder %s659_s30, %s489_s10  ;;  %s553_s19 = smov [#allocation2]  }
  0x1b   : > { %s493_s11 = sshll.u32 %s553_s19, 4  ;;  %s494_s11 = int_to_ptr.vmem [resolvable:$false] %s493_s11 }
  0x1c   : > { %p491_p12 = pnand %p490_p11, %p619_p5  ;;  %s495_s12 = scalar_lea.vmem %s494_s11, 512 }
  0x1d   : > { %206 = vadd.xlane.f32.xlu0 %v205_v3  ;;  %431 = vmatpush3.bf16.msra.mxu0 %v483_v17  ;;  %p496_p0 = scmp.lt.s32.totalorder %s659_s30, %s494_s11  ;;  %p497_p1 = scmp.lt.s32.totalorder %s495_s12, %s489_s10 }
  0x1e   : > { %432 = vmatprep.subr.bf16.mxu0 %v551_v15  ;;  %p492_p13 = pneg %p491_p12 }
  0x1f   : > { %p498_p2 = por %p497_p1, %p496_p0 }
  0x21   : > { %433 = vmatpush3.bf16.msra.mxu0 %v484_v18  ;;  %p499_p3 = pnand %p498_p2, %p492_p13 }
  0xa2   : > { %v204_v4 = vpop.xlane.xlu0 %203 }
  0xa3   : > { %v209_v5 = vmul.f32 0.015625, %v204_v4 }
  0xa5   : > { %v211_v6 = vsub.f32 %v197_v0, %v209_v5 }
  0xa6   : > { %v207_v7 = vpop.xlane.xlu0 %206 }
  0xa7   : > { %v210_v8 = vmul.f32 0.015625, %v207_v7  ;;  %v213_v9 = vmul.f32 %v211_v6, %v211_v6 }
  0xa9   : > { %v212_v10 = vsub.f32 %v198_v1, %v210_v8  ;;  %v215_v11 = vsel %vm201_vm0, %v213_v9, 0.0 }
  0xaa   : > { %216 = vadd.xlane.f32.xlu1 %v215_v11 }
  0xab   : > { %v214_v12 = vmul.f32 %v212_v10, %v212_v10 }
  0xad   : > { %v218_v13 = vsel %vm201_vm0, %v214_v12, 0.0 }
  0xae   : > { %219 = vadd.xlane.f32.xlu1 %v218_v13 }
 0x133   : > { %v217_v19 = vpop.xlane.xlu1 %216 }
 0x134   : > { %v221_v20 = vmul.f32 0.015625, %v217_v19 }
 0x136   : > { %v223_v21 = vadd.f32 1e-05, %v221_v20 }
 0x137   : > { %v220_v22 = vpop.xlane.xlu1 %219 }
 0x138   : > { %485 = vrsqrt.f32 %v223_v21  ;;  %v222_v23 = vmul.f32 0.015625, %v220_v22 }
 0x13a   : > { %v224_v24 = vadd.f32 1e-05, %v222_v23 }
 0x13c   : > { %487 = vrsqrt.f32 %v224_v24 }
 0x145   : > { %v486_v25 = vpop.eup %485 }
 0x146   : > { %v227_v26 = vmul.f32 %v486_v25, %v211_v6 }
 0x148   : > { %v235_v30 = vmul.f32 %v407_v27, %v227_v26 }
 0x149   : > { %v488_v28 = vpop.eup %487 }
 0x14a   : > { %v228_v29 = vmul.f32 %v488_v28, %v212_v10  ;;  %v243_v33 = vadd.f32 %v408_v31, %v235_v30 }
 0x14c   : > { %v236_v32 = vmul.f32 %v407_v27, %v228_v29 }
 0x14e   : > { %v244_v34 = vadd.f32 %v408_v31, %v236_v32 }
 0x150   : > { %v245_v35 = vpack.c.bf16 %v244_v34, %v243_v33 }
 0x152   : > { %435 = vmatmul.mubr.msk.bf16.vlgmr.msra.gmra.mxu0 %vm201_vm0, %v245_v35 }
 0x212   : > { %v315_v36 = vpop.f32.mrf.mxu0 }
 0x213   : > { %322 = vst [vmem:[%s190_s29] sm:$0xff] %v315_v36 }
 0x214   : > { %v436_v37 = vpop.f32.mrf.mxu0 }
 0x216   : > { %v318_v38 = vpop.f32.mrf.mxu0 }
 0x217   : > { %323 = vst [vmem:[%s190_s29 + $0x8] sm:$0xff] %v318_v38 }
 0x218   : > { %v437_v39 = vpop.f32.mrf.mxu0 }
 0x219   : > { %502 = shalt.err (!%p499_p3)
}
 0x21a   : > { %s503_s13 = scalar_lea.hbm %s664_s8, 256  ;;  %s507_s22 = scalar_lea.hbm %s710_s4, 512 }
 0x21b   : > { %p504_p4 = scmp.ne.s32.totalorder %s664_s8, %s503_s13  ;;  %p508_p9 = scmp.lt.s32.totalorder %s664_s8, %s710_s4 }
 0x21c   : > { %p509_p10 = scmp.lt.s32.totalorder %s507_s22, %s503_s13 }
 0x21d   : > { %p505_p7 = pnand %p504_p4, %p619_p5 }
 0x21e   : > { %p510_p11 = por %p509_p10, %p508_p9 }
 0x21f   : > { %p506_p8 = pneg %p505_p7 }
 0x221   : > { %p511_p12 = pnand %p510_p11, %p506_p8 }
 0x223   : > { %514 = shalt.err (!%p511_p12)
}
 0x224   : > { %s554_s28 = smov 128   ;;  %s555_s29 = smov 8  }
 0x225   : > { %438 = dma.vmem_to_hbm [thread:$0]  (%p619_p5), %s659_s30, 256, %s664_s8, %s666_s9, %s554_s28, %s554_s28, %s555_s29  }
 0x226 PF: > { %p444_p13 = scmp.ge.s32.totalorder %s549_s18, 2  ;;  %s353_s5 = sand.u32 1, %s537_s15  }
 0x227   : > { %s354_s6 = scalar_lea.sflag [#allocation3], %s353_s5 }
 0x228   : > { %p441_p0 = pnand %p444_p13, %p623_p6 }
 0x22a   : > { %p442_p1 = pneg %p441_p0 }
 0x22c   : > { %532 = dma.done.wait (%p442_p1), %s354_s6, 256  }
 0x22d   : > { %534 = vsyncadd (%p442_p1), %s354_s6, 4294967040  ;;  %p14_p2 = scmp.ge.s32.totalorder %s606_s21, 4   ;;  %s713_s15 = smov %s541_s16 }
 0x22e   : > { %s714_s16 = smov %s545_s17  ;;  %s715_s17 = smov %s617_s24 }
 0x22f   : > { %s716_s18 = smov %s606_s21  ;;  %16 = sbr.rel (!%p14_p2) target bundleno = 3 (0x3), region = 71 }
 0x234   :  { %359 = vsyncpa [#allocation3], 1 }
 0x235   :  { %361 = vsyncpa [#allocation3 + $0x1], 1 }

// kernel: multimodal_forward.7
= control target key start
LH: loop header
LB: loop body
LE: loop exit
PB: predicated region body
PF: predicated region fallthrough
CT: control target
= control target key end

     0   :  { %s5278_s25 = smov 0   ;;  %s6124_s0 = inlined_call_operand.vmem [shape: f32[2,5,64], index: 0, kind: input, shape index: {}]   ;;  %s6125_s1 = inlined_call_operand.vmem [shape: f32[1,64], index: 1, kind: input, shape index: {}]   ;;  %s6126_s2 = inlined_call_operand.vmem [shape: f32[1,64], index: 2, kind: input, shape index: {}]   ;;  %s6127_s3 = inlined_call_operand.vmem [shape: bf16[3,8,64,8], index: 3, kind: input, shape index: {}]   ;;  %s6128_s4 = inlined_call_operand.vmem [shape: f32[3,8,1,8], index: 4, kind: input, shape index: {}]   ;;  %s6129_s5 = inlined_call_operand.vmem [shape: bf16[8,8,64], index: 5, kind: input, shape index: {}]   ;;  %s6130_s6 = inlined_call_operand.vmem [shape: f32[1,64], index: 6, kind: input, shape index: {}]   ;;  %s6131_s7 = inlined_call_operand.vmem [shape: f32[1,64], index: 7, kind: input, shape index: {}]   ;;  %s6132_s8 = inlined_call_operand.vmem [shape: f32[1,64], index: 8, kind: input, shape index: {}]   ;;  %s6133_s9 = inlined_call_operand.vmem [shape: bf16[64,128], index: 9, kind: input, shape index: {}]   ;;  %s6134_s10 = inlined_call_operand.vmem [shape: f32[1,128], index: 10, kind: input, shape index: {}]   ;;  %s6135_s11 = inlined_call_operand.vmem [shape: bf16[128,64], index: 11, kind: input, shape index: {}]   ;;  %s6136_s12 = inlined_call_operand.vmem [shape: f32[1,64], index: 12, kind: input, shape index: {}]   ;;  %s6137_s13 = inlined_call_operand.vmem [shape: f32[2,5,64], index: 13, kind: output, shape index: {}]  }
   0x1 LB: > { %s3982_s26 = sadd.s32 4294967295, %s5203_s25   ;;  %p3986_p0 = scmp.ge.s32.totalorder %s5203_s25, 1  ;;  %s5203_s25 = sphi %s5278_s25, %s23_s25  }
   0x2   : > { %p386_p1 = scmp.lt.s32.totalorder %s5203_s25, 3 }
   0x4   : > { %p387_p2 = pnand %p3986_p0, %p386_p1 }
   0x5   : > { %p428_p3 = scmp.lt.s32.totalorder (!%p387_p2), %s3982_s26, 1 }
   0x6   : > { %390 = sbr.rel (%p387_p2) target bundleno = 8441 (0x20f9), region = 72 }
   0xb   : > { %s6139_s26 = smov (!%p428_p3, %s3982_s26), 1  ;;  %vm440_vm0 = vcmask 520192   ;;  %v5050_v7 = vld [vmem:[%s6127_s3 + $0x18] sm:$0xff]   ;;  %v5205_v8 = vmov 0.0   ;;  %v5052_v10 = vld [vmem:[%s6127_s3 + $0x10] sm:$0xff]   ;;  %v5054_v12 = vld [vmem:[%s6127_s3 + $0x8] sm:$0xff]  }
   0xc   : > { %s3987_s27 = sshll.u32 %s6139_s26, 3  ;;  %4575 = vmatprep.subr.bf16.mxu0 %v5205_v8  ;;  %4587 = vmatprep.subr.bf16.mxu1 %v5205_v8  ;;  %v5051_v9 = vld [vmem:[%s6127_s3 + $0x118] sm:$0xff]   ;;  %v5053_v11 = vld [vmem:[%s6127_s3 + $0x110] sm:$0xff]   ;;  %v5055_v13 = vld [vmem:[%s6127_s3 + $0x108] sm:$0xff]   ;;  %vm5206_vm1 = vmmov 0   ;;  %vm527_vm2 = vcmask 523264  }
   0xd   : > { %s5294_s30 = scalar_lea.vmem %s6124_s0, %s3987_s27  ;;  %4576 = vmatpush3.bf16.msra.mxu0 %v5050_v7  ;;  %4588 = vmatpush3.bf16.msra.mxu1 %v5051_v9  ;;  %v5056_v14 = vld [vmem:[%s6127_s3] sm:$0xff]   ;;  %v5058_v25 = vld [vmem:[%s6127_s3 + $0x218] sm:$0xff]   ;;  %v5059_v27 = vld [vmem:[%s6127_s3 + $0x210] sm:$0xff]   ;;  %vm717_vm3 = vcmask 64512   ;;  %vm783_vm4 = vcmask 1041408   ;;  %vm784_vm5 = vcmask 1042432   ;;  %s435_s21 = scalar_lea.vmem %s6137_s13, %s3987_s27 }
   0xe   : > { %v437_v0 = vld [vmem:[%s5294_s30] sm:$0x1f]  ;;  %4577 = vmatprep.subr.bf16.mxu0 %v5205_v8  ;;  %4589 = vmatprep.subr.bf16.mxu1 %v5205_v8  ;;  %v5060_v28 = vld [vmem:[%s6127_s3 + $0x208] sm:$0xff]   ;;  %v5062_v44 = vld [vmem:[%s6127_s3 + $0x38] sm:$0xff]   ;;  %v5207_v48 = vmov 65535   ;;  %vm765_vm6 = vcmask 36864  }
   0xf   : > { %v441_v1 = vsel %vm440_vm0, %v437_v0, 0.0  ;;  %v5057_v15 = vld [vmem:[%s6127_s3 + $0x100] sm:$0xff]   ;;  %4583 = vmatprep.mubr.msk.bf16.mxu0 %vm5206_vm1, %v5205_v8  ;;  %4595 = vmatprep.mubr.msk.bf16.mxu1 %vm5206_vm1, %v5205_v8  ;;  %v4014_v30 = vld [vmem:[%s6128_s4 + $0x8] ss:$0 sm:$0xff]  ;;  %v4021_v46 = vld [vmem:[%s6128_s4 + $0x10] ss:$0 sm:$0xff] }
  0x10   : > { %442 = vadd.xlane.f32.xlu0 %v441_v1  ;;  %v3989_v20 = vld [vmem:[%s6125_s1] ss:$0 sm:$0xff]  ;;  %v5063_v47 = vld [vmem:[%s6127_s3 + $0x30] sm:$0xff]   ;;  %v785_v49 = vsel %vm783_vm4, 4294967295, %v5207_v48  ;;  %v5064_v54 = vld [vmem:[%s6127_s3 + $0x28] sm:$0xff]   ;;  %vm779_vm7 = vcmask 39936  }
  0x11   : > { %4578 = vmatpush3.bf16.msra.mxu0 %v5052_v10  ;;  %4590 = vmatpush3.bf16.msra.mxu1 %v5053_v11  ;;  %v3990_v22 = vld [vmem:[%s6126_s2] ss:$0 sm:$0xff]  ;;  %v5394_v52 = vsel %vm784_vm5, %v785_v49, 0  ;;  %v5066_v60 = vld [vmem:[%s6127_s3 + $0x238] sm:$0xff]   ;;  %v5067_v61 = vld [vmem:[%s6127_s3 + $0x230] sm:$0xff]   ;;  %vm1189_vm8 = vcmask 1043456  }
  0x12   : > { %4579 = vmatprep.subr.bf16.mxu0 %v5205_v8  ;;  %4591 = vmatprep.subr.bf16.mxu1 %v5205_v8  ;;  %v5061_v29 = vld [vmem:[%s6127_s3 + $0x200] sm:$0xff]   ;;  %v5068_v62 = vld [vmem:[%s6127_s3 + $0x228] sm:$0xff]  }
  0x13   : > { %v4007_v37 = vld [vmem:[%s6128_s4] ss:$0 sm:$0xff] }
  0x14   : > { %v5065_v59 = vld [vmem:[%s6127_s3 + $0x20] sm:$0xff]  }
  0x15   : > { %4580 = vmatpush3.bf16.msra.mxu0 %v5054_v12  ;;  %4592 = vmatpush3.bf16.msra.mxu1 %v5055_v13  ;;  %v5069_v63 = vld [vmem:[%s6127_s3 + $0x220] sm:$0xff]  }
  0x16   : > { %4581 = vmatprep.subr.bf16.mxu0 %v5205_v8  ;;  %4593 = vmatprep.subr.bf16.mxu1 %v5205_v8 }
  0x19   : > { %4582 = vmatpush3.bf16.msra.mxu0 %v5056_v14  ;;  %4594 = vmatpush3.bf16.msra.mxu1 %v5057_v15 }
  0x1a   : > { %4599 = vmatprep.subr.bf16.mxu0 %v5205_v8  ;;  %4617 = vmatprep.subr.bf16.mxu1 %v5205_v8 }
  0x99   : > { %v443_v2 = vpop.xlane.xlu0 %442 }
  0x9a   : > { %v445_v3 = vmul.f32 0.015625, %v443_v2 }
  0x9c   : > { %v446_v4 = vsub.f32 %v437_v0, %v445_v3 }
  0x9e   : > { %v447_v5 = vmul.f32 %v446_v4, %v446_v4 }
  0xa0   : > { %v448_v6 = vsel %vm440_vm0, %v447_v5, 0.0 }
  0xa1   : > { %449 = vadd.xlane.f32.xlu0 %v448_v6 }
 0x12a   : > { %v450_v16 = vpop.xlane.xlu0 %449 }
 0x12b   : > { %v451_v17 = vmul.f32 0.015625, %v450_v16 }
 0x12d   : > { %v452_v18 = vadd.f32 1e-05, %v451_v17 }
 0x12f   : > { %5158 = vrsqrt.f32 %v452_v18 }
 0x13c   : > { %v5159_v19 = vpop.eup %5158 }
 0x13d   : > { %v454_v21 = vmul.f32 %v5159_v19, %v446_v4 }
 0x13f   : > { %v461_v23 = vmul.f32 %v3989_v20, %v454_v21 }
 0x141   : > { %v468_v24 = vadd.f32 %v3990_v22, %v461_v23  ;;  %v5070_v23 = vld [vmem:[%s6127_s3 + $0x138] sm:$0xff]  }
 0x143   : > { %v5346_v26 = vpack.c.bf16 %v468_v24, %v468_v24 }
 0x145   : > { %4584 = vmatmul.mubr.msk.bf16.vlgmr.msra.gmra.mxu0 %vm527_vm2, %v5346_v26  ;;  %4596 = vmatmul.mubr.msk.bf16.vlgmr.msra.gmra.mxu1 %vm527_vm2, %v5346_v26 }
 0x146   : > { %4600 = vmatpush3.bf16.msra.mxu0 %v5058_v25  ;;  %4607 = vmatprep.mubr.msk.bf16.mxu0 %vm5206_vm1, %v5205_v8  ;;  %v5071_v25 = vld [vmem:[%s6127_s3 + $0x130] sm:$0xff]  }
 0x147   : > { %4601 = vmatprep.subr.bf16.mxu0 %v5205_v8  ;;  %4619 = vmatprep.mubr.msk.bf16.mxu1 %vm5206_vm1, %v5205_v8 }
 0x14a   : > { %4602 = vmatpush3.bf16.msra.mxu0 %v5059_v27  ;;  %v5072_v27 = vld [vmem:[%s6127_s3 + $0x128] sm:$0xff]  }
 0x14b   : > { %4603 = vmatprep.subr.bf16.mxu0 %v5205_v8 }
 0x14e   : > { %4604 = vmatpush3.bf16.msra.mxu0 %v5060_v28  ;;  %v5073_v28 = vld [vmem:[%s6127_s3 + $0x120] sm:$0xff]  }
 0x14f   : > { %4605 = vmatprep.subr.bf16.mxu0 %v5205_v8 }
 0x152   : > { %4606 = vmatpush3.bf16.msra.mxu0 %v5061_v29 }
 0x153   : > { %4611 = vmatprep.subr.bf16.mxu0 %v5205_v8 }
 0x155   : > { %4608 = vmatmul.mubr.msk.bf16.vlgmr.msra.gmra.mxu0 %vm527_vm2, %v5346_v26 }
 0x156   : > { %4613 = vmatprep.mubr.msk.bf16.mxu0 %vm5206_vm1, %v5205_v8 }
 0x205   : > { %v565_v31 = vpop.f32.mrf.mxu0  ;;  %v637_v32 = vpop.f32.mrf.mxu1 }
 0x206   : > { %v638_v33 = vadd.f32 %v4014_v30, %v637_v32  ;;  %v566_v43 = vadd.f32 %v4007_v37, %v565_v31 }
 0x207   : > { %v4585_v34 = vpop.f32.mrf.mxu0  ;;  %v4597_v35 = vpop.f32.mrf.mxu1 }
 0x208   : > { %v716_v36 = vpack.c.bf16 %v638_v33, %v638_v33  ;;  %v715_v45 = vpack.c.bf16 %v566_v43, %v566_v43  ;;  %v4061_v33 = vld [vmem:[%s6128_s4 + $0x9] ss:$0 sm:$0xff]  ;;  %v4068_v35 = vld [vmem:[%s6128_s4 + $0x11] ss:$0 sm:$0xff] }
 0x209   : > { %v568_v38 = vpop.f32.mrf.mxu0  ;;  %v640_v39 = vpop.f32.mrf.mxu1 }
 0x20a   : > { %v722_v40 = vsel %vm717_vm3, %v716_v36, 0  ;;  %v4054_v39 = vld [vmem:[%s6128_s4 + $0x1] ss:$0 sm:$0xff] }
 0x20b   : > { %v4586_v41 = vpop.f32.mrf.mxu0  ;;  %v4598_v42 = vpop.f32.mrf.mxu1  ;;  %4612 = vmatpush3.bf16.xpose.msra.mxu0 %v722_v40 }
 0x20c   : > { %4623 = vmatprep.subr.bf16.mxu0 %v5205_v8 }
 0x212   : > { %4614 = vmatmul.mubr.msk.bf16.vlgmr.msra.gmra.mxu0 %vm717_vm3, %v715_v45 }
 0x213   : > { %4624 = vmatpush3.bf16.msra.mxu0 %v5062_v44  ;;  %4631 = vmatprep.mubr.msk.bf16.mxu0 %vm5206_vm1, %v5205_v8 }
 0x214   : > { %4625 = vmatprep.subr.bf16.mxu0 %v5205_v8 }
 0x215   : > { %v709_v50 = vpop.f32.mrf.mxu0 }
 0x216   : > { %v710_v51 = vadd.f32 %v4021_v46, %v709_v50 }
 0x217   : > { %v4609_v53 = vpop.f32.mrf.mxu0  ;;  %4626 = vmatpush3.bf16.msra.mxu0 %v5063_v47 }
 0x218   : > { %v778_v55 = vpack.c.bf16 %v710_v51, %v710_v51  ;;  %4627 = vmatprep.subr.bf16.mxu0 %v5205_v8 }
 0x219   : > { %v712_v56 = vpop.f32.mrf.mxu0 }
 0x21a   : > { %v788_v57 = vand.u32 %v5394_v52, %v778_v55 }
 0x21b   : > { %v4610_v58 = vpop.f32.mrf.mxu0  ;;  %4628 = vmatpush3.bf16.msra.mxu0 %v5064_v54 }
 0x21c   : > { %4618 = vmatpush3.bf16.msra.mxu1 %v788_v57  ;;  %4629 = vmatprep.subr.bf16.mxu0 %v5205_v8 }
 0x21d   : > { %4635 = vmatprep.subr.bf16.mxu1 %v5205_v8 }
 0x21f   : > { %4630 = vmatpush3.bf16.msra.mxu0 %v5065_v59 }
 0x220   : > { %4647 = vmatprep.subr.bf16.mxu0 %v5205_v8 }
 0x222   : > { %4632 = vmatmul.mubr.msk.bf16.vlgmr.msra.gmra.mxu0 %vm527_vm2, %v5346_v26 }
 0x223   : > { %4648 = vmatpush3.bf16.msra.mxu0 %v5066_v60  ;;  %4655 = vmatprep.mubr.msk.bf16.mxu0 %vm5206_vm1, %v5205_v8  ;;  %v4076_v60 = vld [vmem:[%s6129_s5 + $0x4] sm:$0xf] }
 0x224   : > { %4649 = vmatprep.subr.bf16.mxu0 %v5205_v8 }
 0x227   : > { %4650 = vmatpush3.bf16.msra.mxu0 %v5067_v61  ;;  %v1191_v61 = vsel %vm1189_vm8, %v4076_v60, 0 }
 0x228   : > { %4651 = vmatprep.subr.bf16.mxu0 %v5205_v8 }
 0x22b   : > { %4652 = vmatpush3.bf16.msra.mxu0 %v5068_v62 }
 0x22c   : > { %4653 = vmatprep.subr.bf16.mxu0 %v5205_v8 }
 0x22f   : > { %4654 = vmatpush3.bf16.msra.mxu0 %v5069_v63 }
 0x230   : > { %4671 = vmatprep.subr.bf16.mxu0 %v5205_v8 }
 0x232   : > { %4656 = vmatmul.mubr.msk.bf16.vlgmr.msra.gmra.mxu0 %vm527_vm2, %v5346_v26 }
 0x233   : > { %4673 = vmatprep.mubr.msk.bf16.mxu0 %vm5206_vm1, %v5205_v8  ;;  %4672 = vmatpush3.bf16.msra.mxu0 %v1191_v61 }
 0x234   : > { %4683 = vmatprep.subr.bf16.mxu0 %v5205_v8 }
 0x2d2   : > { %v758_v0 = vpop.f32.mrf.mxu0 }
 0x2d3   : > { %v764_v1 = vmul.f32 0.35355338, %v758_v0  ;;  %v831_v0 = vld [vmem:[%s6129_s5] sm:$0xf] }
 0x2d4   : > { %v4615_v2 = vpop.f32.mrf.mxu0 }
 0x2d5   : > { %v766_v3 = vsel %vm765_vm6, %v764_v1, -inf }
 0x2d6   : > { %767 = vmax.xlane.f32.xlu1 %v766_v3  ;;  %v761_v4 = vpop.f32.mrf.mxu0  ;;  %v1237_v3 = vsel %vm1189_vm8, %v831_v0, 0 }
 0x2d7   : > { %v5074_v4 = vld [vmem:[%s6127_s3 + $0x158] sm:$0xff]  }
 0x2d8   : > { %v4616_v5 = vpop.f32.mrf.mxu0 }
 0x2e2   : > { %v925_v6 = vpop.f32.mrf.mxu0 }
 0x2e3   : > { %v926_v44 = vadd.f32 %v4054_v39, %v925_v6  ;;  %v5075_v6 = vld [vmem:[%s6127_s3 + $0x150] sm:$0xff]  }
 0x2e4   : > { %v4633_v7 = vpop.f32.mrf.mxu0 }
 0x2e5   : > { %v1075_v46 = vpack.c.bf16 %v926_v44, %v926_v44  ;;  %v5076_v7 = vld [vmem:[%s6127_s3 + $0x148] sm:$0xff]  }
 0x2e6   : > { %v928_v9 = vpop.f32.mrf.mxu0 }
 0x2e7   : > { %v5077_v9 = vld [vmem:[%s6127_s3 + $0x140] sm:$0xff]  }
 0x2e8   : > { %v4634_v10 = vpop.f32.mrf.mxu0 }
 0x2f2   : > { %v1069_v11 = vpop.f32.mrf.mxu0 }
 0x2f3   : > { %v1070_v40 = vadd.f32 %v4068_v35, %v1069_v11  ;;  %v5078_v11 = vld [vmem:[%s6127_s3 + $0x58] sm:$0xff]  }
 0x2f4   : > { %v4657_v12 = vpop.f32.mrf.mxu0 }
 0x2f5   : > { %v1136_v45 = vpack.c.bf16 %v1070_v40, %v1070_v40  ;;  %v4104_v40 = vld [vmem:[%s6128_s4 + $0x2] ss:$0 sm:$0xff] }
 0x2f6   : > { %v1072_v13 = vpop.f32.mrf.mxu0 }
 0x2f7   : > { %v1141_v47 = vand.u32 %v1136_v45, %v5394_v52 }
 0x2f8   : > { %v4658_v14 = vpop.f32.mrf.mxu0 }
 0x35f   : > { %v768_v15 = vpop.xlane.xlu1 %767 }
 0x360   : > { %v769_v16 = vsub.f32 %v764_v1, %v768_v15  ;;  %v5079_v15 = vld [vmem:[%s6127_s3 + $0x50] sm:$0xff]  }
 0x362   : > { %v770_v17 = vmul.f32 1.442695, %v769_v16 }
 0x364   : > { %5160 = vpow2.f32 %v770_v17 }
 0x371   : > { %v5161_v18 = vpop.eup %5160 }
 0x372   : > { %v772_v19 = vsel %vm765_vm6, %v5161_v18, 0.0 }
 0x373   : > { %773 = vadd.xlane.f32.xlu1 %v772_v19 }
 0x3fc   : > { %v774_v20 = vpop.xlane.xlu1 %773 }
 0x3fd   : > { %5162 = vrcp.f32 %v774_v20 }
 0x40a   : > { %v5163_v21 = vpop.eup %5162 }
 0x40b   : > { %v776_v22 = vmul.f32 %v5163_v21, %v5161_v18  ;;  %v5080_v18 = vld [vmem:[%s6127_s3 + $0x48] sm:$0xff]   ;;  %v5081_v21 = vld [vmem:[%s6127_s3 + $0x40] sm:$0xff]  }
 0x40d   : > { %v777_v24 = vpack.c.bf16 %v776_v22, %v776_v22 }
 0x40f   : > { %4620 = vmatmul.mubr.msk.bf16.vlgmr.msra.gmra.mxu1 %vm779_vm7, %v777_v24  ;;  %v5083_v24 = vld [vmem:[%s6127_s3 + $0x250] sm:$0xff]  }
 0x410   : > { %4636 = vmatpush3.bf16.msra.mxu1 %v5070_v23  ;;  %4643 = vmatprep.mubr.msk.bf16.mxu1 %vm5206_vm1, %v5205_v8  ;;  %v5082_v23 = vld [vmem:[%s6127_s3 + $0x258] sm:$0xff]  }
 0x411   : > { %4637 = vmatprep.subr.bf16.mxu1 %v5205_v8 }
 0x414   : > { %4638 = vmatpush3.bf16.msra.mxu1 %v5071_v25  ;;  %v4111_v25 = vld [vmem:[%s6128_s4 + $0xa] ss:$0 sm:$0xff] }
 0x415   : > { %4639 = vmatprep.subr.bf16.mxu1 %v5205_v8 }
 0x418   : > { %4640 = vmatpush3.bf16.msra.mxu1 %v5072_v27 }
 0x419   : > { %4641 = vmatprep.subr.bf16.mxu1 %v5205_v8 }
 0x41c   : > { %4642 = vmatpush3.bf16.msra.mxu1 %v5073_v28  ;;  %v5084_v28 = vld [vmem:[%s6127_s3 + $0x248] sm:$0xff]  }
 0x41d   : > { %4659 = vmatprep.subr.bf16.mxu1 %v5205_v8 }
 0x41f   : > { %4644 = vmatmul.mubr.msk.bf16.vlgmr.msra.gmra.mxu1 %vm527_vm2, %v5346_v26 }
 0x420   : > { %4661 = vmatprep.mubr.msk.bf16.mxu1 %vm5206_vm1, %v5205_v8 }
 0x4cf   : > { %v824_v29 = vpop.f32.mrf.mxu1 }
 0x4d0   : > { %v830_v5 = vpack.c.bf16 %v824_v29, %v824_v29 }
 0x4d1   : > { %v4621_v30 = vpop.f32.mrf.mxu1 }
 0x4d3   : > { %v827_v31 = vpop.f32.mrf.mxu1 }
 0x4d5   : > { %v4622_v32 = vpop.f32.mrf.mxu1 }
 0x4df   : > { %v997_v34 = vpop.f32.mrf.mxu1 }
 0x4e0   : > { %v998_v36 = vadd.f32 %v4061_v33, %v997_v34  ;;  %v5085_v33 = vld [vmem:[%s6127_s3 + $0x240] sm:$0xff]  }
 0x4e1   : > { %v4645_v37 = vpop.f32.mrf.mxu1 }
 0x4e2   : > { %v1076_v38 = vpack.c.bf16 %v998_v36, %v998_v36 }
 0x4e3   : > { %v1000_v41 = vpop.f32.mrf.mxu1 }
 0x4e4   : > { %v1081_v42 = vsel %vm717_vm3, %v1076_v38, 0 }
 0x4e5   : > { %v4646_v43 = vpop.f32.mrf.mxu1  ;;  %4660 = vmatpush3.bf16.xpose.msra.mxu1 %v1081_v42 }
 0x4e6   : > { %4665 = vmatprep.subr.bf16.mxu1 %v5205_v8 }
 0x4ec   : > { %4662 = vmatmul.mubr.msk.bf16.vlgmr.msra.gmra.mxu1 %vm717_vm3, %v1075_v46 }
 0x4ed   : > { %4666 = vmatpush3.bf16.msra.mxu1 %v1141_v47  ;;  %4667 = vmatprep.mubr.msk.bf16.mxu1 %vm5206_vm1, %v5205_v8  ;;  %v4118_v47 = vld [vmem:[%s6128_s4 + $0x12] ss:$0 sm:$0xff] }
 0x4ee   : > { %4677 = vmatprep.subr.bf16.mxu1 %v5205_v8 }
 0x5ac   : > { %v1117_v48 = vpop.f32.mrf.mxu1 }
 0x5ad   : > { %v1123_v49 = vmul.f32 0.35355338, %v1117_v48 }
 0x5ae   : > { %v4663_v50 = vpop.f32.mrf.mxu1 }
 0x5af   : > { %v1124_v51 = vsel %vm765_vm6, %v1123_v49, -inf }
 0x5b0   : > { %1125 = vmax.xlane.f32.xlu0 %v1124_v51  ;;  %v1120_v53 = vpop.f32.mrf.mxu1 }
 0x5b2   : > { %v4664_v54 = vpop.f32.mrf.mxu1 }
 0x639   : > { %v1126_v55 = vpop.xlane.xlu0 %1125 }
 0x63a   : > { %v1127_v56 = vsub.f32 %v1123_v49, %v1126_v55 }
 0x63c   : > { %v1128_v57 = vmul.f32 1.442695, %v1127_v56 }
 0x63e   : > { %5164 = vpow2.f32 %v1128_v57 }
 0x64b   : > { %v5165_v58 = vpop.eup %5164 }
 0x64c   : > { %v1130_v59 = vsel %vm765_vm6, %v5165_v58, 0.0 }
 0x64d   : > { %1131 = vadd.xlane.f32.xlu1 %v1130_v59 }
 0x6d6   : > { %v1132_v62 = vpop.xlane.xlu1 %1131 }
 0x6d7   : > { %5166 = vrcp.f32 %v1132_v62 }
 0x6e4   : > { %v5167_v63 = vpop.eup %5166 }
 0x6e5   : > { %v1134_v1 = vmul.f32 %v5167_v63, %v5165_v58 }
 0x6e7   : > { %v1135_v2 = vpack.c.bf16 %v1134_v1, %v1134_v1 }
 0x6e9   : > { %4668 = vmatmul.mubr.msk.bf16.vlgmr.msra.gmra.mxu1 %vm779_vm7, %v1135_v2 }
 0x6ea   : > { %4678 = vmatpush3.bf16.msra.mxu1 %v1237_v3  ;;  %4679 = vmatprep.mubr.msk.bf16.mxu1 %vm5206_vm1, %v5205_v8  ;;  %v4126_v3 = vld [vmem:[%s6129_s5 + $0x8] sm:$0xf] }
 0x6eb   : > { %4695 = vmatprep.subr.bf16.mxu1 %v5205_v8 }
 0x6f1   : > { %4680 = vmatmul.mubr.msk.bf16.vlgmr.msra.gmra.mxu1 %vm717_vm3, %v830_v5 }
 0x6f2   : > { %4696 = vmatpush3.bf16.msra.mxu1 %v5074_v4  ;;  %4703 = vmatprep.mubr.msk.bf16.mxu1 %vm5206_vm1, %v5205_v8  ;;  %v1637_v4 = vsel %vm1189_vm8, %v4126_v3, 0 }
 0x6f3   : > { %4697 = vmatprep.subr.bf16.mxu1 %v5205_v8 }
 0x6f6   : > { %4698 = vmatpush3.bf16.msra.mxu1 %v5075_v6 }
 0x6f7   : > { %4699 = vmatprep.subr.bf16.mxu1 %v5205_v8 }
 0x6fa   : > { %4700 = vmatpush3.bf16.msra.mxu1 %v5076_v7 }
 0x6fb   : > { %4701 = vmatprep.subr.bf16.mxu1 %v5205_v8 }
 0x6fe   : > { %4702 = vmatpush3.bf16.msra.mxu1 %v5077_v9  ;;  %v5086_v9 = vld [vmem:[%s6127_s3 + $0x78] sm:$0xff]  }
 0x6ff   : > { %4719 = vmatprep.subr.bf16.mxu1 %v5205_v8 }
 0x701   : > { %4704 = vmatmul.mubr.msk.bf16.vlgmr.msra.gmra.mxu1 %vm527_vm2, %v5346_v26 }
 0x702   : > { %4721 = vmatprep.mubr.msk.bf16.mxu1 %vm5206_vm1, %v5205_v8 }
 0x7a9   : > { %v1177_v10 = vpop.f32.mrf.mxu1 }
 0x7aa   : > { %v1183_v12 = vpack.c.bf16 %v1177_v10, %v1177_v10 }
 0x7ab   : > { %v4669_v13 = vpop.f32.mrf.mxu1 }
 0x7ac   : > { %4674 = vmatmul.mubr.msk.bf16.vlgmr.msra.gmra.mxu0 %vm717_vm3, %v1183_v12  ;;  %v5088_v12 = vld [vmem:[%s6127_s3 + $0x68] sm:$0xff]   ;;  %v5089_v13 = vld [vmem:[%s6127_s3 + $0x60] sm:$0xff]  }
 0x7ad   : > { %4684 = vmatpush3.bf16.msra.mxu0 %v5078_v11  ;;  %v1180_v14 = vpop.f32.mrf.mxu1  ;;  %4691 = vmatprep.mubr.msk.bf16.mxu0 %vm5206_vm1, %v5205_v8  ;;  %v5087_v11 = vld [vmem:[%s6127_s3 + $0x70] sm:$0xff]  }
 0x7ae   : > { %4685 = vmatprep.subr.bf16.mxu0 %v5205_v8  ;;  %v5090_v14 = vld [vmem:[%s6127_s3 + $0x278] sm:$0xff]  }
 0x7af   : > { %v4670_v16 = vpop.f32.mrf.mxu1 }
 0x7b0   : > { %v5092_v16 = vld [vmem:[%s6127_s3 + $0x268] sm:$0xff]  }
 0x7b1   : > { %4686 = vmatpush3.bf16.msra.mxu0 %v5079_v15  ;;  %v5520_v17 = vpop.f32.mrf.mxu1  ;;  %v5091_v15 = vld [vmem:[%s6127_s3 + $0x270] sm:$0xff]  }
 0x7b2   : > { %4687 = vmatprep.subr.bf16.mxu0 %v5205_v8 }
 0x7b3   : > { %v4681_v19 = vpop.f32.mrf.mxu1 }
 0x7b5   : > { %4688 = vmatpush3.bf16.msra.mxu0 %v5080_v18  ;;  %v1276_v20 = vpop.f32.mrf.mxu1  ;;  %v5093_v18 = vld [vmem:[%s6127_s3 + $0x260] sm:$0xff]  }
 0x7b6   : > { %4689 = vmatprep.subr.bf16.mxu0 %v5205_v8  ;;  %v5094_v20 = vld [vmem:[%s6127_s3 + $0x178] sm:$0xff]  }
 0x7b7   : > { %v4682_v22 = vpop.f32.mrf.mxu1 }
 0x7b9   : > { %4690 = vmatpush3.bf16.msra.mxu0 %v5081_v21 }
 0x7ba   : > { %4707 = vmatprep.subr.bf16.mxu0 %v5205_v8 }
 0x7bc   : > { %4692 = vmatmul.mubr.msk.bf16.vlgmr.msra.gmra.mxu0 %vm527_vm2, %v5346_v26 }
 0x7bd   : > { %4708 = vmatpush3.bf16.msra.mxu0 %v5082_v23  ;;  %4715 = vmatprep.mubr.msk.bf16.mxu0 %vm5206_vm1, %v5205_v8 }
 0x7be   : > { %4709 = vmatprep.subr.bf16.mxu0 %v5205_v8 }
 0x7c1   : > { %v1444_v27 = vpop.f32.mrf.mxu1  ;;  %4710 = vmatpush3.bf16.msra.mxu0 %v5083_v24  ;;  %v5095_v24 = vld [vmem:[%s6127_s3 + $0x170] sm:$0xff]  }
 0x7c2   : > { %v1445_v29 = vadd.f32 %v4111_v25, %v1444_v27  ;;  %4711 = vmatprep.subr.bf16.mxu0 %v5205_v8  ;;  %v5096_v27 = vld [vmem:[%s6127_s3 + $0x168] sm:$0xff]  }
 0x7c3   : > { %v4705_v30 = vpop.f32.mrf.mxu1 }
 0x7c4   : > { %v1523_v31 = vpack.c.bf16 %v1445_v29, %v1445_v29 }
 0x7c5   : > { %v1447_v32 = vpop.f32.mrf.mxu1  ;;  %4712 = vmatpush3.bf16.msra.mxu0 %v5084_v28  ;;  %v5097_v28 = vld [vmem:[%s6127_s3 + $0x160] sm:$0xff]  }
 0x7c6   : > { %v1528_v34 = vsel %vm717_vm3, %v1523_v31, 0  ;;  %4713 = vmatprep.subr.bf16.mxu0 %v5205_v8 }
 0x7c7   : > { %v4706_v35 = vpop.f32.mrf.mxu1  ;;  %4720 = vmatpush3.bf16.xpose.msra.mxu1 %v1528_v34 }
 0x7c8   : > { %4725 = vmatprep.subr.bf16.mxu1 %v5205_v8 }
 0x7c9   : > { %4714 = vmatpush3.bf16.msra.mxu0 %v5085_v33 }
 0x7ca   : > { %4731 = vmatprep.subr.bf16.mxu0 %v5205_v8 }
 0x7cc   : > { %4716 = vmatmul.mubr.msk.bf16.vlgmr.msra.gmra.mxu0 %vm527_vm2, %v5346_v26 }
 0x7cd   : > { %4733 = vmatprep.mubr.msk.bf16.mxu0 %vm5206_vm1, %v5205_v8  ;;  %4732 = vmatpush3.bf16.msra.mxu0 %v1637_v4 }
 0x7ce   : > { %4749 = vmatprep.subr.bf16.mxu0 %v5205_v8 }
 0x86c   : > { %v5560_v36 = vpop.f32.mrf.mxu0 }
 0x86e   : > { %v4675_v37 = vpop.f32.mrf.mxu0 }
 0x870   : > { %v1230_v38 = vpop.f32.mrf.mxu0 }
 0x871   : > { %v1274_v38 = vadd.f32 %v5520_v17, %v5560_v36  ;;  %v4153_v17 = vld [vmem:[%s6128_s4 + $0x3] ss:$0 sm:$0xff] }
 0x872   : > { %v4676_v39 = vpop.f32.mrf.mxu0 }
 0x87c   : > { %v1372_v41 = vpop.f32.mrf.mxu0 }
 0x87d   : > { %v1373_v42 = vadd.f32 %v4104_v40, %v1372_v41 }
 0x87e   : > { %v4693_v43 = vpop.f32.mrf.mxu0 }
 0x87f   : > { %v1522_v44 = vpack.c.bf16 %v1373_v42, %v1373_v42 }
 0x880   : > { %v1375_v45 = vpop.f32.mrf.mxu0 }
 0x881   : > { %4722 = vmatmul.mubr.msk.bf16.vlgmr.msra.gmra.mxu1 %vm717_vm3, %v1522_v44  ;;  %v4160_v44 = vld [vmem:[%s6128_s4 + $0xb] ss:$0 sm:$0xff] }
 0x882   : > { %v4694_v46 = vpop.f32.mrf.mxu0  ;;  %4727 = vmatprep.mubr.msk.bf16.mxu1 %vm5206_vm1, %v5205_v8 }
 0x883   : > { %v4167_v46 = vld [vmem:[%s6128_s4 + $0x13] ss:$0 sm:$0xff] }
 0x88c   : > { %v1516_v48 = vpop.f32.mrf.mxu0 }
 0x88d   : > { %v1517_v49 = vadd.f32 %v4118_v47, %v1516_v48 }
 0x88e   : > { %v4717_v50 = vpop.f32.mrf.mxu0 }
 0x88f   : > { %v1583_v51 = vpack.c.bf16 %v1517_v49, %v1517_v49 }
 0x890   : > { %v1519_v53 = vpop.f32.mrf.mxu0 }
 0x891   : > { %v1588_v54 = vand.u32 %v1583_v51, %v5394_v52 }
 0x892   : > { %v4718_v55 = vpop.f32.mrf.mxu0 }
 0x893   : > { %4726 = vmatpush3.bf16.msra.mxu1 %v1588_v54 }
 0x894   : > { %4737 = vmatprep.subr.bf16.mxu1 %v5205_v8 }
 0x941   : > { %v1564_v56 = vpop.f32.mrf.mxu1 }
 0x942   : > { %v1570_v57 = vmul.f32 0.35355338, %v1564_v56 }
 0x943   : > { %v4723_v58 = vpop.f32.mrf.mxu1 }
 0x944   : > { %v1571_v59 = vsel %vm765_vm6, %v1570_v57, -inf }
 0x945   : > { %1572 = vmax.xlane.f32.xlu0 %v1571_v59  ;;  %v1567_v60 = vpop.f32.mrf.mxu1 }
 0x947   : > { %v4724_v61 = vpop.f32.mrf.mxu1 }
 0x9ce   : > { %v1573_v62 = vpop.xlane.xlu0 %1572 }
 0x9cf   : > { %v1574_v63 = vsub.f32 %v1570_v57, %v1573_v62 }
 0x9d1   : > { %v1575_v0 = vmul.f32 1.442695, %v1574_v63 }
 0x9d3   : > { %5168 = vpow2.f32 %v1575_v0 }
 0x9e0   : > { %v5169_v1 = vpop.eup %5168 }
 0x9e1   : > { %v1577_v2 = vsel %vm765_vm6, %v5169_v1, 0.0 }
 0x9e2   : > { %1578 = vadd.xlane.f32.xlu1 %v1577_v2 }
 0xa6b   : > { %v1579_v5 = vpop.xlane.xlu1 %1578 }
 0xa6c   : > { %5170 = vrcp.f32 %v1579_v5  ;;  %v4175_v5 = vld [vmem:[%s6129_s5 + $0xc] sm:$0xf] }
 0xa79   : > { %v5171_v6 = vpop.eup %5170 }
 0xa7a   : > { %v1581_v7 = vmul.f32 %v5171_v6, %v5169_v1  ;;  %v2038_v6 = vsel %vm1189_vm8, %v4175_v5, 0 }
 0xa7c   : > { %v1582_v10 = vpack.c.bf16 %v1581_v7, %v1581_v7 }
 0xa7e   : > { %4728 = vmatmul.mubr.msk.bf16.vlgmr.msra.gmra.mxu1 %vm779_vm7, %v1582_v10 }
 0xa7f   : > { %4738 = vmatpush3.bf16.msra.mxu1 %v5086_v9  ;;  %4745 = vmatprep.mubr.msk.bf16.mxu1 %vm5206_vm1, %v5205_v8 }
 0xa80   : > { %4739 = vmatprep.subr.bf16.mxu1 %v5205_v8 }
 0xa83   : > { %4740 = vmatpush3.bf16.msra.mxu1 %v5087_v11  ;;  %v5098_v11 = vld [vmem:[%s6127_s3 + $0x98] sm:$0xff]  }
 0xa84   : > { %4741 = vmatprep.subr.bf16.mxu1 %v5205_v8 }
 0xa87   : > { %4742 = vmatpush3.bf16.msra.mxu1 %v5088_v12 }
 0xa88   : > { %4743 = vmatprep.subr.bf16.mxu1 %v5205_v8 }
 0xa8b   : > { %4744 = vmatpush3.bf16.msra.mxu1 %v5089_v13  ;;  %v5099_v13 = vld [vmem:[%s6127_s3 + $0x90] sm:$0xff]  }
 0xa8c   : > { %4761 = vmatprep.subr.bf16.mxu1 %v5205_v8 }
 0xa8e   : > { %4746 = vmatmul.mubr.msk.bf16.vlgmr.msra.gmra.mxu1 %vm527_vm2, %v5346_v26 }
 0xa8f   : > { %4762 = vmatpush3.bf16.msra.mxu1 %v5090_v14  ;;  %4769 = vmatprep.mubr.msk.bf16.mxu1 %vm5206_vm1, %v5205_v8  ;;  %v5100_v14 = vld [vmem:[%s6127_s3 + $0x88] sm:$0xff]  }
 0xa90   : > { %4763 = vmatprep.subr.bf16.mxu1 %v5205_v8 }
 0xa93   : > { %4764 = vmatpush3.bf16.msra.mxu1 %v5091_v15  ;;  %v5101_v15 = vld [vmem:[%s6127_s3 + $0x80] sm:$0xff]  }
 0xa94   : > { %4765 = vmatprep.subr.bf16.mxu1 %v5205_v8 }
 0xa97   : > { %4766 = vmatpush3.bf16.msra.mxu1 %v5092_v16  ;;  %v5102_v16 = vld [vmem:[%s6127_s3 + $0x298] sm:$0xff]  }
 0xa98   : > { %4767 = vmatprep.subr.bf16.mxu1 %v5205_v8 }
 0xa9b   : > { %4768 = vmatpush3.bf16.msra.mxu1 %v5093_v18  ;;  %v5103_v18 = vld [vmem:[%s6127_s3 + $0x290] sm:$0xff]  }
 0xa9c   : > { %4785 = vmatprep.subr.bf16.mxu1 %v5205_v8 }
 0xa9e   : > { %4770 = vmatmul.mubr.msk.bf16.vlgmr.msra.gmra.mxu1 %vm527_vm2, %v5346_v26 }
 0xa9f   : > { %4787 = vmatprep.mubr.msk.bf16.mxu1 %vm5206_vm1, %v5205_v8  ;;  %4786 = vmatpush3.bf16.msra.mxu1 %v2038_v6  ;;  %v4224_v6 = vld [vmem:[%s6129_s5 + $0x10] sm:$0xf] }
 0xaa0   : > { %4803 = vmatprep.subr.bf16.mxu1 %v5205_v8 }
 0xb3e   : > { %v1624_v19 = vpop.f32.mrf.mxu1 }
 0xb3f   : > { %v1630_v21 = vpack.c.bf16 %v1624_v19, %v1624_v19  ;;  %v5104_v19 = vld [vmem:[%s6127_s3 + $0x288] sm:$0xff]  }
 0xb40   : > { %v4729_v22 = vpop.f32.mrf.mxu1 }
 0xb41   : > { %4734 = vmatmul.mubr.msk.bf16.vlgmr.msra.gmra.mxu0 %vm717_vm3, %v1630_v21  ;;  %v5106_v22 = vld [vmem:[%s6127_s3 + $0x198] sm:$0xff]  }
 0xb42   : > { %4750 = vmatpush3.bf16.msra.mxu0 %v5094_v20  ;;  %v1627_v23 = vpop.f32.mrf.mxu1  ;;  %4757 = vmatprep.mubr.msk.bf16.mxu0 %vm5206_vm1, %v5205_v8  ;;  %v5105_v20 = vld [vmem:[%s6127_s3 + $0x280] sm:$0xff]  }
 0xb43   : > { %4751 = vmatprep.subr.bf16.mxu0 %v5205_v8 }
 0xb44   : > { %v4730_v25 = vpop.f32.mrf.mxu1 }
 0xb46   : > { %4752 = vmatpush3.bf16.msra.mxu0 %v5095_v24 }
 0xb47   : > { %4753 = vmatprep.subr.bf16.mxu0 %v5205_v8 }
 0xb4a   : > { %4754 = vmatpush3.bf16.msra.mxu0 %v5096_v27  ;;  %v5107_v27 = vld [vmem:[%s6127_s3 + $0x190] sm:$0xff]  }
 0xb4b   : > { %4755 = vmatprep.subr.bf16.mxu0 %v5205_v8 }
 0xb4e   : > { %v1773_v29 = vpop.f32.mrf.mxu1  ;;  %4756 = vmatpush3.bf16.msra.mxu0 %v5097_v28 }
 0xb4f   : > { %4773 = vmatprep.subr.bf16.mxu0 %v5205_v8  ;;  %v1774_v54 = vadd.f32 %v4153_v17, %v1773_v29  ;;  %v5108_v29 = vld [vmem:[%s6127_s3 + $0x188] sm:$0xff]  }
 0xb50   : > { %v4747_v30 = vpop.f32.mrf.mxu1 }
 0xb51   : > { %4758 = vmatmul.mubr.msk.bf16.vlgmr.msra.gmra.mxu0 %vm527_vm2, %v5346_v26  ;;  %v1923_v56 = vpack.c.bf16 %v1774_v54, %v1774_v54  ;;  %v5109_v30 = vld [vmem:[%s6127_s3 + $0x180] sm:$0xff]  }
 0xb52   : > { %v1776_v31 = vpop.f32.mrf.mxu1  ;;  %4775 = vmatprep.mubr.msk.bf16.mxu0 %vm5206_vm1, %v5205_v8 }
 0xb54   : > { %v4748_v32 = vpop.f32.mrf.mxu1 }
 0xb5e   : > { %v1917_v33 = vpop.f32.mrf.mxu1 }
 0xb5f   : > { %v1918_v36 = vadd.f32 %v4167_v46, %v1917_v33  ;;  %v4209_v46 = vld [vmem:[%s6128_s4 + $0xc] ss:$0 sm:$0xff] }
 0xb60   : > { %v4771_v34 = vpop.f32.mrf.mxu1 }
 0xb61   : > { %v1984_v55 = vpack.c.bf16 %v1918_v36, %v1918_v36 }
 0xb62   : > { %v1920_v35 = vpop.f32.mrf.mxu1 }
 0xb63   : > { %v1989_v57 = vand.u32 %v1984_v55, %v5394_v52 }
 0xb64   : > { %v4772_v37 = vpop.f32.mrf.mxu1 }
 0xc01   : > { %v1673_v39 = vpop.f32.mrf.mxu0 }
 0xc02   : > { %v5648_v40 = vadd.f32 %v1673_v39, %v1274_v38 }
 0xc03   : > { %v4735_v41 = vpop.f32.mrf.mxu0 }
 0xc05   : > { %v1676_v42 = vpop.f32.mrf.mxu0 }
 0xc07   : > { %v4736_v43 = vpop.f32.mrf.mxu0 }
 0xc11   : > { %v1845_v45 = vpop.f32.mrf.mxu0 }
 0xc12   : > { %v1846_v47 = vadd.f32 %v4160_v44, %v1845_v45 }
 0xc13   : > { %v4759_v48 = vpop.f32.mrf.mxu0 }
 0xc14   : > { %v1924_v49 = vpack.c.bf16 %v1846_v47, %v1846_v47  ;;  %v4216_v48 = vld [vmem:[%s6128_s4 + $0x14] ss:$0 sm:$0xff] }
 0xc15   : > { %v1848_v50 = vpop.f32.mrf.mxu0 }
 0xc16   : > { %v1929_v51 = vsel %vm717_vm3, %v1924_v49, 0 }
 0xc17   : > { %v4760_v53 = vpop.f32.mrf.mxu0  ;;  %4774 = vmatpush3.bf16.xpose.msra.mxu0 %v1929_v51 }
 0xc18   : > { %4779 = vmatprep.subr.bf16.mxu0 %v5205_v8 }
 0xc1e   : > { %4776 = vmatmul.mubr.msk.bf16.vlgmr.msra.gmra.mxu0 %vm717_vm3, %v1923_v56 }
 0xc1f   : > { %4780 = vmatpush3.bf16.msra.mxu0 %v1989_v57  ;;  %4781 = vmatprep.mubr.msk.bf16.mxu0 %vm5206_vm1, %v5205_v8 }
 0xc20   : > { %4791 = vmatprep.subr.bf16.mxu0 %v5205_v8 }
 0xcde   : > { %v1965_v58 = vpop.f32.mrf.mxu0 }
 0xcdf   : > { %v1971_v59 = vmul.f32 0.35355338, %v1965_v58 }
 0xce0   : > { %v4777_v60 = vpop.f32.mrf.mxu0 }
 0xce1   : > { %v1972_v61 = vsel %vm765_vm6, %v1971_v59, -inf }
 0xce2   : > { %1973 = vmax.xlane.f32.xlu0 %v1972_v61  ;;  %v1968_v62 = vpop.f32.mrf.mxu0 }
 0xce4   : > { %v4778_v63 = vpop.f32.mrf.mxu0 }
 0xd6b   : > { %v1974_v0 = vpop.xlane.xlu0 %1973 }
 0xd6c   : > { %v1975_v1 = vsub.f32 %v1971_v59, %v1974_v0 }
 0xd6e   : > { %v1976_v2 = vmul.f32 1.442695, %v1975_v1 }
 0xd70   : > { %5172 = vpow2.f32 %v1976_v2 }
 0xd7d   : > { %v5173_v3 = vpop.eup %5172 }
 0xd7e   : > { %v1978_v4 = vsel %vm765_vm6, %v5173_v3, 0.0 }
 0xd7f   : > { %1979 = vadd.xlane.f32.xlu1 %v1978_v4 }
 0xe08   : > { %v1980_v7 = vpop.xlane.xlu1 %1979 }
 0xe09   : > { %5174 = vrcp.f32 %v1980_v7  ;;  %v2439_v7 = vsel %vm1189_vm8, %v4224_v6, 0 }
 0xe16   : > { %v5175_v9 = vpop.eup %5174 }
 0xe17   : > { %v1982_v10 = vmul.f32 %v5175_v9, %v5173_v3 }
 0xe19   : > { %v1983_v12 = vpack.c.bf16 %v1982_v10, %v1982_v10 }
 0xe1b   : > { %4782 = vmatmul.mubr.msk.bf16.vlgmr.msra.gmra.mxu0 %vm779_vm7, %v1983_v12  ;;  %v5110_v12 = vld [vmem:[%s6127_s3 + $0xb8] sm:$0xff]  }
 0xe1c   : > { %4792 = vmatpush3.bf16.msra.mxu0 %v5098_v11  ;;  %4799 = vmatprep.mubr.msk.bf16.mxu0 %vm5206_vm1, %v5205_v8 }
 0xe1d   : > { %4793 = vmatprep.subr.bf16.mxu0 %v5205_v8 }
 0xe20   : > { %4794 = vmatpush3.bf16.msra.mxu0 %v5099_v13 }
 0xe21   : > { %4795 = vmatprep.subr.bf16.mxu0 %v5205_v8 }
 0xe24   : > { %4796 = vmatpush3.bf16.msra.mxu0 %v5100_v14  ;;  %v5111_v14 = vld [vmem:[%s6127_s3 + $0xb0] sm:$0xff]  }
 0xe25   : > { %4797 = vmatprep.subr.bf16.mxu0 %v5205_v8 }
 0xe28   : > { %4798 = vmatpush3.bf16.msra.mxu0 %v5101_v15  ;;  %v5112_v15 = vld [vmem:[%s6127_s3 + $0xa8] sm:$0xff]  }
 0xe29   : > { %4815 = vmatprep.subr.bf16.mxu0 %v5205_v8 }
 0xe2b   : > { %4800 = vmatmul.mubr.msk.bf16.vlgmr.msra.gmra.mxu0 %vm527_vm2, %v5346_v26 }
 0xe2c   : > { %4816 = vmatpush3.bf16.msra.mxu0 %v5102_v16  ;;  %4823 = vmatprep.mubr.msk.bf16.mxu0 %vm5206_vm1, %v5205_v8  ;;  %v5113_v16 = vld [vmem:[%s6127_s3 + $0xa0] sm:$0xff]  }
 0xe2d   : > { %4817 = vmatprep.subr.bf16.mxu0 %v5205_v8 }
 0xe30   : > { %4818 = vmatpush3.bf16.msra.mxu0 %v5103_v18  ;;  %v5114_v18 = vld [vmem:[%s6127_s3 + $0x2b8] sm:$0xff]  }
 0xe31   : > { %4819 = vmatprep.subr.bf16.mxu0 %v5205_v8 }
 0xe34   : > { %4820 = vmatpush3.bf16.msra.mxu0 %v5104_v19  ;;  %v5115_v19 = vld [vmem:[%s6127_s3 + $0x2b0] sm:$0xff]  }
 0xe35   : > { %4821 = vmatprep.subr.bf16.mxu0 %v5205_v8 }
 0xe38   : > { %4822 = vmatpush3.bf16.msra.mxu0 %v5105_v20  ;;  %v5116_v20 = vld [vmem:[%s6127_s3 + $0x2a8] sm:$0xff]  }
 0xe39   : > { %4839 = vmatprep.subr.bf16.mxu0 %v5205_v8 }
 0xe3b   : > { %4824 = vmatmul.mubr.msk.bf16.vlgmr.msra.gmra.mxu0 %vm527_vm2, %v5346_v26 }
 0xe3c   : > { %4841 = vmatprep.mubr.msk.bf16.mxu0 %vm5206_vm1, %v5205_v8  ;;  %4840 = vmatpush3.bf16.msra.mxu0 %v2439_v7  ;;  %v4273_v7 = vld [vmem:[%s6129_s5 + $0x14] sm:$0xf] }
 0xe3d   : > { %4857 = vmatprep.subr.bf16.mxu0 %v5205_v8 }
 0xedb   : > { %v2025_v21 = vpop.f32.mrf.mxu0 }
 0xedc   : > { %v2031_v23 = vpack.c.bf16 %v2025_v21, %v2025_v21  ;;  %v5117_v21 = vld [vmem:[%s6127_s3 + $0x2a0] sm:$0xff]  }
 0xedd   : > { %v4783_v24 = vpop.f32.mrf.mxu0 }
 0xede   : > { %4788 = vmatmul.mubr.msk.bf16.vlgmr.msra.gmra.mxu1 %vm717_vm3, %v2031_v23  ;;  %v5118_v23 = vld [vmem:[%s6127_s3 + $0x1b8] sm:$0xff]  }
 0xedf   : > { %4804 = vmatpush3.bf16.msra.mxu1 %v5106_v22  ;;  %v2028_v25 = vpop.f32.mrf.mxu0  ;;  %4811 = vmatprep.mubr.msk.bf16.mxu1 %vm5206_vm1, %v5205_v8 }
 0xee0   : > { %4805 = vmatprep.subr.bf16.mxu1 %v5205_v8 }
 0xee1   : > { %v4784_v28 = vpop.f32.mrf.mxu0 }
 0xee2   : > { %v5119_v28 = vld [vmem:[%s6127_s3 + $0x1b0] sm:$0xff]  }
 0xee3   : > { %4806 = vmatpush3.bf16.msra.mxu1 %v5107_v27 }
 0xee4   : > { %4807 = vmatprep.subr.bf16.mxu1 %v5205_v8 }
 0xee7   : > { %4808 = vmatpush3.bf16.msra.mxu1 %v5108_v29 }
 0xee8   : > { %4809 = vmatprep.subr.bf16.mxu1 %v5205_v8 }
 0xeeb   : > { %v2174_v31 = vpop.f32.mrf.mxu0  ;;  %4810 = vmatpush3.bf16.msra.mxu1 %v5109_v30  ;;  %v5120_v30 = vld [vmem:[%s6127_s3 + $0x1a8] sm:$0xff]  }
 0xeec   : > { %4827 = vmatprep.subr.bf16.mxu1 %v5205_v8 }
 0xeed   : > { %v4801_v32 = vpop.f32.mrf.mxu0 }
 0xeee   : > { %4812 = vmatmul.mubr.msk.bf16.vlgmr.msra.gmra.mxu1 %vm527_vm2, %v5346_v26 }
 0xeef   : > { %v2177_v33 = vpop.f32.mrf.mxu0  ;;  %4829 = vmatprep.mubr.msk.bf16.mxu1 %vm5206_vm1, %v5205_v8 }
 0xef1   : > { %v4802_v34 = vpop.f32.mrf.mxu0 }
 0xefb   : > { %v2318_v35 = vpop.f32.mrf.mxu0 }
 0xefc   : > { %v2319_v50 = vadd.f32 %v4216_v48, %v2318_v35  ;;  %v4258_v48 = vld [vmem:[%s6128_s4 + $0xd] ss:$0 sm:$0xff] }
 0xefd   : > { %v4825_v37 = vpop.f32.mrf.mxu0 }
 0xefe   : > { %v2385_v56 = vpack.c.bf16 %v2319_v50, %v2319_v50 }
 0xeff   : > { %v2321_v38 = vpop.f32.mrf.mxu0 }
 0xf00   : > { %v2390_v58 = vand.u32 %v2385_v56, %v5394_v52 }
 0xf01   : > { %v4826_v39 = vpop.f32.mrf.mxu0 }
 0xf9e   : > { %v2074_v41 = vpop.f32.mrf.mxu1 }
 0xf9f   : > { %v5740_v42 = vadd.f32 %v2074_v41, %v5648_v40  ;;  %v4202_v40 = vld [vmem:[%s6128_s4 + $0x4] ss:$0 sm:$0xff] }
 0xfa0   : > { %v4789_v43 = vpop.f32.mrf.mxu1  ;;  %v2175_v55 = vadd.f32 %v4202_v40, %v2174_v31  ;;  %v5121_v31 = vld [vmem:[%s6127_s3 + $0x1a0] sm:$0xff]  }
 0xfa2   : > { %v2077_v44 = vpop.f32.mrf.mxu1  ;;  %v2324_v57 = vpack.c.bf16 %v2175_v55, %v2175_v55 }
 0xfa4   : > { %v4790_v45 = vpop.f32.mrf.mxu1 }
 0xfae   : > { %v2246_v47 = vpop.f32.mrf.mxu1 }
 0xfaf   : > { %v2247_v49 = vadd.f32 %v4209_v46, %v2246_v47 }
 0xfb0   : > { %v4813_v17 = vpop.f32.mrf.mxu1 }
 0xfb1   : > { %v2325_v36 = vpack.c.bf16 %v2247_v49, %v2247_v49  ;;  %v4265_v17 = vld [vmem:[%s6128_s4 + $0x15] ss:$0 sm:$0xff] }
 0xfb2   : > { %v2249_v51 = vpop.f32.mrf.mxu1 }
 0xfb3   : > { %v2330_v53 = vsel %vm717_vm3, %v2325_v36, 0 }
 0xfb4   : > { %v4814_v54 = vpop.f32.mrf.mxu1  ;;  %4828 = vmatpush3.bf16.xpose.msra.mxu1 %v2330_v53 }
 0xfb5   : > { %4833 = vmatprep.subr.bf16.mxu1 %v5205_v8 }
 0xfbb   : > { %4830 = vmatmul.mubr.msk.bf16.vlgmr.msra.gmra.mxu1 %vm717_vm3, %v2324_v57 }
 0xfbc   : > { %4834 = vmatpush3.bf16.msra.mxu1 %v2390_v58  ;;  %4835 = vmatprep.mubr.msk.bf16.mxu1 %vm5206_vm1, %v5205_v8 }
 0xfbd   : > { %4845 = vmatprep.subr.bf16.mxu1 %v5205_v8 }
0x107b   : > { %v2366_v59 = vpop.f32.mrf.mxu1 }
0x107c   : > { %v2372_v60 = vmul.f32 0.35355338, %v2366_v59 }
0x107d   : > { %v4831_v61 = vpop.f32.mrf.mxu1 }
0x107e   : > { %v2373_v62 = vsel %vm765_vm6, %v2372_v60, -inf }
0x107f   : > { %2374 = vmax.xlane.f32.xlu0 %v2373_v62  ;;  %v2369_v63 = vpop.f32.mrf.mxu1 }
0x1081   : > { %v4832_v0 = vpop.f32.mrf.mxu1 }
0x1108   : > { %v2375_v1 = vpop.xlane.xlu0 %2374 }
0x1109   : > { %v2376_v2 = vsub.f32 %v2372_v60, %v2375_v1 }
0x110b   : > { %v2377_v3 = vmul.f32 1.442695, %v2376_v2 }
0x110d   : > { %5176 = vpow2.f32 %v2377_v3 }
0x111a   : > { %v5177_v4 = vpop.eup %5176 }
0x111b   : > { %v2379_v5 = vsel %vm765_vm6, %v5177_v4, 0.0 }
0x111c   : > { %2380 = vadd.xlane.f32.xlu1 %v2379_v5 }
0x11a5   : > { %v2381_v9 = vpop.xlane.xlu1 %2380 }
0x11a6   : > { %5178 = vrcp.f32 %v2381_v9  ;;  %v2840_v9 = vsel %vm1189_vm8, %v4273_v7, 0 }
0x11b3   : > { %v5179_v10 = vpop.eup %5178 }
0x11b4   : > { %v2383_v11 = vmul.f32 %v5179_v10, %v5177_v4 }
0x11b6   : > { %v2384_v13 = vpack.c.bf16 %v2383_v11, %v2383_v11 }
0x11b8   : > { %4836 = vmatmul.mubr.msk.bf16.vlgmr.msra.gmra.mxu1 %vm779_vm7, %v2384_v13  ;;  %v5122_v13 = vld [vmem:[%s6127_s3 + $0xd8] sm:$0xff]  }
0x11b9   : > { %4846 = vmatpush3.bf16.msra.mxu1 %v5110_v12  ;;  %4853 = vmatprep.mubr.msk.bf16.mxu1 %vm5206_vm1, %v5205_v8 }
0x11ba   : > { %4847 = vmatprep.subr.bf16.mxu1 %v5205_v8 }
0x11bd   : > { %4848 = vmatpush3.bf16.msra.mxu1 %v5111_v14 }
0x11be   : > { %4849 = vmatprep.subr.bf16.mxu1 %v5205_v8 }
0x11c1   : > { %4850 = vmatpush3.bf16.msra.mxu1 %v5112_v15  ;;  %v5123_v15 = vld [vmem:[%s6127_s3 + $0xd0] sm:$0xff]  }
0x11c2   : > { %4851 = vmatprep.subr.bf16.mxu1 %v5205_v8 }
0x11c5   : > { %4852 = vmatpush3.bf16.msra.mxu1 %v5113_v16  ;;  %v5124_v16 = vld [vmem:[%s6127_s3 + $0xc8] sm:$0xff]  }
0x11c6   : > { %4869 = vmatprep.subr.bf16.mxu1 %v5205_v8 }
0x11c8   : > { %4854 = vmatmul.mubr.msk.bf16.vlgmr.msra.gmra.mxu1 %vm527_vm2, %v5346_v26 }
0x11c9   : > { %4870 = vmatpush3.bf16.msra.mxu1 %v5114_v18  ;;  %4877 = vmatprep.mubr.msk.bf16.mxu1 %vm5206_vm1, %v5205_v8  ;;  %v5125_v18 = vld [vmem:[%s6127_s3 + $0xc0] sm:$0xff]  }
0x11ca   : > { %4871 = vmatprep.subr.bf16.mxu1 %v5205_v8 }
0x11cd   : > { %4872 = vmatpush3.bf16.msra.mxu1 %v5115_v19  ;;  %v5126_v19 = vld [vmem:[%s6127_s3 + $0x2d8] sm:$0xff]  }
0x11ce   : > { %4873 = vmatprep.subr.bf16.mxu1 %v5205_v8 }
0x11d1   : > { %4874 = vmatpush3.bf16.msra.mxu1 %v5116_v20  ;;  %v5127_v20 = vld [vmem:[%s6127_s3 + $0x2d0] sm:$0xff]  }
0x11d2   : > { %4875 = vmatprep.subr.bf16.mxu1 %v5205_v8 }
0x11d5   : > { %4876 = vmatpush3.bf16.msra.mxu1 %v5117_v21  ;;  %v5128_v21 = vld [vmem:[%s6127_s3 + $0x2c8] sm:$0xff]  }
0x11d6   : > { %4893 = vmatprep.subr.bf16.mxu1 %v5205_v8 }
0x11d8   : > { %4878 = vmatmul.mubr.msk.bf16.vlgmr.msra.gmra.mxu1 %vm527_vm2, %v5346_v26 }
0x11d9   : > { %4895 = vmatprep.mubr.msk.bf16.mxu1 %vm5206_vm1, %v5205_v8  ;;  %4894 = vmatpush3.bf16.msra.mxu1 %v2840_v9  ;;  %v4322_v9 = vld [vmem:[%s6129_s5 + $0x18] sm:$0xf] }
0x11da   : > { %4911 = vmatprep.subr.bf16.mxu1 %v5205_v8 }
0x1278   : > { %v2426_v22 = vpop.f32.mrf.mxu1 }
0x1279   : > { %v2432_v24 = vpack.c.bf16 %v2426_v22, %v2426_v22  ;;  %v5129_v22 = vld [vmem:[%s6127_s3 + $0x2c0] sm:$0xff]  }
0x127a   : > { %v4837_v25 = vpop.f32.mrf.mxu1 }
0x127b   : > { %4842 = vmatmul.mubr.msk.bf16.vlgmr.msra.gmra.mxu0 %vm717_vm3, %v2432_v24  ;;  %v5130_v24 = vld [vmem:[%s6127_s3 + $0x1d8] sm:$0xff]  }
0x127c   : > { %4858 = vmatpush3.bf16.msra.mxu0 %v5118_v23  ;;  %v2429_v27 = vpop.f32.mrf.mxu1  ;;  %4865 = vmatprep.mubr.msk.bf16.mxu0 %vm5206_vm1, %v5205_v8 }
0x127d   : > { %4859 = vmatprep.subr.bf16.mxu0 %v5205_v8 }
0x127e   : > { %v4838_v29 = vpop.f32.mrf.mxu1 }
0x127f   : > { %v5131_v29 = vld [vmem:[%s6127_s3 + $0x1d0] sm:$0xff]  }
0x1280   : > { %4860 = vmatpush3.bf16.msra.mxu0 %v5119_v28 }
0x1281   : > { %4861 = vmatprep.subr.bf16.mxu0 %v5205_v8 }
0x1284   : > { %4862 = vmatpush3.bf16.msra.mxu0 %v5120_v30 }
0x1285   : > { %4863 = vmatprep.subr.bf16.mxu0 %v5205_v8 }
0x1288   : > { %v2575_v32 = vpop.f32.mrf.mxu1  ;;  %4864 = vmatpush3.bf16.msra.mxu0 %v5121_v31  ;;  %v5132_v31 = vld [vmem:[%s6127_s3 + $0x1c8] sm:$0xff]  }
0x1289   : > { %4881 = vmatprep.subr.bf16.mxu0 %v5205_v8 }
0x128a   : > { %v4855_v33 = vpop.f32.mrf.mxu1 }
0x128b   : > { %4866 = vmatmul.mubr.msk.bf16.vlgmr.msra.gmra.mxu0 %vm527_vm2, %v5346_v26 }
0x128c   : > { %v2578_v34 = vpop.f32.mrf.mxu1  ;;  %4883 = vmatprep.mubr.msk.bf16.mxu0 %vm5206_vm1, %v5205_v8 }
0x128e   : > { %v4856_v35 = vpop.f32.mrf.mxu1 }
0x1298   : > { %v2719_v37 = vpop.f32.mrf.mxu1 }
0x1299   : > { %v2720_v51 = vadd.f32 %v4265_v17, %v2719_v37  ;;  %v4307_v17 = vld [vmem:[%s6128_s4 + $0xe] ss:$0 sm:$0xff] }
0x129a   : > { %v4879_v38 = vpop.f32.mrf.mxu1 }
0x129b   : > { %v2786_v57 = vpack.c.bf16 %v2720_v51, %v2720_v51 }
0x129c   : > { %v2722_v39 = vpop.f32.mrf.mxu1 }
0x129d   : > { %v2791_v59 = vand.u32 %v2786_v57, %v5394_v52 }
0x129e   : > { %v4880_v41 = vpop.f32.mrf.mxu1 }
0x133b   : > { %v2475_v43 = vpop.f32.mrf.mxu0 }
0x133c   : > { %v5832_v44 = vadd.f32 %v2475_v43, %v5740_v42  ;;  %v4251_v42 = vld [vmem:[%s6128_s4 + $0x5] ss:$0 sm:$0xff] }
0x133d   : > { %v4843_v45 = vpop.f32.mrf.mxu0  ;;  %v2576_v56 = vadd.f32 %v4251_v42, %v2575_v32  ;;  %v5133_v32 = vld [vmem:[%s6127_s3 + $0x1c0] sm:$0xff]  }
0x133f   : > { %v2478_v46 = vpop.f32.mrf.mxu0  ;;  %v2725_v58 = vpack.c.bf16 %v2576_v56, %v2576_v56 }
0x1341   : > { %v4844_v47 = vpop.f32.mrf.mxu0 }
0x134b   : > { %v2647_v49 = vpop.f32.mrf.mxu0 }
0x134c   : > { %v2648_v36 = vadd.f32 %v4258_v48, %v2647_v49 }
0x134d   : > { %v4867_v40 = vpop.f32.mrf.mxu0 }
0x134e   : > { %v2726_v50 = vpack.c.bf16 %v2648_v36, %v2648_v36  ;;  %v4314_v40 = vld [vmem:[%s6128_s4 + $0x16] ss:$0 sm:$0xff] }
0x134f   : > { %v2650_v53 = vpop.f32.mrf.mxu0 }
0x1350   : > { %v2731_v54 = vsel %vm717_vm3, %v2726_v50, 0 }
0x1351   : > { %v4868_v55 = vpop.f32.mrf.mxu0  ;;  %4882 = vmatpush3.bf16.xpose.msra.mxu0 %v2731_v54 }
0x1352   : > { %4887 = vmatprep.subr.bf16.mxu0 %v5205_v8 }
0x1358   : > { %4884 = vmatmul.mubr.msk.bf16.vlgmr.msra.gmra.mxu0 %vm717_vm3, %v2725_v58 }
0x1359   : > { %4888 = vmatpush3.bf16.msra.mxu0 %v2791_v59  ;;  %4889 = vmatprep.mubr.msk.bf16.mxu0 %vm5206_vm1, %v5205_v8 }
0x135a   : > { %4899 = vmatprep.subr.bf16.mxu0 %v5205_v8 }
0x1418   : > { %v2767_v60 = vpop.f32.mrf.mxu0 }
0x1419   : > { %v2773_v61 = vmul.f32 0.35355338, %v2767_v60 }
0x141a   : > { %v4885_v62 = vpop.f32.mrf.mxu0 }
0x141b   : > { %v2774_v63 = vsel %vm765_vm6, %v2773_v61, -inf }
0x141c   : > { %2775 = vmax.xlane.f32.xlu0 %v2774_v63  ;;  %v2770_v0 = vpop.f32.mrf.mxu0 }
0x141e   : > { %v4886_v1 = vpop.f32.mrf.mxu0 }
0x14a5   : > { %v2776_v2 = vpop.xlane.xlu0 %2775 }
0x14a6   : > { %v2777_v3 = vsub.f32 %v2773_v61, %v2776_v2 }
0x14a8   : > { %v2778_v4 = vmul.f32 1.442695, %v2777_v3 }
0x14aa   : > { %5180 = vpow2.f32 %v2778_v4 }
0x14b7   : > { %v5181_v5 = vpop.eup %5180 }
0x14b8   : > { %v2780_v6 = vsel %vm765_vm6, %v5181_v5, 0.0 }
0x14b9   : > { %2781 = vadd.xlane.f32.xlu1 %v2780_v6 }
0x1542   : > { %v2782_v10 = vpop.xlane.xlu1 %2781 }
0x1543   : > { %5182 = vrcp.f32 %v2782_v10  ;;  %v3241_v10 = vsel %vm1189_vm8, %v4322_v9, 0 }
0x1550   : > { %v5183_v11 = vpop.eup %5182 }
0x1551   : > { %v2784_v12 = vmul.f32 %v5183_v11, %v5181_v5 }
0x1553   : > { %v2785_v14 = vpack.c.bf16 %v2784_v12, %v2784_v12 }
0x1555   : > { %4890 = vmatmul.mubr.msk.bf16.vlgmr.msra.gmra.mxu0 %vm779_vm7, %v2785_v14  ;;  %v5134_v14 = vld [vmem:[%s6127_s3 + $0xf8] sm:$0xff]  }
0x1556   : > { %4900 = vmatpush3.bf16.msra.mxu0 %v5122_v13  ;;  %4907 = vmatprep.mubr.msk.bf16.mxu0 %vm5206_vm1, %v5205_v8 }
0x1557   : > { %4901 = vmatprep.subr.bf16.mxu0 %v5205_v8 }
0x155a   : > { %4902 = vmatpush3.bf16.msra.mxu0 %v5123_v15 }
0x155b   : > { %4903 = vmatprep.subr.bf16.mxu0 %v5205_v8 }
0x155e   : > { %4904 = vmatpush3.bf16.msra.mxu0 %v5124_v16  ;;  %v5135_v16 = vld [vmem:[%s6127_s3 + $0xf0] sm:$0xff]  }
0x155f   : > { %4905 = vmatprep.subr.bf16.mxu0 %v5205_v8 }
0x1562   : > { %4906 = vmatpush3.bf16.msra.mxu0 %v5125_v18  ;;  %v5136_v18 = vld [vmem:[%s6127_s3 + $0xe8] sm:$0xff]  }
0x1563   : > { %4923 = vmatprep.subr.bf16.mxu0 %v5205_v8 }
0x1565   : > { %4908 = vmatmul.mubr.msk.bf16.vlgmr.msra.gmra.mxu0 %vm527_vm2, %v5346_v26 }
0x1566   : > { %4924 = vmatpush3.bf16.msra.mxu0 %v5126_v19  ;;  %4931 = vmatprep.mubr.msk.bf16.mxu0 %vm5206_vm1, %v5205_v8  ;;  %v5137_v19 = vld [vmem:[%s6127_s3 + $0xe0] sm:$0xff]  }
0x1567   : > { %4925 = vmatprep.subr.bf16.mxu0 %v5205_v8 }
0x156a   : > { %4926 = vmatpush3.bf16.msra.mxu0 %v5127_v20  ;;  %v5138_v20 = vld [vmem:[%s6127_s3 + $0x2f8] sm:$0xff]  }
0x156b   : > { %4927 = vmatprep.subr.bf16.mxu0 %v5205_v8 }
0x156e   : > { %4928 = vmatpush3.bf16.msra.mxu0 %v5128_v21  ;;  %v5139_v21 = vld [vmem:[%s6127_s3 + $0x2f0] sm:$0xff]  }
0x156f   : > { %4929 = vmatprep.subr.bf16.mxu0 %v5205_v8 }
0x1572   : > { %4930 = vmatpush3.bf16.msra.mxu0 %v5129_v22  ;;  %v5140_v22 = vld [vmem:[%s6127_s3 + $0x2e8] sm:$0xff]  }
0x1573   : > { %4947 = vmatprep.subr.bf16.mxu0 %v5205_v8 }
0x1575   : > { %4932 = vmatmul.mubr.msk.bf16.vlgmr.msra.gmra.mxu0 %vm527_vm2, %v5346_v26 }
0x1576   : > { %4949 = vmatprep.mubr.msk.bf16.mxu0 %vm5206_vm1, %v5205_v8  ;;  %4948 = vmatpush3.bf16.msra.mxu0 %v3241_v10 }
0x1577   : > { %4965 = vmatprep.subr.bf16.mxu0 %v5205_v8 }
0x1615   : > { %v2827_v23 = vpop.f32.mrf.mxu0 }
0x1616   : > { %v2833_v25 = vpack.c.bf16 %v2827_v23, %v2827_v23  ;;  %v5141_v23 = vld [vmem:[%s6127_s3 + $0x2e0] sm:$0xff]  }
0x1617   : > { %v4891_v27 = vpop.f32.mrf.mxu0 }
0x1618   : > { %4896 = vmatmul.mubr.msk.bf16.vlgmr.msra.gmra.mxu1 %vm717_vm3, %v2833_v25  ;;  %v5142_v25 = vld [vmem:[%s6127_s3 + $0x1f8] sm:$0xff]  }
0x1619   : > { %4912 = vmatpush3.bf16.msra.mxu1 %v5130_v24  ;;  %v2830_v28 = vpop.f32.mrf.mxu0  ;;  %4919 = vmatprep.mubr.msk.bf16.mxu1 %vm5206_vm1, %v5205_v8 }
0x161a   : > { %4913 = vmatprep.subr.bf16.mxu1 %v5205_v8 }
0x161b   : > { %v4892_v30 = vpop.f32.mrf.mxu0 }
0x161c   : > { %v5143_v30 = vld [vmem:[%s6127_s3 + $0x1f0] sm:$0xff]  }
0x161d   : > { %4914 = vmatpush3.bf16.msra.mxu1 %v5131_v29 }
0x161e   : > { %4915 = vmatprep.subr.bf16.mxu1 %v5205_v8 }
0x1621   : > { %4916 = vmatpush3.bf16.msra.mxu1 %v5132_v31 }
0x1622   : > { %4917 = vmatprep.subr.bf16.mxu1 %v5205_v8 }
0x1625   : > { %v2976_v33 = vpop.f32.mrf.mxu0  ;;  %4918 = vmatpush3.bf16.msra.mxu1 %v5133_v32  ;;  %v5144_v32 = vld [vmem:[%s6127_s3 + $0x1e8] sm:$0xff]  }
0x1626   : > { %4935 = vmatprep.subr.bf16.mxu1 %v5205_v8 }
0x1627   : > { %v4909_v34 = vpop.f32.mrf.mxu0 }
0x1628   : > { %4920 = vmatmul.mubr.msk.bf16.vlgmr.msra.gmra.mxu1 %vm527_vm2, %v5346_v26 }
0x1629   : > { %v2979_v35 = vpop.f32.mrf.mxu0  ;;  %4937 = vmatprep.mubr.msk.bf16.mxu1 %vm5206_vm1, %v5205_v8 }
0x162b   : > { %v4910_v37 = vpop.f32.mrf.mxu0 }
0x1635   : > { %v3120_v38 = vpop.f32.mrf.mxu0 }
0x1636   : > { %v3121_v53 = vadd.f32 %v4314_v40, %v3120_v38  ;;  %v4356_v40 = vld [vmem:[%s6128_s4 + $0xf] ss:$0 sm:$0xff] }
0x1637   : > { %v4933_v39 = vpop.f32.mrf.mxu0 }
0x1638   : > { %v3187_v58 = vpack.c.bf16 %v3121_v53, %v3121_v53  ;;  %v4349_v53 = vld [vmem:[%s6128_s4 + $0x7] ss:$0 sm:$0xff] }
0x1639   : > { %v3123_v41 = vpop.f32.mrf.mxu0 }
0x163a   : > { %v3192_v60 = vand.u32 %v3187_v58, %v5394_v52 }
0x163b   : > { %v4934_v43 = vpop.f32.mrf.mxu0 }
0x16d8   : > { %v2876_v45 = vpop.f32.mrf.mxu1 }
0x16d9   : > { %v5924_v46 = vadd.f32 %v2876_v45, %v5832_v44  ;;  %v4300_v44 = vld [vmem:[%s6128_s4 + $0x6] ss:$0 sm:$0xff] }
0x16da   : > { %v4897_v47 = vpop.f32.mrf.mxu1  ;;  %v2977_v57 = vadd.f32 %v4300_v44, %v2976_v33  ;;  %v5145_v33 = vld [vmem:[%s6127_s3 + $0x1e0] sm:$0xff]  }
0x16dc   : > { %v2879_v48 = vpop.f32.mrf.mxu1  ;;  %v3126_v59 = vpack.c.bf16 %v2977_v57, %v2977_v57 }
0x16de   : > { %v4898_v49 = vpop.f32.mrf.mxu1 }
0x16e8   : > { %v3048_v36 = vpop.f32.mrf.mxu1 }
0x16e9   : > { %v3049_v50 = vadd.f32 %v4307_v17, %v3048_v36 }
0x16ea   : > { %v4921_v42 = vpop.f32.mrf.mxu1 }
0x16eb   : > { %v3127_v51 = vpack.c.bf16 %v3049_v50, %v3049_v50  ;;  %v4363_v50 = vld [vmem:[%s6128_s4 + $0x17] ss:$0 sm:$0xff] }
0x16ec   : > { %v3051_v54 = vpop.f32.mrf.mxu1 }
0x16ed   : > { %v3132_v55 = vsel %vm717_vm3, %v3127_v51, 0 }
0x16ee   : > { %v4922_v56 = vpop.f32.mrf.mxu1  ;;  %4936 = vmatpush3.bf16.xpose.msra.mxu1 %v3132_v55 }
0x16ef   : > { %4941 = vmatprep.subr.bf16.mxu1 %v5205_v8 }
0x16f5   : > { %4938 = vmatmul.mubr.msk.bf16.vlgmr.msra.gmra.mxu1 %vm717_vm3, %v3126_v59 }
0x16f6   : > { %4942 = vmatpush3.bf16.msra.mxu1 %v3192_v60  ;;  %4943 = vmatprep.mubr.msk.bf16.mxu1 %vm5206_vm1, %v5205_v8 }
0x16f7   : > { %4953 = vmatprep.subr.bf16.mxu1 %v5205_v8 }
0x17b5   : > { %v3168_v61 = vpop.f32.mrf.mxu1 }
0x17b6   : > { %v3174_v62 = vmul.f32 0.35355338, %v3168_v61 }
0x17b7   : > { %v4939_v63 = vpop.f32.mrf.mxu1 }
0x17b8   : > { %v3175_v0 = vsel %vm765_vm6, %v3174_v62, -inf }
0x17b9   : > { %3176 = vmax.xlane.f32.xlu0 %v3175_v0  ;;  %v3171_v1 = vpop.f32.mrf.mxu1 }
0x17bb   : > { %v4940_v2 = vpop.f32.mrf.mxu1 }
0x1842   : > { %v3177_v3 = vpop.xlane.xlu0 %3176 }
0x1843   : > { %v3178_v4 = vsub.f32 %v3174_v62, %v3177_v3 }
0x1845   : > { %v3179_v5 = vmul.f32 1.442695, %v3178_v4 }
0x1847   : > { %5184 = vpow2.f32 %v3179_v5 }
0x1854   : > { %v5185_v6 = vpop.eup %5184 }
0x1855   : > { %v3181_v7 = vsel %vm765_vm6, %v5185_v6, 0.0 }
0x1856   : > { %3182 = vadd.xlane.f32.xlu1 %v3181_v7  ;;  %v4371_v7 = vld [vmem:[%s6129_s5 + $0x1c] sm:$0xf] }
0x1857   : > { %v3642_v9 = vsel %vm1189_vm8, %v4371_v7, 0  ;;  %v4382_v7 = vld [vmem:[%s6136_s12] ss:$0 sm:$0xff] }
0x18df   : > { %v3183_v11 = vpop.xlane.xlu1 %3182 }
0x18e0   : > { %5186 = vrcp.f32 %v3183_v11 }
0x18ed   : > { %v5187_v12 = vpop.eup %5186 }
0x18ee   : > { %v3185_v13 = vmul.f32 %v5187_v12, %v5185_v6 }
0x18f0   : > { %v3186_v15 = vpack.c.bf16 %v3185_v13, %v3185_v13 }
0x18f2   : > { %4944 = vmatmul.mubr.msk.bf16.vlgmr.msra.gmra.mxu1 %vm779_vm7, %v3186_v15 }
0x18f3   : > { %4954 = vmatpush3.bf16.msra.mxu1 %v5134_v14  ;;  %4961 = vmatprep.mubr.msk.bf16.mxu1 %vm5206_vm1, %v5205_v8 }
0x18f4   : > { %4955 = vmatprep.subr.bf16.mxu1 %v5205_v8 }
0x18f7   : > { %4956 = vmatpush3.bf16.msra.mxu1 %v5135_v16 }
0x18f8   : > { %4957 = vmatprep.subr.bf16.mxu1 %v5205_v8 }
0x18fb   : > { %4958 = vmatpush3.bf16.msra.mxu1 %v5136_v18 }
0x18fc   : > { %4959 = vmatprep.subr.bf16.mxu1 %v5205_v8 }
0x18ff   : > { %4960 = vmatpush3.bf16.msra.mxu1 %v5137_v19 }
0x1900   : > { %4977 = vmatprep.subr.bf16.mxu1 %v5205_v8 }
0x1902   : > { %4962 = vmatmul.mubr.msk.bf16.vlgmr.msra.gmra.mxu1 %vm527_vm2, %v5346_v26 }
0x1903   : > { %4978 = vmatpush3.bf16.msra.mxu1 %v5138_v20  ;;  %4985 = vmatprep.mubr.msk.bf16.mxu1 %vm5206_vm1, %v5205_v8 }
0x1904   : > { %4979 = vmatprep.subr.bf16.mxu1 %v5205_v8 }
0x1907   : > { %4980 = vmatpush3.bf16.msra.mxu1 %v5139_v21  ;;  %v4373_v21 = vld [vmem:[%s6130_s6] ss:$0 sm:$0xff] }
0x1908   : > { %4981 = vmatprep.subr.bf16.mxu1 %v5205_v8 }
0x190b   : > { %4982 = vmatpush3.bf16.msra.mxu1 %v5140_v22 }
0x190c   : > { %4983 = vmatprep.subr.bf16.mxu1 %v5205_v8 }
0x190f   : > { %4984 = vmatpush3.bf16.msra.mxu1 %v5141_v23 }
0x1910   : > { %5001 = vmatprep.subr.bf16.mxu1 %v5205_v8 }
0x1912   : > { %4986 = vmatmul.mubr.msk.bf16.vlgmr.msra.gmra.mxu1 %vm527_vm2, %v5346_v26 }
0x1913   : > { %5003 = vmatprep.mubr.msk.bf16.mxu1 %vm5206_vm1, %v5205_v8  ;;  %5002 = vmatpush3.bf16.msra.mxu1 %v3642_v9 }
0x1914   : > { %5019 = vmatprep.subr.bf16.mxu1 %v5205_v8 }
0x19b2   : > { %v3228_v24 = vpop.f32.mrf.mxu1 }
0x19b3   : > { %v3234_v27 = vpack.c.bf16 %v3228_v24, %v3228_v24 }
0x19b4   : > { %v4945_v28 = vpop.f32.mrf.mxu1 }
0x19b5   : > { %4950 = vmatmul.mubr.msk.bf16.vlgmr.msra.gmra.mxu0 %vm717_vm3, %v3234_v27  ;;  %v5196_v27 = vld [vmem:[%s5294_s30] sm:$0x1f] }
0x19b6   : > { %4966 = vmatpush3.bf16.msra.mxu0 %v5142_v25  ;;  %v3231_v29 = vpop.f32.mrf.mxu1  ;;  %4973 = vmatprep.mubr.msk.bf16.mxu0 %vm5206_vm1, %v5205_v8 }
0x19b7   : > { %4967 = vmatprep.subr.bf16.mxu0 %v5205_v8 }
0x19b8   : > { %v4946_v31 = vpop.f32.mrf.mxu1 }
0x19ba   : > { %4968 = vmatpush3.bf16.msra.mxu0 %v5143_v30 }
0x19bb   : > { %4969 = vmatprep.subr.bf16.mxu0 %v5205_v8 }
0x19be   : > { %4970 = vmatpush3.bf16.msra.mxu0 %v5144_v32 }
0x19bf   : > { %4971 = vmatprep.subr.bf16.mxu0 %v5205_v8 }
0x19c2   : > { %v3377_v34 = vpop.f32.mrf.mxu1  ;;  %4972 = vmatpush3.bf16.msra.mxu0 %v5145_v33 }
0x19c3   : > { %4989 = vmatprep.subr.bf16.mxu0 %v5205_v8  ;;  %v3378_v57 = vadd.f32 %v4349_v53, %v3377_v34  ;;  %v5153_v53 = vld [vmem:[%s6135_s11 + $0x20] sm:$0xff]  }
0x19c4   : > { %v4963_v35 = vpop.f32.mrf.mxu1 }
0x19c5   : > { %4974 = vmatmul.mubr.msk.bf16.vlgmr.msra.gmra.mxu0 %vm527_vm2, %v5346_v26  ;;  %v3527_v59 = vpack.c.bf16 %v3378_v57, %v3378_v57  ;;  %v4376_v57 = vld [vmem:[%s6134_s10] ss:$0 sm:$0xff] }
0x19c6   : > { %v3380_v37 = vpop.f32.mrf.mxu1  ;;  %4991 = vmatprep.mubr.msk.bf16.mxu0 %vm5206_vm1, %v5205_v8 }
0x19c7   : > { %v5146_v37 = vld [vmem:[%s6133_s9 + $0x18] sm:$0xff]  }
0x19c8   : > { %v4964_v38 = vpop.f32.mrf.mxu1 }
0x19c9   : > { %v5147_v38 = vld [vmem:[%s6133_s9 + $0x10] sm:$0xff]  }
0x19d2   : > { %v3521_v39 = vpop.f32.mrf.mxu1 }
0x19d4   : > { %v4987_v41 = vpop.f32.mrf.mxu1 }
0x19d5   : > { %v5149_v41 = vld [vmem:[%s6133_s9] sm:$0xff]  }
0x19d6   : > { %v3524_v43 = vpop.f32.mrf.mxu1 }
0x19d8   : > { %v4988_v45 = vpop.f32.mrf.mxu1 }
0x1a75   : > { %v3277_v47 = vpop.f32.mrf.mxu0 }
0x1a76   : > { %v3283_v48 = vadd.f32 %v3277_v47, %v5924_v46  ;;  %v3522_v46 = vadd.f32 %v4363_v50, %v3521_v39  ;;  %v5148_v39 = vld [vmem:[%s6133_s9 + $0x8] sm:$0xff]  }
0x1a77   : > { %v4951_v49 = vpop.f32.mrf.mxu0 }
0x1a78   : > { %v3588_v58 = vpack.c.bf16 %v3522_v46, %v3522_v46  ;;  %v4374_v49 = vld [vmem:[%s6131_s7] ss:$0 sm:$0xff]  ;;  %v5154_v46 = vld [vmem:[%s6135_s11 + $0x18] sm:$0xff]  }
0x1a79   : > { %v3280_v17 = vpop.f32.mrf.mxu0 }
0x1a7a   : > { %v3593_v60 = vand.u32 %v3588_v58, %v5394_v52 }
0x1a7b   : > { %v4952_v36 = vpop.f32.mrf.mxu0 }
0x1a7c   : > { %v4375_v36 = vld [vmem:[%s6132_s8] ss:$0 sm:$0xff] }
0x1a85   : > { %v3449_v26 = vpop.f32.mrf.mxu0 }
0x1a86   : > { %v3450_v42 = vadd.f32 %v4356_v40, %v3449_v26 }
0x1a87   : > { %v4975_v51 = vpop.f32.mrf.mxu0 }
0x1a88   : > { %v3528_v44 = vpack.c.bf16 %v3450_v42, %v3450_v42  ;;  %v5150_v42 = vld [vmem:[%s6135_s11 + $0x38] sm:$0xff]   ;;  %v5151_v51 = vld [vmem:[%s6135_s11 + $0x30] sm:$0xff]  }
0x1a89   : > { %v3452_v54 = vpop.f32.mrf.mxu0 }
0x1a8a   : > { %v3533_v55 = vsel %vm717_vm3, %v3528_v44, 0  ;;  %v5152_v44 = vld [vmem:[%s6135_s11 + $0x28] sm:$0xff]   ;;  %v5155_v54 = vld [vmem:[%s6135_s11 + $0x10] sm:$0xff]  }
0x1a8b   : > { %v4976_v56 = vpop.f32.mrf.mxu0  ;;  %4990 = vmatpush3.bf16.xpose.msra.mxu0 %v3533_v55  ;;  %v5156_v55 = vld [vmem:[%s6135_s11 + $0x8] sm:$0xff]  }
0x1a8c   : > { %4995 = vmatprep.subr.bf16.mxu0 %v5205_v8  ;;  %v5157_v56 = vld [vmem:[%s6135_s11] sm:$0xff]  }
0x1a92   : > { %4992 = vmatmul.mubr.msk.bf16.vlgmr.msra.gmra.mxu0 %vm717_vm3, %v3527_v59 }
0x1a93   : > { %4996 = vmatpush3.bf16.msra.mxu0 %v3593_v60  ;;  %4997 = vmatprep.mubr.msk.bf16.mxu0 %vm5206_vm1, %v5205_v8 }
0x1a94   : > { %5007 = vmatprep.subr.bf16.mxu0 %v5205_v8 }
0x1b52   : > { %v3569_v61 = vpop.f32.mrf.mxu0 }
0x1b53   : > { %v3575_v62 = vmul.f32 0.35355338, %v3569_v61 }
0x1b54   : > { %v4993_v63 = vpop.f32.mrf.mxu0 }
0x1b55   : > { %v3576_v0 = vsel %vm765_vm6, %v3575_v62, -inf }
0x1b56   : > { %3577 = vmax.xlane.f32.xlu0 %v3576_v0  ;;  %v3572_v1 = vpop.f32.mrf.mxu0 }
0x1b58   : > { %v4994_v2 = vpop.f32.mrf.mxu0 }
0x1bdf   : > { %v3578_v3 = vpop.xlane.xlu0 %3577 }
0x1be0   : > { %v3579_v4 = vsub.f32 %v3575_v62, %v3578_v3 }
0x1be2   : > { %v3580_v5 = vmul.f32 1.442695, %v3579_v4 }
0x1be4   : > { %5188 = vpow2.f32 %v3580_v5 }
0x1bf1   : > { %v5189_v52 = vpop.eup %5188 }
0x1bf2   : > { %v3582_v6 = vsel %vm765_vm6, %v5189_v52, 0.0 }
0x1bf3   : > { %3583 = vadd.xlane.f32.xlu1 %v3582_v6 }
0x1c7c   : > { %v3584_v10 = vpop.xlane.xlu1 %3583 }
0x1c7d   : > { %5190 = vrcp.f32 %v3584_v10 }
0x1c8a   : > { %v5191_v11 = vpop.eup %5190 }
0x1c8b   : > { %v3586_v12 = vmul.f32 %v5191_v11, %v5189_v52 }
0x1c8d   : > { %v3587_v13 = vpack.c.bf16 %v3586_v12, %v3586_v12 }
0x1c8f   : > { %4998 = vmatmul.mubr.msk.bf16.vlgmr.msra.gmra.mxu0 %vm779_vm7, %v3587_v13 }
0x1c90   : > { %5015 = vmatprep.mubr.msk.bf16.mxu0 %vm5206_vm1, %v5205_v8  ;;  %5008 = vmatpush3.bf16.msra.mxu0 %v5146_v37 }
0x1c91   : > { %5009 = vmatprep.subr.bf16.mxu0 %v5205_v8 }
0x1c94   : > { %5010 = vmatpush3.bf16.msra.mxu0 %v5147_v38 }
0x1c95   : > { %5011 = vmatprep.subr.bf16.mxu0 %v5205_v8 }
0x1c98   : > { %5012 = vmatpush3.bf16.msra.mxu0 %v5148_v39 }
0x1c99   : > { %5013 = vmatprep.subr.bf16.mxu0 %v5205_v8 }
0x1c9c   : > { %5014 = vmatpush3.bf16.msra.mxu0 %v5149_v41 }
0x1d4f   : > { %v3629_v14 = vpop.f32.mrf.mxu0 }
0x1d50   : > { %v3635_v15 = vpack.c.bf16 %v3629_v14, %v3629_v14 }
0x1d51   : > { %v4999_v16 = vpop.f32.mrf.mxu0 }
0x1d52   : > { %5004 = vmatmul.mubr.msk.bf16.vlgmr.msra.gmra.mxu1 %vm717_vm3, %v3635_v15 }
0x1d53   : > { %v3632_v18 = vpop.f32.mrf.mxu0  ;;  %5035 = vmatprep.mubr.msk.bf16.mxu1 %vm5206_vm1, %v5205_v8  ;;  %5020 = vmatpush3.bf16.msra.mxu1 %v5150_v42 }
0x1d54   : > { %5021 = vmatprep.subr.bf16.mxu1 %v5205_v8 }
0x1d55   : > { %v5000_v19 = vpop.f32.mrf.mxu0 }
0x1d57   : > { %5022 = vmatpush3.bf16.msra.mxu1 %v5151_v51 }
0x1d58   : > { %5023 = vmatprep.subr.bf16.mxu1 %v5205_v8 }
0x1d5b   : > { %5024 = vmatpush3.bf16.msra.mxu1 %v5152_v44 }
0x1d5c   : > { %5025 = vmatprep.subr.bf16.mxu1 %v5205_v8 }
0x1d5f   : > { %5026 = vmatpush3.bf16.msra.mxu1 %v5153_v53 }
0x1d60   : > { %5027 = vmatprep.subr.bf16.mxu1 %v5205_v8 }
0x1d63   : > { %5028 = vmatpush3.bf16.msra.mxu1 %v5154_v46 }
0x1d64   : > { %5029 = vmatprep.subr.bf16.mxu1 %v5205_v8 }
0x1d67   : > { %5030 = vmatpush3.bf16.msra.mxu1 %v5155_v54 }
0x1d68   : > { %5031 = vmatprep.subr.bf16.mxu1 %v5205_v8 }
0x1d6b   : > { %5032 = vmatpush3.bf16.msra.mxu1 %v5156_v55 }
0x1d6c   : > { %5033 = vmatprep.subr.bf16.mxu1 %v5205_v8 }
0x1d6f   : > { %5034 = vmatpush3.bf16.msra.mxu1 %v5157_v56 }
0x1e12   : > { %v3678_v20 = vpop.f32.mrf.mxu1 }
0x1e13   : > { %v3684_v22 = vadd.f32 %v3678_v20, %v3283_v48 }
0x1e14   : > { %v5005_v23 = vpop.f32.mrf.mxu1 }
0x1e15   : > { %v3692_v24 = vadd.f32 %v4373_v21, %v3684_v22 }
0x1e16   : > { %v3681_v25 = vpop.f32.mrf.mxu1 }
0x1e17   : > { %v6049_v28 = vadd.f32 %v5196_v27, %v3692_v24 }
0x1e18   : > { %v5006_v29 = vpop.f32.mrf.mxu1 }
0x1e19   : > { %v3696_v30 = vsel %vm440_vm0, %v6049_v28, 0.0 }
0x1e1a   : > { %3697 = vadd.xlane.f32.xlu0 %v3696_v30 }
0x1ea3   : > { %v3698_v31 = vpop.xlane.xlu0 %3697 }
0x1ea4   : > { %v3699_v32 = vmul.f32 0.015625, %v3698_v31 }
0x1ea6   : > { %v3700_v33 = vsub.f32 %v6049_v28, %v3699_v32 }
0x1ea8   : > { %v3701_v34 = vmul.f32 %v3700_v33, %v3700_v33 }
0x1eaa   : > { %v3702_v35 = vsel %vm440_vm0, %v3701_v34, 0.0 }
0x1eab   : > { %3703 = vadd.xlane.f32.xlu1 %v3702_v35 }
0x1f34   : > { %v3704_v43 = vpop.xlane.xlu1 %3703 }
0x1f35   : > { %v3705_v45 = vmul.f32 0.015625, %v3704_v43 }
0x1f37   : > { %v3706_v47 = vadd.f32 1e-05, %v3705_v45 }
0x1f39   : > { %5192 = vrsqrt.f32 %v3706_v47 }
0x1f46   : > { %v5193_v48 = vpop.eup %5192 }
0x1f47   : > { %v3708_v17 = vmul.f32 %v5193_v48, %v3700_v33 }
0x1f49   : > { %v3715_v40 = vmul.f32 %v4374_v49, %v3708_v17 }
0x1f4b   : > { %v3722_v26 = vadd.f32 %v4375_v36, %v3715_v40 }
0x1f4d   : > { %v3723_v50 = vpack.c.bf16 %v3722_v26, %v3722_v26 }
0x1f4f   : > { %5016 = vmatmul.mubr.msk.bf16.vlgmr.msra.gmra.mxu0 %vm527_vm2, %v3723_v50 }
0x200f   : > { %v3800_v58 = vpop.f32.mrf.mxu0 }
0x2010   : > { %v3801_v59 = vadd.f32 %v4376_v57, %v3800_v58 }
0x2011   : > { %v5017_v60 = vpop.f32.mrf.mxu0 }
0x2012   : > { %v3806_v61 = vmul.f32 %v3801_v59, %v3801_v59 }
0x2013   : > { %v3803_v62 = vpop.f32.mrf.mxu0 }
0x2014   : > { %v3807_v63 = vmul.f32 %v3806_v61, %v3801_v59 }
0x2015   : > { %v5018_v0 = vpop.f32.mrf.mxu0 }
0x2016   : > { %v3808_v1 = vmul.f32 0.044715, %v3807_v63 }
0x2018   : > { %v3809_v2 = vadd.f32 %v3808_v1, %v3801_v59 }
0x201a   : > { %v3810_v3 = vmul.f32 0.7978846, %v3809_v2 }
0x201c   : > { %5194 = vtanh.f32 %v3810_v3 }
0x2029   : > { %v5195_v4 = vpop.eup %5194 }
0x202a   : > { %v3812_v5 = vadd.f32 1.0, %v5195_v4 }
0x202c   : > { %v3813_v8 = vmul.f32 0.5, %v3812_v5 }
0x202e   : > { %v3814_v52 = vmul.f32 %v3813_v8, %v3801_v59 }
0x2030   : > { %v3815_v6 = vpack.c.bf16 %v3814_v52, %v3814_v52 }
0x2032   : > { %5036 = vmatmul.mubr.bf16.vlgmr.msra.gmra.mxu1 %v3815_v6 }
0x20f2   : > { %v3921_v9 = vpop.f32.mrf.mxu1 }
0x20f3   : > { %v3922_v10 = vadd.f32 %v4382_v7, %v3921_v9 }
0x20f4   : > { %v5037_v11 = vpop.f32.mrf.mxu1 }
0x20f5   : > { %v3927_v12 = vadd.f32 %v3922_v10, %v6049_v28 }
0x20f6   : > { %v3924_v13 = vpop.f32.mrf.mxu1 }
0x20f7   : > { %3928 = vst.msk [vmem:[%s435_s21] sm:$0x1f] %vm440_vm0, %v3927_v12 }
0x20f8   : > { %v5038_v14 = vpop.f32.mrf.mxu1 }
0x20f9 PF: > { %s23_s25 = sadd.s32 1, %s5203_s25  }
0x20fa   : > { %p20_p4 = scmp.ge.s32.totalorder %s23_s25, 4  }
0x20fc   :  { %22 = sbr.rel (!%p20_p4) target bundleno = 1 (0x1), region = 155 }

// kernel: multimodal_forward.9
= control target key start
LH: loop header
LB: loop body
LE: loop exit
PB: predicated region body
PF: predicated region fallthrough
CT: control target
= control target key end

     0   :  { %s5263_s25 = smov 0   ;;  %s6109_s0 = inlined_call_operand.vmem [shape: f32[5,2,64], index: 0, kind: input, shape index: {}]   ;;  %s6110_s1 = inlined_call_operand.vmem [shape: f32[1,64], index: 1, kind: input, shape index: {}]   ;;  %s6111_s2 = inlined_call_operand.vmem [shape: f32[1,64], index: 2, kind: input, shape index: {}]   ;;  %s6112_s3 = inlined_call_operand.vmem [shape: bf16[3,8,64,8], index: 3, kind: input, shape index: {}]   ;;  %s6113_s4 = inlined_call_operand.vmem [shape: f32[3,8,1,8], index: 4, kind: input, shape index: {}]   ;;  %s6114_s5 = inlined_call_operand.vmem [shape: bf16[8,8,64], index: 5, kind: input, shape index: {}]   ;;  %s6115_s6 = inlined_call_operand.vmem [shape: f32[1,64], index: 6, kind: input, shape index: {}]   ;;  %s6116_s7 = inlined_call_operand.vmem [shape: f32[1,64], index: 7, kind: input, shape index: {}]   ;;  %s6117_s8 = inlined_call_operand.vmem [shape: f32[1,64], index: 8, kind: input, shape index: {}]   ;;  %s6118_s9 = inlined_call_operand.vmem [shape: bf16[64,128], index: 9, kind: input, shape index: {}]   ;;  %s6119_s10 = inlined_call_operand.vmem [shape: f32[1,128], index: 10, kind: input, shape index: {}]   ;;  %s6120_s11 = inlined_call_operand.vmem [shape: bf16[128,64], index: 11, kind: input, shape index: {}]   ;;  %s6121_s12 = inlined_call_operand.vmem [shape: f32[1,64], index: 12, kind: input, shape index: {}]   ;;  %s6122_s13 = inlined_call_operand.vmem [shape: f32[5,2,64], index: 13, kind: output, shape index: {}]  }
   0x1 LB: > { %s3971_s26 = sadd.s32 4294967295, %s5189_s25   ;;  %p3975_p0 = scmp.ge.s32.totalorder %s5189_s25, 1  ;;  %s5189_s25 = sphi %s5263_s25, %s23_s25  }
   0x2   : > { %p386_p1 = scmp.lt.s32.totalorder %s5189_s25, 6 }
   0x4   : > { %p387_p2 = pnand %p3975_p0, %p386_p1 }
   0x5   : > { %p428_p3 = scmp.lt.s32.totalorder (!%p387_p2), %s3971_s26, 4 }
   0x6   : > { %390 = sbr.rel (%p387_p2) target bundleno = 8423 (0x20e7), region = 72 }
   0xb   : > { %v5038_v0 = vld [vmem:[%s6112_s3 + $0x118] sm:$0xff]   ;;  %v5191_v1 = vmov 0.0   ;;  %v5040_v3 = vld [vmem:[%s6112_s3 + $0x110] sm:$0xff]   ;;  %vm5192_vm0 = vmmov 0   ;;  %s6124_s26 = smov (!%p428_p3, %s3971_s26), 4  ;;  %v5042_v5 = vld [vmem:[%s6112_s3 + $0x108] sm:$0xff]  }
   0xc   : > { %4576 = vmatprep.subr.bf16.mxu1 %v5191_v1  ;;  %4564 = vmatprep.subr.bf16.mxu0 %v5191_v1  ;;  %v5039_v2 = vld [vmem:[%s6112_s3 + $0x18] sm:$0xff]   ;;  %v5041_v4 = vld [vmem:[%s6112_s3 + $0x10] sm:$0xff]   ;;  %s3976_s20 = sshll.u32 %s6124_s26, 1  ;;  %v5043_v6 = vld [vmem:[%s6112_s3 + $0x8] sm:$0xff]   ;;  %vm496_vm1 = vcmask 523264   ;;  %vm686_vm2 = vcmask 64512  }
   0xd   : > { %4577 = vmatpush3.bf16.msra.mxu1 %v5038_v0  ;;  %4584 = vmatprep.mubr.msk.bf16.mxu1 %vm5192_vm0, %v5191_v1  ;;  %s5306_s27 = scalar_lea.vmem %s6109_s0, %s3976_s20  ;;  %v5044_v7 = vld [vmem:[%s6112_s3 + $0x100] sm:$0xff]   ;;  %v5046_v11 = vld [vmem:[%s6112_s3 + $0x218] sm:$0xff]   ;;  %v5047_v12 = vld [vmem:[%s6112_s3 + $0x210] sm:$0xff]   ;;  %vm752_vm3 = vcmask 1040384   ;;  %vm734_vm4 = vcmask 9216   ;;  %vm748_vm5 = vcmask 15360   ;;  %s435_s19 = scalar_lea.vmem %s6122_s13, %s3976_s20 }
   0xe   : > { %4565 = vmatpush3.bf16.msra.mxu0 %v5039_v2  ;;  %4578 = vmatprep.subr.bf16.mxu1 %v5191_v1  ;;  %v437_v8 = vld [vmem:[%s5306_s27] sm:$0x3]  ;;  %v5048_v13 = vld [vmem:[%s6112_s3 + $0x208] sm:$0xff]   ;;  %v4008_v30 = vld [vmem:[%s6113_s4 + $0x10] ss:$0 sm:$0xff]  ;;  %vm1155_vm6 = vcmask 1043456  }
   0xf   : > { %4566 = vmatprep.subr.bf16.mxu0 %v5191_v1  ;;  %4572 = vmatprep.mubr.msk.bf16.mxu0 %vm5192_vm0, %v5191_v1  ;;  %v5045_v9 = vld [vmem:[%s6112_s3] sm:$0xff]   ;;  %v5318_v10 = vpack.c.bf16 %v437_v8, %v437_v8  ;;  %v4001_v15 = vld [vmem:[%s6113_s4 + $0x8] ss:$0 sm:$0xff]  ;;  %v5051_v49 = vld [vmem:[%s6112_s3 + $0x38] sm:$0xff]   ;;  %vm3662_vm7 = vcmask 517120  }
  0x10   : > { %v5049_v14 = vld [vmem:[%s6112_s3 + $0x200] sm:$0xff]   ;;  %v5053_v50 = vld [vmem:[%s6112_s3 + $0x30] sm:$0xff]   ;;  %v5055_v51 = vld [vmem:[%s6112_s3 + $0x28] sm:$0xff]  }
  0x11   : > { %4579 = vmatpush3.bf16.msra.mxu1 %v5040_v3  ;;  %v3994_v19 = vld [vmem:[%s6113_s4] ss:$0 sm:$0xff]  ;;  %v5050_v56 = vld [vmem:[%s6112_s3 + $0x138] sm:$0xff]   ;;  %v5052_v58 = vld [vmem:[%s6112_s3 + $0x130] sm:$0xff]  }
  0x12   : > { %4567 = vmatpush3.bf16.msra.mxu0 %v5041_v4  ;;  %4580 = vmatprep.subr.bf16.mxu1 %v5191_v1  ;;  %v5057_v52 = vld [vmem:[%s6112_s3 + $0x20] sm:$0xff]   ;;  %v5054_v59 = vld [vmem:[%s6112_s3 + $0x128] sm:$0xff]  }
  0x13   : > { %4568 = vmatprep.subr.bf16.mxu0 %v5191_v1  ;;  %v5056_v60 = vld [vmem:[%s6112_s3 + $0x120] sm:$0xff]  }
  0x15   : > { %4581 = vmatpush3.bf16.msra.mxu1 %v5042_v5 }
  0x16   : > { %4569 = vmatpush3.bf16.msra.mxu0 %v5043_v6  ;;  %4582 = vmatprep.subr.bf16.mxu1 %v5191_v1  ;;  %v4048_v6 = vld [vmem:[%s6113_s4 + $0x9] ss:$0 sm:$0xff] }
  0x17   : > { %4570 = vmatprep.subr.bf16.mxu0 %v5191_v1 }
  0x19   : > { %4583 = vmatpush3.bf16.msra.mxu1 %v5044_v7 }
  0x1a   : > { %4571 = vmatpush3.bf16.msra.mxu0 %v5045_v9  ;;  %4606 = vmatprep.subr.bf16.mxu1 %v5191_v1  ;;  %v4041_v9 = vld [vmem:[%s6113_s4 + $0x1] ss:$0 sm:$0xff] }
  0x1b   : > { %4588 = vmatprep.subr.bf16.mxu0 %v5191_v1 }
  0x1c   : > { %4585 = vmatmul.mubr.msk.bf16.vlgmr.msra.gmra.mxu1 %vm496_vm1, %v5318_v10 }
  0x1d   : > { %4573 = vmatmul.mubr.msk.bf16.vlgmr.msra.gmra.mxu0 %vm496_vm1, %v5318_v10  ;;  %4608 = vmatprep.mubr.msk.bf16.mxu1 %vm5192_vm0, %v5191_v1 }
  0x1e   : > { %4589 = vmatpush3.bf16.msra.mxu0 %v5046_v11  ;;  %4596 = vmatprep.mubr.msk.bf16.mxu0 %vm5192_vm0, %v5191_v1 }
  0x1f   : > { %4590 = vmatprep.subr.bf16.mxu0 %v5191_v1 }
  0x22   : > { %4591 = vmatpush3.bf16.msra.mxu0 %v5047_v12 }
  0x23   : > { %4592 = vmatprep.subr.bf16.mxu0 %v5191_v1 }
  0x26   : > { %4593 = vmatpush3.bf16.msra.mxu0 %v5048_v13 }
  0x27   : > { %4594 = vmatprep.subr.bf16.mxu0 %v5191_v1 }
  0x2a   : > { %4595 = vmatpush3.bf16.msra.mxu0 %v5049_v14 }
  0x2b   : > { %4600 = vmatprep.subr.bf16.mxu0 %v5191_v1 }
  0x2d   : > { %4597 = vmatmul.mubr.msk.bf16.vlgmr.msra.gmra.mxu0 %vm496_vm1, %v5318_v10 }
  0x2e   : > { %4602 = vmatprep.mubr.msk.bf16.mxu0 %vm5192_vm0, %v5191_v1 }
  0xdc   : > { %v606_v16 = vpop.f32.mrf.mxu1 }
  0xdd   : > { %v607_v17 = vadd.f32 %v4001_v15, %v606_v16  ;;  %v534_v18 = vpop.f32.mrf.mxu0 }
  0xde   : > { %v4586_v20 = vpop.f32.mrf.mxu1  ;;  %v535_v25 = vadd.f32 %v3994_v19, %v534_v18  ;;  %v5058_v18 = vld [vmem:[%s6112_s3 + $0x238] sm:$0xff]   ;;  %v5059_v19 = vld [vmem:[%s6112_s3 + $0x230] sm:$0xff]  }
  0xdf   : > { %v685_v21 = vpack.c.bf16 %v607_v17, %v607_v17  ;;  %v4574_v22 = vpop.f32.mrf.mxu0  ;;  %v5060_v20 = vld [vmem:[%s6112_s3 + $0x228] sm:$0xff]  }
  0xe0   : > { %v609_v23 = vpop.f32.mrf.mxu1  ;;  %v684_v29 = vpack.c.bf16 %v535_v25, %v535_v25 }
  0xe1   : > { %v691_v24 = vsel %vm686_vm2, %v685_v21, 0  ;;  %v537_v26 = vpop.f32.mrf.mxu0  ;;  %v5061_v21 = vld [vmem:[%s6112_s3 + $0x220] sm:$0xff]  }
  0xe2   : > { %v4587_v27 = vpop.f32.mrf.mxu1  ;;  %4601 = vmatpush3.bf16.xpose.msra.mxu0 %v691_v24 }
  0xe3   : > { %v4575_v28 = vpop.f32.mrf.mxu0  ;;  %4612 = vmatprep.subr.bf16.mxu0 %v5191_v1 }
  0xe9   : > { %4603 = vmatmul.mubr.msk.bf16.vlgmr.msra.gmra.mxu0 %vm686_vm2, %v684_v29 }
  0xea   : > { %4620 = vmatprep.mubr.msk.bf16.mxu0 %vm5192_vm0, %v5191_v1  ;;  %4613 = vmatpush3.bf16.msra.mxu0 %v5051_v49  ;;  %v5062_v49 = vld [vmem:[%s6112_s3 + $0x158] sm:$0xff]  }
  0xeb   : > { %4614 = vmatprep.subr.bf16.mxu0 %v5191_v1 }
  0xed   : > { %v678_v31 = vpop.f32.mrf.mxu0 }
  0xee   : > { %v679_v32 = vadd.f32 %v4008_v30, %v678_v31  ;;  %4615 = vmatpush3.bf16.msra.mxu0 %v5053_v50 }
  0xef   : > { %v4598_v33 = vpop.f32.mrf.mxu0  ;;  %4616 = vmatprep.subr.bf16.mxu0 %v5191_v1 }
  0xf0   : > { %v747_v34 = vpack.c.bf16 %v679_v32, %v679_v32  ;;  %v4055_v33 = vld [vmem:[%s6113_s4 + $0x11] ss:$0 sm:$0xff] }
  0xf1   : > { %v681_v35 = vpop.f32.mrf.mxu0 }
  0xf2   : > { %v754_v36 = vsel %vm752_vm3, %v747_v34, 0  ;;  %4617 = vmatpush3.bf16.msra.mxu0 %v5055_v51  ;;  %v5063_v51 = vld [vmem:[%s6112_s3 + $0x150] sm:$0xff]  }
  0xf3   : > { %v4599_v37 = vpop.f32.mrf.mxu0  ;;  %4607 = vmatpush3.bf16.msra.mxu1 %v754_v36  ;;  %4618 = vmatprep.subr.bf16.mxu0 %v5191_v1 }
  0xf4   : > { %4624 = vmatprep.subr.bf16.mxu1 %v5191_v1 }
  0xf6   : > { %4619 = vmatpush3.bf16.msra.mxu0 %v5057_v52  ;;  %v5064_v52 = vld [vmem:[%s6112_s3 + $0x148] sm:$0xff]  }
  0xf7   : > { %4636 = vmatprep.subr.bf16.mxu0 %v5191_v1 }
  0xf9   : > { %4621 = vmatmul.mubr.msk.bf16.vlgmr.msra.gmra.mxu0 %vm496_vm1, %v5318_v10 }
  0xfa   : > { %4644 = vmatprep.mubr.msk.bf16.mxu0 %vm5192_vm0, %v5191_v1  ;;  %4637 = vmatpush3.bf16.msra.mxu0 %v5058_v18 }
  0xfb   : > { %4638 = vmatprep.subr.bf16.mxu0 %v5191_v1 }
  0xfe   : > { %4639 = vmatpush3.bf16.msra.mxu0 %v5059_v19 }
  0xff   : > { %4640 = vmatprep.subr.bf16.mxu0 %v5191_v1 }
 0x102   : > { %4641 = vmatpush3.bf16.msra.mxu0 %v5060_v20 }
 0x103   : > { %4642 = vmatprep.subr.bf16.mxu0 %v5191_v1 }
 0x106   : > { %4643 = vmatpush3.bf16.msra.mxu0 %v5061_v21 }
 0x107   : > { %4660 = vmatprep.subr.bf16.mxu0 %v5191_v1 }
 0x109   : > { %4645 = vmatmul.mubr.msk.bf16.vlgmr.msra.gmra.mxu0 %vm496_vm1, %v5318_v10 }
 0x10a   : > { %4662 = vmatprep.mubr.msk.bf16.mxu0 %vm5192_vm0, %v5191_v1 }
 0x1a9   : > { %v727_v38 = vpop.f32.mrf.mxu0 }
 0x1aa   : > { %v733_v39 = vmul.f32 0.35355338, %v727_v38 }
 0x1ab   : > { %v4604_v40 = vpop.f32.mrf.mxu0 }
 0x1ac   : > { %v735_v41 = vsel %vm734_vm4, %v733_v39, -inf }
 0x1ad   : > { %736 = vmax.xlane.f32.xlu0 %v735_v41  ;;  %v730_v42 = vpop.f32.mrf.mxu0  ;;  %v4063_v41 = vld [vmem:[%s6114_s5 + $0x4] sm:$0xf] }
 0x1ae   : > { %v1157_v42 = vsel %vm1155_vm6, %v4063_v41, 0 }
 0x1af   : > { %v4605_v43 = vpop.f32.mrf.mxu0  ;;  %4661 = vmatpush3.bf16.msra.mxu0 %v1157_v42 }
 0x1b0   : > { %4672 = vmatprep.subr.bf16.mxu0 %v5191_v1 }
 0x1b9   : > { %v891_v61 = vpop.f32.mrf.mxu0 }
 0x1ba   : > { %v892_v15 = vadd.f32 %v4041_v9, %v891_v61 }
 0x1bb   : > { %v4622_v62 = vpop.f32.mrf.mxu0 }
 0x1bc   : > { %v1041_v17 = vpack.c.bf16 %v892_v15, %v892_v15  ;;  %v5068_v62 = vld [vmem:[%s6112_s3 + $0x48] sm:$0xff]  }
 0x1bd   : > { %v894_v63 = vpop.f32.mrf.mxu0 }
 0x1bf   : > { %v4623_v0 = vpop.f32.mrf.mxu0 }
 0x1c9   : > { %v1035_v34 = vpop.f32.mrf.mxu0 }
 0x1ca   : > { %v1036_v35 = vadd.f32 %v4055_v33, %v1035_v34 }
 0x1cb   : > { %v4646_v36 = vpop.f32.mrf.mxu0 }
 0x1cc   : > { %v1102_v37 = vpack.c.bf16 %v1036_v35, %v1036_v35 }
 0x1cd   : > { %v1038_v38 = vpop.f32.mrf.mxu0 }
 0x1cf   : > { %v4647_v40 = vpop.f32.mrf.mxu0 }
 0x236   : > { %v737_v44 = vpop.xlane.xlu0 %736 }
 0x237   : > { %v738_v45 = vsub.f32 %v733_v39, %v737_v44  ;;  %v1107_v39 = vsel %vm752_vm3, %v1102_v37, 0 }
 0x239   : > { %v739_v46 = vmul.f32 1.442695, %v738_v45  ;;  %v797_v45 = vld [vmem:[%s6114_s5] sm:$0xf] }
 0x23b   : > { %5146 = vpow2.f32 %v739_v46 }
 0x248   : > { %v5147_v47 = vpop.eup %5146 }
 0x249   : > { %v741_v48 = vsel %vm734_vm4, %v5147_v47, 0.0 }
 0x24a   : > { %742 = vadd.xlane.f32.xlu0 %v741_v48  ;;  %v1203_v48 = vsel %vm1155_vm6, %v797_v45, 0 }
 0x2d3   : > { %v743_v53 = vpop.xlane.xlu0 %742 }
 0x2d4   : > { %5148 = vrcp.f32 %v743_v53  ;;  %v5065_v53 = vld [vmem:[%s6112_s3 + $0x140] sm:$0xff]  }
 0x2e1   : > { %v5149_v54 = vpop.eup %5148 }
 0x2e2   : > { %v745_v55 = vmul.f32 %v5149_v54, %v5147_v47 }
 0x2e4   : > { %v746_v57 = vpack.c.bf16 %v745_v55, %v745_v55  ;;  %v5066_v55 = vld [vmem:[%s6112_s3 + $0x58] sm:$0xff]  }
 0x2e6   : > { %4609 = vmatmul.mubr.msk.bf16.vlgmr.msra.gmra.mxu1 %vm748_vm5, %v746_v57 }
 0x2e7   : > { %4625 = vmatpush3.bf16.msra.mxu1 %v5050_v56  ;;  %4632 = vmatprep.mubr.msk.bf16.mxu1 %vm5192_vm0, %v5191_v1 }
 0x2e8   : > { %4626 = vmatprep.subr.bf16.mxu1 %v5191_v1 }
 0x2eb   : > { %4627 = vmatpush3.bf16.msra.mxu1 %v5052_v58 }
 0x2ec   : > { %4628 = vmatprep.subr.bf16.mxu1 %v5191_v1 }
 0x2ef   : > { %4629 = vmatpush3.bf16.msra.mxu1 %v5054_v59  ;;  %v5067_v59 = vld [vmem:[%s6112_s3 + $0x50] sm:$0xff]  }
 0x2f0   : > { %4630 = vmatprep.subr.bf16.mxu1 %v5191_v1 }
 0x2f3   : > { %4631 = vmatpush3.bf16.msra.mxu1 %v5056_v60 }
 0x2f4   : > { %4648 = vmatprep.subr.bf16.mxu1 %v5191_v1 }
 0x2f6   : > { %4633 = vmatmul.mubr.msk.bf16.vlgmr.msra.gmra.mxu1 %vm496_vm1, %v5318_v10 }
 0x2f7   : > { %4650 = vmatprep.mubr.msk.bf16.mxu1 %vm5192_vm0, %v5191_v1 }
 0x3a6   : > { %v5411_v2 = vpop.f32.mrf.mxu1 }
 0x3a7   : > { %v796_v50 = vpack.c.bf16 %v5411_v2, %v5411_v2  ;;  %v5069_v2 = vld [vmem:[%s6112_s3 + $0x40] sm:$0xff]  }
 0x3a8   : > { %v4610_v3 = vpop.f32.mrf.mxu1 }
 0x3aa   : > { %v793_v4 = vpop.f32.mrf.mxu1 }
 0x3ab   : > { %v4098_v4 = vld [vmem:[%s6113_s4 + $0xa] ss:$0 sm:$0xff] }
 0x3ac   : > { %v4611_v5 = vpop.f32.mrf.mxu1 }
 0x3b6   : > { %v963_v7 = vpop.f32.mrf.mxu1 }
 0x3b7   : > { %v964_v8 = vadd.f32 %v4048_v6, %v963_v7 }
 0x3b8   : > { %v4634_v11 = vpop.f32.mrf.mxu1 }
 0x3b9   : > { %v1042_v12 = vpack.c.bf16 %v964_v8, %v964_v8 }
 0x3ba   : > { %v966_v13 = vpop.f32.mrf.mxu1 }
 0x3bb   : > { %v1047_v14 = vsel %vm686_vm2, %v1042_v12, 0 }
 0x3bc   : > { %v4635_v16 = vpop.f32.mrf.mxu1  ;;  %4649 = vmatpush3.bf16.xpose.msra.mxu1 %v1047_v14 }
 0x3bd   : > { %4654 = vmatprep.subr.bf16.mxu1 %v5191_v1 }
 0x3c3   : > { %4651 = vmatmul.mubr.msk.bf16.vlgmr.msra.gmra.mxu1 %vm686_vm2, %v1041_v17  ;;  %v4091_v17 = vld [vmem:[%s6113_s4 + $0x2] ss:$0 sm:$0xff] }
 0x3c4   : > { %4656 = vmatprep.mubr.msk.bf16.mxu1 %vm5192_vm0, %v5191_v1  ;;  %4655 = vmatpush3.bf16.msra.mxu1 %v1107_v39  ;;  %v4105_v39 = vld [vmem:[%s6113_s4 + $0x12] ss:$0 sm:$0xff] }
 0x3c5   : > { %4666 = vmatprep.subr.bf16.mxu1 %v5191_v1 }
 0x483   : > { %v1083_v22 = vpop.f32.mrf.mxu1 }
 0x484   : > { %v1089_v23 = vmul.f32 0.35355338, %v1083_v22 }
 0x485   : > { %v4652_v24 = vpop.f32.mrf.mxu1 }
 0x486   : > { %v1090_v25 = vsel %vm734_vm4, %v1089_v23, -inf  ;;  %v5070_v24 = vld [vmem:[%s6112_s3 + $0x258] sm:$0xff]  }
 0x487   : > { %1091 = vmax.xlane.f32.xlu1 %v1090_v25  ;;  %v1086_v26 = vpop.f32.mrf.mxu1  ;;  %v5071_v25 = vld [vmem:[%s6112_s3 + $0x250] sm:$0xff]  }
 0x488   : > { %v5072_v26 = vld [vmem:[%s6112_s3 + $0x248] sm:$0xff]  }
 0x489   : > { %v4653_v27 = vpop.f32.mrf.mxu1 }
 0x48a   : > { %v5073_v27 = vld [vmem:[%s6112_s3 + $0x240] sm:$0xff]  }
 0x510   : > { %v1092_v28 = vpop.xlane.xlu1 %1091 }
 0x511   : > { %v1093_v29 = vsub.f32 %v1089_v23, %v1092_v28 }
 0x513   : > { %v1094_v30 = vmul.f32 1.442695, %v1093_v29 }
 0x515   : > { %5150 = vpow2.f32 %v1094_v30 }
 0x522   : > { %v5151_v31 = vpop.eup %5150 }
 0x523   : > { %v1096_v32 = vsel %vm734_vm4, %v5151_v31, 0.0 }
 0x524   : > { %1097 = vadd.xlane.f32.xlu1 %v1096_v32 }
 0x5ad   : > { %v1098_v43 = vpop.xlane.xlu1 %1097 }
 0x5ae   : > { %5152 = vrcp.f32 %v1098_v43 }
 0x5bb   : > { %v5153_v44 = vpop.eup %5152 }
 0x5bc   : > { %v1100_v46 = vmul.f32 %v5153_v44, %v5151_v31 }
 0x5be   : > { %v1101_v47 = vpack.c.bf16 %v1100_v46, %v1100_v46 }
 0x5c0   : > { %4657 = vmatmul.mubr.msk.bf16.vlgmr.msra.gmra.mxu1 %vm748_vm5, %v1101_v47  ;;  %v4113_v47 = vld [vmem:[%s6114_s5 + $0x8] sm:$0xf] }
 0x5c1   : > { %4667 = vmatpush3.bf16.msra.mxu1 %v1203_v48  ;;  %4668 = vmatprep.mubr.msk.bf16.mxu1 %vm5192_vm0, %v5191_v1  ;;  %v1603_v48 = vsel %vm1155_vm6, %v4113_v47, 0 }
 0x5c2   : > { %4684 = vmatprep.subr.bf16.mxu1 %v5191_v1 }
 0x5c8   : > { %4669 = vmatmul.mubr.msk.bf16.vlgmr.msra.gmra.mxu1 %vm686_vm2, %v796_v50 }
 0x5c9   : > { %4685 = vmatpush3.bf16.msra.mxu1 %v5062_v49  ;;  %4692 = vmatprep.mubr.msk.bf16.mxu1 %vm5192_vm0, %v5191_v1 }
 0x5ca   : > { %4686 = vmatprep.subr.bf16.mxu1 %v5191_v1 }
 0x5cd   : > { %4687 = vmatpush3.bf16.msra.mxu1 %v5063_v51 }
 0x5ce   : > { %4688 = vmatprep.subr.bf16.mxu1 %v5191_v1 }
 0x5d1   : > { %4689 = vmatpush3.bf16.msra.mxu1 %v5064_v52 }
 0x5d2   : > { %4690 = vmatprep.subr.bf16.mxu1 %v5191_v1 }
 0x5d5   : > { %4691 = vmatpush3.bf16.msra.mxu1 %v5065_v53  ;;  %v5075_v53 = vld [vmem:[%s6112_s3 + $0x78] sm:$0xff]  }
 0x5d6   : > { %4708 = vmatprep.subr.bf16.mxu1 %v5191_v1 }
 0x5d8   : > { %4693 = vmatmul.mubr.msk.bf16.vlgmr.msra.gmra.mxu1 %vm496_vm1, %v5318_v10 }
 0x5d9   : > { %4710 = vmatprep.mubr.msk.bf16.mxu1 %vm5192_vm0, %v5191_v1 }
 0x680   : > { %v1143_v54 = vpop.f32.mrf.mxu1 }
 0x681   : > { %v1149_v56 = vpack.c.bf16 %v1143_v54, %v1143_v54  ;;  %v5077_v54 = vld [vmem:[%s6112_s3 + $0x70] sm:$0xff]  }
 0x682   : > { %v4658_v57 = vpop.f32.mrf.mxu1 }
 0x683   : > { %4663 = vmatmul.mubr.msk.bf16.vlgmr.msra.gmra.mxu0 %vm686_vm2, %v1149_v56  ;;  %v5081_v56 = vld [vmem:[%s6112_s3 + $0x60] sm:$0xff]  }
 0x684   : > { %4673 = vmatpush3.bf16.msra.mxu0 %v5066_v55  ;;  %v1146_v58 = vpop.f32.mrf.mxu1  ;;  %4680 = vmatprep.mubr.msk.bf16.mxu0 %vm5192_vm0, %v5191_v1  ;;  %v5079_v55 = vld [vmem:[%s6112_s3 + $0x68] sm:$0xff]  }
 0x685   : > { %4674 = vmatprep.subr.bf16.mxu0 %v5191_v1  ;;  %v5074_v58 = vld [vmem:[%s6112_s3 + $0x178] sm:$0xff]  }
 0x686   : > { %v4659_v60 = vpop.f32.mrf.mxu1 }
 0x688   : > { %4675 = vmatpush3.bf16.msra.mxu0 %v5067_v59  ;;  %v5499_v61 = vpop.f32.mrf.mxu1 }
 0x689   : > { %4676 = vmatprep.subr.bf16.mxu0 %v5191_v1 }
 0x68a   : > { %v4670_v63 = vpop.f32.mrf.mxu1 }
 0x68b   : > { %v5076_v63 = vld [vmem:[%s6112_s3 + $0x170] sm:$0xff]  }
 0x68c   : > { %4677 = vmatpush3.bf16.msra.mxu0 %v5068_v62  ;;  %v1242_v0 = vpop.f32.mrf.mxu1 }
 0x68d   : > { %4678 = vmatprep.subr.bf16.mxu0 %v5191_v1 }
 0x68e   : > { %v4671_v3 = vpop.f32.mrf.mxu1 }
 0x68f   : > { %v5080_v3 = vld [vmem:[%s6112_s3 + $0x160] sm:$0xff]  }
 0x690   : > { %4679 = vmatpush3.bf16.msra.mxu0 %v5069_v2  ;;  %v5078_v2 = vld [vmem:[%s6112_s3 + $0x168] sm:$0xff]  }
 0x691   : > { %4696 = vmatprep.subr.bf16.mxu0 %v5191_v1 }
 0x693   : > { %4681 = vmatmul.mubr.msk.bf16.vlgmr.msra.gmra.mxu0 %vm496_vm1, %v5318_v10 }
 0x694   : > { %4704 = vmatprep.mubr.msk.bf16.mxu0 %vm5192_vm0, %v5191_v1  ;;  %4697 = vmatpush3.bf16.msra.mxu0 %v5070_v24 }
 0x695   : > { %4698 = vmatprep.subr.bf16.mxu0 %v5191_v1 }
 0x698   : > { %v1410_v5 = vpop.f32.mrf.mxu1  ;;  %4699 = vmatpush3.bf16.msra.mxu0 %v5071_v25  ;;  %v5082_v25 = vld [vmem:[%s6112_s3 + $0x278] sm:$0xff]  }
 0x699   : > { %v1411_v6 = vadd.f32 %v4098_v4, %v1410_v5  ;;  %4700 = vmatprep.subr.bf16.mxu0 %v5191_v1 }
 0x69a   : > { %v4694_v7 = vpop.f32.mrf.mxu1 }
 0x69b   : > { %v1489_v8 = vpack.c.bf16 %v1411_v6, %v1411_v6 }
 0x69c   : > { %v1413_v9 = vpop.f32.mrf.mxu1  ;;  %4701 = vmatpush3.bf16.msra.mxu0 %v5072_v26  ;;  %v5083_v26 = vld [vmem:[%s6112_s3 + $0x270] sm:$0xff]  }
 0x69d   : > { %v1494_v11 = vsel %vm686_vm2, %v1489_v8, 0  ;;  %4702 = vmatprep.subr.bf16.mxu0 %v5191_v1 }
 0x69e   : > { %v4695_v12 = vpop.f32.mrf.mxu1  ;;  %4709 = vmatpush3.bf16.xpose.msra.mxu1 %v1494_v11 }
 0x69f   : > { %4714 = vmatprep.subr.bf16.mxu1 %v5191_v1 }
 0x6a0   : > { %4703 = vmatpush3.bf16.msra.mxu0 %v5073_v27  ;;  %v5084_v27 = vld [vmem:[%s6112_s3 + $0x268] sm:$0xff]  }
 0x6a1   : > { %4720 = vmatprep.subr.bf16.mxu0 %v5191_v1 }
 0x6a3   : > { %4705 = vmatmul.mubr.msk.bf16.vlgmr.msra.gmra.mxu0 %vm496_vm1, %v5318_v10 }
 0x6a4   : > { %4722 = vmatprep.mubr.msk.bf16.mxu0 %vm5192_vm0, %v5191_v1  ;;  %4721 = vmatpush3.bf16.msra.mxu0 %v1603_v48  ;;  %v4162_v48 = vld [vmem:[%s6114_s5 + $0xc] sm:$0xf] }
 0x6a5   : > { %4738 = vmatprep.subr.bf16.mxu0 %v5191_v1 }
 0x743   : > { %v5519_v13 = vpop.f32.mrf.mxu0 }
 0x744   : > { %v1240_v8 = vadd.f32 %v5499_v61, %v5519_v13 }
 0x745   : > { %v4664_v14 = vpop.f32.mrf.mxu0 }
 0x747   : > { %v1196_v15 = vpop.f32.mrf.mxu0 }
 0x749   : > { %v4665_v16 = vpop.f32.mrf.mxu0 }
 0x74a   : > { %v4147_v16 = vld [vmem:[%s6113_s4 + $0xb] ss:$0 sm:$0xff] }
 0x753   : > { %v1338_v18 = vpop.f32.mrf.mxu0 }
 0x754   : > { %v1339_v19 = vadd.f32 %v4091_v17, %v1338_v18 }
 0x755   : > { %v4682_v20 = vpop.f32.mrf.mxu0 }
 0x756   : > { %v1488_v21 = vpack.c.bf16 %v1339_v19, %v1339_v19  ;;  %v4140_v19 = vld [vmem:[%s6113_s4 + $0x3] ss:$0 sm:$0xff] }
 0x757   : > { %v1341_v22 = vpop.f32.mrf.mxu0 }
 0x758   : > { %4711 = vmatmul.mubr.msk.bf16.vlgmr.msra.gmra.mxu1 %vm686_vm2, %v1488_v21 }
 0x759   : > { %v4683_v23 = vpop.f32.mrf.mxu0  ;;  %4716 = vmatprep.mubr.msk.bf16.mxu1 %vm5192_vm0, %v5191_v1 }
 0x763   : > { %v1482_v40 = vpop.f32.mrf.mxu0 }
 0x764   : > { %v1483_v41 = vadd.f32 %v4105_v39, %v1482_v40 }
 0x765   : > { %v4706_v42 = vpop.f32.mrf.mxu0 }
 0x766   : > { %v1549_v43 = vpack.c.bf16 %v1483_v41, %v1483_v41 }
 0x767   : > { %v1485_v44 = vpop.f32.mrf.mxu0 }
 0x768   : > { %v1554_v45 = vsel %vm752_vm3, %v1549_v43, 0 }
 0x769   : > { %v4707_v46 = vpop.f32.mrf.mxu0  ;;  %4715 = vmatpush3.bf16.msra.mxu1 %v1554_v45 }
 0x76a   : > { %4726 = vmatprep.subr.bf16.mxu1 %v5191_v1 }
 0x818   : > { %v1530_v28 = vpop.f32.mrf.mxu1 }
 0x819   : > { %v1536_v29 = vmul.f32 0.35355338, %v1530_v28  ;;  %v5085_v28 = vld [vmem:[%s6112_s3 + $0x260] sm:$0xff]  }
 0x81a   : > { %v4712_v30 = vpop.f32.mrf.mxu1 }
 0x81b   : > { %v1537_v31 = vsel %vm734_vm4, %v1536_v29, -inf }
 0x81c   : > { %1538 = vmax.xlane.f32.xlu0 %v1537_v31  ;;  %v1533_v32 = vpop.f32.mrf.mxu1 }
 0x81e   : > { %v4713_v33 = vpop.f32.mrf.mxu1 }
 0x8a5   : > { %v1539_v34 = vpop.xlane.xlu0 %1538 }
 0x8a6   : > { %v1540_v35 = vsub.f32 %v1536_v29, %v1539_v34 }
 0x8a8   : > { %v1541_v36 = vmul.f32 1.442695, %v1540_v35  ;;  %v4154_v35 = vld [vmem:[%s6113_s4 + $0x13] ss:$0 sm:$0xff] }
 0x8aa   : > { %5154 = vpow2.f32 %v1541_v36 }
 0x8b7   : > { %v5155_v37 = vpop.eup %5154 }
 0x8b8   : > { %v1543_v38 = vsel %vm734_vm4, %v5155_v37, 0.0 }
 0x8b9   : > { %1544 = vadd.xlane.f32.xlu1 %v1543_v38 }
 0x942   : > { %v1545_v49 = vpop.xlane.xlu1 %1544 }
 0x943   : > { %5156 = vrcp.f32 %v1545_v49  ;;  %v2004_v49 = vsel %vm1155_vm6, %v4162_v48, 0  ;;  %v4211_v48 = vld [vmem:[%s6114_s5 + $0x10] sm:$0xf] }
 0x950   : > { %v5157_v50 = vpop.eup %5156 }
 0x951   : > { %v1547_v51 = vmul.f32 %v5157_v50, %v5155_v37 }
 0x953   : > { %v1548_v52 = vpack.c.bf16 %v1547_v51, %v1547_v51 }
 0x955   : > { %4717 = vmatmul.mubr.msk.bf16.vlgmr.msra.gmra.mxu1 %vm748_vm5, %v1548_v52 }
 0x956   : > { %4734 = vmatprep.mubr.msk.bf16.mxu1 %vm5192_vm0, %v5191_v1  ;;  %4727 = vmatpush3.bf16.msra.mxu1 %v5075_v53 }
 0x957   : > { %4728 = vmatprep.subr.bf16.mxu1 %v5191_v1 }
 0x95a   : > { %4729 = vmatpush3.bf16.msra.mxu1 %v5077_v54  ;;  %v5087_v54 = vld [vmem:[%s6112_s3 + $0x98] sm:$0xff]  }
 0x95b   : > { %4730 = vmatprep.subr.bf16.mxu1 %v5191_v1 }
 0x95e   : > { %4731 = vmatpush3.bf16.msra.mxu1 %v5079_v55  ;;  %v5089_v55 = vld [vmem:[%s6112_s3 + $0x90] sm:$0xff]  }
 0x95f   : > { %4732 = vmatprep.subr.bf16.mxu1 %v5191_v1 }
 0x962   : > { %4733 = vmatpush3.bf16.msra.mxu1 %v5081_v56  ;;  %v5091_v56 = vld [vmem:[%s6112_s3 + $0x88] sm:$0xff]  }
 0x963   : > { %4750 = vmatprep.subr.bf16.mxu1 %v5191_v1 }
 0x965   : > { %4735 = vmatmul.mubr.msk.bf16.vlgmr.msra.gmra.mxu1 %vm496_vm1, %v5318_v10 }
 0x966   : > { %4758 = vmatprep.mubr.msk.bf16.mxu1 %vm5192_vm0, %v5191_v1  ;;  %4751 = vmatpush3.bf16.msra.mxu1 %v5082_v25  ;;  %v5094_v25 = vld [vmem:[%s6112_s3 + $0x298] sm:$0xff]  }
 0x967   : > { %4752 = vmatprep.subr.bf16.mxu1 %v5191_v1 }
 0x96a   : > { %4753 = vmatpush3.bf16.msra.mxu1 %v5083_v26  ;;  %v5095_v26 = vld [vmem:[%s6112_s3 + $0x290] sm:$0xff]  }
 0x96b   : > { %4754 = vmatprep.subr.bf16.mxu1 %v5191_v1 }
 0x96e   : > { %4755 = vmatpush3.bf16.msra.mxu1 %v5084_v27  ;;  %v5096_v27 = vld [vmem:[%s6112_s3 + $0x288] sm:$0xff]  }
 0x96f   : > { %4756 = vmatprep.subr.bf16.mxu1 %v5191_v1 }
 0x972   : > { %4757 = vmatpush3.bf16.msra.mxu1 %v5085_v28  ;;  %v5097_v28 = vld [vmem:[%s6112_s3 + $0x280] sm:$0xff]  }
 0x973   : > { %4774 = vmatprep.subr.bf16.mxu1 %v5191_v1 }
 0x975   : > { %4759 = vmatmul.mubr.msk.bf16.vlgmr.msra.gmra.mxu1 %vm496_vm1, %v5318_v10 }
 0x976   : > { %4776 = vmatprep.mubr.msk.bf16.mxu1 %vm5192_vm0, %v5191_v1  ;;  %4775 = vmatpush3.bf16.msra.mxu1 %v2004_v49  ;;  %v2405_v49 = vsel %vm1155_vm6, %v4211_v48, 0  ;;  %v4260_v48 = vld [vmem:[%s6114_s5 + $0x14] sm:$0xf] }
 0x977   : > { %4792 = vmatprep.subr.bf16.mxu1 %v5191_v1 }
 0xa15   : > { %v1590_v57 = vpop.f32.mrf.mxu1 }
 0xa16   : > { %v1596_v59 = vpack.c.bf16 %v1590_v57, %v1590_v57  ;;  %v5093_v57 = vld [vmem:[%s6112_s3 + $0x80] sm:$0xff]  }
 0xa17   : > { %v4718_v60 = vpop.f32.mrf.mxu1 }
 0xa18   : > { %4723 = vmatmul.mubr.msk.bf16.vlgmr.msra.gmra.mxu0 %vm686_vm2, %v1596_v59  ;;  %v5086_v59 = vld [vmem:[%s6112_s3 + $0x198] sm:$0xff]  }
 0xa19   : > { %4739 = vmatpush3.bf16.msra.mxu0 %v5074_v58  ;;  %v1593_v62 = vpop.f32.mrf.mxu1  ;;  %4746 = vmatprep.mubr.msk.bf16.mxu0 %vm5192_vm0, %v5191_v1 }
 0xa1a   : > { %4740 = vmatprep.subr.bf16.mxu0 %v5191_v1 }
 0xa1b   : > { %v4719_v0 = vpop.f32.mrf.mxu1 }
 0xa1c   : > { %v5088_v0 = vld [vmem:[%s6112_s3 + $0x190] sm:$0xff]  }
 0xa1d   : > { %4741 = vmatpush3.bf16.msra.mxu0 %v5076_v63 }
 0xa1e   : > { %4742 = vmatprep.subr.bf16.mxu0 %v5191_v1 }
 0xa21   : > { %4743 = vmatpush3.bf16.msra.mxu0 %v5078_v2 }
 0xa22   : > { %4744 = vmatprep.subr.bf16.mxu0 %v5191_v1 }
 0xa25   : > { %4745 = vmatpush3.bf16.msra.mxu0 %v5080_v3  ;;  %v1739_v4 = vpop.f32.mrf.mxu1  ;;  %v5090_v3 = vld [vmem:[%s6112_s3 + $0x188] sm:$0xff]  }
 0xa26   : > { %4762 = vmatprep.subr.bf16.mxu0 %v5191_v1  ;;  %v1740_v13 = vadd.f32 %v4140_v19, %v1739_v4  ;;  %v5092_v4 = vld [vmem:[%s6112_s3 + $0x180] sm:$0xff]  }
 0xa27   : > { %v4736_v5 = vpop.f32.mrf.mxu1 }
 0xa28   : > { %4747 = vmatmul.mubr.msk.bf16.vlgmr.msra.gmra.mxu0 %vm496_vm1, %v5318_v10  ;;  %v1889_v24 = vpack.c.bf16 %v1740_v13, %v1740_v13 }
 0xa29   : > { %4764 = vmatprep.mubr.msk.bf16.mxu0 %vm5192_vm0, %v5191_v1  ;;  %v1742_v6 = vpop.f32.mrf.mxu1 }
 0xa2b   : > { %v4737_v7 = vpop.f32.mrf.mxu1 }
 0xa35   : > { %v1883_v36 = vpop.f32.mrf.mxu1 }
 0xa36   : > { %v1884_v37 = vadd.f32 %v4154_v35, %v1883_v36 }
 0xa37   : > { %v4760_v38 = vpop.f32.mrf.mxu1 }
 0xa38   : > { %v1950_v39 = vpack.c.bf16 %v1884_v37, %v1884_v37 }
 0xa39   : > { %v1886_v40 = vpop.f32.mrf.mxu1 }
 0xa3a   : > { %v1955_v41 = vsel %vm752_vm3, %v1950_v39, 0  ;;  %v4203_v40 = vld [vmem:[%s6113_s4 + $0x14] ss:$0 sm:$0xff] }
 0xa3b   : > { %v4761_v42 = vpop.f32.mrf.mxu1 }
 0xad8   : > { %v1639_v9 = vpop.f32.mrf.mxu0 }
 0xad9   : > { %v5607_v11 = vadd.f32 %v1639_v9, %v1240_v8 }
 0xada   : > { %v4724_v12 = vpop.f32.mrf.mxu0 }
 0xadc   : > { %v1642_v14 = vpop.f32.mrf.mxu0 }
 0xade   : > { %v4725_v15 = vpop.f32.mrf.mxu0 }
 0xae8   : > { %v1811_v17 = vpop.f32.mrf.mxu0 }
 0xae9   : > { %v1812_v18 = vadd.f32 %v4147_v16, %v1811_v17  ;;  %v4196_v17 = vld [vmem:[%s6113_s4 + $0xc] ss:$0 sm:$0xff] }
 0xaea   : > { %v4748_v20 = vpop.f32.mrf.mxu0 }
 0xaeb   : > { %v1890_v21 = vpack.c.bf16 %v1812_v18, %v1812_v18  ;;  %v4189_v20 = vld [vmem:[%s6113_s4 + $0x4] ss:$0 sm:$0xff] }
 0xaec   : > { %v1814_v22 = vpop.f32.mrf.mxu0 }
 0xaed   : > { %v1895_v61 = vsel %vm686_vm2, %v1890_v21, 0 }
 0xaee   : > { %v4749_v23 = vpop.f32.mrf.mxu0  ;;  %4763 = vmatpush3.bf16.xpose.msra.mxu0 %v1895_v61 }
 0xaef   : > { %4768 = vmatprep.subr.bf16.mxu0 %v5191_v1 }
 0xaf5   : > { %4765 = vmatmul.mubr.msk.bf16.vlgmr.msra.gmra.mxu0 %vm686_vm2, %v1889_v24 }
 0xaf6   : > { %4770 = vmatprep.mubr.msk.bf16.mxu0 %vm5192_vm0, %v5191_v1  ;;  %4769 = vmatpush3.bf16.msra.mxu0 %v1955_v41 }
 0xaf7   : > { %4780 = vmatprep.subr.bf16.mxu0 %v5191_v1 }
 0xbb5   : > { %v1931_v29 = vpop.f32.mrf.mxu0 }
 0xbb6   : > { %v1937_v30 = vmul.f32 0.35355338, %v1931_v29 }
 0xbb7   : > { %v4766_v31 = vpop.f32.mrf.mxu0 }
 0xbb8   : > { %v1938_v32 = vsel %vm734_vm4, %v1937_v30, -inf }
 0xbb9   : > { %1939 = vmax.xlane.f32.xlu0 %v1938_v32  ;;  %v1934_v33 = vpop.f32.mrf.mxu0 }
 0xbbb   : > { %v4767_v34 = vpop.f32.mrf.mxu0 }
 0xc42   : > { %v1940_v43 = vpop.xlane.xlu0 %1939 }
 0xc43   : > { %v1941_v44 = vsub.f32 %v1937_v30, %v1940_v43 }
 0xc45   : > { %v1942_v45 = vmul.f32 1.442695, %v1941_v44 }
 0xc47   : > { %5158 = vpow2.f32 %v1942_v45 }
 0xc54   : > { %v5159_v46 = vpop.eup %5158 }
 0xc55   : > { %v1944_v47 = vsel %vm734_vm4, %v5159_v46, 0.0 }
 0xc56   : > { %1945 = vadd.xlane.f32.xlu1 %v1944_v47 }
 0xcdf   : > { %v1946_v50 = vpop.xlane.xlu1 %1945 }
 0xce0   : > { %5160 = vrcp.f32 %v1946_v50 }
 0xced   : > { %v5161_v51 = vpop.eup %5160 }
 0xcee   : > { %v1948_v52 = vmul.f32 %v5161_v51, %v5159_v46 }
 0xcf0   : > { %v1949_v53 = vpack.c.bf16 %v1948_v52, %v1948_v52 }
 0xcf2   : > { %4771 = vmatmul.mubr.msk.bf16.vlgmr.msra.gmra.mxu0 %vm748_vm5, %v1949_v53 }
 0xcf3   : > { %4788 = vmatprep.mubr.msk.bf16.mxu0 %vm5192_vm0, %v5191_v1  ;;  %4781 = vmatpush3.bf16.msra.mxu0 %v5087_v54  ;;  %v5099_v54 = vld [vmem:[%s6112_s3 + $0xb8] sm:$0xff]  }
 0xcf4   : > { %4782 = vmatprep.subr.bf16.mxu0 %v5191_v1 }
 0xcf7   : > { %4783 = vmatpush3.bf16.msra.mxu0 %v5089_v55  ;;  %v5101_v55 = vld [vmem:[%s6112_s3 + $0xb0] sm:$0xff]  }
 0xcf8   : > { %4784 = vmatprep.subr.bf16.mxu0 %v5191_v1 }
 0xcfb   : > { %4785 = vmatpush3.bf16.msra.mxu0 %v5091_v56  ;;  %v5103_v56 = vld [vmem:[%s6112_s3 + $0xa8] sm:$0xff]  }
 0xcfc   : > { %4786 = vmatprep.subr.bf16.mxu0 %v5191_v1 }
 0xcff   : > { %4787 = vmatpush3.bf16.msra.mxu0 %v5093_v57  ;;  %v5105_v57 = vld [vmem:[%s6112_s3 + $0xa0] sm:$0xff]  }
 0xd00   : > { %4804 = vmatprep.subr.bf16.mxu0 %v5191_v1 }
 0xd02   : > { %4789 = vmatmul.mubr.msk.bf16.vlgmr.msra.gmra.mxu0 %vm496_vm1, %v5318_v10 }
 0xd03   : > { %4812 = vmatprep.mubr.msk.bf16.mxu0 %vm5192_vm0, %v5191_v1  ;;  %4805 = vmatpush3.bf16.msra.mxu0 %v5094_v25  ;;  %v5106_v25 = vld [vmem:[%s6112_s3 + $0x2b8] sm:$0xff]  }
 0xd04   : > { %4806 = vmatprep.subr.bf16.mxu0 %v5191_v1 }
 0xd07   : > { %4807 = vmatpush3.bf16.msra.mxu0 %v5095_v26  ;;  %v5107_v26 = vld [vmem:[%s6112_s3 + $0x2b0] sm:$0xff]  }
 0xd08   : > { %4808 = vmatprep.subr.bf16.mxu0 %v5191_v1 }
 0xd0b   : > { %4809 = vmatpush3.bf16.msra.mxu0 %v5096_v27  ;;  %v5108_v27 = vld [vmem:[%s6112_s3 + $0x2a8] sm:$0xff]  }
 0xd0c   : > { %4810 = vmatprep.subr.bf16.mxu0 %v5191_v1 }
 0xd0f   : > { %4811 = vmatpush3.bf16.msra.mxu0 %v5097_v28  ;;  %v5109_v28 = vld [vmem:[%s6112_s3 + $0x2a0] sm:$0xff]  }
 0xd10   : > { %4828 = vmatprep.subr.bf16.mxu0 %v5191_v1 }
 0xd12   : > { %4813 = vmatmul.mubr.msk.bf16.vlgmr.msra.gmra.mxu0 %vm496_vm1, %v5318_v10 }
 0xd13   : > { %4830 = vmatprep.mubr.msk.bf16.mxu0 %vm5192_vm0, %v5191_v1  ;;  %4829 = vmatpush3.bf16.msra.mxu0 %v2405_v49  ;;  %v2806_v49 = vsel %vm1155_vm6, %v4260_v48, 0  ;;  %v4309_v48 = vld [vmem:[%s6114_s5 + $0x18] sm:$0xf] }
 0xd14   : > { %4846 = vmatprep.subr.bf16.mxu0 %v5191_v1 }
 0xdb2   : > { %v1991_v58 = vpop.f32.mrf.mxu0 }
 0xdb3   : > { %v1997_v60 = vpack.c.bf16 %v1991_v58, %v1991_v58 }
 0xdb4   : > { %v4772_v62 = vpop.f32.mrf.mxu0 }
 0xdb5   : > { %4777 = vmatmul.mubr.msk.bf16.vlgmr.msra.gmra.mxu1 %vm686_vm2, %v1997_v60 }
 0xdb6   : > { %4793 = vmatpush3.bf16.msra.mxu1 %v5086_v59  ;;  %v1994_v63 = vpop.f32.mrf.mxu0  ;;  %4800 = vmatprep.mubr.msk.bf16.mxu1 %vm5192_vm0, %v5191_v1  ;;  %v5098_v59 = vld [vmem:[%s6112_s3 + $0x1b8] sm:$0xff]  }
 0xdb7   : > { %4794 = vmatprep.subr.bf16.mxu1 %v5191_v1 }
 0xdb8   : > { %v4773_v2 = vpop.f32.mrf.mxu0 }
 0xdba   : > { %4795 = vmatpush3.bf16.msra.mxu1 %v5088_v0  ;;  %v5100_v0 = vld [vmem:[%s6112_s3 + $0x1b0] sm:$0xff]  }
 0xdbb   : > { %4796 = vmatprep.subr.bf16.mxu1 %v5191_v1 }
 0xdbe   : > { %4797 = vmatpush3.bf16.msra.mxu1 %v5090_v3  ;;  %v5102_v3 = vld [vmem:[%s6112_s3 + $0x1a8] sm:$0xff]  }
 0xdbf   : > { %4798 = vmatprep.subr.bf16.mxu1 %v5191_v1 }
 0xdc2   : > { %4799 = vmatpush3.bf16.msra.mxu1 %v5092_v4  ;;  %v2140_v5 = vpop.f32.mrf.mxu0  ;;  %v5104_v4 = vld [vmem:[%s6112_s3 + $0x1a0] sm:$0xff]  }
 0xdc3   : > { %4816 = vmatprep.subr.bf16.mxu1 %v5191_v1 }
 0xdc4   : > { %v4790_v6 = vpop.f32.mrf.mxu0 }
 0xdc5   : > { %4801 = vmatmul.mubr.msk.bf16.vlgmr.msra.gmra.mxu1 %vm496_vm1, %v5318_v10 }
 0xdc6   : > { %4818 = vmatprep.mubr.msk.bf16.mxu1 %vm5192_vm0, %v5191_v1  ;;  %v2143_v7 = vpop.f32.mrf.mxu0 }
 0xdc8   : > { %v4791_v8 = vpop.f32.mrf.mxu0 }
 0xdd2   : > { %v2284_v41 = vpop.f32.mrf.mxu0 }
 0xdd3   : > { %v2285_v42 = vadd.f32 %v4203_v40, %v2284_v41 }
 0xdd4   : > { %v4814_v43 = vpop.f32.mrf.mxu0 }
 0xdd5   : > { %v2351_v44 = vpack.c.bf16 %v2285_v42, %v2285_v42 }
 0xdd6   : > { %v2287_v45 = vpop.f32.mrf.mxu0 }
 0xdd7   : > { %v2356_v46 = vsel %vm752_vm3, %v2351_v44, 0 }
 0xdd8   : > { %v4815_v47 = vpop.f32.mrf.mxu0 }
 0xe75   : > { %v2040_v9 = vpop.f32.mrf.mxu1 }
 0xe76   : > { %v5699_v12 = vadd.f32 %v2040_v9, %v5607_v11  ;;  %v2141_v11 = vadd.f32 %v4189_v20, %v2140_v5 }
 0xe77   : > { %v4778_v14 = vpop.f32.mrf.mxu1 }
 0xe78   : > { %v2290_v24 = vpack.c.bf16 %v2141_v11, %v2141_v11 }
 0xe79   : > { %v2043_v15 = vpop.f32.mrf.mxu1 }
 0xe7b   : > { %v4779_v16 = vpop.f32.mrf.mxu1 }
 0xe85   : > { %v2212_v18 = vpop.f32.mrf.mxu1 }
 0xe86   : > { %v2213_v19 = vadd.f32 %v4196_v17, %v2212_v18  ;;  %v4245_v18 = vld [vmem:[%s6113_s4 + $0xd] ss:$0 sm:$0xff] }
 0xe87   : > { %v4802_v21 = vpop.f32.mrf.mxu1 }
 0xe88   : > { %v2291_v22 = vpack.c.bf16 %v2213_v19, %v2213_v19  ;;  %v4238_v21 = vld [vmem:[%s6113_s4 + $0x5] ss:$0 sm:$0xff] }
 0xe89   : > { %v2215_v61 = vpop.f32.mrf.mxu1 }
 0xe8a   : > { %v2296_v13 = vsel %vm686_vm2, %v2291_v22, 0 }
 0xe8b   : > { %v4803_v23 = vpop.f32.mrf.mxu1  ;;  %4817 = vmatpush3.bf16.xpose.msra.mxu1 %v2296_v13 }
 0xe8c   : > { %4822 = vmatprep.subr.bf16.mxu1 %v5191_v1 }
 0xe92   : > { %4819 = vmatmul.mubr.msk.bf16.vlgmr.msra.gmra.mxu1 %vm686_vm2, %v2290_v24 }
 0xe93   : > { %4824 = vmatprep.mubr.msk.bf16.mxu1 %vm5192_vm0, %v5191_v1  ;;  %4823 = vmatpush3.bf16.msra.mxu1 %v2356_v46 }
 0xe94   : > { %4834 = vmatprep.subr.bf16.mxu1 %v5191_v1 }
 0xf52   : > { %v2332_v29 = vpop.f32.mrf.mxu1 }
 0xf53   : > { %v2338_v30 = vmul.f32 0.35355338, %v2332_v29 }
 0xf54   : > { %v4820_v31 = vpop.f32.mrf.mxu1 }
 0xf55   : > { %v2339_v32 = vsel %vm734_vm4, %v2338_v30, -inf }
 0xf56   : > { %2340 = vmax.xlane.f32.xlu0 %v2339_v32  ;;  %v2335_v33 = vpop.f32.mrf.mxu1 }
 0xf58   : > { %v4821_v34 = vpop.f32.mrf.mxu1 }
 0xfdf   : > { %v2341_v35 = vpop.xlane.xlu0 %2340 }
 0xfe0   : > { %v2342_v36 = vsub.f32 %v2338_v30, %v2341_v35  ;;  %v4252_v35 = vld [vmem:[%s6113_s4 + $0x15] ss:$0 sm:$0xff] }
 0xfe2   : > { %v2343_v37 = vmul.f32 1.442695, %v2342_v36 }
 0xfe4   : > { %5162 = vpow2.f32 %v2343_v37 }
 0xff1   : > { %v5163_v38 = vpop.eup %5162 }
 0xff2   : > { %v2345_v39 = vsel %vm734_vm4, %v5163_v38, 0.0 }
 0xff3   : > { %2346 = vadd.xlane.f32.xlu1 %v2345_v39 }
0x107c   : > { %v2347_v50 = vpop.xlane.xlu1 %2346 }
0x107d   : > { %5164 = vrcp.f32 %v2347_v50 }
0x108a   : > { %v5165_v51 = vpop.eup %5164 }
0x108b   : > { %v2349_v52 = vmul.f32 %v5165_v51, %v5163_v38 }
0x108d   : > { %v2350_v53 = vpack.c.bf16 %v2349_v52, %v2349_v52 }
0x108f   : > { %4825 = vmatmul.mubr.msk.bf16.vlgmr.msra.gmra.mxu1 %vm748_vm5, %v2350_v53 }
0x1090   : > { %4842 = vmatprep.mubr.msk.bf16.mxu1 %vm5192_vm0, %v5191_v1  ;;  %4835 = vmatpush3.bf16.msra.mxu1 %v5099_v54  ;;  %v5111_v54 = vld [vmem:[%s6112_s3 + $0xd8] sm:$0xff]  }
0x1091   : > { %4836 = vmatprep.subr.bf16.mxu1 %v5191_v1 }
0x1094   : > { %4837 = vmatpush3.bf16.msra.mxu1 %v5101_v55  ;;  %v5113_v55 = vld [vmem:[%s6112_s3 + $0xd0] sm:$0xff]  }
0x1095   : > { %4838 = vmatprep.subr.bf16.mxu1 %v5191_v1 }
0x1098   : > { %4839 = vmatpush3.bf16.msra.mxu1 %v5103_v56  ;;  %v5115_v56 = vld [vmem:[%s6112_s3 + $0xc8] sm:$0xff]  }
0x1099   : > { %4840 = vmatprep.subr.bf16.mxu1 %v5191_v1 }
0x109c   : > { %4841 = vmatpush3.bf16.msra.mxu1 %v5105_v57  ;;  %v5117_v57 = vld [vmem:[%s6112_s3 + $0xc0] sm:$0xff]  }
0x109d   : > { %4858 = vmatprep.subr.bf16.mxu1 %v5191_v1 }
0x109f   : > { %4843 = vmatmul.mubr.msk.bf16.vlgmr.msra.gmra.mxu1 %vm496_vm1, %v5318_v10 }
0x10a0   : > { %4866 = vmatprep.mubr.msk.bf16.mxu1 %vm5192_vm0, %v5191_v1  ;;  %4859 = vmatpush3.bf16.msra.mxu1 %v5106_v25  ;;  %v5118_v25 = vld [vmem:[%s6112_s3 + $0x2d8] sm:$0xff]  }
0x10a1   : > { %4860 = vmatprep.subr.bf16.mxu1 %v5191_v1 }
0x10a4   : > { %4861 = vmatpush3.bf16.msra.mxu1 %v5107_v26  ;;  %v5119_v26 = vld [vmem:[%s6112_s3 + $0x2d0] sm:$0xff]  }
0x10a5   : > { %4862 = vmatprep.subr.bf16.mxu1 %v5191_v1 }
0x10a8   : > { %4863 = vmatpush3.bf16.msra.mxu1 %v5108_v27  ;;  %v5120_v27 = vld [vmem:[%s6112_s3 + $0x2c8] sm:$0xff]  }
0x10a9   : > { %4864 = vmatprep.subr.bf16.mxu1 %v5191_v1 }
0x10ac   : > { %4865 = vmatpush3.bf16.msra.mxu1 %v5109_v28  ;;  %v5121_v28 = vld [vmem:[%s6112_s3 + $0x2c0] sm:$0xff]  }
0x10ad   : > { %4882 = vmatprep.subr.bf16.mxu1 %v5191_v1 }
0x10af   : > { %4867 = vmatmul.mubr.msk.bf16.vlgmr.msra.gmra.mxu1 %vm496_vm1, %v5318_v10 }
0x10b0   : > { %4884 = vmatprep.mubr.msk.bf16.mxu1 %vm5192_vm0, %v5191_v1  ;;  %4883 = vmatpush3.bf16.msra.mxu1 %v2806_v49  ;;  %v3207_v49 = vsel %vm1155_vm6, %v4309_v48, 0 }
0x10b1   : > { %4900 = vmatprep.subr.bf16.mxu1 %v5191_v1 }
0x114f   : > { %v2392_v58 = vpop.f32.mrf.mxu1 }
0x1150   : > { %v2398_v60 = vpack.c.bf16 %v2392_v58, %v2392_v58 }
0x1151   : > { %v4826_v62 = vpop.f32.mrf.mxu1 }
0x1152   : > { %4831 = vmatmul.mubr.msk.bf16.vlgmr.msra.gmra.mxu0 %vm686_vm2, %v2398_v60 }
0x1153   : > { %4847 = vmatpush3.bf16.msra.mxu0 %v5098_v59  ;;  %v2395_v63 = vpop.f32.mrf.mxu1  ;;  %4854 = vmatprep.mubr.msk.bf16.mxu0 %vm5192_vm0, %v5191_v1  ;;  %v5110_v59 = vld [vmem:[%s6112_s3 + $0x1d8] sm:$0xff]  }
0x1154   : > { %4848 = vmatprep.subr.bf16.mxu0 %v5191_v1 }
0x1155   : > { %v4827_v2 = vpop.f32.mrf.mxu1 }
0x1157   : > { %4849 = vmatpush3.bf16.msra.mxu0 %v5100_v0  ;;  %v5112_v0 = vld [vmem:[%s6112_s3 + $0x1d0] sm:$0xff]  }
0x1158   : > { %4850 = vmatprep.subr.bf16.mxu0 %v5191_v1 }
0x115b   : > { %4851 = vmatpush3.bf16.msra.mxu0 %v5102_v3  ;;  %v5114_v3 = vld [vmem:[%s6112_s3 + $0x1c8] sm:$0xff]  }
0x115c   : > { %4852 = vmatprep.subr.bf16.mxu0 %v5191_v1 }
0x115f   : > { %4853 = vmatpush3.bf16.msra.mxu0 %v5104_v4  ;;  %v2541_v5 = vpop.f32.mrf.mxu1  ;;  %v5116_v4 = vld [vmem:[%s6112_s3 + $0x1c0] sm:$0xff]  }
0x1160   : > { %4870 = vmatprep.subr.bf16.mxu0 %v5191_v1 }
0x1161   : > { %v4844_v6 = vpop.f32.mrf.mxu1 }
0x1162   : > { %4855 = vmatmul.mubr.msk.bf16.vlgmr.msra.gmra.mxu0 %vm496_vm1, %v5318_v10 }
0x1163   : > { %4872 = vmatprep.mubr.msk.bf16.mxu0 %vm5192_vm0, %v5191_v1  ;;  %v2544_v7 = vpop.f32.mrf.mxu1 }
0x1165   : > { %v4845_v8 = vpop.f32.mrf.mxu1 }
0x116f   : > { %v2685_v36 = vpop.f32.mrf.mxu1 }
0x1170   : > { %v2686_v37 = vadd.f32 %v4252_v35, %v2685_v36 }
0x1171   : > { %v4868_v38 = vpop.f32.mrf.mxu1 }
0x1172   : > { %v2752_v39 = vpack.c.bf16 %v2686_v37, %v2686_v37 }
0x1173   : > { %v2688_v40 = vpop.f32.mrf.mxu1 }
0x1174   : > { %v2757_v41 = vsel %vm752_vm3, %v2752_v39, 0  ;;  %v4301_v40 = vld [vmem:[%s6113_s4 + $0x16] ss:$0 sm:$0xff] }
0x1175   : > { %v4869_v42 = vpop.f32.mrf.mxu1 }
0x1212   : > { %v2441_v9 = vpop.f32.mrf.mxu0 }
0x1213   : > { %v5791_v14 = vadd.f32 %v2441_v9, %v5699_v12  ;;  %v2542_v12 = vadd.f32 %v4238_v21, %v2541_v5 }
0x1214   : > { %v4832_v15 = vpop.f32.mrf.mxu0 }
0x1215   : > { %v2691_v24 = vpack.c.bf16 %v2542_v12, %v2542_v12 }
0x1216   : > { %v2444_v16 = vpop.f32.mrf.mxu0 }
0x1218   : > { %v4833_v17 = vpop.f32.mrf.mxu0 }
0x1222   : > { %v2613_v19 = vpop.f32.mrf.mxu0 }
0x1223   : > { %v2614_v20 = vadd.f32 %v4245_v18, %v2613_v19  ;;  %v4294_v19 = vld [vmem:[%s6113_s4 + $0xe] ss:$0 sm:$0xff] }
0x1224   : > { %v4856_v22 = vpop.f32.mrf.mxu0 }
0x1225   : > { %v2692_v61 = vpack.c.bf16 %v2614_v20, %v2614_v20  ;;  %v4287_v22 = vld [vmem:[%s6113_s4 + $0x6] ss:$0 sm:$0xff] }
0x1226   : > { %v2616_v13 = vpop.f32.mrf.mxu0 }
0x1227   : > { %v2697_v11 = vsel %vm686_vm2, %v2692_v61, 0 }
0x1228   : > { %v4857_v23 = vpop.f32.mrf.mxu0  ;;  %4871 = vmatpush3.bf16.xpose.msra.mxu0 %v2697_v11 }
0x1229   : > { %4876 = vmatprep.subr.bf16.mxu0 %v5191_v1 }
0x122f   : > { %4873 = vmatmul.mubr.msk.bf16.vlgmr.msra.gmra.mxu0 %vm686_vm2, %v2691_v24 }
0x1230   : > { %4878 = vmatprep.mubr.msk.bf16.mxu0 %vm5192_vm0, %v5191_v1  ;;  %4877 = vmatpush3.bf16.msra.mxu0 %v2757_v41 }
0x1231   : > { %4888 = vmatprep.subr.bf16.mxu0 %v5191_v1 }
0x12ef   : > { %v2733_v29 = vpop.f32.mrf.mxu0 }
0x12f0   : > { %v2739_v30 = vmul.f32 0.35355338, %v2733_v29 }
0x12f1   : > { %v4874_v31 = vpop.f32.mrf.mxu0 }
0x12f2   : > { %v2740_v32 = vsel %vm734_vm4, %v2739_v30, -inf }
0x12f3   : > { %2741 = vmax.xlane.f32.xlu0 %v2740_v32  ;;  %v2736_v33 = vpop.f32.mrf.mxu0 }
0x12f5   : > { %v4875_v34 = vpop.f32.mrf.mxu0 }
0x137c   : > { %v2742_v43 = vpop.xlane.xlu0 %2741 }
0x137d   : > { %v2743_v44 = vsub.f32 %v2739_v30, %v2742_v43 }
0x137f   : > { %v2744_v45 = vmul.f32 1.442695, %v2743_v44 }
0x1381   : > { %5166 = vpow2.f32 %v2744_v45 }
0x138e   : > { %v5167_v46 = vpop.eup %5166 }
0x138f   : > { %v2746_v47 = vsel %vm734_vm4, %v5167_v46, 0.0 }
0x1390   : > { %2747 = vadd.xlane.f32.xlu1 %v2746_v47 }
0x1419   : > { %v2748_v50 = vpop.xlane.xlu1 %2747 }
0x141a   : > { %5168 = vrcp.f32 %v2748_v50 }
0x1427   : > { %v5169_v51 = vpop.eup %5168 }
0x1428   : > { %v2750_v52 = vmul.f32 %v5169_v51, %v5167_v46 }
0x142a   : > { %v2751_v53 = vpack.c.bf16 %v2750_v52, %v2750_v52 }
0x142c   : > { %4879 = vmatmul.mubr.msk.bf16.vlgmr.msra.gmra.mxu0 %vm748_vm5, %v2751_v53 }
0x142d   : > { %4896 = vmatprep.mubr.msk.bf16.mxu0 %vm5192_vm0, %v5191_v1  ;;  %4889 = vmatpush3.bf16.msra.mxu0 %v5111_v54  ;;  %v5123_v54 = vld [vmem:[%s6112_s3 + $0xf8] sm:$0xff]  }
0x142e   : > { %4890 = vmatprep.subr.bf16.mxu0 %v5191_v1 }
0x1431   : > { %4891 = vmatpush3.bf16.msra.mxu0 %v5113_v55  ;;  %v5125_v55 = vld [vmem:[%s6112_s3 + $0xf0] sm:$0xff]  }
0x1432   : > { %4892 = vmatprep.subr.bf16.mxu0 %v5191_v1 }
0x1435   : > { %4893 = vmatpush3.bf16.msra.mxu0 %v5115_v56  ;;  %v5127_v56 = vld [vmem:[%s6112_s3 + $0xe8] sm:$0xff]  }
0x1436   : > { %4894 = vmatprep.subr.bf16.mxu0 %v5191_v1 }
0x1439   : > { %4895 = vmatpush3.bf16.msra.mxu0 %v5117_v57  ;;  %v5129_v57 = vld [vmem:[%s6112_s3 + $0xe0] sm:$0xff]  }
0x143a   : > { %4912 = vmatprep.subr.bf16.mxu0 %v5191_v1 }
0x143c   : > { %4897 = vmatmul.mubr.msk.bf16.vlgmr.msra.gmra.mxu0 %vm496_vm1, %v5318_v10 }
0x143d   : > { %4920 = vmatprep.mubr.msk.bf16.mxu0 %vm5192_vm0, %v5191_v1  ;;  %4913 = vmatpush3.bf16.msra.mxu0 %v5118_v25  ;;  %v5130_v25 = vld [vmem:[%s6112_s3 + $0x2f8] sm:$0xff]  }
0x143e   : > { %4914 = vmatprep.subr.bf16.mxu0 %v5191_v1 }
0x1441   : > { %4915 = vmatpush3.bf16.msra.mxu0 %v5119_v26  ;;  %v5131_v26 = vld [vmem:[%s6112_s3 + $0x2f0] sm:$0xff]  }
0x1442   : > { %4916 = vmatprep.subr.bf16.mxu0 %v5191_v1 }
0x1445   : > { %4917 = vmatpush3.bf16.msra.mxu0 %v5120_v27  ;;  %v5132_v27 = vld [vmem:[%s6112_s3 + $0x2e8] sm:$0xff]  }
0x1446   : > { %4918 = vmatprep.subr.bf16.mxu0 %v5191_v1 }
0x1449   : > { %4919 = vmatpush3.bf16.msra.mxu0 %v5121_v28  ;;  %v5133_v28 = vld [vmem:[%s6112_s3 + $0x2e0] sm:$0xff]  }
0x144a   : > { %4936 = vmatprep.subr.bf16.mxu0 %v5191_v1 }
0x144c   : > { %4921 = vmatmul.mubr.msk.bf16.vlgmr.msra.gmra.mxu0 %vm496_vm1, %v5318_v10 }
0x144d   : > { %4938 = vmatprep.mubr.msk.bf16.mxu0 %vm5192_vm0, %v5191_v1  ;;  %4937 = vmatpush3.bf16.msra.mxu0 %v3207_v49 }
0x144e   : > { %4954 = vmatprep.subr.bf16.mxu0 %v5191_v1 }
0x14ec   : > { %v2793_v58 = vpop.f32.mrf.mxu0 }
0x14ed   : > { %v2799_v60 = vpack.c.bf16 %v2793_v58, %v2793_v58 }
0x14ee   : > { %v4880_v62 = vpop.f32.mrf.mxu0 }
0x14ef   : > { %4885 = vmatmul.mubr.msk.bf16.vlgmr.msra.gmra.mxu1 %vm686_vm2, %v2799_v60 }
0x14f0   : > { %4901 = vmatpush3.bf16.msra.mxu1 %v5110_v59  ;;  %v2796_v63 = vpop.f32.mrf.mxu0  ;;  %4908 = vmatprep.mubr.msk.bf16.mxu1 %vm5192_vm0, %v5191_v1  ;;  %v5122_v59 = vld [vmem:[%s6112_s3 + $0x1f8] sm:$0xff]  }
0x14f1   : > { %4902 = vmatprep.subr.bf16.mxu1 %v5191_v1 }
0x14f2   : > { %v4881_v2 = vpop.f32.mrf.mxu0 }
0x14f4   : > { %4903 = vmatpush3.bf16.msra.mxu1 %v5112_v0  ;;  %v5124_v0 = vld [vmem:[%s6112_s3 + $0x1f0] sm:$0xff]  }
0x14f5   : > { %4904 = vmatprep.subr.bf16.mxu1 %v5191_v1 }
0x14f8   : > { %4905 = vmatpush3.bf16.msra.mxu1 %v5114_v3  ;;  %v5126_v3 = vld [vmem:[%s6112_s3 + $0x1e8] sm:$0xff]  }
0x14f9   : > { %4906 = vmatprep.subr.bf16.mxu1 %v5191_v1 }
0x14fc   : > { %4907 = vmatpush3.bf16.msra.mxu1 %v5116_v4  ;;  %v2942_v5 = vpop.f32.mrf.mxu0  ;;  %v5128_v4 = vld [vmem:[%s6112_s3 + $0x1e0] sm:$0xff]  }
0x14fd   : > { %4924 = vmatprep.subr.bf16.mxu1 %v5191_v1 }
0x14fe   : > { %v4898_v6 = vpop.f32.mrf.mxu0 }
0x14ff   : > { %4909 = vmatmul.mubr.msk.bf16.vlgmr.msra.gmra.mxu1 %vm496_vm1, %v5318_v10 }
0x1500   : > { %4926 = vmatprep.mubr.msk.bf16.mxu1 %vm5192_vm0, %v5191_v1  ;;  %v2945_v7 = vpop.f32.mrf.mxu0 }
0x1502   : > { %v4899_v8 = vpop.f32.mrf.mxu0 }
0x150c   : > { %v3086_v41 = vpop.f32.mrf.mxu0 }
0x150d   : > { %v3087_v42 = vadd.f32 %v4301_v40, %v3086_v41 }
0x150e   : > { %v4922_v43 = vpop.f32.mrf.mxu0 }
0x150f   : > { %v3153_v44 = vpack.c.bf16 %v3087_v42, %v3087_v42 }
0x1510   : > { %v3089_v45 = vpop.f32.mrf.mxu0 }
0x1511   : > { %v3158_v46 = vsel %vm752_vm3, %v3153_v44, 0 }
0x1512   : > { %v4923_v47 = vpop.f32.mrf.mxu0 }
0x1513   : > { %v4358_v47 = vld [vmem:[%s6114_s5 + $0x1c] sm:$0xf] }
0x1514   : > { %v3608_v48 = vsel %vm1155_vm6, %v4358_v47, 0 }
0x15af   : > { %v2842_v9 = vpop.f32.mrf.mxu1 }
0x15b0   : > { %v5883_v15 = vadd.f32 %v2842_v9, %v5791_v14  ;;  %v2943_v14 = vadd.f32 %v4287_v22, %v2942_v5 }
0x15b1   : > { %v4886_v16 = vpop.f32.mrf.mxu1 }
0x15b2   : > { %v3092_v24 = vpack.c.bf16 %v2943_v14, %v2943_v14 }
0x15b3   : > { %v2845_v17 = vpop.f32.mrf.mxu1 }
0x15b5   : > { %v4887_v18 = vpop.f32.mrf.mxu1 }
0x15bf   : > { %v3014_v20 = vpop.f32.mrf.mxu1 }
0x15c0   : > { %v3015_v21 = vadd.f32 %v4294_v19, %v3014_v20  ;;  %v4343_v20 = vld [vmem:[%s6113_s4 + $0xf] ss:$0 sm:$0xff] }
0x15c1   : > { %v4910_v61 = vpop.f32.mrf.mxu1 }
0x15c2   : > { %v3093_v13 = vpack.c.bf16 %v3015_v21, %v3015_v21 }
0x15c3   : > { %v3017_v11 = vpop.f32.mrf.mxu1 }
0x15c4   : > { %v3098_v12 = vsel %vm686_vm2, %v3093_v13, 0  ;;  %v4336_v13 = vld [vmem:[%s6113_s4 + $0x7] ss:$0 sm:$0xff] }
0x15c5   : > { %v4911_v23 = vpop.f32.mrf.mxu1  ;;  %4925 = vmatpush3.bf16.xpose.msra.mxu1 %v3098_v12 }
0x15c6   : > { %4930 = vmatprep.subr.bf16.mxu1 %v5191_v1 }
0x15cc   : > { %4927 = vmatmul.mubr.msk.bf16.vlgmr.msra.gmra.mxu1 %vm686_vm2, %v3092_v24 }
0x15cd   : > { %4932 = vmatprep.mubr.msk.bf16.mxu1 %vm5192_vm0, %v5191_v1  ;;  %4931 = vmatpush3.bf16.msra.mxu1 %v3158_v46 }
0x15ce   : > { %4942 = vmatprep.subr.bf16.mxu1 %v5191_v1 }
0x168c   : > { %v3134_v29 = vpop.f32.mrf.mxu1 }
0x168d   : > { %v3140_v30 = vmul.f32 0.35355338, %v3134_v29 }
0x168e   : > { %v4928_v31 = vpop.f32.mrf.mxu1 }
0x168f   : > { %v3141_v32 = vsel %vm734_vm4, %v3140_v30, -inf }
0x1690   : > { %3142 = vmax.xlane.f32.xlu0 %v3141_v32  ;;  %v3137_v33 = vpop.f32.mrf.mxu1 }
0x1692   : > { %v4929_v34 = vpop.f32.mrf.mxu1 }
0x1719   : > { %v3143_v35 = vpop.xlane.xlu0 %3142 }
0x171a   : > { %v3144_v36 = vsub.f32 %v3140_v30, %v3143_v35  ;;  %v4350_v35 = vld [vmem:[%s6113_s4 + $0x17] ss:$0 sm:$0xff] }
0x171c   : > { %v3145_v37 = vmul.f32 1.442695, %v3144_v36 }
0x171e   : > { %5170 = vpow2.f32 %v3145_v37 }
0x172b   : > { %v5171_v38 = vpop.eup %5170 }
0x172c   : > { %v3147_v39 = vsel %vm734_vm4, %v5171_v38, 0.0 }
0x172d   : > { %3148 = vadd.xlane.f32.xlu1 %v3147_v39 }
0x17b6   : > { %v3149_v50 = vpop.xlane.xlu1 %3148 }
0x17b7   : > { %5172 = vrcp.f32 %v3149_v50 }
0x17c4   : > { %v5173_v51 = vpop.eup %5172 }
0x17c5   : > { %v3151_v52 = vmul.f32 %v5173_v51, %v5171_v38 }
0x17c7   : > { %v3152_v53 = vpack.c.bf16 %v3151_v52, %v3151_v52 }
0x17c9   : > { %4933 = vmatmul.mubr.msk.bf16.vlgmr.msra.gmra.mxu1 %vm748_vm5, %v3152_v53 }
0x17ca   : > { %4950 = vmatprep.mubr.msk.bf16.mxu1 %vm5192_vm0, %v5191_v1  ;;  %4943 = vmatpush3.bf16.msra.mxu1 %v5123_v54 }
0x17cb   : > { %4944 = vmatprep.subr.bf16.mxu1 %v5191_v1 }
0x17ce   : > { %4945 = vmatpush3.bf16.msra.mxu1 %v5125_v55 }
0x17cf   : > { %4946 = vmatprep.subr.bf16.mxu1 %v5191_v1 }
0x17d2   : > { %4947 = vmatpush3.bf16.msra.mxu1 %v5127_v56 }
0x17d3   : > { %4948 = vmatprep.subr.bf16.mxu1 %v5191_v1 }
0x17d6   : > { %4949 = vmatpush3.bf16.msra.mxu1 %v5129_v57 }
0x17d7   : > { %4966 = vmatprep.subr.bf16.mxu1 %v5191_v1 }
0x17d9   : > { %4951 = vmatmul.mubr.msk.bf16.vlgmr.msra.gmra.mxu1 %vm496_vm1, %v5318_v10 }
0x17da   : > { %4974 = vmatprep.mubr.msk.bf16.mxu1 %vm5192_vm0, %v5191_v1  ;;  %4967 = vmatpush3.bf16.msra.mxu1 %v5130_v25  ;;  %v4361_v25 = vld [vmem:[%s6110_s1] ss:$0 sm:$0xff] }
0x17db   : > { %4968 = vmatprep.subr.bf16.mxu1 %v5191_v1 }
0x17de   : > { %4969 = vmatpush3.bf16.msra.mxu1 %v5131_v26 }
0x17df   : > { %4970 = vmatprep.subr.bf16.mxu1 %v5191_v1 }
0x17e2   : > { %4971 = vmatpush3.bf16.msra.mxu1 %v5132_v27  ;;  %v4362_v27 = vld [vmem:[%s6111_s2] ss:$0 sm:$0xff] }
0x17e3   : > { %4972 = vmatprep.subr.bf16.mxu1 %v5191_v1 }
0x17e6   : > { %4973 = vmatpush3.bf16.msra.mxu1 %v5133_v28 }
0x17e7   : > { %4990 = vmatprep.subr.bf16.mxu1 %v5191_v1 }
0x17e9   : > { %4975 = vmatmul.mubr.msk.bf16.vlgmr.msra.gmra.mxu1 %vm496_vm1, %v5318_v10 }
0x17ea   : > { %4992 = vmatprep.mubr.msk.bf16.mxu1 %vm5192_vm0, %v5191_v1  ;;  %4991 = vmatpush3.bf16.msra.mxu1 %v3608_v48 }
0x17eb   : > { %5008 = vmatprep.subr.bf16.mxu1 %v5191_v1 }
0x1889   : > { %v3194_v58 = vpop.f32.mrf.mxu1 }
0x188a   : > { %v3200_v60 = vpack.c.bf16 %v3194_v58, %v3194_v58 }
0x188b   : > { %v4934_v62 = vpop.f32.mrf.mxu1 }
0x188c   : > { %4939 = vmatmul.mubr.msk.bf16.vlgmr.msra.gmra.mxu0 %vm686_vm2, %v3200_v60 }
0x188d   : > { %4955 = vmatpush3.bf16.msra.mxu0 %v5122_v59  ;;  %v3197_v63 = vpop.f32.mrf.mxu1  ;;  %4962 = vmatprep.mubr.msk.bf16.mxu0 %vm5192_vm0, %v5191_v1  ;;  %v4360_v59 = vld [vmem:[%s6115_s6] ss:$0 sm:$0xff] }
0x188e   : > { %4956 = vmatprep.subr.bf16.mxu0 %v5191_v1 }
0x188f   : > { %v4935_v2 = vpop.f32.mrf.mxu1 }
0x1890   : > { %v5182_v2 = vld [vmem:[%s5306_s27] sm:$0x3] }
0x1891   : > { %4957 = vmatpush3.bf16.msra.mxu0 %v5124_v0 }
0x1892   : > { %4958 = vmatprep.subr.bf16.mxu0 %v5191_v1 }
0x1895   : > { %4959 = vmatpush3.bf16.msra.mxu0 %v5126_v3 }
0x1896   : > { %4960 = vmatprep.subr.bf16.mxu0 %v5191_v1 }
0x1899   : > { %4961 = vmatpush3.bf16.msra.mxu0 %v5128_v4  ;;  %v3343_v5 = vpop.f32.mrf.mxu1 }
0x189a   : > { %4978 = vmatprep.subr.bf16.mxu0 %v5191_v1 }
0x189b   : > { %v4952_v6 = vpop.f32.mrf.mxu1 }
0x189c   : > { %4963 = vmatmul.mubr.msk.bf16.vlgmr.msra.gmra.mxu0 %vm496_vm1, %v5318_v10 }
0x189d   : > { %4980 = vmatprep.mubr.msk.bf16.mxu0 %vm5192_vm0, %v5191_v1  ;;  %v3346_v7 = vpop.f32.mrf.mxu1 }
0x189f   : > { %v4953_v8 = vpop.f32.mrf.mxu1 }
0x18a9   : > { %v3487_v36 = vpop.f32.mrf.mxu1 }
0x18aa   : > { %v3488_v37 = vadd.f32 %v4350_v35, %v3487_v36 }
0x18ab   : > { %v4976_v38 = vpop.f32.mrf.mxu1 }
0x18ac   : > { %v3554_v39 = vpack.c.bf16 %v3488_v37, %v3488_v37 }
0x18ad   : > { %v3490_v10 = vpop.f32.mrf.mxu1 }
0x18ae   : > { %v3559_v40 = vsel %vm752_vm3, %v3554_v39, 0 }
0x18af   : > { %v4977_v41 = vpop.f32.mrf.mxu1 }
0x194c   : > { %v3243_v9 = vpop.f32.mrf.mxu0 }
0x194d   : > { %v5975_v16 = vadd.f32 %v3243_v9, %v5883_v15  ;;  %v3344_v15 = vadd.f32 %v4336_v13, %v3343_v5  ;;  %v5141_v13 = vld [vmem:[%s6120_s11 + $0x20] sm:$0xff]  }
0x194e   : > { %v4940_v17 = vpop.f32.mrf.mxu0 }
0x194f   : > { %v3493_v24 = vpack.c.bf16 %v3344_v15, %v3344_v15 }
0x1950   : > { %v3246_v18 = vpop.f32.mrf.mxu0 }
0x1951   : > { %v5135_v18 = vld [vmem:[%s6118_s9 + $0x10] sm:$0xff]  }
0x1952   : > { %v4941_v19 = vpop.f32.mrf.mxu0 }
0x1953   : > { %v5136_v19 = vld [vmem:[%s6118_s9 + $0x8] sm:$0xff]  }
0x195c   : > { %v3415_v21 = vpop.f32.mrf.mxu0 }
0x195d   : > { %v3416_v22 = vadd.f32 %v4343_v20, %v3415_v21  ;;  %v5137_v20 = vld [vmem:[%s6118_s9] sm:$0xff]   ;;  %v5138_v21 = vld [vmem:[%s6120_s11 + $0x38] sm:$0xff]  }
0x195e   : > { %v4964_v61 = vpop.f32.mrf.mxu0 }
0x195f   : > { %v3494_v11 = vpack.c.bf16 %v3416_v22, %v3416_v22  ;;  %v5139_v22 = vld [vmem:[%s6120_s11 + $0x30] sm:$0xff]   ;;  %v5140_v61 = vld [vmem:[%s6120_s11 + $0x28] sm:$0xff]  }
0x1960   : > { %v3418_v12 = vpop.f32.mrf.mxu0 }
0x1961   : > { %v3499_v14 = vsel %vm686_vm2, %v3494_v11, 0  ;;  %v5142_v11 = vld [vmem:[%s6120_s11 + $0x18] sm:$0xff]   ;;  %v5143_v12 = vld [vmem:[%s6120_s11 + $0x10] sm:$0xff]  }
0x1962   : > { %v4965_v23 = vpop.f32.mrf.mxu0  ;;  %4979 = vmatpush3.bf16.xpose.msra.mxu0 %v3499_v14 }
0x1963   : > { %4984 = vmatprep.subr.bf16.mxu0 %v5191_v1 }
0x1969   : > { %4981 = vmatmul.mubr.msk.bf16.vlgmr.msra.gmra.mxu0 %vm686_vm2, %v3493_v24 }
0x196a   : > { %4986 = vmatprep.mubr.msk.bf16.mxu0 %vm5192_vm0, %v5191_v1  ;;  %4985 = vmatpush3.bf16.msra.mxu0 %v3559_v40 }
0x196b   : > { %4996 = vmatprep.subr.bf16.mxu0 %v5191_v1 }
0x1a29   : > { %v3535_v29 = vpop.f32.mrf.mxu0 }
0x1a2a   : > { %v3541_v30 = vmul.f32 0.35355338, %v3535_v29 }
0x1a2b   : > { %v4982_v31 = vpop.f32.mrf.mxu0 }
0x1a2c   : > { %v3542_v32 = vsel %vm734_vm4, %v3541_v30, -inf  ;;  %v5144_v31 = vld [vmem:[%s6120_s11 + $0x8] sm:$0xff]  }
0x1a2d   : > { %3543 = vmax.xlane.f32.xlu0 %v3542_v32  ;;  %v3538_v33 = vpop.f32.mrf.mxu0  ;;  %v5145_v32 = vld [vmem:[%s6120_s11] sm:$0xff]  }
0x1a2e   : > { %v4363_v33 = vld [vmem:[%s6119_s10] ss:$0 sm:$0xff] }
0x1a2f   : > { %v4983_v34 = vpop.f32.mrf.mxu0 }
0x1ab6   : > { %v3544_v42 = vpop.xlane.xlu0 %3543 }
0x1ab7   : > { %v3545_v43 = vsub.f32 %v3541_v30, %v3544_v42 }
0x1ab9   : > { %v3546_v44 = vmul.f32 1.442695, %v3545_v43 }
0x1abb   : > { %5174 = vpow2.f32 %v3546_v44 }
0x1ac8   : > { %v5175_v45 = vpop.eup %5174 }
0x1ac9   : > { %v3548_v46 = vsel %vm734_vm4, %v5175_v45, 0.0 }
0x1aca   : > { %3549 = vadd.xlane.f32.xlu1 %v3548_v46 }
0x1b53   : > { %v3550_v49 = vpop.xlane.xlu1 %3549 }
0x1b54   : > { %5176 = vrcp.f32 %v3550_v49 }
0x1b61   : > { %v5177_v50 = vpop.eup %5176 }
0x1b62   : > { %v3552_v51 = vmul.f32 %v5177_v50, %v5175_v45 }
0x1b64   : > { %v3553_v52 = vpack.c.bf16 %v3552_v51, %v3552_v51 }
0x1b66   : > { %4987 = vmatmul.mubr.msk.bf16.vlgmr.msra.gmra.mxu0 %vm748_vm5, %v3553_v52 }
0x1b67   : > { %5004 = vmatprep.mubr.msk.bf16.mxu0 %vm5192_vm0, %v5191_v1 }
0x1c26   : > { %v3595_v53 = vpop.f32.mrf.mxu0 }
0x1c27   : > { %v3601_v54 = vpack.c.bf16 %v3595_v53, %v3595_v53 }
0x1c28   : > { %v4988_v55 = vpop.f32.mrf.mxu0 }
0x1c29   : > { %4993 = vmatmul.mubr.msk.bf16.vlgmr.msra.gmra.mxu1 %vm686_vm2, %v3601_v54 }
0x1c2a   : > { %v3598_v56 = vpop.f32.mrf.mxu0  ;;  %5024 = vmatprep.mubr.msk.bf16.mxu1 %vm5192_vm0, %v5191_v1  ;;  %5009 = vmatpush3.bf16.msra.mxu1 %v5138_v21 }
0x1c2b   : > { %5010 = vmatprep.subr.bf16.mxu1 %v5191_v1  ;;  %v4378_v56 = vld [vmem:[%s6116_s7] ss:$0 sm:$0xff] }
0x1c2c   : > { %v4989_v57 = vpop.f32.mrf.mxu0 }
0x1c2e   : > { %5011 = vmatpush3.bf16.msra.mxu1 %v5139_v22 }
0x1c2f   : > { %5012 = vmatprep.subr.bf16.mxu1 %v5191_v1 }
0x1c32   : > { %5013 = vmatpush3.bf16.msra.mxu1 %v5140_v61 }
0x1c33   : > { %5014 = vmatprep.subr.bf16.mxu1 %v5191_v1 }
0x1c36   : > { %5015 = vmatpush3.bf16.msra.mxu1 %v5141_v13 }
0x1c37   : > { %5016 = vmatprep.subr.bf16.mxu1 %v5191_v1 }
0x1c3a   : > { %5017 = vmatpush3.bf16.msra.mxu1 %v5142_v11 }
0x1c3b   : > { %5018 = vmatprep.subr.bf16.mxu1 %v5191_v1 }
0x1c3e   : > { %5019 = vmatpush3.bf16.msra.mxu1 %v5143_v12 }
0x1c3f   : > { %5020 = vmatprep.subr.bf16.mxu1 %v5191_v1 }
0x1c42   : > { %5021 = vmatpush3.bf16.msra.mxu1 %v5144_v31 }
0x1c43   : > { %5022 = vmatprep.subr.bf16.mxu1 %v5191_v1 }
0x1c46   : > { %5023 = vmatpush3.bf16.msra.mxu1 %v5145_v32 }
0x1ce9   : > { %v3644_v58 = vpop.f32.mrf.mxu1 }
0x1cea   : > { %v3650_v60 = vadd.f32 %v3644_v58, %v5975_v16  ;;  %v5134_v16 = vld [vmem:[%s6118_s9 + $0x18] sm:$0xff]   ;;  %v4379_v58 = vld [vmem:[%s6117_s8] ss:$0 sm:$0xff] }
0x1ceb   : > { %v4994_v62 = vpop.f32.mrf.mxu1  ;;  %4997 = vmatpush3.bf16.msra.mxu0 %v5134_v16 }
0x1cec   : > { %v3658_v63 = vadd.f32 %v4360_v59, %v3650_v60  ;;  %4998 = vmatprep.subr.bf16.mxu0 %v5191_v1 }
0x1ced   : > { %v3647_v0 = vpop.f32.mrf.mxu1 }
0x1cee   : > { %v3659_v3 = vadd.f32 %v5182_v2, %v3658_v63 }
0x1cef   : > { %v4995_v4 = vpop.f32.mrf.mxu1  ;;  %4999 = vmatpush3.bf16.msra.mxu0 %v5135_v18 }
0x1cf0   : > { %v3663_v5 = vsel %vm3662_vm7, %v3659_v3, 0.0  ;;  %5000 = vmatprep.subr.bf16.mxu0 %v5191_v1 }
0x1cf1   : > { %3664 = vadd.xlane.f32.xlu0 %v3663_v5 }
0x1cf3   : > { %5001 = vmatpush3.bf16.msra.mxu0 %v5136_v19 }
0x1cf4   : > { %5002 = vmatprep.subr.bf16.mxu0 %v5191_v1  ;;  %v4369_v1 = vld [vmem:[%s6121_s12] ss:$0 sm:$0xff] }
0x1cf7   : > { %5003 = vmatpush3.bf16.msra.mxu0 %v5137_v20 }
0x1d7a   : > { %v3665_v6 = vpop.xlane.xlu0 %3664 }
0x1d7b   : > { %v3667_v7 = vmul.f32 0.015625, %v3665_v6 }
0x1d7d   : > { %v3668_v8 = vsub.f32 %v3659_v3, %v3667_v7 }
0x1d7f   : > { %v3669_v9 = vmul.f32 %v3668_v8, %v3668_v8 }
0x1d81   : > { %v3670_v17 = vsel %vm3662_vm7, %v3669_v9, 0.0 }
0x1d82   : > { %3671 = vadd.xlane.f32.xlu1 %v3670_v17 }
0x1e0b   : > { %v3672_v14 = vpop.xlane.xlu1 %3671 }
0x1e0c   : > { %v3673_v15 = vmul.f32 0.015625, %v3672_v14 }
0x1e0e   : > { %v3674_v23 = vadd.f32 1e-05, %v3673_v15 }
0x1e10   : > { %5178 = vrsqrt.f32 %v3674_v23 }
0x1e1d   : > { %v5179_v24 = vpop.eup %5178 }
0x1e1e   : > { %v3676_v26 = vmul.f32 %v5179_v24, %v3668_v8 }
0x1e20   : > { %v3683_v28 = vmul.f32 %v4361_v25, %v3676_v26 }
0x1e22   : > { %v3690_v29 = vadd.f32 %v4362_v27, %v3683_v28 }
0x1e24   : > { %v3691_v30 = vpack.c.bf16 %v3690_v29, %v3690_v29 }
0x1e26   : > { %5005 = vmatmul.mubr.msk.bf16.vlgmr.msra.gmra.mxu0 %vm496_vm1, %v3691_v30 }
0x1ee6   : > { %v3768_v34 = vpop.f32.mrf.mxu0 }
0x1ee7   : > { %v3769_v35 = vadd.f32 %v4363_v33, %v3768_v34 }
0x1ee8   : > { %v5006_v36 = vpop.f32.mrf.mxu0 }
0x1ee9   : > { %v3774_v37 = vmax.f32 %v3769_v35, 0.0 }
0x1eea   : > { %v3771_v38 = vpop.f32.mrf.mxu0 }
0x1eeb   : > { %v3775_v39 = vpack.c.bf16 %v3774_v37, %v3774_v37 }
0x1eec   : > { %v5007_v10 = vpop.f32.mrf.mxu0 }
0x1eed   : > { %5025 = vmatmul.mubr.bf16.vlgmr.msra.gmra.mxu1 %v3775_v39 }
0x1fad   : > { %v3881_v40 = vpop.f32.mrf.mxu1 }
0x1fae   : > { %v3882_v41 = vadd.f32 %v4369_v1, %v3881_v40 }
0x1faf   : > { %v5026_v42 = vpop.f32.mrf.mxu1 }
0x1fb0   : > { %v3887_v43 = vadd.f32 %v3882_v41, %v3690_v29 }
0x1fb1   : > { %v3884_v44 = vpop.f32.mrf.mxu1 }
0x1fb2   : > { %v3890_v45 = vsel %vm3662_vm7, %v3887_v43, 0.0 }
0x1fb3   : > { %3891 = vadd.xlane.f32.xlu0 %v3890_v45  ;;  %v5027_v46 = vpop.f32.mrf.mxu1 }
0x203c   : > { %v3892_v47 = vpop.xlane.xlu0 %3891 }
0x203d   : > { %v3893_v48 = vmul.f32 0.015625, %v3892_v47 }
0x203f   : > { %v3894_v49 = vsub.f32 %v3887_v43, %v3893_v48 }
0x2041   : > { %v3895_v50 = vmul.f32 %v3894_v49, %v3894_v49 }
0x2043   : > { %v3896_v51 = vsel %vm3662_vm7, %v3895_v50, 0.0 }
0x2044   : > { %3897 = vadd.xlane.f32.xlu1 %v3896_v51 }
0x20cd   : > { %v3898_v52 = vpop.xlane.xlu1 %3897 }
0x20ce   : > { %v3899_v53 = vmul.f32 0.015625, %v3898_v52 }
0x20d0   : > { %v3900_v54 = vadd.f32 1e-05, %v3899_v53 }
0x20d2   : > { %5180 = vrsqrt.f32 %v3900_v54 }
0x20df   : > { %v5181_v55 = vpop.eup %5180 }
0x20e0   : > { %v3902_v57 = vmul.f32 %v5181_v55, %v3894_v49 }
0x20e2   : > { %v3909_v59 = vmul.f32 %v4378_v56, %v3902_v57 }
0x20e4   : > { %v3916_v60 = vadd.f32 %v4379_v58, %v3909_v59 }
0x20e6   : > { %3917 = vst.msk [vmem:[%s435_s19] sm:$0x3] %vm3662_vm7, %v3916_v60 }
0x20e7 PF: > { %s23_s25 = sadd.s32 1, %s5189_s25  }
0x20e8   : > { %p20_p4 = scmp.ge.s32.totalorder %s23_s25, 7  }
0x20ea   :  { %22 = sbr.rel (!%p20_p4) target bundleno = 1 (0x1), region = 155 }

// kernel: multimodal_forward.10
= control target key start
LH: loop header
LB: loop body
LE: loop exit
PB: predicated region body
PF: predicated region fallthrough
CT: control target
= control target key end

     0   :  { %s5694_s29 = smov 0   ;;  %s6645_s0 = inlined_call_operand.vmem [shape: f32[2,16,64], index: 0, kind: input, shape index: {}]   ;;  %s6646_s1 = inlined_call_operand.vmem [shape: f32[1,64], index: 1, kind: input, shape index: {}]   ;;  %s6647_s2 = inlined_call_operand.vmem [shape: f32[1,64], index: 2, kind: input, shape index: {}]   ;;  %s6648_s3 = inlined_call_operand.vmem [shape: bf16[3,8,64,8], index: 3, kind: input, shape index: {}]   ;;  %s6649_s4 = inlined_call_operand.vmem [shape: f32[3,8,1,8], index: 4, kind: input, shape index: {}]   ;;  %s6650_s5 = inlined_call_operand.vmem [shape: bf16[8,8,64], index: 5, kind: input, shape index: {}]   ;;  %s6651_s6 = inlined_call_operand.vmem [shape: f32[1,64], index: 6, kind: input, shape index: {}]   ;;  %s6652_s7 = inlined_call_operand.vmem [shape: f32[1,64], index: 7, kind: input, shape index: {}]   ;;  %s6653_s8 = inlined_call_operand.vmem [shape: f32[1,64], index: 8, kind: input, shape index: {}]   ;;  %s6654_s9 = inlined_call_operand.vmem [shape: bf16[64,256], index: 9, kind: input, shape index: {}]   ;;  %s6655_s10 = inlined_call_operand.vmem [shape: f32[1,256], index: 10, kind: input, shape index: {}]   ;;  %s6656_s11 = inlined_call_operand.vmem [shape: bf16[256,64], index: 11, kind: input, shape index: {}]   ;;  %s6657_s12 = inlined_call_operand.vmem [shape: f32[1,64], index: 12, kind: input, shape index: {}]   ;;  %s6658_s13 = inlined_call_operand.vmem [shape: f32[2,16,16], index: 13, kind: input, shape index: {}]   ;;  %s6659_s14 = inlined_call_operand.vmem [shape: f32[2,16,64], index: 14, kind: output, shape index: {}]  }
   0x1 LB: > { %s4338_s30 = sadd.s32 4294967295, %s5614_s29   ;;  %p4342_p0 = scmp.ge.s32.totalorder %s5614_s29, 1  ;;  %s5614_s29 = sphi %s5694_s29, %s24_s29  }
   0x2   : > { %p422_p1 = scmp.lt.s32.totalorder %s5614_s29, 3 }
   0x4   : > { %p423_p2 = pnand %p4342_p0, %p422_p1 }
   0x5   : > { %p473_p3 = scmp.lt.s32.totalorder (!%p423_p2), %s4338_s30, 1 }
   0x6   : > { %426 = sbr.rel (%p423_p2) target bundleno = 8571 (0x217b), region = 76 }
   0xb   : > { %vm493_vm0 = vcmask 523264   ;;  %s6661_s30 = smov (!%p473_p3, %s4338_s30), 1  ;;  %v5400_v14 = vld [vmem:[%s6648_s3 + $0x18] sm:$0xff]   ;;  %v5616_v15 = vmov 0.0   ;;  %v5402_v17 = vld [vmem:[%s6648_s3 + $0x10] sm:$0xff]   ;;  %v5404_v19 = vld [vmem:[%s6648_s3 + $0x8] sm:$0xff]  }
   0xc   : > { %s5702_s15 = sshll.u32 %s6661_s30, 4  ;;  %4957 = vmatprep.subr.bf16.mxu0 %v5616_v15  ;;  %4969 = vmatprep.subr.bf16.mxu1 %v5616_v15  ;;  %v5401_v16 = vld [vmem:[%s6648_s3 + $0x118] sm:$0xff]   ;;  %v5403_v18 = vld [vmem:[%s6648_s3 + $0x110] sm:$0xff]   ;;  %v5405_v20 = vld [vmem:[%s6648_s3 + $0x108] sm:$0xff]   ;;  %vm5617_vm1 = vmmov 0   ;;  %vm789_vm2 = vcmask 64512  }
   0xd   : > { %s5708_s18 = scalar_lea.vmem %s6645_s0, %s5702_s15  ;;  %4958 = vmatpush3.bf16.msra.mxu0 %v5400_v14  ;;  %4970 = vmatpush3.bf16.msra.mxu1 %v5401_v16  ;;  %v5406_v21 = vld [vmem:[%s6648_s3] sm:$0xff]   ;;  %v5408_v39 = vld [vmem:[%s6648_s3 + $0x218] sm:$0xff]   ;;  %v5409_v41 = vld [vmem:[%s6648_s3 + $0x210] sm:$0xff]   ;;  %s5849_s19 = scalar_lea.vmem %s6658_s13, %s5702_s15  ;;  %vm841_vm3 = vcmask 130048   ;;  %vm1285_vm4 = vcmask 1043456  }
   0xe   : > { %v489_v0 = vld [vmem:[%s5708_s18] sm:$0xff]  ;;  %v490_v2 = vld [vmem:[%s5708_s18 + $0x8] sm:$0xff]  ;;  %4959 = vmatprep.subr.bf16.mxu0 %v5616_v15  ;;  %4971 = vmatprep.subr.bf16.mxu1 %v5616_v15  ;;  %v5412_v60 = vld [vmem:[%s6648_s3 + $0x38] sm:$0xff]   ;;  %s487_s23 = scalar_lea.vmem %s6659_s14, %s5702_s15 }
   0xf   : > { %v494_v1 = vsel %vm493_vm0, %v489_v0, 0.0  ;;  %v497_v3 = vsel %vm493_vm0, %v490_v2, 0.0  ;;  %v5407_v22 = vld [vmem:[%s6648_s3 + $0x100] sm:$0xff]   ;;  %4965 = vmatprep.mubr.msk.bf16.mxu0 %vm5617_vm1, %v5616_v15  ;;  %4977 = vmatprep.mubr.msk.bf16.mxu1 %vm5617_vm1, %v5616_v15  ;;  %v5410_v42 = vld [vmem:[%s6648_s3 + $0x208] sm:$0xff]   ;;  %v4381_v63 = vld [vmem:[%s6649_s4 + $0x10] ss:$0 sm:$0xff] }
  0x10   : > { %495 = vadd.xlane.f32.xlu0 %v494_v1  ;;  %v4349_v31 = vld [vmem:[%s6646_s1] ss:$0 sm:$0xff]  ;;  %v4374_v46 = vld [vmem:[%s6649_s4 + $0x8] ss:$0 sm:$0xff]  ;;  %v5413_v1 = vld [vmem:[%s6648_s3 + $0x30] sm:$0xff]  }
  0x11   : > { %4960 = vmatpush3.bf16.msra.mxu0 %v5402_v17  ;;  %4972 = vmatpush3.bf16.msra.mxu1 %v5403_v18  ;;  %v4350_v35 = vld [vmem:[%s6647_s2] ss:$0 sm:$0xff] }
  0x12   : > { %4961 = vmatprep.subr.bf16.mxu0 %v5616_v15  ;;  %4973 = vmatprep.subr.bf16.mxu1 %v5616_v15  ;;  %v5411_v43 = vld [vmem:[%s6648_s3 + $0x200] sm:$0xff]  }
  0x13   : > { %v4367_v57 = vld [vmem:[%s6649_s4] ss:$0 sm:$0xff] }
  0x14   : > { %498 = vadd.xlane.f32.xlu0 %v497_v3 }
  0x15   : > { %4962 = vmatpush3.bf16.msra.mxu0 %v5404_v19  ;;  %4974 = vmatpush3.bf16.msra.mxu1 %v5405_v20  ;;  %v5856_v19 = vld [vmem:[%s5849_s19 + $0x8] sm:$0xff] }
  0x16   : > { %4963 = vmatprep.subr.bf16.mxu0 %v5616_v15  ;;  %4975 = vmatprep.subr.bf16.mxu1 %v5616_v15 }
  0x19   : > { %4964 = vmatpush3.bf16.msra.mxu0 %v5406_v21  ;;  %4976 = vmatpush3.bf16.msra.mxu1 %v5407_v22 }
  0x1a   : > { %4981 = vmatprep.subr.bf16.mxu0 %v5616_v15  ;;  %4999 = vmatprep.subr.bf16.mxu1 %v5616_v15 }
  0x99   : > { %v496_v4 = vpop.xlane.xlu0 %495 }
  0x9a   : > { %v501_v5 = vmul.f32 0.015625, %v496_v4 }
  0x9c   : > { %v503_v6 = vsub.f32 %v489_v0, %v501_v5 }
  0x9d   : > { %v499_v7 = vpop.xlane.xlu0 %498 }
  0x9e   : > { %v502_v8 = vmul.f32 0.015625, %v499_v7  ;;  %v505_v9 = vmul.f32 %v503_v6, %v503_v6 }
  0xa0   : > { %v504_v10 = vsub.f32 %v490_v2, %v502_v8  ;;  %v507_v11 = vsel %vm493_vm0, %v505_v9, 0.0  ;;  %v5415_v8 = vld [vmem:[%s6648_s3 + $0x20] sm:$0xff]   ;;  %v5416_v9 = vld [vmem:[%s6648_s3 + $0x238] sm:$0xff]  }
  0xa1   : > { %508 = vadd.xlane.f32.xlu1 %v507_v11  ;;  %v5418_v11 = vld [vmem:[%s6648_s3 + $0x228] sm:$0xff]  }
  0xa2   : > { %v506_v12 = vmul.f32 %v504_v10, %v504_v10 }
  0xa4   : > { %v510_v13 = vsel %vm493_vm0, %v506_v12, 0.0  ;;  %v5419_v12 = vld [vmem:[%s6648_s3 + $0x220] sm:$0xff]  }
  0xa5   : > { %511 = vadd.xlane.f32.xlu1 %v510_v13  ;;  %v5852_v13 = vld [vmem:[%s5849_s19] sm:$0xff] }
 0x12a   : > { %v509_v23 = vpop.xlane.xlu1 %508 }
 0x12b   : > { %v513_v24 = vmul.f32 0.015625, %v509_v23 }
 0x12d   : > { %v515_v25 = vadd.f32 1e-05, %v513_v24 }
 0x12e   : > { %v512_v26 = vpop.xlane.xlu1 %511 }
 0x12f   : > { %5524 = vrsqrt.f32 %v515_v25  ;;  %v514_v27 = vmul.f32 0.015625, %v512_v26 }
 0x131   : > { %v516_v28 = vadd.f32 1e-05, %v514_v27  ;;  %v4414_v27 = vld [vmem:[%s6649_s4 + $0x1] ss:$0 sm:$0xff] }
 0x133   : > { %5526 = vrsqrt.f32 %v516_v28 }
 0x13c   : > { %v5525_v29 = vpop.eup %5524 }
 0x13d   : > { %v519_v30 = vmul.f32 %v5525_v29, %v503_v6  ;;  %v5414_v6 = vld [vmem:[%s6648_s3 + $0x28] sm:$0xff]  }
 0x13f   : > { %v527_v33 = vmul.f32 %v4349_v31, %v519_v30 }
 0x140   : > { %v5527_v32 = vpop.eup %5526 }
 0x141   : > { %v520_v34 = vmul.f32 %v5527_v32, %v504_v10  ;;  %v535_v37 = vadd.f32 %v4350_v35, %v527_v33  ;;  %v5417_v10 = vld [vmem:[%s6648_s3 + $0x230] sm:$0xff]  }
 0x143   : > { %v528_v36 = vmul.f32 %v4349_v31, %v520_v34 }
 0x145   : > { %v536_v38 = vadd.f32 %v4350_v35, %v528_v36  ;;  %v4428_v35 = vld [vmem:[%s6649_s4 + $0x11] ss:$0 sm:$0xff] }
 0x147   : > { %v5763_v40 = vpack.c.bf16 %v536_v38, %v535_v37 }
 0x149   : > { %4966 = vmatmul.mubr.msk.bf16.vlgmr.msra.gmra.mxu0 %vm493_vm0, %v5763_v40  ;;  %4978 = vmatmul.mubr.msk.bf16.vlgmr.msra.gmra.mxu1 %vm493_vm0, %v5763_v40 }
 0x14a   : > { %4982 = vmatpush3.bf16.msra.mxu0 %v5408_v39  ;;  %4989 = vmatprep.mubr.msk.bf16.mxu0 %vm5617_vm1, %v5616_v15 }
 0x14b   : > { %4983 = vmatprep.subr.bf16.mxu0 %v5616_v15  ;;  %5001 = vmatprep.mubr.msk.bf16.mxu1 %vm5617_vm1, %v5616_v15 }
 0x14e   : > { %4984 = vmatpush3.bf16.msra.mxu0 %v5409_v41 }
 0x14f   : > { %4985 = vmatprep.subr.bf16.mxu0 %v5616_v15 }
 0x152   : > { %4986 = vmatpush3.bf16.msra.mxu0 %v5410_v42 }
 0x153   : > { %4987 = vmatprep.subr.bf16.mxu0 %v5616_v15 }
 0x156   : > { %4988 = vmatpush3.bf16.msra.mxu0 %v5411_v43 }
 0x157   : > { %4993 = vmatprep.subr.bf16.mxu0 %v5616_v15 }
 0x159   : > { %4990 = vmatmul.mubr.msk.bf16.vlgmr.msra.gmra.mxu0 %vm493_vm0, %v5763_v40 }
 0x15a   : > { %4995 = vmatprep.mubr.msk.bf16.mxu0 %vm5617_vm1, %v5616_v15 }
 0x209   : > { %v634_v44 = vpop.f32.mrf.mxu0  ;;  %v707_v45 = vpop.f32.mrf.mxu1 }
 0x20a   : > { %v708_v51 = vadd.f32 %v4374_v46, %v707_v45  ;;  %v635_v59 = vadd.f32 %v4367_v57, %v634_v44 }
 0x20b   : > { %v4967_v47 = vpop.f32.mrf.mxu0  ;;  %v4979_v48 = vpop.f32.mrf.mxu1 }
 0x20d   : > { %v637_v49 = vpop.f32.mrf.mxu0  ;;  %v710_v50 = vpop.f32.mrf.mxu1 }
 0x20e   : > { %v711_v52 = vadd.f32 %v4374_v46, %v710_v50  ;;  %v638_v58 = vadd.f32 %v4367_v57, %v637_v49 }
 0x20f   : > { %v4968_v53 = vpop.f32.mrf.mxu0  ;;  %v4980_v54 = vpop.f32.mrf.mxu1 }
 0x210   : > { %v788_v55 = vpack.c.bf16 %v711_v52, %v708_v51  ;;  %v787_v61 = vpack.c.bf16 %v638_v58, %v635_v59  ;;  %v5420_v59 = vld [vmem:[%s6648_s3 + $0x138] sm:$0xff]  }
 0x212   : > { %v794_v56 = vsel %vm789_vm2, %v788_v55, 0 }
 0x213   : > { %4994 = vmatpush3.bf16.xpose.msra.mxu0 %v794_v56 }
 0x214   : > { %5005 = vmatprep.subr.bf16.mxu0 %v5616_v15 }
 0x219   : > { %v780_v62 = vpop.f32.mrf.mxu0 }
 0x21a   : > { %4996 = vmatmul.mubr.msk.bf16.vlgmr.msra.gmra.mxu0 %vm789_vm2, %v787_v61  ;;  %v781_v3 = vadd.f32 %v4381_v63, %v780_v62  ;;  %v5421_v61 = vld [vmem:[%s6648_s3 + $0x130] sm:$0xff]   ;;  %v5422_v62 = vld [vmem:[%s6648_s3 + $0x128] sm:$0xff]  }
 0x21b   : > { %v4991_v0 = vpop.f32.mrf.mxu0  ;;  %5006 = vmatpush3.bf16.msra.mxu0 %v5412_v60  ;;  %5013 = vmatprep.mubr.msk.bf16.mxu0 %vm5617_vm1, %v5616_v15 }
 0x21c   : > { %5007 = vmatprep.subr.bf16.mxu0 %v5616_v15 }
 0x21d   : > { %v783_v2 = vpop.f32.mrf.mxu0 }
 0x21e   : > { %v784_v4 = vadd.f32 %v4381_v63, %v783_v2  ;;  %v5423_v63 = vld [vmem:[%s6648_s3 + $0x120] sm:$0xff]  }
 0x21f   : > { %v4992_v5 = vpop.f32.mrf.mxu0  ;;  %5008 = vmatpush3.bf16.msra.mxu0 %v5413_v1 }
 0x220   : > { %v865_v7 = vpack.c.bf16 %v784_v4, %v781_v3  ;;  %5009 = vmatprep.subr.bf16.mxu0 %v5616_v15 }
 0x222   : > { %5000 = vmatpush3.bf16.msra.mxu1 %v865_v7 }
 0x223   : > { %5010 = vmatpush3.bf16.msra.mxu0 %v5414_v6  ;;  %5017 = vmatprep.subr.bf16.mxu1 %v5616_v15  ;;  %v4421_v6 = vld [vmem:[%s6649_s4 + $0x9] ss:$0 sm:$0xff] }
 0x224   : > { %5011 = vmatprep.subr.bf16.mxu0 %v5616_v15 }
 0x227   : > { %5012 = vmatpush3.bf16.msra.mxu0 %v5415_v8 }
 0x228   : > { %5029 = vmatprep.subr.bf16.mxu0 %v5616_v15 }
 0x22a   : > { %5014 = vmatmul.mubr.msk.bf16.vlgmr.msra.gmra.mxu0 %vm493_vm0, %v5763_v40 }
 0x22b   : > { %5030 = vmatpush3.bf16.msra.mxu0 %v5416_v9  ;;  %5037 = vmatprep.mubr.msk.bf16.mxu0 %vm5617_vm1, %v5616_v15 }
 0x22c   : > { %5031 = vmatprep.subr.bf16.mxu0 %v5616_v15 }
 0x22f   : > { %5032 = vmatpush3.bf16.msra.mxu0 %v5417_v10 }
 0x230   : > { %5033 = vmatprep.subr.bf16.mxu0 %v5616_v15 }
 0x233   : > { %5034 = vmatpush3.bf16.msra.mxu0 %v5418_v11 }
 0x234   : > { %5035 = vmatprep.subr.bf16.mxu0 %v5616_v15 }
 0x237   : > { %5036 = vmatpush3.bf16.msra.mxu0 %v5419_v12 }
 0x238   : > { %5053 = vmatprep.subr.bf16.mxu0 %v5616_v15 }
 0x23a   : > { %5038 = vmatmul.mubr.msk.bf16.vlgmr.msra.gmra.mxu0 %vm493_vm0, %v5763_v40 }
 0x23b   : > { %5055 = vmatprep.mubr.msk.bf16.mxu0 %vm5617_vm1, %v5616_v15 }
 0x2da   : > { %v830_v14 = vpop.f32.mrf.mxu0 }
 0x2db   : > { %v837_v16 = vmul.f32 0.35355338, %v830_v14 }
 0x2dc   : > { %v4997_v17 = vpop.f32.mrf.mxu0 }
 0x2dd   : > { %v839_v18 = vadd.f32 %v837_v16, %v5852_v13 }
 0x2de   : > { %v833_v20 = vpop.f32.mrf.mxu0 }
 0x2df   : > { %v838_v21 = vmul.f32 0.35355338, %v833_v20  ;;  %v842_v22 = vsel %vm841_vm3, %v839_v18, -inf }
 0x2e0   : > { %843 = vmax.xlane.f32.xlu0 %v842_v22  ;;  %v4998_v23 = vpop.f32.mrf.mxu0 }
 0x2e1   : > { %v840_v24 = vadd.f32 %v838_v21, %v5856_v19 }
 0x2e3   : > { %v845_v25 = vsel %vm841_vm3, %v840_v24, -inf }
 0x2e4   : > { %846 = vmax.xlane.f32.xlu1 %v845_v25 }
 0x2ea   : > { %v1005_v26 = vpop.f32.mrf.mxu0 }
 0x2eb   : > { %v5864_v30 = vadd.f32 %v4414_v27, %v1005_v26 }
 0x2ec   : > { %v5015_v28 = vpop.f32.mrf.mxu0 }
 0x2ee   : > { %v1008_v29 = vpop.f32.mrf.mxu0 }
 0x2ef   : > { %v5866_v31 = vadd.f32 %v4414_v27, %v1008_v29 }
 0x2f0   : > { %v5016_v32 = vpop.f32.mrf.mxu0 }
 0x2f1   : > { %v1158_v33 = vpack.c.bf16 %v5866_v31, %v5864_v30 }
 0x2fa   : > { %v1151_v34 = vpop.f32.mrf.mxu0 }
 0x2fb   : > { %v1152_v38 = vadd.f32 %v4428_v35, %v1151_v34 }
 0x2fc   : > { %v5039_v36 = vpop.f32.mrf.mxu0 }
 0x2fe   : > { %v1154_v37 = vpop.f32.mrf.mxu0 }
 0x2ff   : > { %v1155_v39 = vadd.f32 %v4428_v35, %v1154_v37 }
 0x300   : > { %v5040_v41 = vpop.f32.mrf.mxu0 }
 0x301   : > { %v1234_v42 = vpack.c.bf16 %v1155_v39, %v1152_v38 }
 0x369   : > { %v844_v43 = vpop.xlane.xlu0 %843 }
 0x36a   : > { %v848_v44 = vsub.f32 %v839_v18, %v844_v43 }
 0x36c   : > { %v850_v45 = vmul.f32 1.442695, %v848_v44 }
 0x36d   : > { %v847_v46 = vpop.xlane.xlu1 %846 }
 0x36e   : > { %5528 = vpow2.f32 %v850_v45  ;;  %v849_v47 = vsub.f32 %v840_v24, %v847_v46 }
 0x370   : > { %v852_v48 = vmul.f32 1.442695, %v849_v47  ;;  %v5424_v47 = vld [vmem:[%s6648_s3 + $0x158] sm:$0xff]  }
 0x372   : > { %5530 = vpow2.f32 %v852_v48  ;;  %v5425_v48 = vld [vmem:[%s6648_s3 + $0x150] sm:$0xff]  }
 0x37b   : > { %v5529_v49 = vpop.eup %5528 }
 0x37c   : > { %v854_v50 = vsel %vm841_vm3, %v5529_v49, 0.0 }
 0x37d   : > { %855 = vadd.xlane.f32.xlu0 %v854_v50  ;;  %v5427_v50 = vld [vmem:[%s6648_s3 + $0x140] sm:$0xff]  }
 0x37f   : > { %v5531_v51 = vpop.eup %5530 }
 0x380   : > { %v857_v52 = vsel %vm841_vm3, %v5531_v51, 0.0 }
 0x381   : > { %858 = vadd.xlane.f32.xlu1 %v857_v52 }
 0x406   : > { %v856_v53 = vpop.xlane.xlu0 %855 }
 0x407   : > { %5532 = vrcp.f32 %v856_v53 }
 0x40a   : > { %v859_v54 = vpop.xlane.xlu1 %858 }
 0x40b   : > { %5534 = vrcp.f32 %v859_v54 }
 0x414   : > { %v5533_v55 = vpop.eup %5532 }
 0x415   : > { %v862_v57 = vmul.f32 %v5533_v55, %v5529_v49  ;;  %v5426_v49 = vld [vmem:[%s6648_s3 + $0x148] sm:$0xff]  }
 0x418   : > { %v5535_v56 = vpop.eup %5534 }
 0x419   : > { %v863_v58 = vmul.f32 %v5535_v56, %v5531_v51  ;;  %v4436_v51 = vld [vmem:[%s6650_s5 + $0x4] sm:$0xf]  ;;  %v5428_v56 = vld [vmem:[%s6648_s3 + $0x58] sm:$0xff]  }
 0x41a   : > { %v1287_v52 = vsel %vm1285_vm4, %v4436_v51, 0 }
 0x41b   : > { %v864_v60 = vpack.c.bf16 %v863_v58, %v862_v57  ;;  %5054 = vmatpush3.bf16.msra.mxu0 %v1287_v52 }
 0x41c   : > { %5065 = vmatprep.subr.bf16.mxu0 %v5616_v15 }
 0x41d   : > { %5002 = vmatmul.mubr.msk.bf16.vlgmr.msra.gmra.mxu1 %vm841_vm3, %v864_v60  ;;  %v5429_v60 = vld [vmem:[%s6648_s3 + $0x50] sm:$0xff]  }
 0x41e   : > { %5018 = vmatpush3.bf16.msra.mxu1 %v5420_v59  ;;  %5025 = vmatprep.mubr.msk.bf16.mxu1 %vm5617_vm1, %v5616_v15 }
 0x41f   : > { %5019 = vmatprep.subr.bf16.mxu1 %v5616_v15 }
 0x422   : > { %5020 = vmatpush3.bf16.msra.mxu1 %v5421_v61 }
 0x423   : > { %5021 = vmatprep.subr.bf16.mxu1 %v5616_v15 }
 0x426   : > { %5022 = vmatpush3.bf16.msra.mxu1 %v5422_v62 }
 0x427   : > { %5023 = vmatprep.subr.bf16.mxu1 %v5616_v15 }
 0x42a   : > { %5024 = vmatpush3.bf16.msra.mxu1 %v5423_v63  ;;  %v5430_v63 = vld [vmem:[%s6648_s3 + $0x48] sm:$0xff]  }
 0x42b   : > { %5041 = vmatprep.subr.bf16.mxu1 %v5616_v15 }
 0x42d   : > { %5026 = vmatmul.mubr.msk.bf16.vlgmr.msra.gmra.mxu1 %vm493_vm0, %v5763_v40 }
 0x42e   : > { %5043 = vmatprep.mubr.msk.bf16.mxu1 %vm5617_vm1, %v5616_v15 }
 0x4dd   : > { %v5898_v0 = vpop.f32.mrf.mxu1 }
 0x4df   : > { %v5003_v1 = vpop.f32.mrf.mxu1 }
 0x4e0   : > { %v5431_v1 = vld [vmem:[%s6648_s3 + $0x40] sm:$0xff]  }
 0x4e1   : > { %v906_v2 = vpop.f32.mrf.mxu1 }
 0x4e2   : > { %v910_v3 = vpack.c.bf16 %v906_v2, %v5898_v0  ;;  %v5432_v2 = vld [vmem:[%s6648_s3 + $0x258] sm:$0xff]  }
 0x4e3   : > { %v5004_v4 = vpop.f32.mrf.mxu1 }
 0x4e4   : > { %v5433_v4 = vld [vmem:[%s6648_s3 + $0x250] sm:$0xff]  }
 0x4ed   : > { %v1078_v5 = vpop.f32.mrf.mxu1 }
 0x4ee   : > { %v1079_v9 = vadd.f32 %v4421_v6, %v1078_v5  ;;  %v4471_v5 = vld [vmem:[%s6649_s4 + $0xa] ss:$0 sm:$0xff] }
 0x4ef   : > { %v5027_v7 = vpop.f32.mrf.mxu1 }
 0x4f1   : > { %v1081_v8 = vpop.f32.mrf.mxu1 }
 0x4f2   : > { %v1082_v10 = vadd.f32 %v4421_v6, %v1081_v8  ;;  %v5434_v8 = vld [vmem:[%s6648_s3 + $0x248] sm:$0xff]  }
 0x4f3   : > { %v5028_v11 = vpop.f32.mrf.mxu1 }
 0x4f4   : > { %v1159_v12 = vpack.c.bf16 %v1082_v10, %v1079_v9 }
 0x4f6   : > { %v1164_v14 = vsel %vm789_vm2, %v1159_v12, 0 }
 0x4f7   : > { %5042 = vmatpush3.bf16.xpose.msra.mxu1 %v1164_v14  ;;  %v5435_v14 = vld [vmem:[%s6648_s3 + $0x240] sm:$0xff]  }
 0x4f8   : > { %5047 = vmatprep.subr.bf16.mxu1 %v5616_v15 }
 0x4fe   : > { %5044 = vmatmul.mubr.msk.bf16.vlgmr.msra.gmra.mxu1 %vm789_vm2, %v1158_v33 }
 0x4ff   : > { %5048 = vmatpush3.bf16.msra.mxu1 %v1234_v42  ;;  %5049 = vmatprep.mubr.msk.bf16.mxu1 %vm5617_vm1, %v5616_v15  ;;  %v911_v42 = vld [vmem:[%s6650_s5] sm:$0xf] }
 0x500   : > { %5059 = vmatprep.subr.bf16.mxu1 %v5616_v15  ;;  %v1334_v46 = vsel %vm1285_vm4, %v911_v42, 0 }
 0x5be   : > { %v1200_v16 = vpop.f32.mrf.mxu1 }
 0x5bf   : > { %v1207_v17 = vmul.f32 0.35355338, %v1200_v16 }
 0x5c0   : > { %v5045_v18 = vpop.f32.mrf.mxu1 }
 0x5c1   : > { %v1209_v20 = vadd.f32 %v1207_v17, %v5852_v13 }
 0x5c2   : > { %v1203_v21 = vpop.f32.mrf.mxu1 }
 0x5c3   : > { %v1208_v22 = vmul.f32 0.35355338, %v1203_v21  ;;  %v1211_v23 = vsel %vm841_vm3, %v1209_v20, -inf }
 0x5c4   : > { %1212 = vmax.xlane.f32.xlu0 %v1211_v23  ;;  %v5046_v24 = vpop.f32.mrf.mxu1  ;;  %v4464_v23 = vld [vmem:[%s6649_s4 + $0x2] ss:$0 sm:$0xff] }
 0x5c5   : > { %v1210_v25 = vadd.f32 %v1208_v22, %v5856_v19 }
 0x5c7   : > { %v1214_v26 = vsel %vm841_vm3, %v1210_v25, -inf }
 0x5c8   : > { %1215 = vmax.xlane.f32.xlu1 %v1214_v26 }
 0x64d   : > { %v1213_v27 = vpop.xlane.xlu0 %1212 }
 0x64e   : > { %v1217_v28 = vsub.f32 %v1209_v20, %v1213_v27 }
 0x650   : > { %v1219_v29 = vmul.f32 1.442695, %v1217_v28 }
 0x651   : > { %v1216_v30 = vpop.xlane.xlu1 %1215 }
 0x652   : > { %5536 = vpow2.f32 %v1219_v29  ;;  %v1218_v31 = vsub.f32 %v1210_v25, %v1216_v30 }
 0x654   : > { %v1221_v32 = vmul.f32 1.442695, %v1218_v31  ;;  %v4478_v31 = vld [vmem:[%s6649_s4 + $0x12] ss:$0 sm:$0xff] }
 0x656   : > { %5538 = vpow2.f32 %v1221_v32 }
 0x65f   : > { %v5537_v33 = vpop.eup %5536 }
 0x660   : > { %v1223_v34 = vsel %vm841_vm3, %v5537_v33, 0.0 }
 0x661   : > { %1224 = vadd.xlane.f32.xlu0 %v1223_v34 }
 0x663   : > { %v5539_v35 = vpop.eup %5538 }
 0x664   : > { %v1226_v36 = vsel %vm841_vm3, %v5539_v35, 0.0 }
 0x665   : > { %1227 = vadd.xlane.f32.xlu1 %v1226_v36 }
 0x6ea   : > { %v1225_v37 = vpop.xlane.xlu0 %1224 }
 0x6eb   : > { %5540 = vrcp.f32 %v1225_v37 }
 0x6ee   : > { %v1228_v38 = vpop.xlane.xlu1 %1227 }
 0x6ef   : > { %5542 = vrcp.f32 %v1228_v38 }
 0x6f8   : > { %v5541_v39 = vpop.eup %5540 }
 0x6f9   : > { %v1231_v43 = vmul.f32 %v5541_v39, %v5537_v33 }
 0x6fc   : > { %v5543_v41 = vpop.eup %5542 }
 0x6fd   : > { %v1232_v44 = vmul.f32 %v5543_v41, %v5539_v35 }
 0x6ff   : > { %v1233_v45 = vpack.c.bf16 %v1232_v44, %v1231_v43 }
 0x701   : > { %5050 = vmatmul.mubr.msk.bf16.vlgmr.msra.gmra.mxu1 %vm841_vm3, %v1233_v45 }
 0x702   : > { %5060 = vmatpush3.bf16.msra.mxu1 %v1334_v46  ;;  %5061 = vmatprep.mubr.msk.bf16.mxu1 %vm5617_vm1, %v5616_v15 }
 0x703   : > { %5077 = vmatprep.subr.bf16.mxu1 %v5616_v15 }
 0x709   : > { %5062 = vmatmul.mubr.msk.bf16.vlgmr.msra.gmra.mxu1 %vm789_vm2, %v910_v3 }
 0x70a   : > { %5078 = vmatpush3.bf16.msra.mxu1 %v5424_v47  ;;  %5085 = vmatprep.mubr.msk.bf16.mxu1 %vm5617_vm1, %v5616_v15 }
 0x70b   : > { %5079 = vmatprep.subr.bf16.mxu1 %v5616_v15 }
 0x70e   : > { %5080 = vmatpush3.bf16.msra.mxu1 %v5425_v48 }
 0x70f   : > { %5081 = vmatprep.subr.bf16.mxu1 %v5616_v15 }
 0x712   : > { %5082 = vmatpush3.bf16.msra.mxu1 %v5426_v49 }
 0x713   : > { %5083 = vmatprep.subr.bf16.mxu1 %v5616_v15 }
 0x716   : > { %5084 = vmatpush3.bf16.msra.mxu1 %v5427_v50 }
 0x717   : > { %5101 = vmatprep.subr.bf16.mxu1 %v5616_v15 }
 0x719   : > { %5086 = vmatmul.mubr.msk.bf16.vlgmr.msra.gmra.mxu1 %vm493_vm0, %v5763_v40 }
 0x71a   : > { %5103 = vmatprep.mubr.msk.bf16.mxu1 %vm5617_vm1, %v5616_v15 }
 0x7c1   : > { %v1272_v53 = vpop.f32.mrf.mxu1 }
 0x7c3   : > { %v5051_v54 = vpop.f32.mrf.mxu1 }
 0x7c5   : > { %v1275_v55 = vpop.f32.mrf.mxu1 }
 0x7c6   : > { %v1279_v57 = vpack.c.bf16 %v1275_v55, %v1272_v53 }
 0x7c7   : > { %v5052_v58 = vpop.f32.mrf.mxu1 }
 0x7c8   : > { %5056 = vmatmul.mubr.msk.bf16.vlgmr.msra.gmra.mxu0 %vm789_vm2, %v1279_v57 }
 0x7c9   : > { %5066 = vmatpush3.bf16.msra.mxu0 %v5428_v56  ;;  %v5959_v59 = vpop.f32.mrf.mxu1  ;;  %5073 = vmatprep.mubr.msk.bf16.mxu0 %vm5617_vm1, %v5616_v15 }
 0x7ca   : > { %5067 = vmatprep.subr.bf16.mxu0 %v5616_v15 }
 0x7cb   : > { %v5063_v61 = vpop.f32.mrf.mxu1 }
 0x7cd   : > { %5068 = vmatpush3.bf16.msra.mxu0 %v5429_v60  ;;  %v5967_v62 = vpop.f32.mrf.mxu1 }
 0x7ce   : > { %5069 = vmatprep.subr.bf16.mxu0 %v5616_v15 }
 0x7cf   : > { %v5064_v0 = vpop.f32.mrf.mxu1 }
 0x7d1   : > { %5070 = vmatpush3.bf16.msra.mxu0 %v5430_v63 }
 0x7d2   : > { %5071 = vmatprep.subr.bf16.mxu0 %v5616_v15 }
 0x7d5   : > { %5072 = vmatpush3.bf16.msra.mxu0 %v5431_v1 }
 0x7d6   : > { %5089 = vmatprep.subr.bf16.mxu0 %v5616_v15 }
 0x7d8   : > { %5074 = vmatmul.mubr.msk.bf16.vlgmr.msra.gmra.mxu0 %vm493_vm0, %v5763_v40 }
 0x7d9   : > { %v1543_v3 = vpop.f32.mrf.mxu1  ;;  %5090 = vmatpush3.bf16.msra.mxu0 %v5432_v2  ;;  %5097 = vmatprep.mubr.msk.bf16.mxu0 %vm5617_vm1, %v5616_v15 }
 0x7da   : > { %5091 = vmatprep.subr.bf16.mxu0 %v5616_v15  ;;  %v1544_v9 = vadd.f32 %v4471_v5, %v1543_v3  ;;  %v5436_v3 = vld [vmem:[%s6648_s3 + $0x78] sm:$0xff]  }
 0x7db   : > { %v5087_v6 = vpop.f32.mrf.mxu1 }
 0x7dc   : > { %v5438_v6 = vld [vmem:[%s6648_s3 + $0x68] sm:$0xff]  }
 0x7dd   : > { %v1546_v7 = vpop.f32.mrf.mxu1  ;;  %5092 = vmatpush3.bf16.msra.mxu0 %v5433_v4 }
 0x7de   : > { %v1547_v10 = vadd.f32 %v4471_v5, %v1546_v7  ;;  %5093 = vmatprep.subr.bf16.mxu0 %v5616_v15  ;;  %v5437_v5 = vld [vmem:[%s6648_s3 + $0x70] sm:$0xff]   ;;  %v5439_v7 = vld [vmem:[%s6648_s3 + $0x60] sm:$0xff]  }
 0x7df   : > { %v5088_v11 = vpop.f32.mrf.mxu1 }
 0x7e0   : > { %v1624_v12 = vpack.c.bf16 %v1547_v10, %v1544_v9  ;;  %v5441_v9 = vld [vmem:[%s6648_s3 + $0x270] sm:$0xff]   ;;  %v5442_v10 = vld [vmem:[%s6648_s3 + $0x268] sm:$0xff]   ;;  %v5443_v11 = vld [vmem:[%s6648_s3 + $0x260] sm:$0xff]  }
 0x7e1   : > { %5094 = vmatpush3.bf16.msra.mxu0 %v5434_v8  ;;  %v5440_v8 = vld [vmem:[%s6648_s3 + $0x278] sm:$0xff]  }
 0x7e2   : > { %v1629_v16 = vsel %vm789_vm2, %v1624_v12, 0  ;;  %5095 = vmatprep.subr.bf16.mxu0 %v5616_v15  ;;  %v4486_v12 = vld [vmem:[%s6650_s5 + $0x8] sm:$0xf] }
 0x7e3   : > { %5102 = vmatpush3.bf16.xpose.msra.mxu1 %v1629_v16 }
 0x7e4   : > { %5107 = vmatprep.subr.bf16.mxu1 %v5616_v15 }
 0x7e5   : > { %5096 = vmatpush3.bf16.msra.mxu0 %v5435_v14  ;;  %v1751_v14 = vsel %vm1285_vm4, %v4486_v12, 0 }
 0x7e6   : > { %5113 = vmatprep.subr.bf16.mxu0 %v5616_v15 }
 0x7e8   : > { %5098 = vmatmul.mubr.msk.bf16.vlgmr.msra.gmra.mxu0 %vm493_vm0, %v5763_v40 }
 0x7e9   : > { %5115 = vmatprep.mubr.msk.bf16.mxu0 %vm5617_vm1, %v5616_v15  ;;  %5114 = vmatpush3.bf16.msra.mxu0 %v1751_v14 }
 0x7ea   : > { %5131 = vmatprep.subr.bf16.mxu0 %v5616_v15 }
 0x888   : > { %v6007_v17 = vpop.f32.mrf.mxu0 }
 0x88a   : > { %v5057_v18 = vpop.f32.mrf.mxu0 }
 0x88c   : > { %v6009_v20 = vpop.f32.mrf.mxu0 }
 0x88e   : > { %v5058_v21 = vpop.f32.mrf.mxu0 }
 0x898   : > { %v1470_v22 = vpop.f32.mrf.mxu0 }
 0x899   : > { %v1471_v26 = vadd.f32 %v4464_v23, %v1470_v22  ;;  %v5444_v22 = vld [vmem:[%s6648_s3 + $0x178] sm:$0xff]  }
 0x89a   : > { %v5075_v24 = vpop.f32.mrf.mxu0 }
 0x89c   : > { %v1473_v25 = vpop.f32.mrf.mxu0 }
 0x89d   : > { %v1474_v27 = vadd.f32 %v4464_v23, %v1473_v25  ;;  %v5445_v25 = vld [vmem:[%s6648_s3 + $0x170] sm:$0xff]  }
 0x89e   : > { %v5076_v28 = vpop.f32.mrf.mxu0 }
 0x89f   : > { %v1623_v29 = vpack.c.bf16 %v1474_v27, %v1471_v26  ;;  %v5446_v26 = vld [vmem:[%s6648_s3 + $0x168] sm:$0xff]   ;;  %v5447_v28 = vld [vmem:[%s6648_s3 + $0x160] sm:$0xff]  }
 0x8a1   : > { %5104 = vmatmul.mubr.msk.bf16.vlgmr.msra.gmra.mxu1 %vm789_vm2, %v1623_v29  ;;  %v4513_v29 = vld [vmem:[%s6649_s4 + $0x3] ss:$0 sm:$0xff] }
 0x8a2   : > { %5109 = vmatprep.mubr.msk.bf16.mxu1 %vm5617_vm1, %v5616_v15 }
 0x8a8   : > { %v1616_v30 = vpop.f32.mrf.mxu0 }
 0x8a9   : > { %v1617_v34 = vadd.f32 %v4478_v31, %v1616_v30 }
 0x8aa   : > { %v5099_v32 = vpop.f32.mrf.mxu0 }
 0x8ac   : > { %v1619_v33 = vpop.f32.mrf.mxu0 }
 0x8ad   : > { %v1620_v35 = vadd.f32 %v4478_v31, %v1619_v33 }
 0x8ae   : > { %v5100_v36 = vpop.f32.mrf.mxu0 }
 0x8af   : > { %v1699_v37 = vpack.c.bf16 %v1620_v35, %v1617_v34 }
 0x8b1   : > { %5108 = vmatpush3.bf16.msra.mxu1 %v1699_v37  ;;  %v4527_v37 = vld [vmem:[%s6649_s4 + $0x13] ss:$0 sm:$0xff] }
 0x8b2   : > { %5119 = vmatprep.subr.bf16.mxu1 %v5616_v15 }
 0x961   : > { %v1665_v38 = vpop.f32.mrf.mxu1 }
 0x962   : > { %v1672_v39 = vmul.f32 0.35355338, %v1665_v38 }
 0x963   : > { %v5105_v41 = vpop.f32.mrf.mxu1 }
 0x964   : > { %v1674_v42 = vadd.f32 %v1672_v39, %v5852_v13 }
 0x965   : > { %v1668_v43 = vpop.f32.mrf.mxu1 }
 0x966   : > { %v1673_v44 = vmul.f32 0.35355338, %v1668_v43  ;;  %v1676_v45 = vsel %vm841_vm3, %v1674_v42, -inf }
 0x967   : > { %1677 = vmax.xlane.f32.xlu0 %v1676_v45  ;;  %v5106_v46 = vpop.f32.mrf.mxu1  ;;  %v1371_v45 = vadd.f32 %v5959_v59, %v6007_v17 }
 0x968   : > { %v1675_v47 = vadd.f32 %v1673_v44, %v5856_v19 }
 0x96a   : > { %v1679_v48 = vsel %vm841_vm3, %v1675_v47, -inf }
 0x96b   : > { %1680 = vmax.xlane.f32.xlu1 %v1679_v48 }
 0x9f0   : > { %v1678_v49 = vpop.xlane.xlu0 %1677 }
 0x9f1   : > { %v1682_v50 = vsub.f32 %v1674_v42, %v1678_v49  ;;  %v1374_v49 = vadd.f32 %v5967_v62, %v6009_v20 }
 0x9f3   : > { %v1684_v51 = vmul.f32 1.442695, %v1682_v50 }
 0x9f4   : > { %v1681_v52 = vpop.xlane.xlu1 %1680 }
 0x9f5   : > { %5544 = vpow2.f32 %v1684_v51  ;;  %v1683_v53 = vsub.f32 %v1675_v47, %v1681_v52 }
 0x9f7   : > { %v1686_v54 = vmul.f32 1.442695, %v1683_v53 }
 0x9f9   : > { %5546 = vpow2.f32 %v1686_v54  ;;  %v4520_v54 = vld [vmem:[%s6649_s4 + $0xb] ss:$0 sm:$0xff] }
 0xa02   : > { %v5545_v55 = vpop.eup %5544 }
 0xa03   : > { %v1688_v56 = vsel %vm841_vm3, %v5545_v55, 0.0 }
 0xa04   : > { %1689 = vadd.xlane.f32.xlu0 %v1688_v56 }
 0xa06   : > { %v5547_v57 = vpop.eup %5546 }
 0xa07   : > { %v1691_v58 = vsel %vm841_vm3, %v5547_v57, 0.0 }
 0xa08   : > { %1692 = vadd.xlane.f32.xlu1 %v1691_v58 }
 0xa8d   : > { %v1690_v60 = vpop.xlane.xlu0 %1689 }
 0xa8e   : > { %5548 = vrcp.f32 %v1690_v60 }
 0xa91   : > { %v1693_v61 = vpop.xlane.xlu1 %1692 }
 0xa92   : > { %5550 = vrcp.f32 %v1693_v61 }
 0xa9b   : > { %v5549_v63 = vpop.eup %5548 }
 0xa9c   : > { %v1696_v1 = vmul.f32 %v5549_v63, %v5545_v55 }
 0xa9f   : > { %v5551_v0 = vpop.eup %5550 }
 0xaa0   : > { %v1697_v2 = vmul.f32 %v5551_v0, %v5547_v57 }
 0xaa2   : > { %v1698_v4 = vpack.c.bf16 %v1697_v2, %v1696_v1 }
 0xaa4   : > { %5110 = vmatmul.mubr.msk.bf16.vlgmr.msra.gmra.mxu1 %vm841_vm3, %v1698_v4 }
 0xaa5   : > { %5120 = vmatpush3.bf16.msra.mxu1 %v5436_v3  ;;  %5127 = vmatprep.mubr.msk.bf16.mxu1 %vm5617_vm1, %v5616_v15 }
 0xaa6   : > { %5121 = vmatprep.subr.bf16.mxu1 %v5616_v15 }
 0xaa9   : > { %5122 = vmatpush3.bf16.msra.mxu1 %v5437_v5 }
 0xaaa   : > { %5123 = vmatprep.subr.bf16.mxu1 %v5616_v15 }
 0xaad   : > { %5124 = vmatpush3.bf16.msra.mxu1 %v5438_v6 }
 0xaae   : > { %5125 = vmatprep.subr.bf16.mxu1 %v5616_v15 }
 0xab1   : > { %5126 = vmatpush3.bf16.msra.mxu1 %v5439_v7 }
 0xab2   : > { %5143 = vmatprep.subr.bf16.mxu1 %v5616_v15 }
 0xab4   : > { %5128 = vmatmul.mubr.msk.bf16.vlgmr.msra.gmra.mxu1 %vm493_vm0, %v5763_v40 }
 0xab5   : > { %5144 = vmatpush3.bf16.msra.mxu1 %v5440_v8  ;;  %5151 = vmatprep.mubr.msk.bf16.mxu1 %vm5617_vm1, %v5616_v15 }
 0xab6   : > { %5145 = vmatprep.subr.bf16.mxu1 %v5616_v15 }
 0xab9   : > { %5146 = vmatpush3.bf16.msra.mxu1 %v5441_v9 }
 0xaba   : > { %5147 = vmatprep.subr.bf16.mxu1 %v5616_v15 }
 0xabd   : > { %5148 = vmatpush3.bf16.msra.mxu1 %v5442_v10 }
 0xabe   : > { %5149 = vmatprep.subr.bf16.mxu1 %v5616_v15 }
 0xac1   : > { %5150 = vmatpush3.bf16.msra.mxu1 %v5443_v11 }
 0xac2   : > { %5167 = vmatprep.subr.bf16.mxu1 %v5616_v15 }
 0xac4   : > { %5152 = vmatmul.mubr.msk.bf16.vlgmr.msra.gmra.mxu1 %vm493_vm0, %v5763_v40 }
 0xac5   : > { %5169 = vmatprep.mubr.msk.bf16.mxu1 %vm5617_vm1, %v5616_v15 }
 0xb64   : > { %v1737_v16 = vpop.f32.mrf.mxu1 }
 0xb66   : > { %v5111_v18 = vpop.f32.mrf.mxu1 }
 0xb68   : > { %v1740_v21 = vpop.f32.mrf.mxu1 }
 0xb69   : > { %v1744_v23 = vpack.c.bf16 %v1740_v21, %v1737_v16 }
 0xb6a   : > { %v5112_v24 = vpop.f32.mrf.mxu1 }
 0xb6b   : > { %5116 = vmatmul.mubr.msk.bf16.vlgmr.msra.gmra.mxu0 %vm789_vm2, %v1744_v23 }
 0xb6c   : > { %5132 = vmatpush3.bf16.msra.mxu0 %v5444_v22  ;;  %5139 = vmatprep.mubr.msk.bf16.mxu0 %vm5617_vm1, %v5616_v15 }
 0xb6d   : > { %5133 = vmatprep.subr.bf16.mxu0 %v5616_v15 }
 0xb70   : > { %5134 = vmatpush3.bf16.msra.mxu0 %v5445_v25 }
 0xb71   : > { %5135 = vmatprep.subr.bf16.mxu0 %v5616_v15 }
 0xb74   : > { %v1889_v27 = vpop.f32.mrf.mxu1  ;;  %5136 = vmatpush3.bf16.msra.mxu0 %v5446_v26 }
 0xb75   : > { %5137 = vmatprep.subr.bf16.mxu0 %v5616_v15  ;;  %v1890_v32 = vadd.f32 %v4513_v29, %v1889_v27  ;;  %v5448_v27 = vld [vmem:[%s6648_s3 + $0x98] sm:$0xff]  }
 0xb76   : > { %v5129_v30 = vpop.f32.mrf.mxu1 }
 0xb77   : > { %v5450_v30 = vld [vmem:[%s6648_s3 + $0x88] sm:$0xff]  }
 0xb78   : > { %v1892_v31 = vpop.f32.mrf.mxu1  ;;  %5138 = vmatpush3.bf16.msra.mxu0 %v5447_v28 }
 0xb79   : > { %v1893_v33 = vadd.f32 %v4513_v29, %v1892_v31  ;;  %5155 = vmatprep.subr.bf16.mxu0 %v5616_v15  ;;  %v5449_v29 = vld [vmem:[%s6648_s3 + $0x90] sm:$0xff]   ;;  %v5451_v31 = vld [vmem:[%s6648_s3 + $0x80] sm:$0xff]  }
 0xb7a   : > { %v5130_v34 = vpop.f32.mrf.mxu1 }
 0xb7b   : > { %v2042_v35 = vpack.c.bf16 %v1893_v33, %v1890_v32  ;;  %5140 = vmatmul.mubr.msk.bf16.vlgmr.msra.gmra.mxu0 %vm493_vm0, %v5763_v40  ;;  %v5452_v32 = vld [vmem:[%s6648_s3 + $0x298] sm:$0xff]   ;;  %v5453_v33 = vld [vmem:[%s6648_s3 + $0x290] sm:$0xff]   ;;  %v5454_v34 = vld [vmem:[%s6648_s3 + $0x288] sm:$0xff]  }
 0xb7c   : > { %5157 = vmatprep.mubr.msk.bf16.mxu0 %vm5617_vm1, %v5616_v15 }
 0xb84   : > { %v2035_v36 = vpop.f32.mrf.mxu1 }
 0xb85   : > { %v2036_v41 = vadd.f32 %v4527_v37, %v2035_v36  ;;  %v4535_v36 = vld [vmem:[%s6650_s5 + $0xc] sm:$0xf] }
 0xb86   : > { %v5153_v38 = vpop.f32.mrf.mxu1 }
 0xb88   : > { %v2038_v39 = vpop.f32.mrf.mxu1 }
 0xb89   : > { %v2039_v42 = vadd.f32 %v4527_v37, %v2038_v39  ;;  %v2170_v37 = vsel %vm1285_vm4, %v4535_v36, 0 }
 0xb8a   : > { %v5154_v43 = vpop.f32.mrf.mxu1  ;;  %5168 = vmatpush3.bf16.msra.mxu1 %v2170_v37 }
 0xb8b   : > { %v2118_v44 = vpack.c.bf16 %v2039_v42, %v2036_v41  ;;  %5185 = vmatprep.subr.bf16.mxu1 %v5616_v15  ;;  %v5456_v42 = vld [vmem:[%s6648_s3 + $0x198] sm:$0xff]  }
 0xc2b   : > { %v1787_v46 = vpop.f32.mrf.mxu0 }
 0xc2c   : > { %v6106_v47 = vadd.f32 %v1787_v46, %v1371_v45  ;;  %v5457_v45 = vld [vmem:[%s6648_s3 + $0x190] sm:$0xff]   ;;  %v5458_v46 = vld [vmem:[%s6648_s3 + $0x188] sm:$0xff]  }
 0xc2d   : > { %v5117_v48 = vpop.f32.mrf.mxu0 }
 0xc2f   : > { %v1790_v50 = vpop.f32.mrf.mxu0 }
 0xc30   : > { %v6110_v51 = vadd.f32 %v1790_v50, %v1374_v49  ;;  %v5459_v49 = vld [vmem:[%s6648_s3 + $0x180] sm:$0xff]  }
 0xc31   : > { %v5118_v52 = vpop.f32.mrf.mxu0  ;;  %v4562_v50 = vld [vmem:[%s6649_s4 + $0x4] ss:$0 sm:$0xff] }
 0xc3b   : > { %v1962_v53 = vpop.f32.mrf.mxu0 }
 0xc3c   : > { %v1963_v57 = vadd.f32 %v4520_v54, %v1962_v53 }
 0xc3d   : > { %v5141_v55 = vpop.f32.mrf.mxu0 }
 0xc3f   : > { %v1965_v56 = vpop.f32.mrf.mxu0 }
 0xc40   : > { %v1966_v59 = vadd.f32 %v4520_v54, %v1965_v56 }
 0xc41   : > { %v5142_v17 = vpop.f32.mrf.mxu0 }
 0xc42   : > { %v2043_v58 = vpack.c.bf16 %v1966_v59, %v1963_v57  ;;  %v4576_v17 = vld [vmem:[%s6649_s4 + $0x14] ss:$0 sm:$0xff] }
 0xc44   : > { %v2048_v60 = vsel %vm789_vm2, %v2043_v58, 0 }
 0xc45   : > { %5156 = vmatpush3.bf16.xpose.msra.mxu0 %v2048_v60 }
 0xc46   : > { %5161 = vmatprep.subr.bf16.mxu0 %v5616_v15 }
 0xc4c   : > { %5158 = vmatmul.mubr.msk.bf16.vlgmr.msra.gmra.mxu0 %vm789_vm2, %v2042_v35  ;;  %v5455_v35 = vld [vmem:[%s6648_s3 + $0x280] sm:$0xff]  }
 0xc4d   : > { %5162 = vmatpush3.bf16.msra.mxu0 %v2118_v44  ;;  %5163 = vmatprep.mubr.msk.bf16.mxu0 %vm5617_vm1, %v5616_v15 }
 0xc4e   : > { %5173 = vmatprep.subr.bf16.mxu0 %v5616_v15 }
 0xd0c   : > { %v2084_v62 = vpop.f32.mrf.mxu0 }
 0xd0d   : > { %v2091_v20 = vmul.f32 0.35355338, %v2084_v62 }
 0xd0e   : > { %v5159_v61 = vpop.f32.mrf.mxu0 }
 0xd0f   : > { %v2093_v63 = vadd.f32 %v2091_v20, %v5852_v13 }
 0xd10   : > { %v2087_v0 = vpop.f32.mrf.mxu0 }
 0xd11   : > { %v2092_v1 = vmul.f32 0.35355338, %v2087_v0  ;;  %v2095_v2 = vsel %vm841_vm3, %v2093_v63, -inf }
 0xd12   : > { %2096 = vmax.xlane.f32.xlu0 %v2095_v2  ;;  %v5160_v3 = vpop.f32.mrf.mxu0 }
 0xd13   : > { %v2094_v4 = vadd.f32 %v2092_v1, %v5856_v19 }
 0xd15   : > { %v2098_v5 = vsel %vm841_vm3, %v2094_v4, -inf }
 0xd16   : > { %2099 = vmax.xlane.f32.xlu1 %v2098_v5 }
 0xd9b   : > { %v2097_v6 = vpop.xlane.xlu0 %2096 }
 0xd9c   : > { %v2101_v7 = vsub.f32 %v2093_v63, %v2097_v6 }
 0xd9e   : > { %v2103_v8 = vmul.f32 1.442695, %v2101_v7  ;;  %v4569_v7 = vld [vmem:[%s6649_s4 + $0xc] ss:$0 sm:$0xff] }
 0xd9f   : > { %v2100_v9 = vpop.xlane.xlu1 %2099 }
 0xda0   : > { %5552 = vpow2.f32 %v2103_v8  ;;  %v2102_v10 = vsub.f32 %v2094_v4, %v2100_v9 }
 0xda2   : > { %v2105_v11 = vmul.f32 1.442695, %v2102_v10 }
 0xda4   : > { %5554 = vpow2.f32 %v2105_v11 }
 0xdad   : > { %v5553_v12 = vpop.eup %5552 }
 0xdae   : > { %v2107_v14 = vsel %vm841_vm3, %v5553_v12, 0.0 }
 0xdaf   : > { %2108 = vadd.xlane.f32.xlu0 %v2107_v14 }
 0xdb1   : > { %v5555_v16 = vpop.eup %5554 }
 0xdb2   : > { %v2110_v18 = vsel %vm841_vm3, %v5555_v16, 0.0 }
 0xdb3   : > { %2111 = vadd.xlane.f32.xlu1 %v2110_v18 }
 0xe38   : > { %v2109_v21 = vpop.xlane.xlu0 %2108 }
 0xe39   : > { %5556 = vrcp.f32 %v2109_v21 }
 0xe3c   : > { %v2112_v22 = vpop.xlane.xlu1 %2111 }
 0xe3d   : > { %5558 = vrcp.f32 %v2112_v22 }
 0xe46   : > { %v5557_v23 = vpop.eup %5556 }
 0xe47   : > { %v2115_v25 = vmul.f32 %v5557_v23, %v5553_v12 }
 0xe4a   : > { %v5559_v24 = vpop.eup %5558 }
 0xe4b   : > { %v2116_v26 = vmul.f32 %v5559_v24, %v5555_v16 }
 0xe4d   : > { %v2117_v28 = vpack.c.bf16 %v2116_v26, %v2115_v25 }
 0xe4f   : > { %5164 = vmatmul.mubr.msk.bf16.vlgmr.msra.gmra.mxu0 %vm841_vm3, %v2117_v28 }
 0xe50   : > { %5174 = vmatpush3.bf16.msra.mxu0 %v5448_v27  ;;  %5181 = vmatprep.mubr.msk.bf16.mxu0 %vm5617_vm1, %v5616_v15 }
 0xe51   : > { %5175 = vmatprep.subr.bf16.mxu0 %v5616_v15 }
 0xe54   : > { %5176 = vmatpush3.bf16.msra.mxu0 %v5449_v29 }
 0xe55   : > { %5177 = vmatprep.subr.bf16.mxu0 %v5616_v15 }
 0xe58   : > { %5178 = vmatpush3.bf16.msra.mxu0 %v5450_v30 }
 0xe59   : > { %5179 = vmatprep.subr.bf16.mxu0 %v5616_v15 }
 0xe5c   : > { %5180 = vmatpush3.bf16.msra.mxu0 %v5451_v31 }
 0xe5d   : > { %5197 = vmatprep.subr.bf16.mxu0 %v5616_v15 }
 0xe5f   : > { %5182 = vmatmul.mubr.msk.bf16.vlgmr.msra.gmra.mxu0 %vm493_vm0, %v5763_v40 }
 0xe60   : > { %5198 = vmatpush3.bf16.msra.mxu0 %v5452_v32  ;;  %5205 = vmatprep.mubr.msk.bf16.mxu0 %vm5617_vm1, %v5616_v15 }
 0xe61   : > { %5199 = vmatprep.subr.bf16.mxu0 %v5616_v15 }
 0xe64   : > { %5200 = vmatpush3.bf16.msra.mxu0 %v5453_v33 }
 0xe65   : > { %5201 = vmatprep.subr.bf16.mxu0 %v5616_v15 }
 0xe68   : > { %5202 = vmatpush3.bf16.msra.mxu0 %v5454_v34 }
 0xe69   : > { %5203 = vmatprep.subr.bf16.mxu0 %v5616_v15 }
 0xe6c   : > { %5204 = vmatpush3.bf16.msra.mxu0 %v5455_v35 }
 0xe6d   : > { %5221 = vmatprep.subr.bf16.mxu0 %v5616_v15 }
 0xe6f   : > { %5206 = vmatmul.mubr.msk.bf16.vlgmr.msra.gmra.mxu0 %vm493_vm0, %v5763_v40 }
 0xe70   : > { %5223 = vmatprep.mubr.msk.bf16.mxu0 %vm5617_vm1, %v5616_v15 }
 0xf0f   : > { %v2156_v38 = vpop.f32.mrf.mxu0 }
 0xf11   : > { %v5165_v39 = vpop.f32.mrf.mxu0 }
 0xf13   : > { %v2159_v41 = vpop.f32.mrf.mxu0 }
 0xf14   : > { %v2163_v43 = vpack.c.bf16 %v2159_v41, %v2156_v38 }
 0xf15   : > { %v5166_v44 = vpop.f32.mrf.mxu0 }
 0xf16   : > { %5170 = vmatmul.mubr.msk.bf16.vlgmr.msra.gmra.mxu1 %vm789_vm2, %v2163_v43  ;;  %v5460_v43 = vld [vmem:[%s6648_s3 + $0xb8] sm:$0xff]  }
 0xf17   : > { %5186 = vmatpush3.bf16.msra.mxu1 %v5456_v42  ;;  %5193 = vmatprep.mubr.msk.bf16.mxu1 %vm5617_vm1, %v5616_v15 }
 0xf18   : > { %5187 = vmatprep.subr.bf16.mxu1 %v5616_v15 }
 0xf1b   : > { %5188 = vmatpush3.bf16.msra.mxu1 %v5457_v45  ;;  %v5461_v45 = vld [vmem:[%s6648_s3 + $0xb0] sm:$0xff]  }
 0xf1c   : > { %5189 = vmatprep.subr.bf16.mxu1 %v5616_v15 }
 0xf1f   : > { %v2308_v48 = vpop.f32.mrf.mxu0  ;;  %5190 = vmatpush3.bf16.msra.mxu1 %v5458_v46  ;;  %v5462_v46 = vld [vmem:[%s6648_s3 + $0xa8] sm:$0xff]  }
 0xf20   : > { %5191 = vmatprep.subr.bf16.mxu1 %v5616_v15  ;;  %v2309_v54 = vadd.f32 %v4562_v50, %v2308_v48  ;;  %v5463_v48 = vld [vmem:[%s6648_s3 + $0xa0] sm:$0xff]  }
 0xf21   : > { %v5183_v52 = vpop.f32.mrf.mxu0 }
 0xf22   : > { %v5466_v52 = vld [vmem:[%s6648_s3 + $0x2a8] sm:$0xff]  }
 0xf23   : > { %v2311_v53 = vpop.f32.mrf.mxu0  ;;  %5192 = vmatpush3.bf16.msra.mxu1 %v5459_v49  ;;  %v5464_v49 = vld [vmem:[%s6648_s3 + $0x2b8] sm:$0xff]  }
 0xf24   : > { %v2312_v55 = vadd.f32 %v4562_v50, %v2311_v53  ;;  %5209 = vmatprep.subr.bf16.mxu1 %v5616_v15  ;;  %v5465_v50 = vld [vmem:[%s6648_s3 + $0x2b0] sm:$0xff]   ;;  %v5467_v53 = vld [vmem:[%s6648_s3 + $0x2a0] sm:$0xff]  }
 0xf25   : > { %v5184_v56 = vpop.f32.mrf.mxu0 }
 0xf26   : > { %v2461_v57 = vpack.c.bf16 %v2312_v55, %v2309_v54  ;;  %5194 = vmatmul.mubr.msk.bf16.vlgmr.msra.gmra.mxu1 %vm493_vm0, %v5763_v40  ;;  %v4584_v54 = vld [vmem:[%s6650_s5 + $0x10] sm:$0xf] }
 0xf27   : > { %5211 = vmatprep.mubr.msk.bf16.mxu1 %vm5617_vm1, %v5616_v15  ;;  %v2589_v55 = vsel %vm1285_vm4, %v4584_v54, 0 }
 0xf28   : > { %5222 = vmatpush3.bf16.msra.mxu0 %v2589_v55 }
 0xf29   : > { %5239 = vmatprep.subr.bf16.mxu0 %v5616_v15 }
 0xf2f   : > { %v2454_v59 = vpop.f32.mrf.mxu0 }
 0xf30   : > { %v2455_v62 = vadd.f32 %v4576_v17, %v2454_v59 }
 0xf31   : > { %v5207_v58 = vpop.f32.mrf.mxu0 }
 0xf33   : > { %v2457_v60 = vpop.f32.mrf.mxu0 }
 0xf34   : > { %v2458_v20 = vadd.f32 %v4576_v17, %v2457_v60  ;;  %v5468_v17 = vld [vmem:[%s6648_s3 + $0x1b8] sm:$0xff]  }
 0xf35   : > { %v5208_v61 = vpop.f32.mrf.mxu0 }
 0xf36   : > { %v2537_v63 = vpack.c.bf16 %v2458_v20, %v2455_v62  ;;  %v5469_v62 = vld [vmem:[%s6648_s3 + $0x1b0] sm:$0xff]   ;;  %v5470_v20 = vld [vmem:[%s6648_s3 + $0x1a8] sm:$0xff]  }
 0xfd6   : > { %v2206_v0 = vpop.f32.mrf.mxu1 }
 0xfd7   : > { %v6205_v1 = vadd.f32 %v2206_v0, %v6106_v47  ;;  %v4611_v0 = vld [vmem:[%s6649_s4 + $0x5] ss:$0 sm:$0xff] }
 0xfd8   : > { %v5171_v2 = vpop.f32.mrf.mxu1 }
 0xfda   : > { %v2209_v3 = vpop.f32.mrf.mxu1 }
 0xfdb   : > { %v6208_v4 = vadd.f32 %v2209_v3, %v6110_v51 }
 0xfdc   : > { %v5172_v5 = vpop.f32.mrf.mxu1 }
 0xfe6   : > { %v2381_v6 = vpop.f32.mrf.mxu1 }
 0xfe7   : > { %v2382_v10 = vadd.f32 %v4569_v7, %v2381_v6 }
 0xfe8   : > { %v5195_v8 = vpop.f32.mrf.mxu1 }
 0xfea   : > { %v2384_v9 = vpop.f32.mrf.mxu1 }
 0xfeb   : > { %v2385_v11 = vadd.f32 %v4569_v7, %v2384_v9 }
 0xfec   : > { %v5196_v12 = vpop.f32.mrf.mxu1 }
 0xfed   : > { %v2462_v14 = vpack.c.bf16 %v2385_v11, %v2382_v10  ;;  %v4625_v10 = vld [vmem:[%s6649_s4 + $0x15] ss:$0 sm:$0xff] }
 0xfef   : > { %v2467_v47 = vsel %vm789_vm2, %v2462_v14, 0 }
 0xff0   : > { %5210 = vmatpush3.bf16.xpose.msra.mxu1 %v2467_v47 }
 0xff1   : > { %5215 = vmatprep.subr.bf16.mxu1 %v5616_v15 }
 0xff7   : > { %5212 = vmatmul.mubr.msk.bf16.vlgmr.msra.gmra.mxu1 %vm789_vm2, %v2461_v57 }
 0xff8   : > { %5216 = vmatpush3.bf16.msra.mxu1 %v2537_v63  ;;  %5217 = vmatprep.mubr.msk.bf16.mxu1 %vm5617_vm1, %v5616_v15  ;;  %v5471_v63 = vld [vmem:[%s6648_s3 + $0x1a0] sm:$0xff]  }
 0xff9   : > { %5227 = vmatprep.subr.bf16.mxu1 %v5616_v15 }
0x10b7   : > { %v2503_v51 = vpop.f32.mrf.mxu1 }
0x10b8   : > { %v2510_v16 = vmul.f32 0.35355338, %v2503_v51 }
0x10b9   : > { %v5213_v18 = vpop.f32.mrf.mxu1 }
0x10ba   : > { %v2512_v21 = vadd.f32 %v2510_v16, %v5852_v13 }
0x10bb   : > { %v2506_v22 = vpop.f32.mrf.mxu1 }
0x10bc   : > { %v2511_v23 = vmul.f32 0.35355338, %v2506_v22  ;;  %v2514_v24 = vsel %vm841_vm3, %v2512_v21, -inf }
0x10bd   : > { %2515 = vmax.xlane.f32.xlu0 %v2514_v24  ;;  %v5214_v25 = vpop.f32.mrf.mxu1 }
0x10be   : > { %v2513_v26 = vadd.f32 %v2511_v23, %v5856_v19 }
0x10c0   : > { %v2517_v27 = vsel %vm841_vm3, %v2513_v26, -inf }
0x10c1   : > { %2518 = vmax.xlane.f32.xlu1 %v2517_v27  ;;  %v4618_v27 = vld [vmem:[%s6649_s4 + $0xd] ss:$0 sm:$0xff] }
0x1146   : > { %v2516_v28 = vpop.xlane.xlu0 %2515 }
0x1147   : > { %v2520_v29 = vsub.f32 %v2512_v21, %v2516_v28 }
0x1149   : > { %v2522_v30 = vmul.f32 1.442695, %v2520_v29 }
0x114a   : > { %v2519_v31 = vpop.xlane.xlu1 %2518 }
0x114b   : > { %5560 = vpow2.f32 %v2522_v30  ;;  %v2521_v32 = vsub.f32 %v2513_v26, %v2519_v31 }
0x114d   : > { %v2524_v33 = vmul.f32 1.442695, %v2521_v32 }
0x114f   : > { %5562 = vpow2.f32 %v2524_v33 }
0x1158   : > { %v5561_v13 = vpop.eup %5560 }
0x1159   : > { %v2526_v34 = vsel %vm841_vm3, %v5561_v13, 0.0 }
0x115a   : > { %2527 = vadd.xlane.f32.xlu0 %v2526_v34 }
0x115c   : > { %v5563_v35 = vpop.eup %5562 }
0x115d   : > { %v2529_v36 = vsel %vm841_vm3, %v5563_v35, 0.0 }
0x115e   : > { %2530 = vadd.xlane.f32.xlu1 %v2529_v36 }
0x11e3   : > { %v2528_v19 = vpop.xlane.xlu0 %2527 }
0x11e4   : > { %5564 = vrcp.f32 %v2528_v19 }
0x11e7   : > { %v2531_v37 = vpop.xlane.xlu1 %2530 }
0x11e8   : > { %5566 = vrcp.f32 %v2531_v37 }
0x11f1   : > { %v5565_v38 = vpop.eup %5564 }
0x11f2   : > { %v2534_v41 = vmul.f32 %v5565_v38, %v5561_v13 }
0x11f5   : > { %v5567_v39 = vpop.eup %5566 }
0x11f6   : > { %v2535_v42 = vmul.f32 %v5567_v39, %v5563_v35  ;;  %v6318_v35 = vld [vmem:[%s5849_s19] sm:$0xff] }
0x11f8   : > { %v2536_v44 = vpack.c.bf16 %v2535_v42, %v2534_v41  ;;  %v6323_v41 = vld [vmem:[%s5849_s19 + $0x8] sm:$0xff] }
0x11fa   : > { %5218 = vmatmul.mubr.msk.bf16.vlgmr.msra.gmra.mxu1 %vm841_vm3, %v2536_v44 }
0x11fb   : > { %5228 = vmatpush3.bf16.msra.mxu1 %v5460_v43  ;;  %5235 = vmatprep.mubr.msk.bf16.mxu1 %vm5617_vm1, %v5616_v15 }
0x11fc   : > { %5229 = vmatprep.subr.bf16.mxu1 %v5616_v15 }
0x11ff   : > { %5230 = vmatpush3.bf16.msra.mxu1 %v5461_v45 }
0x1200   : > { %5231 = vmatprep.subr.bf16.mxu1 %v5616_v15 }
0x1203   : > { %5232 = vmatpush3.bf16.msra.mxu1 %v5462_v46 }
0x1204   : > { %5233 = vmatprep.subr.bf16.mxu1 %v5616_v15 }
0x1207   : > { %5234 = vmatpush3.bf16.msra.mxu1 %v5463_v48 }
0x1208   : > { %5251 = vmatprep.subr.bf16.mxu1 %v5616_v15 }
0x120a   : > { %5236 = vmatmul.mubr.msk.bf16.vlgmr.msra.gmra.mxu1 %vm493_vm0, %v5763_v40 }
0x120b   : > { %5252 = vmatpush3.bf16.msra.mxu1 %v5464_v49  ;;  %5259 = vmatprep.mubr.msk.bf16.mxu1 %vm5617_vm1, %v5616_v15 }
0x120c   : > { %5253 = vmatprep.subr.bf16.mxu1 %v5616_v15 }
0x120f   : > { %5254 = vmatpush3.bf16.msra.mxu1 %v5465_v50 }
0x1210   : > { %5255 = vmatprep.subr.bf16.mxu1 %v5616_v15 }
0x1213   : > { %5256 = vmatpush3.bf16.msra.mxu1 %v5466_v52 }
0x1214   : > { %5257 = vmatprep.subr.bf16.mxu1 %v5616_v15 }
0x1217   : > { %5258 = vmatpush3.bf16.msra.mxu1 %v5467_v53 }
0x1218   : > { %5275 = vmatprep.subr.bf16.mxu1 %v5616_v15 }
0x121a   : > { %5260 = vmatmul.mubr.msk.bf16.vlgmr.msra.gmra.mxu1 %vm493_vm0, %v5763_v40 }
0x121b   : > { %5277 = vmatprep.mubr.msk.bf16.mxu1 %vm5617_vm1, %v5616_v15 }
0x12ba   : > { %v2575_v56 = vpop.f32.mrf.mxu1 }
0x12bc   : > { %v5219_v57 = vpop.f32.mrf.mxu1 }
0x12be   : > { %v2578_v59 = vpop.f32.mrf.mxu1 }
0x12bf   : > { %v2582_v58 = vpack.c.bf16 %v2578_v59, %v2575_v56 }
0x12c0   : > { %v5220_v60 = vpop.f32.mrf.mxu1 }
0x12c1   : > { %5224 = vmatmul.mubr.msk.bf16.vlgmr.msra.gmra.mxu0 %vm789_vm2, %v2582_v58 }
0x12c2   : > { %5240 = vmatpush3.bf16.msra.mxu0 %v5468_v17  ;;  %5247 = vmatprep.mubr.msk.bf16.mxu0 %vm5617_vm1, %v5616_v15 }
0x12c3   : > { %5241 = vmatprep.subr.bf16.mxu0 %v5616_v15 }
0x12c6   : > { %5242 = vmatpush3.bf16.msra.mxu0 %v5469_v62  ;;  %v5472_v62 = vld [vmem:[%s6648_s3 + $0xd8] sm:$0xff]  }
0x12c7   : > { %5243 = vmatprep.subr.bf16.mxu0 %v5616_v15 }
0x12ca   : > { %v2727_v61 = vpop.f32.mrf.mxu1  ;;  %5244 = vmatpush3.bf16.msra.mxu0 %v5470_v20 }
0x12cb   : > { %5245 = vmatprep.subr.bf16.mxu0 %v5616_v15  ;;  %v2728_v5 = vadd.f32 %v4611_v0, %v2727_v61  ;;  %v5473_v61 = vld [vmem:[%s6648_s3 + $0xd0] sm:$0xff]  }
0x12cc   : > { %v5237_v2 = vpop.f32.mrf.mxu1 }
0x12cd   : > { %v5476_v2 = vld [vmem:[%s6648_s3 + $0x2d8] sm:$0xff]  }
0x12ce   : > { %v2730_v3 = vpop.f32.mrf.mxu1  ;;  %5246 = vmatpush3.bf16.msra.mxu0 %v5471_v63  ;;  %v5474_v63 = vld [vmem:[%s6648_s3 + $0xc8] sm:$0xff]  }
0x12cf   : > { %v2731_v6 = vadd.f32 %v4611_v0, %v2730_v3  ;;  %5263 = vmatprep.subr.bf16.mxu0 %v5616_v15  ;;  %v5475_v0 = vld [vmem:[%s6648_s3 + $0xc0] sm:$0xff]   ;;  %v5477_v3 = vld [vmem:[%s6648_s3 + $0x2d0] sm:$0xff]  }
0x12d0   : > { %v5238_v7 = vpop.f32.mrf.mxu1 }
0x12d1   : > { %v2880_v8 = vpack.c.bf16 %v2731_v6, %v2728_v5  ;;  %5248 = vmatmul.mubr.msk.bf16.vlgmr.msra.gmra.mxu0 %vm493_vm0, %v5763_v40  ;;  %v5478_v5 = vld [vmem:[%s6648_s3 + $0x2c8] sm:$0xff]   ;;  %v5479_v6 = vld [vmem:[%s6648_s3 + $0x2c0] sm:$0xff]   ;;  %v4633_v7 = vld [vmem:[%s6650_s5 + $0x14] sm:$0xf] }
0x12d2   : > { %5265 = vmatprep.mubr.msk.bf16.mxu0 %vm5617_vm1, %v5616_v15 }
0x12da   : > { %v2873_v9 = vpop.f32.mrf.mxu1 }
0x12db   : > { %v2874_v14 = vadd.f32 %v4625_v10, %v2873_v9 }
0x12dc   : > { %v5261_v11 = vpop.f32.mrf.mxu1 }
0x12de   : > { %v2876_v12 = vpop.f32.mrf.mxu1 }
0x12df   : > { %v2877_v47 = vadd.f32 %v4625_v10, %v2876_v12  ;;  %v5480_v12 = vld [vmem:[%s6648_s3 + $0x1d8] sm:$0xff]  }
0x12e0   : > { %v5262_v51 = vpop.f32.mrf.mxu1 }
0x12e1   : > { %v2956_v16 = vpack.c.bf16 %v2877_v47, %v2874_v14  ;;  %v5481_v51 = vld [vmem:[%s6648_s3 + $0x1d0] sm:$0xff]  }
0x1381   : > { %v2625_v18 = vpop.f32.mrf.mxu0 }
0x1382   : > { %v6303_v21 = vadd.f32 %v2625_v18, %v6205_v1 }
0x1383   : > { %v5225_v22 = vpop.f32.mrf.mxu0 }
0x1384   : > { %v5483_v22 = vld [vmem:[%s6648_s3 + $0x1c0] sm:$0xff]  }
0x1385   : > { %v2628_v23 = vpop.f32.mrf.mxu0 }
0x1386   : > { %v6306_v24 = vadd.f32 %v2628_v23, %v6208_v4  ;;  %v4660_v23 = vld [vmem:[%s6649_s4 + $0x6] ss:$0 sm:$0xff] }
0x1387   : > { %v5226_v25 = vpop.f32.mrf.mxu0 }
0x1391   : > { %v2800_v26 = vpop.f32.mrf.mxu0 }
0x1392   : > { %v2801_v30 = vadd.f32 %v4618_v27, %v2800_v26 }
0x1393   : > { %v5249_v28 = vpop.f32.mrf.mxu0 }
0x1395   : > { %v2803_v29 = vpop.f32.mrf.mxu0 }
0x1396   : > { %v2804_v31 = vadd.f32 %v4618_v27, %v2803_v29 }
0x1397   : > { %v5250_v32 = vpop.f32.mrf.mxu0 }
0x1398   : > { %v2881_v33 = vpack.c.bf16 %v2804_v31, %v2801_v30  ;;  %v4674_v32 = vld [vmem:[%s6649_s4 + $0x16] ss:$0 sm:$0xff] }
0x139a   : > { %v2886_v1 = vsel %vm789_vm2, %v2881_v33, 0 }
0x139b   : > { %5264 = vmatpush3.bf16.xpose.msra.mxu0 %v2886_v1 }
0x139c   : > { %5269 = vmatprep.subr.bf16.mxu0 %v5616_v15 }
0x13a2   : > { %5266 = vmatmul.mubr.msk.bf16.vlgmr.msra.gmra.mxu0 %vm789_vm2, %v2880_v8  ;;  %v3008_v8 = vsel %vm1285_vm4, %v4633_v7, 0 }
0x13a3   : > { %5270 = vmatpush3.bf16.msra.mxu0 %v2956_v16  ;;  %5271 = vmatprep.mubr.msk.bf16.mxu0 %vm5617_vm1, %v5616_v15  ;;  %v5482_v16 = vld [vmem:[%s6648_s3 + $0x1c8] sm:$0xff]  }
0x13a4   : > { %5281 = vmatprep.subr.bf16.mxu0 %v5616_v15  ;;  %5276 = vmatpush3.bf16.msra.mxu1 %v3008_v8 }
0x13a5   : > { %5293 = vmatprep.subr.bf16.mxu1 %v5616_v15 }
0x1462   : > { %v2922_v4 = vpop.f32.mrf.mxu0 }
0x1463   : > { %v2929_v13 = vmul.f32 0.35355338, %v2922_v4 }
0x1464   : > { %v5267_v34 = vpop.f32.mrf.mxu0 }
0x1465   : > { %v2931_v36 = vadd.f32 %v6318_v35, %v2929_v13 }
0x1466   : > { %v2925_v19 = vpop.f32.mrf.mxu0 }
0x1467   : > { %v2930_v37 = vmul.f32 0.35355338, %v2925_v19  ;;  %v2933_v38 = vsel %vm841_vm3, %v2931_v36, -inf }
0x1468   : > { %2934 = vmax.xlane.f32.xlu0 %v2933_v38  ;;  %v5268_v39 = vpop.f32.mrf.mxu0 }
0x1469   : > { %v2932_v42 = vadd.f32 %v6323_v41, %v2930_v37 }
0x146b   : > { %v2936_v43 = vsel %vm841_vm3, %v2932_v42, -inf }
0x146c   : > { %2937 = vmax.xlane.f32.xlu1 %v2936_v43 }
0x14f1   : > { %v2935_v44 = vpop.xlane.xlu0 %2934 }
0x14f2   : > { %v2939_v45 = vsub.f32 %v2931_v36, %v2935_v44 }
0x14f4   : > { %v2941_v46 = vmul.f32 1.442695, %v2939_v45  ;;  %v4667_v45 = vld [vmem:[%s6649_s4 + $0xe] ss:$0 sm:$0xff] }
0x14f5   : > { %v2938_v48 = vpop.xlane.xlu1 %2937 }
0x14f6   : > { %5568 = vpow2.f32 %v2941_v46  ;;  %v2940_v49 = vsub.f32 %v2932_v42, %v2938_v48 }
0x14f8   : > { %v2943_v50 = vmul.f32 1.442695, %v2940_v49 }
0x14fa   : > { %5570 = vpow2.f32 %v2943_v50 }
0x1503   : > { %v5569_v52 = vpop.eup %5568 }
0x1504   : > { %v2945_v53 = vsel %vm841_vm3, %v5569_v52, 0.0 }
0x1505   : > { %2946 = vadd.xlane.f32.xlu0 %v2945_v53 }
0x1507   : > { %v5571_v54 = vpop.eup %5570 }
0x1508   : > { %v2948_v55 = vsel %vm841_vm3, %v5571_v54, 0.0 }
0x1509   : > { %2949 = vadd.xlane.f32.xlu1 %v2948_v55 }
0x158e   : > { %v2947_v56 = vpop.xlane.xlu0 %2946 }
0x158f   : > { %5572 = vrcp.f32 %v2947_v56 }
0x1592   : > { %v2950_v57 = vpop.xlane.xlu1 %2949 }
0x1593   : > { %5574 = vrcp.f32 %v2950_v57 }
0x159c   : > { %v5573_v59 = vpop.eup %5572 }
0x159d   : > { %v2953_v58 = vmul.f32 %v5573_v59, %v5569_v52 }
0x15a0   : > { %v5575_v17 = vpop.eup %5574 }
0x15a1   : > { %v2954_v60 = vmul.f32 %v5575_v17, %v5571_v54 }
0x15a3   : > { %v2955_v20 = vpack.c.bf16 %v2954_v60, %v2953_v58 }
0x15a5   : > { %5272 = vmatmul.mubr.msk.bf16.vlgmr.msra.gmra.mxu0 %vm841_vm3, %v2955_v20 }
0x15a6   : > { %5282 = vmatpush3.bf16.msra.mxu0 %v5472_v62  ;;  %5289 = vmatprep.mubr.msk.bf16.mxu0 %vm5617_vm1, %v5616_v15 }
0x15a7   : > { %5283 = vmatprep.subr.bf16.mxu0 %v5616_v15 }
0x15aa   : > { %5284 = vmatpush3.bf16.msra.mxu0 %v5473_v61 }
0x15ab   : > { %5285 = vmatprep.subr.bf16.mxu0 %v5616_v15 }
0x15ae   : > { %5286 = vmatpush3.bf16.msra.mxu0 %v5474_v63 }
0x15af   : > { %5287 = vmatprep.subr.bf16.mxu0 %v5616_v15 }
0x15b2   : > { %5288 = vmatpush3.bf16.msra.mxu0 %v5475_v0 }
0x15b3   : > { %5305 = vmatprep.subr.bf16.mxu0 %v5616_v15 }
0x15b5   : > { %5290 = vmatmul.mubr.msk.bf16.vlgmr.msra.gmra.mxu0 %vm493_vm0, %v5763_v40 }
0x15b6   : > { %5306 = vmatpush3.bf16.msra.mxu0 %v5476_v2  ;;  %5313 = vmatprep.mubr.msk.bf16.mxu0 %vm5617_vm1, %v5616_v15 }
0x15b7   : > { %5307 = vmatprep.subr.bf16.mxu0 %v5616_v15 }
0x15ba   : > { %5308 = vmatpush3.bf16.msra.mxu0 %v5477_v3 }
0x15bb   : > { %5309 = vmatprep.subr.bf16.mxu0 %v5616_v15 }
0x15be   : > { %5310 = vmatpush3.bf16.msra.mxu0 %v5478_v5 }
0x15bf   : > { %5311 = vmatprep.subr.bf16.mxu0 %v5616_v15 }
0x15c2   : > { %5312 = vmatpush3.bf16.msra.mxu0 %v5479_v6 }
0x15c3   : > { %5329 = vmatprep.subr.bf16.mxu0 %v5616_v15 }
0x15c5   : > { %5314 = vmatmul.mubr.msk.bf16.vlgmr.msra.gmra.mxu0 %vm493_vm0, %v5763_v40 }
0x15c6   : > { %5331 = vmatprep.mubr.msk.bf16.mxu0 %vm5617_vm1, %v5616_v15 }
0x1665   : > { %v2994_v9 = vpop.f32.mrf.mxu0 }
0x1667   : > { %v5273_v10 = vpop.f32.mrf.mxu0 }
0x1669   : > { %v2997_v11 = vpop.f32.mrf.mxu0 }
0x166a   : > { %v3001_v14 = vpack.c.bf16 %v2997_v11, %v2994_v9 }
0x166b   : > { %v5274_v47 = vpop.f32.mrf.mxu0 }
0x166c   : > { %5278 = vmatmul.mubr.msk.bf16.vlgmr.msra.gmra.mxu1 %vm789_vm2, %v3001_v14 }
0x166d   : > { %5294 = vmatpush3.bf16.msra.mxu1 %v5480_v12  ;;  %5301 = vmatprep.mubr.msk.bf16.mxu1 %vm5617_vm1, %v5616_v15 }
0x166e   : > { %5295 = vmatprep.subr.bf16.mxu1 %v5616_v15 }
0x1671   : > { %5296 = vmatpush3.bf16.msra.mxu1 %v5481_v51  ;;  %v5484_v51 = vld [vmem:[%s6648_s3 + $0xf8] sm:$0xff]  }
0x1672   : > { %5297 = vmatprep.subr.bf16.mxu1 %v5616_v15 }
0x1675   : > { %v3146_v18 = vpop.f32.mrf.mxu0  ;;  %5298 = vmatpush3.bf16.msra.mxu1 %v5482_v16 }
0x1676   : > { %5299 = vmatprep.subr.bf16.mxu1 %v5616_v15  ;;  %v3147_v27 = vadd.f32 %v4660_v23, %v3146_v18  ;;  %v5485_v18 = vld [vmem:[%s6648_s3 + $0xf0] sm:$0xff]  }
0x1677   : > { %v5291_v25 = vpop.f32.mrf.mxu0 }
0x1678   : > { %v5488_v25 = vld [vmem:[%s6648_s3 + $0x2f8] sm:$0xff]  }
0x1679   : > { %v3149_v26 = vpop.f32.mrf.mxu0  ;;  %5300 = vmatpush3.bf16.msra.mxu1 %v5483_v22  ;;  %v5486_v22 = vld [vmem:[%s6648_s3 + $0xe8] sm:$0xff]  }
0x167a   : > { %v3150_v28 = vadd.f32 %v4660_v23, %v3149_v26  ;;  %5317 = vmatprep.subr.bf16.mxu1 %v5616_v15  ;;  %v5487_v23 = vld [vmem:[%s6648_s3 + $0xe0] sm:$0xff]   ;;  %v5489_v26 = vld [vmem:[%s6648_s3 + $0x2f0] sm:$0xff]  }
0x167b   : > { %v5292_v29 = vpop.f32.mrf.mxu0 }
0x167c   : > { %v3299_v30 = vpack.c.bf16 %v3150_v28, %v3147_v27  ;;  %5302 = vmatmul.mubr.msk.bf16.vlgmr.msra.gmra.mxu1 %vm493_vm0, %v5763_v40  ;;  %v5490_v27 = vld [vmem:[%s6648_s3 + $0x2e8] sm:$0xff]   ;;  %v5491_v28 = vld [vmem:[%s6648_s3 + $0x2e0] sm:$0xff]   ;;  %v4682_v29 = vld [vmem:[%s6650_s5 + $0x18] sm:$0xf] }
0x167d   : > { %5319 = vmatprep.mubr.msk.bf16.mxu1 %vm5617_vm1, %v5616_v15 }
0x1685   : > { %v3292_v31 = vpop.f32.mrf.mxu0 }
0x1686   : > { %v3293_v4 = vadd.f32 %v4674_v32, %v3292_v31 }
0x1687   : > { %v5315_v33 = vpop.f32.mrf.mxu0 }
0x1689   : > { %v3295_v1 = vpop.f32.mrf.mxu0 }
0x168a   : > { %v3296_v13 = vadd.f32 %v4674_v32, %v3295_v1  ;;  %v5492_v1 = vld [vmem:[%s6648_s3 + $0x1f8] sm:$0xff]  }
0x168b   : > { %v5316_v34 = vpop.f32.mrf.mxu0 }
0x168c   : > { %v3375_v36 = vpack.c.bf16 %v3296_v13, %v3293_v4  ;;  %v5493_v34 = vld [vmem:[%s6648_s3 + $0x1f0] sm:$0xff]  }
0x172c   : > { %v3044_v19 = vpop.f32.mrf.mxu1 }
0x172d   : > { %v6407_v37 = vadd.f32 %v3044_v19, %v6303_v21 }
0x172e   : > { %v5279_v38 = vpop.f32.mrf.mxu1 }
0x172f   : > { %v5495_v38 = vld [vmem:[%s6648_s3 + $0x1e0] sm:$0xff]  }
0x1730   : > { %v3047_v39 = vpop.f32.mrf.mxu1 }
0x1731   : > { %v6410_v42 = vadd.f32 %v3047_v39, %v6306_v24  ;;  %v4709_v39 = vld [vmem:[%s6649_s4 + $0x7] ss:$0 sm:$0xff] }
0x1732   : > { %v5280_v43 = vpop.f32.mrf.mxu1 }
0x173c   : > { %v3219_v44 = vpop.f32.mrf.mxu1 }
0x173d   : > { %v3220_v49 = vadd.f32 %v4667_v45, %v3219_v44 }
0x173e   : > { %v5303_v46 = vpop.f32.mrf.mxu1 }
0x1740   : > { %v3222_v48 = vpop.f32.mrf.mxu1 }
0x1741   : > { %v3223_v50 = vadd.f32 %v4667_v45, %v3222_v48 }
0x1742   : > { %v5304_v52 = vpop.f32.mrf.mxu1 }
0x1743   : > { %v3300_v53 = vpack.c.bf16 %v3223_v50, %v3220_v49  ;;  %v4723_v52 = vld [vmem:[%s6649_s4 + $0x17] ss:$0 sm:$0xff] }
0x1745   : > { %v3305_v21 = vsel %vm789_vm2, %v3300_v53, 0 }
0x1746   : > { %5318 = vmatpush3.bf16.xpose.msra.mxu1 %v3305_v21 }
0x1747   : > { %5323 = vmatprep.subr.bf16.mxu1 %v5616_v15 }
0x174d   : > { %5320 = vmatmul.mubr.msk.bf16.vlgmr.msra.gmra.mxu1 %vm789_vm2, %v3299_v30  ;;  %v3427_v30 = vsel %vm1285_vm4, %v4682_v29, 0 }
0x174e   : > { %5324 = vmatpush3.bf16.msra.mxu1 %v3375_v36  ;;  %5325 = vmatprep.mubr.msk.bf16.mxu1 %vm5617_vm1, %v5616_v15  ;;  %v5494_v36 = vld [vmem:[%s6648_s3 + $0x1e8] sm:$0xff]  }
0x174f   : > { %5335 = vmatprep.subr.bf16.mxu1 %v5616_v15  ;;  %5330 = vmatpush3.bf16.msra.mxu0 %v3427_v30 }
0x1750   : > { %5347 = vmatprep.subr.bf16.mxu0 %v5616_v15 }
0x180d   : > { %v3341_v24 = vpop.f32.mrf.mxu1 }
0x180e   : > { %v3348_v54 = vmul.f32 0.35355338, %v3341_v24 }
0x180f   : > { %v5321_v55 = vpop.f32.mrf.mxu1 }
0x1810   : > { %v3350_v56 = vadd.f32 %v6318_v35, %v3348_v54 }
0x1811   : > { %v3344_v57 = vpop.f32.mrf.mxu1 }
0x1812   : > { %v3349_v59 = vmul.f32 0.35355338, %v3344_v57  ;;  %v3352_v17 = vsel %vm841_vm3, %v3350_v56, -inf }
0x1813   : > { %3353 = vmax.xlane.f32.xlu0 %v3352_v17  ;;  %v5322_v58 = vpop.f32.mrf.mxu1 }
0x1814   : > { %v3351_v60 = vadd.f32 %v6323_v41, %v3349_v59 }
0x1816   : > { %v3355_v62 = vsel %vm841_vm3, %v3351_v60, -inf }
0x1817   : > { %3356 = vmax.xlane.f32.xlu1 %v3355_v62 }
0x189c   : > { %v3354_v20 = vpop.xlane.xlu0 %3353 }
0x189d   : > { %v3358_v61 = vsub.f32 %v3350_v56, %v3354_v20  ;;  %v4716_v20 = vld [vmem:[%s6649_s4 + $0xf] ss:$0 sm:$0xff] }
0x189f   : > { %v3360_v63 = vmul.f32 1.442695, %v3358_v61 }
0x18a0   : > { %v3357_v0 = vpop.xlane.xlu1 %3356 }
0x18a1   : > { %5576 = vpow2.f32 %v3360_v63  ;;  %v3359_v2 = vsub.f32 %v3351_v60, %v3357_v0 }
0x18a3   : > { %v3362_v3 = vmul.f32 1.442695, %v3359_v2 }
0x18a5   : > { %5578 = vpow2.f32 %v3362_v3 }
0x18ae   : > { %v5577_v5 = vpop.eup %5576 }
0x18af   : > { %v3364_v6 = vsel %vm841_vm3, %v5577_v5, 0.0 }
0x18b0   : > { %3365 = vadd.xlane.f32.xlu0 %v3364_v6 }
0x18b2   : > { %v5579_v7 = vpop.eup %5578 }
0x18b3   : > { %v3367_v8 = vsel %vm841_vm3, %v5579_v7, 0.0 }
0x18b4   : > { %3368 = vadd.xlane.f32.xlu1 %v3367_v8 }
0x1939   : > { %v3366_v9 = vpop.xlane.xlu0 %3365 }
0x193a   : > { %5580 = vrcp.f32 %v3366_v9 }
0x193d   : > { %v3369_v10 = vpop.xlane.xlu1 %3368 }
0x193e   : > { %5582 = vrcp.f32 %v3369_v10 }
0x1947   : > { %v5581_v11 = vpop.eup %5580 }
0x1948   : > { %v3372_v14 = vmul.f32 %v5581_v11, %v5577_v5 }
0x194b   : > { %v5583_v12 = vpop.eup %5582 }
0x194c   : > { %v3373_v47 = vmul.f32 %v5583_v12, %v5579_v7 }
0x194e   : > { %v3374_v16 = vpack.c.bf16 %v3373_v47, %v3372_v14 }
0x1950   : > { %5326 = vmatmul.mubr.msk.bf16.vlgmr.msra.gmra.mxu1 %vm841_vm3, %v3374_v16 }
0x1951   : > { %5336 = vmatpush3.bf16.msra.mxu1 %v5484_v51  ;;  %5343 = vmatprep.mubr.msk.bf16.mxu1 %vm5617_vm1, %v5616_v15 }
0x1952   : > { %5337 = vmatprep.subr.bf16.mxu1 %v5616_v15 }
0x1955   : > { %5338 = vmatpush3.bf16.msra.mxu1 %v5485_v18 }
0x1956   : > { %5339 = vmatprep.subr.bf16.mxu1 %v5616_v15 }
0x1959   : > { %5340 = vmatpush3.bf16.msra.mxu1 %v5486_v22 }
0x195a   : > { %5341 = vmatprep.subr.bf16.mxu1 %v5616_v15 }
0x195d   : > { %5342 = vmatpush3.bf16.msra.mxu1 %v5487_v23 }
0x195e   : > { %5359 = vmatprep.subr.bf16.mxu1 %v5616_v15 }
0x1960   : > { %5344 = vmatmul.mubr.msk.bf16.vlgmr.msra.gmra.mxu1 %vm493_vm0, %v5763_v40 }
0x1961   : > { %5360 = vmatpush3.bf16.msra.mxu1 %v5488_v25  ;;  %5367 = vmatprep.mubr.msk.bf16.mxu1 %vm5617_vm1, %v5616_v15 }
0x1962   : > { %5361 = vmatprep.subr.bf16.mxu1 %v5616_v15 }
0x1965   : > { %5362 = vmatpush3.bf16.msra.mxu1 %v5489_v26 }
0x1966   : > { %5363 = vmatprep.subr.bf16.mxu1 %v5616_v15 }
0x1969   : > { %5364 = vmatpush3.bf16.msra.mxu1 %v5490_v27 }
0x196a   : > { %5365 = vmatprep.subr.bf16.mxu1 %v5616_v15 }
0x196d   : > { %5366 = vmatpush3.bf16.msra.mxu1 %v5491_v28 }
0x196e   : > { %5383 = vmatprep.subr.bf16.mxu1 %v5616_v15 }
0x1970   : > { %5368 = vmatmul.mubr.msk.bf16.vlgmr.msra.gmra.mxu1 %vm493_vm0, %v5763_v40 }
0x1971   : > { %5385 = vmatprep.mubr.msk.bf16.mxu1 %vm5617_vm1, %v5616_v15 }
0x1a10   : > { %v3413_v31 = vpop.f32.mrf.mxu1 }
0x1a12   : > { %v5327_v32 = vpop.f32.mrf.mxu1 }
0x1a14   : > { %v3416_v33 = vpop.f32.mrf.mxu1 }
0x1a15   : > { %v3420_v4 = vpack.c.bf16 %v3416_v33, %v3413_v31 }
0x1a16   : > { %v5328_v13 = vpop.f32.mrf.mxu1 }
0x1a17   : > { %5332 = vmatmul.mubr.msk.bf16.vlgmr.msra.gmra.mxu0 %vm789_vm2, %v3420_v4 }
0x1a18   : > { %5348 = vmatpush3.bf16.msra.mxu0 %v5492_v1  ;;  %5355 = vmatprep.mubr.msk.bf16.mxu0 %vm5617_vm1, %v5616_v15  ;;  %v4731_v1 = vld [vmem:[%s6650_s5 + $0x1c] sm:$0xf] }
0x1a19   : > { %5349 = vmatprep.subr.bf16.mxu0 %v5616_v15  ;;  %v3846_v4 = vsel %vm1285_vm4, %v4731_v1, 0  ;;  %v5514_v1 = vld [vmem:[%s6656_s11 + $0x60] sm:$0xff]  }
0x1a1a   : > { %5384 = vmatpush3.bf16.msra.mxu1 %v3846_v4  ;;  %v5515_v4 = vld [vmem:[%s6656_s11 + $0x20] sm:$0xff]  }
0x1a1c   : > { %5350 = vmatpush3.bf16.msra.mxu0 %v5493_v34 }
0x1a1d   : > { %5351 = vmatprep.subr.bf16.mxu0 %v5616_v15 }
0x1a20   : > { %v3565_v19 = vpop.f32.mrf.mxu1  ;;  %5352 = vmatpush3.bf16.msra.mxu0 %v5494_v36 }
0x1a21   : > { %5353 = vmatprep.subr.bf16.mxu0 %v5616_v15  ;;  %v3566_v45 = vadd.f32 %v4709_v39, %v3565_v19 }
0x1a22   : > { %v5345_v43 = vpop.f32.mrf.mxu1 }
0x1a23   : > { %v4733_v43 = vld [vmem:[%s6651_s6] ss:$0 sm:$0xff] }
0x1a24   : > { %v3568_v44 = vpop.f32.mrf.mxu1  ;;  %5354 = vmatpush3.bf16.msra.mxu0 %v5495_v38 }
0x1a25   : > { %v3569_v46 = vadd.f32 %v4709_v39, %v3568_v44  ;;  %5371 = vmatprep.subr.bf16.mxu0 %v5616_v15 }
0x1a26   : > { %v5346_v48 = vpop.f32.mrf.mxu1 }
0x1a27   : > { %v3718_v49 = vpack.c.bf16 %v3569_v46, %v3566_v45  ;;  %5356 = vmatmul.mubr.msk.bf16.vlgmr.msra.gmra.mxu0 %vm493_vm0, %v5763_v40 }
0x1a28   : > { %5373 = vmatprep.mubr.msk.bf16.mxu0 %vm5617_vm1, %v5616_v15 }
0x1a30   : > { %v3711_v50 = vpop.f32.mrf.mxu1 }
0x1a31   : > { %v3712_v24 = vadd.f32 %v4723_v52, %v3711_v50 }
0x1a32   : > { %v5369_v53 = vpop.f32.mrf.mxu1 }
0x1a34   : > { %v3714_v21 = vpop.f32.mrf.mxu1 }
0x1a35   : > { %v3715_v54 = vadd.f32 %v4723_v52, %v3714_v21 }
0x1a36   : > { %v5370_v55 = vpop.f32.mrf.mxu1 }
0x1a37   : > { %v3794_v56 = vpack.c.bf16 %v3715_v54, %v3712_v24  ;;  %v5607_v54 = vld [vmem:[%s5708_s18 + $0x8] sm:$0xff] }
0x1ad7   : > { %v3463_v57 = vpop.f32.mrf.mxu0 }
0x1ad8   : > { %v6505_v59 = vadd.f32 %v3463_v57, %v6407_v37 }
0x1ad9   : > { %v5333_v17 = vpop.f32.mrf.mxu0 }
0x1adb   : > { %v3466_v40 = vpop.f32.mrf.mxu0 }
0x1adc   : > { %v6508_v58 = vadd.f32 %v3466_v40, %v6410_v42 }
0x1add   : > { %v5334_v60 = vpop.f32.mrf.mxu0 }
0x1ae7   : > { %v3638_v62 = vpop.f32.mrf.mxu0 }
0x1ae8   : > { %v3639_v0 = vadd.f32 %v4716_v20, %v3638_v62 }
0x1ae9   : > { %v5357_v61 = vpop.f32.mrf.mxu0 }
0x1aeb   : > { %v3641_v63 = vpop.f32.mrf.mxu0 }
0x1aec   : > { %v3642_v2 = vadd.f32 %v4716_v20, %v3641_v63 }
0x1aed   : > { %v5358_v3 = vpop.f32.mrf.mxu0 }
0x1aee   : > { %v3719_v5 = vpack.c.bf16 %v3642_v2, %v3639_v0  ;;  %v5498_v0 = vld [vmem:[%s6654_s9 + $0x34] ss:$8 sps:$4 sm:$0xff]   ;;  %v5496_v2 = vld [vmem:[%s6654_s9 + $0x30] ss:$8 sps:$4 sm:$0xff]   ;;  %v5501_v3 = vld [vmem:[%s6654_s9 + $0x24] ss:$8 sps:$4 sm:$0xff]  }
0x1af0   : > { %v3724_v37 = vsel %vm789_vm2, %v3719_v5, 0  ;;  %v5499_v5 = vld [vmem:[%s6654_s9 + $0x20] ss:$8 sps:$4 sm:$0xff]  }
0x1af1   : > { %5372 = vmatpush3.bf16.xpose.msra.mxu0 %v3724_v37  ;;  %v5504_v37 = vld [vmem:[%s6654_s9 + $0x14] ss:$8 sps:$4 sm:$0xff]  }
0x1af2   : > { %5377 = vmatprep.subr.bf16.mxu0 %v5616_v15 }
0x1af8   : > { %5374 = vmatmul.mubr.msk.bf16.vlgmr.msra.gmra.mxu0 %vm789_vm2, %v3718_v49  ;;  %v5606_v49 = vld [vmem:[%s5708_s18] sm:$0xff] }
0x1af9   : > { %5378 = vmatpush3.bf16.msra.mxu0 %v3794_v56  ;;  %5379 = vmatprep.mubr.msk.bf16.mxu0 %vm5617_vm1, %v5616_v15 }
0x1afa   : > { %4018 = vmatprep.subr.bf16.mxu0 %v5498_v0 }
0x1bb8   : > { %v3760_v42 = vpop.f32.mrf.mxu0 }
0x1bb9   : > { %v3767_v6 = vmul.f32 0.35355338, %v3760_v42  ;;  %v5502_v42 = vld [vmem:[%s6654_s9 + $0x10] ss:$8 sps:$4 sm:$0xff]  }
0x1bba   : > { %v5375_v7 = vpop.f32.mrf.mxu0 }
0x1bbb   : > { %v3769_v8 = vadd.f32 %v6318_v35, %v3767_v6  ;;  %v5507_v6 = vld [vmem:[%s6654_s9 + $0x4] ss:$8 sps:$4 sm:$0xff]   ;;  %v5505_v7 = vld [vmem:[%s6654_s9] ss:$8 sps:$4 sm:$0xff]  }
0x1bbc   : > { %v3763_v9 = vpop.f32.mrf.mxu0 }
0x1bbd   : > { %v3768_v10 = vmul.f32 0.35355338, %v3763_v9  ;;  %v3771_v11 = vsel %vm841_vm3, %v3769_v8, -inf }
0x1bbe   : > { %3772 = vmax.xlane.f32.xlu0 %v3771_v11  ;;  %v5376_v12 = vpop.f32.mrf.mxu0 }
0x1bbf   : > { %v3770_v14 = vadd.f32 %v6323_v41, %v3768_v10 }
0x1bc1   : > { %v3774_v47 = vsel %vm841_vm3, %v3770_v14, -inf }
0x1bc2   : > { %3775 = vmax.xlane.f32.xlu1 %v3774_v47 }
0x1c47   : > { %v3773_v51 = vpop.xlane.xlu0 %3772 }
0x1c48   : > { %v3777_v16 = vsub.f32 %v3769_v8, %v3773_v51  ;;  %v5618_v8 = vmov 0  }
0x1c4a   : > { %v3779_v18 = vmul.f32 1.442695, %v3777_v16 }
0x1c4b   : > { %v3776_v15 = vpop.xlane.xlu1 %3775 }
0x1c4c   : > { %5584 = vpow2.f32 %v3779_v18  ;;  %v3778_v22 = vsub.f32 %v3770_v14, %v3776_v15  ;;  %v4734_v18 = vld [vmem:[%s6652_s7] ss:$0 sm:$0xff] }
0x1c4e   : > { %v3781_v23 = vmul.f32 1.442695, %v3778_v22 }
0x1c50   : > { %5586 = vpow2.f32 %v3781_v23 }
0x1c59   : > { %v5585_v35 = vpop.eup %5584 }
0x1c5a   : > { %v3783_v25 = vsel %vm841_vm3, %v5585_v35, 0.0 }
0x1c5b   : > { %3784 = vadd.xlane.f32.xlu0 %v3783_v25 }
0x1c5d   : > { %v5587_v26 = vpop.eup %5586 }
0x1c5e   : > { %v3786_v27 = vsel %vm841_vm3, %v5587_v26, 0.0 }
0x1c5f   : > { %3787 = vadd.xlane.f32.xlu1 %v3786_v27 }
0x1ce4   : > { %v3785_v41 = vpop.xlane.xlu0 %3784 }
0x1ce5   : > { %5588 = vrcp.f32 %v3785_v41 }
0x1ce8   : > { %v3788_v28 = vpop.xlane.xlu1 %3787 }
0x1ce9   : > { %5590 = vrcp.f32 %v3788_v28  ;;  %v5508_v28 = vld [vmem:[%s6656_s11 + $0x78] sm:$0xff]  }
0x1cea   : > { %4935 = vmatprep.subr.bf16.mxu1 %v5508_v28 }
0x1cf2   : > { %v5589_v29 = vpop.eup %5588 }
0x1cf3   : > { %v3791_v31 = vmul.f32 %v5589_v29, %v5585_v35  ;;  %v4735_v35 = vld [vmem:[%s6653_s8] ss:$0 sm:$0xff]  ;;  %v5509_v29 = vld [vmem:[%s6656_s11 + $0x38] sm:$0xff]  }
0x1cf6   : > { %v5591_v30 = vpop.eup %5590 }
0x1cf7   : > { %v3792_v32 = vmul.f32 %v5591_v30, %v5587_v26  ;;  %v5510_v30 = vld [vmem:[%s6656_s11 + $0x70] sm:$0xff]  }
0x1cf9   : > { %v3793_v33 = vpack.c.bf16 %v3792_v32, %v3791_v31  ;;  %v5511_v31 = vld [vmem:[%s6656_s11 + $0x30] sm:$0xff]   ;;  %v5512_v32 = vld [vmem:[%s6656_s11 + $0x68] sm:$0xff]  }
0x1cfb   : > { %5380 = vmatmul.mubr.msk.bf16.vlgmr.msra.gmra.mxu0 %vm841_vm3, %v3793_v33  ;;  %v5513_v33 = vld [vmem:[%s6656_s11 + $0x28] sm:$0xff]  }
0x1cfc   : > { %4019 = vmatpush1.bf16.msra.mxu0 %v5496_v2  ;;  %4042 = vmatprep.mubr.bf16.mxu0 %v5618_v8 }
0x1cfd   : > { %4020 = vmatprep.subr.bf16.mxu0 %v5501_v3 }
0x1d00   : > { %4021 = vmatpush1.bf16.msra.mxu0 %v5499_v5 }
0x1d01   : > { %4022 = vmatprep.subr.bf16.mxu0 %v5504_v37 }
0x1d04   : > { %4023 = vmatpush1.bf16.msra.mxu0 %v5502_v42 }
0x1d05   : > { %4024 = vmatprep.subr.bf16.mxu0 %v5507_v6 }
0x1d08   : > { %4025 = vmatpush1.bf16.msra.mxu0 %v5505_v7 }
0x1dbb   : > { %v3832_v13 = vpop.f32.mrf.mxu0 }
0x1dbd   : > { %v5381_v34 = vpop.f32.mrf.mxu0 }
0x1dbe   : > { %v5517_v34 = vld [vmem:[%s6656_s11 + $0x18] sm:$0xff]  }
0x1dbf   : > { %v3835_v36 = vpop.f32.mrf.mxu0 }
0x1dc0   : > { %v3839_v19 = vpack.c.bf16 %v3835_v36, %v3832_v13  ;;  %v5516_v13 = vld [vmem:[%s6656_s11 + $0x58] sm:$0xff]   ;;  %v5518_v36 = vld [vmem:[%s6656_s11 + $0x50] sm:$0xff]  }
0x1dc1   : > { %v5382_v38 = vpop.f32.mrf.mxu0 }
0x1dc2   : > { %5386 = vmatmul.mubr.msk.bf16.vlgmr.msra.gmra.mxu1 %vm789_vm2, %v3839_v19  ;;  %v5519_v19 = vld [vmem:[%s6656_s11 + $0x10] sm:$0xff]   ;;  %v5520_v38 = vld [vmem:[%s6656_s11 + $0x48] sm:$0xff]  }
0x1dc3   : > { %4936 = vmatpush3.bf16.msra.mxu1 %v5509_v29 }
0x1dc4   : > { %4937 = vmatprep.subr.bf16.mxu1 %v5510_v30 }
0x1dc7   : > { %4938 = vmatpush3.bf16.msra.mxu1 %v5511_v31 }
0x1dc8   : > { %4939 = vmatprep.subr.bf16.mxu1 %v5512_v32 }
0x1dcb   : > { %4940 = vmatpush3.bf16.msra.mxu1 %v5513_v33 }
0x1dcc   : > { %4941 = vmatprep.subr.bf16.mxu1 %v5514_v1 }
0x1dcf   : > { %4942 = vmatpush3.bf16.msra.mxu1 %v5515_v4 }
0x1dd0   : > { %4943 = vmatprep.subr.bf16.mxu1 %v5516_v13  ;;  %v4745_v13 = vld [vmem:[%s6657_s12] ss:$0 sm:$0xff] }
0x1dd3   : > { %4944 = vmatpush3.bf16.msra.mxu1 %v5517_v34 }
0x1dd4   : > { %4945 = vmatprep.subr.bf16.mxu1 %v5518_v36 }
0x1dd7   : > { %4946 = vmatpush3.bf16.msra.mxu1 %v5519_v19 }
0x1dd8   : > { %4947 = vmatprep.subr.bf16.mxu1 %v5520_v38 }
0x1e82   : > { %v3882_v39 = vpop.f32.mrf.mxu1 }
0x1e83   : > { %v3889_v44 = vadd.f32 %v3882_v39, %v6505_v59  ;;  %v5521_v39 = vld [vmem:[%s6656_s11 + $0x8] sm:$0xff]  }
0x1e84   : > { %v5387_v45 = vpop.f32.mrf.mxu1  ;;  %4948 = vmatpush3.bf16.msra.mxu1 %v5521_v39 }
0x1e85   : > { %v3898_v46 = vadd.f32 %v4733_v43, %v3889_v44  ;;  %v5523_v44 = vld [vmem:[%s6656_s11] sm:$0xff]   ;;  %v3957_v45 = vlaneseq }
0x1e86   : > { %v3885_v48 = vpop.f32.mrf.mxu1 }
0x1e87   : > { %v6535_v50 = vadd.f32 %v5606_v49, %v3898_v46  ;;  %v3890_v52 = vadd.f32 %v3885_v48, %v6508_v58  ;;  %v3958_v46 = vshrl.u32 %v3957_v45, 7  ;;  %v3955_v49 = vld [vmem:[%s6655_s10] sm:$0x3] }
0x1e88   : > { %v5388_v53 = vpop.f32.mrf.mxu1 }
0x1e89   : > { %v3899_v21 = vadd.f32 %v4733_v43, %v3890_v52  ;;  %v3904_v24 = vsel %vm493_vm0, %v6535_v50, 0.0  ;;  %v5522_v43 = vld [vmem:[%s6656_s11 + $0x40] sm:$0xff]   ;;  %v3959_v48 = vsub.s32 0, %v3958_v46  ;;  %v3963_v52 = vsub.s32 1, %v3958_v46 }
0x1e8a   : > { %3905 = vadd.xlane.f32.xlu0 %v3904_v24  ;;  %4949 = vmatprep.subr.bf16.mxu1 %v5522_v43 }
0x1e8b   : > { %v6541_v55 = vadd.f32 %v5607_v54, %v3899_v21  ;;  %4950 = vmatpush3.bf16.msra.mxu1 %v5523_v44  ;;  %v3960_v53 = vrot.slane %v3955_v49, %v3959_v48  ;;  %v3964_v21 = vrot.slane %v3955_v49, %v3963_v52 }
0x1e8d   : > { %v3907_v56 = vsel %vm493_vm0, %v6541_v55, 0.0 }
0x1e8e   : > { %3908 = vadd.xlane.f32.xlu1 %v3907_v56 }
0x1f13   : > { %v3906_v57 = vpop.xlane.xlu0 %3905 }
0x1f14   : > { %v3910_v59 = vmul.f32 0.015625, %v3906_v57 }
0x1f16   : > { %v3912_v17 = vsub.f32 %v6535_v50, %v3910_v59 }
0x1f17   : > { %v3909_v40 = vpop.xlane.xlu1 %3908 }
0x1f18   : > { %v3911_v60 = vmul.f32 0.015625, %v3909_v40  ;;  %v3914_v58 = vmul.f32 %v3912_v17, %v3912_v17 }
0x1f1a   : > { %v3913_v62 = vsub.f32 %v6541_v55, %v3911_v60  ;;  %v3916_v20 = vsel %vm493_vm0, %v3914_v58, 0.0 }
0x1f1b   : > { %3917 = vadd.xlane.f32.xlu0 %v3916_v20 }
0x1f1c   : > { %v3915_v61 = vmul.f32 %v3913_v62, %v3913_v62 }
0x1f1e   : > { %v3919_v63 = vsel %vm493_vm0, %v3915_v61, 0.0 }
0x1f1f   : > { %3920 = vadd.xlane.f32.xlu1 %v3919_v63 }
0x1fa4   : > { %v3918_v9 = vpop.xlane.xlu0 %3917 }
0x1fa5   : > { %v3922_v10 = vmul.f32 0.015625, %v3918_v9 }
0x1fa7   : > { %v3924_v11 = vadd.f32 1e-05, %v3922_v10 }
0x1fa8   : > { %v3921_v12 = vpop.xlane.xlu1 %3920 }
0x1fa9   : > { %5592 = vrsqrt.f32 %v3924_v11  ;;  %v3923_v14 = vmul.f32 0.015625, %v3921_v12 }
0x1fab   : > { %v3925_v47 = vadd.f32 1e-05, %v3923_v14 }
0x1fad   : > { %5594 = vrsqrt.f32 %v3925_v47 }
0x1fb6   : > { %v5593_v51 = vpop.eup %5592 }
0x1fb7   : > { %v3928_v16 = vmul.f32 %v5593_v51, %v3912_v17 }
0x1fb9   : > { %v3936_v23 = vmul.f32 %v4734_v18, %v3928_v16 }
0x1fba   : > { %v5595_v15 = vpop.eup %5594 }
0x1fbb   : > { %v3929_v22 = vmul.f32 %v5595_v15, %v3913_v62  ;;  %v3944_v26 = vadd.f32 %v4735_v35, %v3936_v23 }
0x1fbd   : > { %v3937_v25 = vmul.f32 %v4734_v18, %v3929_v22 }
0x1fbf   : > { %v3945_v27 = vadd.f32 %v4735_v35, %v3937_v25 }
0x1fc1   : > { %v3946_v41 = vpack.c.bf16 %v3945_v27, %v3944_v26 }
0x1fc3   : > { %4744 = vmatmul.mubr.msk.bf16.vlgmr.msra.gmra.mxu0 %vm493_vm0, %v3946_v41 }
0x2083   : > { %v4044_v24 = vpop.f32.mrf.mxu0 }
0x2084   : > { %v4045_v54 = vadd.f32 %v4044_v24, %v3960_v53 }
0x2085   : > { %v4046_v56 = vpop.f32.mrf.mxu0 }
0x2086   : > { %v4053_v57 = vmul.f32 %v4045_v54, %v4045_v54  ;;  %v4047_v59 = vadd.f32 %v4046_v56, %v3964_v21 }
0x2087   : > { %v4048_v17 = vpop.f32.mrf.mxu0 }
0x2088   : > { %v4057_v40 = vmul.f32 %v4053_v57, %v4045_v54  ;;  %v4054_v60 = vmul.f32 %v4047_v59, %v4047_v59  ;;  %v4049_v58 = vadd.f32 %v4048_v17, %v3960_v53 }
0x2089   : > { %v4050_v62 = vpop.f32.mrf.mxu0 }
0x208a   : > { %v4061_v20 = vmul.f32 0.044715, %v4057_v40  ;;  %v4058_v61 = vmul.f32 %v4054_v60, %v4047_v59  ;;  %v4055_v63 = vmul.f32 %v4049_v58, %v4049_v58  ;;  %v4051_v0 = vadd.f32 %v4050_v62, %v3964_v21 }
0x208c   : > { %v4065_v2 = vadd.f32 %v4061_v20, %v4045_v54  ;;  %v4062_v3 = vmul.f32 0.044715, %v4058_v61  ;;  %v4059_v5 = vmul.f32 %v4055_v63, %v4049_v58  ;;  %v4056_v37 = vmul.f32 %v4051_v0, %v4051_v0 }
0x208e   : > { %v4069_v42 = vmul.f32 0.7978846, %v4065_v2  ;;  %v4066_v6 = vadd.f32 %v4062_v3, %v4047_v59  ;;  %v4063_v7 = vmul.f32 0.044715, %v4059_v5  ;;  %v4060_v8 = vmul.f32 %v4056_v37, %v4051_v0 }
0x2090   : > { %v4070_v9 = vmul.f32 0.7978846, %v4066_v6  ;;  %v4067_v10 = vadd.f32 %v4063_v7, %v4049_v58  ;;  %v4064_v11 = vmul.f32 0.044715, %v4060_v8  ;;  %5596 = vtanh.f32 %v4069_v42 }
0x2092   : > { %5598 = vtanh.f32 %v4070_v9  ;;  %v4071_v12 = vmul.f32 0.7978846, %v4067_v10  ;;  %v4068_v14 = vadd.f32 %v4064_v11, %v4051_v0 }
0x2094   : > { %5600 = vtanh.f32 %v4071_v12  ;;  %v4072_v47 = vmul.f32 0.7978846, %v4068_v14 }
0x2096   : > { %5602 = vtanh.f32 %v4072_v47 }
0x209d   : > { %v5597_v51 = vpop.eup %5596 }
0x209e   : > { %v4077_v22 = vadd.f32 1.0, %v5597_v51 }
0x209f   : > { %v5599_v16 = vpop.eup %5598 }
0x20a0   : > { %v4078_v18 = vadd.f32 1.0, %v5599_v16  ;;  %v4081_v41 = vmul.f32 0.5, %v4077_v22 }
0x20a1   : > { %v5601_v15 = vpop.eup %5600 }
0x20a2   : > { %v4079_v23 = vadd.f32 1.0, %v5601_v15  ;;  %v4082_v27 = vmul.f32 0.5, %v4078_v18  ;;  %v4085_v32 = vmul.f32 %v4081_v41, %v4045_v54 }
0x20a3   : > { %v5603_v35 = vpop.eup %5602 }
0x20a4   : > { %v4083_v25 = vmul.f32 0.5, %v4079_v23  ;;  %v4080_v26 = vadd.f32 1.0, %v5603_v35  ;;  %v4086_v30 = vmul.f32 %v4082_v27, %v4047_v59 }
0x20a6   : > { %v4084_v28 = vmul.f32 0.5, %v4080_v26  ;;  %v4087_v29 = vmul.f32 %v4083_v25, %v4049_v58 }
0x20a8   : > { %v4088_v31 = vmul.f32 %v4084_v28, %v4051_v0  ;;  %v4089_v1 = vpack.c.bf16 %v4087_v29, %v4085_v32 }
0x20aa   : > { %v4090_v33 = vpack.c.bf16 %v4088_v31, %v4086_v30 }
0x20ac   : > { %4258 = vmatprep.mubr.bf16.mxu1 %v4090_v33 }
0x20ad   : > { %4259 = vmatmul.mubr.bf16.vlgmr.msra.gmra.mxu1 %v4089_v1 }
0x216d   : > { %v4951_v4 = vpop.f32.mrf.mxu1 }
0x216f   : > { %v4952_v34 = vpop.f32.mrf.mxu1 }
0x2170   : > { %v4953_v36 = vadd.f32 %v4952_v34, %v4951_v4 }
0x2171   : > { %v4954_v19 = vpop.f32.mrf.mxu1 }
0x2172   : > { %v4261_v38 = vadd.f32 %v4953_v36, %v4745_v13 }
0x2173   : > { %v4955_v39 = vpop.f32.mrf.mxu1 }
0x2174   : > { %v4267_v43 = vadd.f32 %v4261_v38, %v6535_v50  ;;  %v4956_v44 = vadd.f32 %v4955_v39, %v4954_v19 }
0x2176   : > { %4269 = vst.msk [vmem:[%s487_s23] sm:$0xff] %vm493_vm0, %v4267_v43  ;;  %v4264_v45 = vadd.f32 %v4956_v44, %v4745_v13 }
0x2178   : > { %v4268_v46 = vadd.f32 %v4264_v45, %v6541_v55 }
0x217a   : > { %4270 = vst.msk [vmem:[%s487_s23 + $0x8] sm:$0xff] %vm493_vm0, %v4268_v46 }
0x217b PF: > { %s24_s29 = sadd.s32 1, %s5614_s29  }
0x217c   : > { %p21_p4 = scmp.ge.s32.totalorder %s24_s29, 4  }
0x217e   :  { %23 = sbr.rel (!%p21_p4) target bundleno = 1 (0x1), region = 162 }

</bundles_post_ra>
